<compile_context>
chip_gen: v5e
topology: v5e:2x2
jax: 0.10.0
libtpu: 0.0.40
codegen_flags: <defaults>
</compile_context>

<pallas_src>
import functools

import jax
import jax.numpy as jnp
from jax.experimental import pallas as pl
from jax.experimental.pallas import tpu as pltpu


LANE = 128
_VMEM_LIMIT = 32 * 1024 * 1024     # safe scoped-VMEM ceiling on v5e / v6e / v7x
_MAX_TILE_ROWS = 1024              # M-tile cap (per-grid-step overhead dominates here)


def _round_up(x, m):
    return (x + m - 1) // m * m


# ---------------------------------------------------------------------------
# Generic fused conv kernel: stride-1 "valid" conv with in-kernel im2col,
# resident bf16 weights, fused bias + PReLU + residual epilogue.
# ---------------------------------------------------------------------------
def _conv_kernel(*refs, KH, KW, OW, TH, HP, apply_prelu, has_res, res_sign):
    idx = 0
    x_ref = refs[idx]; idx += 1          # (N*HP, WP, Cp)  bf16, VMEM-resident slab
    w_ref = refs[idx]; idx += 1          # (KH*KW, Cp, Np) bf16, VMEM-resident
    b_ref = refs[idx]; idx += 1          # (1, Np)         f32,  VMEM-resident
    alpha_ref = None
    if apply_prelu:
        alpha_ref = refs[idx]; idx += 1  # (1,)            f32,  SMEM scalar
    res_ref = None
    if has_res:
        res_ref = refs[idx]; idx += 1    # (TH*OW, Np)     bf16
    o_ref = refs[idx]; idx += 1          # (TH*OW, Np)     bf16
    acc_ref = refs[idx]                  # (TH*OW, Np)     f32 scratch

    n = pl.program_id(0)                 # batch image
    t = pl.program_id(1)                 # tile of output rows within the image
    row0 = n * HP + t * TH               # first padded-input row of this tile

    cp = x_ref.shape[-1]
    acc_ref[...] = jnp.zeros_like(acc_ref)

    # In-kernel im2col: KH*KW shifted windows read straight from the resident
    # VMEM slab, each feeding one MXU matmul (unrolled -> LLO visibility).
    for dy in range(KH):
        for dx in range(KW):
            win = x_ref[pl.ds(row0 + dy, TH), pl.ds(dx, OW), :]   # (TH, OW, Cp)
            a = win.reshape(TH * OW, cp)                          # free: OW % 8 == 0
            acc_ref[...] += jnp.dot(a, w_ref[dy * KW + dx],
                                    preferred_element_type=jnp.float32)

    # Epilogue, once per tile: bias, PReLU, fused residual, bf16 store.
    y = acc_ref[...] + b_ref[...]
    if apply_prelu:
        alpha = alpha_ref[0]
        y = jnp.where(y > 0, y, alpha * y)
    if has_res:
        y = y + res_sign * res_ref[...].astype(jnp.float32)
    o_ref[...] = y.astype(o_ref.dtype)


def conv_s1(x_rows, w_taps, bias, *, N, HP, WP, KH, KW,
            alpha=None, residual=None, res_sign=1.0):
    """Stride-1 valid conv over a pre-padded, channel-padded input.

    x_rows:   (N*HP, WP, Cp) bf16 (Cp a multiple of 128).
    w_taps:   (KH*KW, Cp, Np) bf16 pre-packed weights (Np a multiple of 128).
    bias:     (1, Np) f32.
    residual: optional (N*OH*OW, Np) bf16, fused as  y + res_sign * residual.
    returns   (N*OH*OW, Np) bf16 (lane-dense, channel-padded).
    """
    rows, wp_, cp = x_rows.shape
    taps, cp2, np_ = w_taps.shape
    assert rows == N * HP and wp_ == WP
    assert taps == KH * KW and cp2 == cp
    assert cp % LANE == 0 and np_ % LANE == 0
    OH = HP - KH + 1
    OW = WP - KW + 1
    assert OW % 8 == 0, "output width must be a multiple of 8 (sublane tile)"

    th = min(OH, max(1, _MAX_TILE_ROWS // OW))
    while OH % th:
        th -= 1
    n_h_tiles = OH // th
    # Keep >= 2 parallel grid blocks so both v7x TensorCores get work.
    if N * n_h_tiles < 2 and OH % 2 == 0 and OH >= 2:
        th = OH // 2
        n_h_tiles = OH // th
    tm = th * OW

    apply_prelu = alpha is not None
    has_res = residual is not None
    grid = (N, n_h_tiles)

    in_specs = [
        pl.BlockSpec((N * HP, WP, cp), lambda n, t: (0, 0, 0)),   # resident input slab
        pl.BlockSpec((taps, cp, np_), lambda n, t: (0, 0, 0)),    # resident weights
        pl.BlockSpec((1, np_), lambda n, t: (0, 0)),              # resident bias
    ]
    inputs = [x_rows, w_taps, bias]
    if apply_prelu:
        in_specs.append(pl.BlockSpec(memory_space=pltpu.MemorySpace.SMEM))
        inputs.append(alpha.reshape(1).astype(jnp.float32))
    if has_res:
        in_specs.append(
            pl.BlockSpec((tm, np_), lambda n, t: (n * n_h_tiles + t, 0)))
        inputs.append(residual)

    kernel = functools.partial(
        _conv_kernel, KH=KH, KW=KW, OW=OW, TH=th, HP=HP,
        apply_prelu=apply_prelu, has_res=has_res, res_sign=float(res_sign))

    flops = 2 * N * OH * OW * np_ * taps * cp
    bytes_accessed = (x_rows.size * 2 + w_taps.size * 2 + bias.size * 4
                      + N * OH * OW * np_ * 2 * (2 if has_res else 1))

    out = pl.pallas_call(
        kernel,
        out_shape=jax.ShapeDtypeStruct((N * OH * OW, np_), jnp.bfloat16),
        grid=grid,
        in_specs=in_specs,
        out_specs=pl.BlockSpec((tm, np_), lambda n, t: (n * n_h_tiles + t, 0)),
        scratch_shapes=[pltpu.VMEM((tm, np_), jnp.float32)],
        compiler_params=pltpu.CompilerParams(
            dimension_semantics=("parallel", "parallel"),
            vmem_limit_bytes=_VMEM_LIMIT),
        cost_estimate=pl.CostEstimate(flops=flops, transcendentals=0,
                                      bytes_accessed=bytes_accessed),
    )(*inputs)
    return out


# ---------------------------------------------------------------------------
# Layout plumbing (small XLA passes between the Pallas conv kernels)
# ---------------------------------------------------------------------------
def _pad_channels(x, cp):
    c = x.shape[-1]
    if c == cp:
        return x
    return jnp.pad(x, [(0, 0)] * (x.ndim - 1) + [(0, cp - c)])


def _prep_input(x_nhwc, pad):
    """Spatial pad, channel pad to a 128 multiple, bf16, collapse (N,H)->rows."""
    x = x_nhwc.astype(jnp.bfloat16)
    n, h, w, c = x.shape
    cp = _round_up(c, LANE)
    x = _pad_channels(x, cp)
    x = jnp.pad(x, ((0, 0), (pad, pad), (pad, pad), (0, 0)))
    hp, wp = h + 2 * pad, w + 2 * pad
    return x.reshape(n * hp, wp, cp), hp, wp


def _space_to_depth4(x_nhwc, pad=2):
    """pad-2 then 4x4 space-to-depth: turns the k=8,s=4,p=2 conv into an exact
    2x2 stride-1 valid conv over 16*C channels."""
    x = x_nhwc.astype(jnp.bfloat16)
    n, h, w, c = x.shape
    assert (h + 2 * pad) % 4 == 0 and (w + 2 * pad) % 4 == 0
    x = jnp.pad(x, ((0, 0), (pad, pad), (pad, pad), (0, 0)))
    hb, wb = (h + 2 * pad) // 4, (w + 2 * pad) // 4
    x = x.reshape(n, hb, 4, wb, 4, c)
    x = jnp.transpose(x, (0, 1, 3, 2, 4, 5)).reshape(n, hb, wb, 16 * c)
    cp = _round_up(16 * c, LANE)
    x = _pad_channels(x, cp)
    return x.reshape(n * hb, wb, cp), hb, wb


def pixel_shuffle_nhwc(x, r):
    """PyTorch PixelShuffle(r) semantics, NHWC layout."""
    n, h, w, c = x.shape
    cc = c // (r * r)
    x = x.reshape(n, h, w, cc, r, r)
    x = jnp.transpose(x, (0, 1, 4, 2, 5, 3))
    return x.reshape(n, h * r, w * r, cc)


# ---------------------------------------------------------------------------
# Parameters (torch layout) + one-time packing into kernel layout
# ---------------------------------------------------------------------------
def init_upblockpix_params(key, num_filter, kernel_size=8):
    ks = jax.random.split(key, 10)
    s = 0.05
    f = num_filter
    return {
        "u1c1_w": s * jax.random.normal(ks[0], (4 * f, f, 3, 3), jnp.float32),
        "u1c1_b": s * jax.random.normal(ks[1], (4 * f,), jnp.float32),
        "u1c2_w": s * jax.random.normal(ks[2], (4 * f, f, 3, 3), jnp.float32),
        "u1c2_b": s * jax.random.normal(ks[3], (4 * f,), jnp.float32),
        "u1_a": jnp.array([0.25], jnp.float32),
        "c2_w": s * jax.random.normal(ks[4], (f, f, kernel_size, kernel_size), jnp.float32),
        "c2_b": s * jax.random.normal(ks[5], (f,), jnp.float32),
        "c2_a": jnp.array([0.25], jnp.float32),
        "u3c1_w": s * jax.random.normal(ks[6], (4 * f, f, 3, 3), jnp.float32),
        "u3c1_b": s * jax.random.normal(ks[7], (4 * f,), jnp.float32),
        "u3c2_w": s * jax.random.normal(ks[8], (4 * f, f, 3, 3), jnp.float32),
        "u3c2_b": s * jax.random.normal(ks[9], (4 * f,), jnp.float32),
        "u3_a": jnp.array([0.25], jnp.float32),
    }


def prepack_upblockpix_params(p):
    """One-time weight packing: per-tap (Cp, Np) bf16 matrices + padded biases."""

    def pack3x3(w, b):
        oc, ic, kh, kw = w.shape
        cp, npad = _round_up(ic, LANE), _round_up(oc, LANE)
        wt = jnp.transpose(w, (2, 3, 1, 0)).reshape(kh * kw, ic, oc)
        wt = jnp.pad(wt, ((0, 0), (0, cp - ic), (0, npad - oc))).astype(jnp.bfloat16)
        bp = jnp.pad(b, (0, npad - oc)).astype(jnp.float32).reshape(1, npad)
        return wt, bp

    def pack8x8s4(w, b):
        oc, ic, _, _ = w.shape                       # k = 8, s = 4, p = 2
        wt = jnp.transpose(w, (2, 3, 1, 0))          # (8, 8, ic, oc)
        wt = wt.reshape(2, 4, 2, 4, ic, oc)          # (by, oy, bx, ox, ic, oc)
        wt = jnp.transpose(wt, (0, 2, 1, 3, 4, 5))   # (by, bx, oy, ox, ic, oc)
        wt = wt.reshape(4, 16 * ic, oc)              # taps of the 2x2 s2d conv
        k = 16 * ic
        cp, npad = _round_up(k, LANE), _round_up(oc, LANE)
        wt = jnp.pad(wt, ((0, 0), (0, cp - k), (0, npad - oc))).astype(jnp.bfloat16)
        bp = jnp.pad(b, (0, npad - oc)).astype(jnp.float32).reshape(1, npad)
        return wt, bp

    packed = {}
    packed["u1c1_w"], packed["u1c1_b"] = pack3x3(p["u1c1_w"], p["u1c1_b"])
    packed["u1c2_w"], packed["u1c2_b"] = pack3x3(p["u1c2_w"], p["u1c2_b"])
    packed["u3c1_w"], packed["u3c1_b"] = pack3x3(p["u3c1_w"], p["u3c1_b"])
    packed["u3c2_w"], packed["u3c2_b"] = pack3x3(p["u3c2_w"], p["u3c2_b"])
    packed["c2_w"], packed["c2_b"] = pack8x8s4(p["c2_w"], p["c2_b"])
    packed["u1_a"] = p["u1_a"]
    packed["c2_a"] = p["c2_a"]
    packed["u3_a"] = p["u3_a"]
    return packed


# ---------------------------------------------------------------------------
# UpBlockPix forward (all conv math in the Pallas kernel)
# ---------------------------------------------------------------------------
def upblockpix_forward(x_nchw, packed):
    f = x_nchw.shape[1]
    np4 = packed["u1c1_w"].shape[2]          # round_up(4f, 128)
    fp = packed["c2_w"].shape[2]             # round_up(f, 128)

    x = jnp.transpose(x_nchw, (0, 2, 3, 1))  # NCHW -> NHWC, (N, S, S, f)
    N, S = x.shape[0], x.shape[1]

    # ---- up_conv1 = Upsampler(4, f): [conv3x3, PixelShuffle(2)] x2, PReLU ----
    xr, hp, wp = _prep_input(x, 1)
    y = conv_s1(xr, packed["u1c1_w"], packed["u1c1_b"],
                N=N, HP=hp, WP=wp, KH=3, KW=3)
    t = pixel_shuffle_nhwc(y.reshape(N, S, S, np4)[..., :4 * f], 2)

    tr, hp, wp = _prep_input(t, 1)
    # PReLU commutes with PixelShuffle -> applied in the epilogue; keep the
    # pre-shuffle activations (h0_pre) for the final fused "+ h0".
    h0_pre = conv_s1(tr, packed["u1c2_w"], packed["u1c2_b"],
                     N=N, HP=hp, WP=wp, KH=3, KW=3, alpha=packed["u1_a"])
    h0 = pixel_shuffle_nhwc(
        h0_pre.reshape(N, 2 * S, 2 * S, np4)[..., :4 * f], 2)  # == up_conv1(x)

    # ---- up_conv2 (k=8, s=4, p=2) + PReLU, with "- x" fused: d = l0 - x ----
    h0r, hb, wb = _space_to_depth4(h0, pad=2)
    x_res = _pad_channels(x.astype(jnp.bfloat16), fp).reshape(N * S * S, fp)
    d = conv_s1(h0r, packed["c2_w"], packed["c2_b"],
                N=N, HP=hb, WP=wb, KH=2, KW=2,
                alpha=packed["c2_a"], residual=x_res, res_sign=-1.0)
    d_img = d.reshape(N, S, S, fp)           # channel-padded lanes stay exactly 0

    # ---- up_conv3 = Upsampler(4, f) on d, final "+ h0" fused pre-shuffle ----
    dr, hp, wp = _prep_input(d_img, 1)       # channels already 128-padded
    s = conv_s1(dr, packed["u3c1_w"], packed["u3c1_b"],
                N=N, HP=hp, WP=wp, KH=3, KW=3)
    s = pixel_shuffle_nhwc(s.reshape(N, S, S, np4)[..., :4 * f], 2)

    sr, hp, wp = _prep_input(s, 1)
    out_pre = conv_s1(sr, packed["u3c2_w"], packed["u3c2_b"],
                      N=N, HP=hp, WP=wp, KH=3, KW=3, alpha=packed["u3_a"],
                      residual=h0_pre, res_sign=1.0)
    out = pixel_shuffle_nhwc(
        out_pre.reshape(N, 2 * S, 2 * S, np4)[..., :4 * f], 2)  # == h1 + h0
    return jnp.transpose(out, (0, 3, 1, 2)).astype(jnp.float32)  # NHWC -> NCHW


# ---------------------------------------------------------------------------
# Pure-JAX f32 reference (follows the torch graph literally) for validation
# ---------------------------------------------------------------------------
def _prelu(x, a):
    return jnp.where(x > 0, x, a * x)


def _conv_ref(x, w_oihw, b, stride, pad):
    y = jax.lax.conv_general_dilated(
        x, jnp.transpose(w_oihw, (2, 3, 1, 0)),
        (stride, stride), [(pad, pad), (pad, pad)],
        dimension_numbers=("NHWC", "HWIO", "NHWC"))
    return y + b.reshape(1, 1, 1, -1)


def _upsampler_ref(x, w1, b1, w2, b2, a):
    t = pixel_shuffle_nhwc(_conv_ref(x, w1, b1, 1, 1), 2)
    t = pixel_shuffle_nhwc(_conv_ref(t, w2, b2, 1, 1), 2)
    return _prelu(t, a)


def upblockpix_ref(x_nchw, p):
    x = jnp.transpose(x_nchw, (0, 2, 3, 1))
    h0 = _upsampler_ref(x, p["u1c1_w"], p["u1c1_b"], p["u1c2_w"], p["u1c2_b"], p["u1_a"])
    l0 = _prelu(_conv_ref(h0, p["c2_w"], p["c2_b"], 4, 2), p["c2_a"])
    h1 = _upsampler_ref(l0 - x, p["u3c1_w"], p["u3c1_b"], p["u3c2_w"], p["u3c2_b"], p["u3_a"])
    return jnp.transpose(h1 + h0, (0, 3, 1, 2))


if __name__ == "__main__":
    num_filter = 8
    batch, spatial = 2, 8

    key = jax.random.PRNGKey(0)
    k_params, k_x = jax.random.split(key)
    params = init_upblockpix_params(k_params, num_filter)
    packed = prepack_upblockpix_params(params)          # one-time weight packing
    x = jax.random.normal(k_x, (batch, num_filter, spatial, spatial), jnp.float32)

    fwd = jax.jit(upblockpix_forward)
    out = fwd(x, packed)
    jax.block_until_ready(out)

    # 4x upsampling: (2, 8, 8, 8) -> (2, 8, 32, 32)
    assert out.shape == (batch, num_filter, spatial * 4, spatial * 4), out.shape

    ref = upblockpix_ref(x, params)
    err = float(jnp.max(jnp.abs(out - ref)))
    assert jnp.allclose(out, ref, rtol=5e-2, atol=5e-2), err

    print("KERNEL_OK")
</pallas_src>

<mosaic_0001>
module attributes {stable_mosaic.version = 11 : i64} {
  func.func @_conv_kernel(%arg0: i32, %arg1: i32, %arg2: memref<20x10x128xbf16, #tpu.memory_space<vmem>>, %arg3: memref<9x128x128xbf16, #tpu.memory_space<vmem>>, %arg4: memref<1x128xf32, #tpu.memory_space<vmem>>, %arg5: memref<64x128xbf16, #tpu.memory_space<vmem>>, %arg6: memref<64x128xf32, #tpu.memory_space<vmem>>) attributes {dimension_semantics = [#tpu.dimension_semantics<parallel>, #tpu.dimension_semantics<parallel>], iteration_bounds = array<i64: 2, 1>, scalar_prefetch = 0 : i64, scratch_operands = 1 : i64, tpu.core_type = #tpu.core_type<tc>, window_params = [{pipeline_mode = #tpu.pipeline_mode<synchronous>, transform_indices = @transform_0, window_bounds = array<i64: 20, 10, 128>}, {pipeline_mode = #tpu.pipeline_mode<synchronous>, transform_indices = @transform_1, window_bounds = array<i64: 9, 128, 128>}, {pipeline_mode = #tpu.pipeline_mode<synchronous>, transform_indices = @transform_2, window_bounds = array<i64: 1, 128>}, {transform_indices = @transform_3, window_bounds = array<i64: 64, 128>}]} {
    %c10_i32 = arith.constant 10 : i32
    %0 = arith.muli %arg0, %c10_i32 : i32
    %c8_i32 = arith.constant 8 : i32
    %1 = arith.muli %arg1, %c8_i32 : i32
    %2 = arith.addi %0, %1 : i32
    %cst = arith.constant 0.000000e+00 : f32
    %3 = vector.broadcast %cst : f32 to vector<64x128xf32>
    %c0 = arith.constant 0 : index
    %c0_0 = arith.constant 0 : index
    %4 = vector.load %arg6[%c0, %c0_0] : memref<64x128xf32, #tpu.memory_space<vmem>>, vector<64x128xf32>
    tpu.vector_store %arg6[%c0, %c0_0], %3 {strides = array<i32>} : memref<64x128xf32, #tpu.memory_space<vmem>>, vector<64x128xf32>,
    %c0_i32 = arith.constant 0 : i32
    %5 = arith.addi %2, %c0_i32 : i32
    %6 = arith.index_cast %5 : i32 to index
    %c0_1 = arith.constant 0 : index
    %c0_2 = arith.constant 0 : index
    %7 = vector.load %arg2[%6, %c0_1, %c0_2] : memref<20x10x128xbf16, #tpu.memory_space<vmem>>, vector<8x8x128xbf16>
    %8 = vector.shape_cast %7 : vector<8x8x128xbf16> to vector<64x128xbf16>
    %c0_3 = arith.constant 0 : index
    %c0_4 = arith.constant 0 : index
    %9 = vector.load %arg6[%c0_3, %c0_4] : memref<64x128xf32, #tpu.memory_space<vmem>>, vector<64x128xf32>
    %c0_5 = arith.constant 0 : index
    %c0_6 = arith.constant 0 : index
    %c0_7 = arith.constant 0 : index
    %10 = vector.load %arg3[%c0_5, %c0_6, %c0_7] : memref<9x128x128xbf16, #tpu.memory_space<vmem>>, vector<1x128x128xbf16>
    %11 = vector.shape_cast %10 : vector<1x128x128xbf16> to vector<128x128xbf16>
    %cst_8 = arith.constant dense<0.000000e+00> : vector<64x128xf32>
    %12 = tpu.matmul %8, %11, %cst_8 {dimension_numbers = #tpu.dot_dimension_numbers<[1], [0], [0], [1], [0, 0, 1, 1], [], []>} : vector<64x128xbf16>, vector<128x128xbf16>, vector<64x128xf32> -> vector<64x128xf32>
    %13 = arith.addf %9, %12 : vector<64x128xf32>
    %c0_9 = arith.constant 0 : index
    %c0_10 = arith.constant 0 : index
    %14 = vector.load %arg6[%c0_9, %c0_10] : memref<64x128xf32, #tpu.memory_space<vmem>>, vector<64x128xf32>
    tpu.vector_store %arg6[%c0_9, %c0_10], %13 {strides = array<i32>} : memref<64x128xf32, #tpu.memory_space<vmem>>, vector<64x128xf32>,
    %c0_i32_11 = arith.constant 0 : i32
    %15 = arith.addi %2, %c0_i32_11 : i32
    %16 = arith.index_cast %15 : i32 to index
    %c1 = arith.constant 1 : index
    %c0_12 = arith.constant 0 : index
    %17 = vector.load %arg2[%16, %c1, %c0_12] : memref<20x10x128xbf16, #tpu.memory_space<vmem>>, vector<8x8x128xbf16>
    %18 = vector.shape_cast %17 : vector<8x8x128xbf16> to vector<64x128xbf16>
    %c0_13 = arith.constant 0 : index
    %c0_14 = arith.constant 0 : index
    %19 = vector.load %arg6[%c0_13, %c0_14] : memref<64x128xf32, #tpu.memory_space<vmem>>, vector<64x128xf32>
    %c1_15 = arith.constant 1 : index
    %c0_16 = arith.constant 0 : index
    %c0_17 = arith.constant 0 : index
    %20 = vector.load %arg3[%c1_15, %c0_16, %c0_17] : memref<9x128x128xbf16, #tpu.memory_space<vmem>>, vector<1x128x128xbf16>
    %21 = vector.shape_cast %20 : vector<1x128x128xbf16> to vector<128x128xbf16>
    %cst_18 = arith.constant dense<0.000000e+00> : vector<64x128xf32>
    %22 = tpu.matmul %18, %21, %cst_18 {dimension_numbers = #tpu.dot_dimension_numbers<[1], [0], [0], [1], [0, 0, 1, 1], [], []>} : vector<64x128xbf16>, vector<128x128xbf16>, vector<64x128xf32> -> vector<64x128xf32>
    %23 = arith.addf %19, %22 : vector<64x128xf32>
    %c0_19 = arith.constant 0 : index
    %c0_20 = arith.constant 0 : index
    %24 = vector.load %arg6[%c0_19, %c0_20] : memref<64x128xf32, #tpu.memory_space<vmem>>, vector<64x128xf32>
    tpu.vector_store %arg6[%c0_19, %c0_20], %23 {strides = array<i32>} : memref<64x128xf32, #tpu.memory_space<vmem>>, vector<64x128xf32>,
    %c0_i32_21 = arith.constant 0 : i32
    %25 = arith.addi %2, %c0_i32_21 : i32
    %26 = arith.index_cast %25 : i32 to index
    %c2 = arith.constant 2 : index
    %c0_22 = arith.constant 0 : index
    %27 = vector.load %arg2[%26, %c2, %c0_22] : memref<20x10x128xbf16, #tpu.memory_space<vmem>>, vector<8x8x128xbf16>
    %28 = vector.shape_cast %27 : vector<8x8x128xbf16> to vector<64x128xbf16>
    %c0_23 = arith.constant 0 : index
    %c0_24 = arith.constant 0 : index
    %29 = vector.load %arg6[%c0_23, %c0_24] : memref<64x128xf32, #tpu.memory_space<vmem>>, vector<64x128xf32>
    %c2_25 = arith.constant 2 : index
    %c0_26 = arith.constant 0 : index
    %c0_27 = arith.constant 0 : index
    %30 = vector.load %arg3[%c2_25, %c0_26, %c0_27] : memref<9x128x128xbf16, #tpu.memory_space<vmem>>, vector<1x128x128xbf16>
    %31 = vector.shape_cast %30 : vector<1x128x128xbf16> to vector<128x128xbf16>
    %cst_28 = arith.constant dense<0.000000e+00> : vector<64x128xf32>
    %32 = tpu.matmul %28, %31, %cst_28 {dimension_numbers = #tpu.dot_dimension_numbers<[1], [0], [0], [1], [0, 0, 1, 1], [], []>} : vector<64x128xbf16>, vector<128x128xbf16>, vector<64x128xf32> -> vector<64x128xf32>
    %33 = arith.addf %29, %32 : vector<64x128xf32>
    %c0_29 = arith.constant 0 : index
    %c0_30 = arith.constant 0 : index
    %34 = vector.load %arg6[%c0_29, %c0_30] : memref<64x128xf32, #tpu.memory_space<vmem>>, vector<64x128xf32>
    tpu.vector_store %arg6[%c0_29, %c0_30], %33 {strides = array<i32>} : memref<64x128xf32, #tpu.memory_space<vmem>>, vector<64x128xf32>,
    %c1_i32 = arith.constant 1 : i32
    %35 = arith.addi %2, %c1_i32 : i32
    %36 = arith.index_cast %35 : i32 to index
    %c0_31 = arith.constant 0 : index
    %c0_32 = arith.constant 0 : index
    %37 = vector.load %arg2[%36, %c0_31, %c0_32] : memref<20x10x128xbf16, #tpu.memory_space<vmem>>, vector<8x8x128xbf16>
    %38 = vector.shape_cast %37 : vector<8x8x128xbf16> to vector<64x128xbf16>
    %c0_33 = arith.constant 0 : index
    %c0_34 = arith.constant 0 : index
    %39 = vector.load %arg6[%c0_33, %c0_34] : memref<64x128xf32, #tpu.memory_space<vmem>>, vector<64x128xf32>
    %c3 = arith.constant 3 : index
    %c0_35 = arith.constant 0 : index
    %c0_36 = arith.constant 0 : index
    %40 = vector.load %arg3[%c3, %c0_35, %c0_36] : memref<9x128x128xbf16, #tpu.memory_space<vmem>>, vector<1x128x128xbf16>
    %41 = vector.shape_cast %40 : vector<1x128x128xbf16> to vector<128x128xbf16>
    %cst_37 = arith.constant dense<0.000000e+00> : vector<64x128xf32>
    %42 = tpu.matmul %38, %41, %cst_37 {dimension_numbers = #tpu.dot_dimension_numbers<[1], [0], [0], [1], [0, 0, 1, 1], [], []>} : vector<64x128xbf16>, vector<128x128xbf16>, vector<64x128xf32> -> vector<64x128xf32>
    %43 = arith.addf %39, %42 : vector<64x128xf32>
    %c0_38 = arith.constant 0 : index
    %c0_39 = arith.constant 0 : index
    %44 = vector.load %arg6[%c0_38, %c0_39] : memref<64x128xf32, #tpu.memory_space<vmem>>, vector<64x128xf32>
    tpu.vector_store %arg6[%c0_38, %c0_39], %43 {strides = array<i32>} : memref<64x128xf32, #tpu.memory_space<vmem>>, vector<64x128xf32>,
    %c1_i32_40 = arith.constant 1 : i32
    %45 = arith.addi %2, %c1_i32_40 : i32
    %46 = arith.index_cast %45 : i32 to index
    %c1_41 = arith.constant 1 : index
    %c0_42 = arith.constant 0 : index
    %47 = vector.load %arg2[%46, %c1_41, %c0_42] : memref<20x10x128xbf16, #tpu.memory_space<vmem>>, vector<8x8x128xbf16>
    %48 = vector.shape_cast %47 : vector<8x8x128xbf16> to vector<64x128xbf16>
    %c0_43 = arith.constant 0 : index
    %c0_44 = arith.constant 0 : index
    %49 = vector.load %arg6[%c0_43, %c0_44] : memref<64x128xf32, #tpu.memory_space<vmem>>, vector<64x128xf32>
    %c4 = arith.constant 4 : index
    %c0_45 = arith.constant 0 : index
    %c0_46 = arith.constant 0 : index
    %50 = vector.load %arg3[%c4, %c0_45, %c0_46] : memref<9x128x128xbf16, #tpu.memory_space<vmem>>, vector<1x128x128xbf16>
    %51 = vector.shape_cast %50 : vector<1x128x128xbf16> to vector<128x128xbf16>
    %cst_47 = arith.constant dense<0.000000e+00> : vector<64x128xf32>
    %52 = tpu.matmul %48, %51, %cst_47 {dimension_numbers = #tpu.dot_dimension_numbers<[1], [0], [0], [1], [0, 0, 1, 1], [], []>} : vector<64x128xbf16>, vector<128x128xbf16>, vector<64x128xf32> -> vector<64x128xf32>
    %53 = arith.addf %49, %52 : vector<64x128xf32>
    %c0_48 = arith.constant 0 : index
    %c0_49 = arith.constant 0 : index
    %54 = vector.load %arg6[%c0_48, %c0_49] : memref<64x128xf32, #tpu.memory_space<vmem>>, vector<64x128xf32>
    tpu.vector_store %arg6[%c0_48, %c0_49], %53 {strides = array<i32>} : memref<64x128xf32, #tpu.memory_space<vmem>>, vector<64x128xf32>,
    %c1_i32_50 = arith.constant 1 : i32
    %55 = arith.addi %2, %c1_i32_50 : i32
    %56 = arith.index_cast %55 : i32 to index
    %c2_51 = arith.constant 2 : index
    %c0_52 = arith.constant 0 : index
    %57 = vector.load %arg2[%56, %c2_51, %c0_52] : memref<20x10x128xbf16, #tpu.memory_space<vmem>>, vector<8x8x128xbf16>
    %58 = vector.shape_cast %57 : vector<8x8x128xbf16> to vector<64x128xbf16>
    %c0_53 = arith.constant 0 : index
    %c0_54 = arith.constant 0 : index
    %59 = vector.load %arg6[%c0_53, %c0_54] : memref<64x128xf32, #tpu.memory_space<vmem>>, vector<64x128xf32>
    %c5 = arith.constant 5 : index
    %c0_55 = arith.constant 0 : index
    %c0_56 = arith.constant 0 : index
    %60 = vector.load %arg3[%c5, %c0_55, %c0_56] : memref<9x128x128xbf16, #tpu.memory_space<vmem>>, vector<1x128x128xbf16>
    %61 = vector.shape_cast %60 : vector<1x128x128xbf16> to vector<128x128xbf16>
    %cst_57 = arith.constant dense<0.000000e+00> : vector<64x128xf32>
    %62 = tpu.matmul %58, %61, %cst_57 {dimension_numbers = #tpu.dot_dimension_numbers<[1], [0], [0], [1], [0, 0, 1, 1], [], []>} : vector<64x128xbf16>, vector<128x128xbf16>, vector<64x128xf32> -> vector<64x128xf32>
    %63 = arith.addf %59, %62 : vector<64x128xf32>
    %c0_58 = arith.constant 0 : index
    %c0_59 = arith.constant 0 : index
    %64 = vector.load %arg6[%c0_58, %c0_59] : memref<64x128xf32, #tpu.memory_space<vmem>>, vector<64x128xf32>
    tpu.vector_store %arg6[%c0_58, %c0_59], %63 {strides = array<i32>} : memref<64x128xf32, #tpu.memory_space<vmem>>, vector<64x128xf32>,
    %c2_i32 = arith.constant 2 : i32
    %65 = arith.addi %2, %c2_i32 : i32
    %66 = arith.index_cast %65 : i32 to index
    %c0_60 = arith.constant 0 : index
    %c0_61 = arith.constant 0 : index
    %67 = vector.load %arg2[%66, %c0_60, %c0_61] : memref<20x10x128xbf16, #tpu.memory_space<vmem>>, vector<8x8x128xbf16>
    %68 = vector.shape_cast %67 : vector<8x8x128xbf16> to vector<64x128xbf16>
    %c0_62 = arith.constant 0 : index
    %c0_63 = arith.constant 0 : index
    %69 = vector.load %arg6[%c0_62, %c0_63] : memref<64x128xf32, #tpu.memory_space<vmem>>, vector<64x128xf32>
    %c6 = arith.constant 6 : index
    %c0_64 = arith.constant 0 : index
    %c0_65 = arith.constant 0 : index
    %70 = vector.load %arg3[%c6, %c0_64, %c0_65] : memref<9x128x128xbf16, #tpu.memory_space<vmem>>, vector<1x128x128xbf16>
    %71 = vector.shape_cast %70 : vector<1x128x128xbf16> to vector<128x128xbf16>
    %cst_66 = arith.constant dense<0.000000e+00> : vector<64x128xf32>
    %72 = tpu.matmul %68, %71, %cst_66 {dimension_numbers = #tpu.dot_dimension_numbers<[1], [0], [0], [1], [0, 0, 1, 1], [], []>} : vector<64x128xbf16>, vector<128x128xbf16>, vector<64x128xf32> -> vector<64x128xf32>
    %73 = arith.addf %69, %72 : vector<64x128xf32>
    %c0_67 = arith.constant 0 : index
    %c0_68 = arith.constant 0 : index
    %74 = vector.load %arg6[%c0_67, %c0_68] : memref<64x128xf32, #tpu.memory_space<vmem>>, vector<64x128xf32>
    tpu.vector_store %arg6[%c0_67, %c0_68], %73 {strides = array<i32>} : memref<64x128xf32, #tpu.memory_space<vmem>>, vector<64x128xf32>,
    %c2_i32_69 = arith.constant 2 : i32
    %75 = arith.addi %2, %c2_i32_69 : i32
    %76 = arith.index_cast %75 : i32 to index
    %c1_70 = arith.constant 1 : index
    %c0_71 = arith.constant 0 : index
    %77 = vector.load %arg2[%76, %c1_70, %c0_71] : memref<20x10x128xbf16, #tpu.memory_space<vmem>>, vector<8x8x128xbf16>
    %78 = vector.shape_cast %77 : vector<8x8x128xbf16> to vector<64x128xbf16>
    %c0_72 = arith.constant 0 : index
    %c0_73 = arith.constant 0 : index
    %79 = vector.load %arg6[%c0_72, %c0_73] : memref<64x128xf32, #tpu.memory_space<vmem>>, vector<64x128xf32>
    %c7 = arith.constant 7 : index
    %c0_74 = arith.constant 0 : index
    %c0_75 = arith.constant 0 : index
    %80 = vector.load %arg3[%c7, %c0_74, %c0_75] : memref<9x128x128xbf16, #tpu.memory_space<vmem>>, vector<1x128x128xbf16>
    %81 = vector.shape_cast %80 : vector<1x128x128xbf16> to vector<128x128xbf16>
    %cst_76 = arith.constant dense<0.000000e+00> : vector<64x128xf32>
    %82 = tpu.matmul %78, %81, %cst_76 {dimension_numbers = #tpu.dot_dimension_numbers<[1], [0], [0], [1], [0, 0, 1, 1], [], []>} : vector<64x128xbf16>, vector<128x128xbf16>, vector<64x128xf32> -> vector<64x128xf32>
    %83 = arith.addf %79, %82 : vector<64x128xf32>
    %c0_77 = arith.constant 0 : index
    %c0_78 = arith.constant 0 : index
    %84 = vector.load %arg6[%c0_77, %c0_78] : memref<64x128xf32, #tpu.memory_space<vmem>>, vector<64x128xf32>
    tpu.vector_store %arg6[%c0_77, %c0_78], %83 {strides = array<i32>} : memref<64x128xf32, #tpu.memory_space<vmem>>, vector<64x128xf32>,
    %c2_i32_79 = arith.constant 2 : i32
    %85 = arith.addi %2, %c2_i32_79 : i32
    %86 = arith.index_cast %85 : i32 to index
    %c2_80 = arith.constant 2 : index
    %c0_81 = arith.constant 0 : index
    %87 = vector.load %arg2[%86, %c2_80, %c0_81] : memref<20x10x128xbf16, #tpu.memory_space<vmem>>, vector<8x8x128xbf16>
    %88 = vector.shape_cast %87 : vector<8x8x128xbf16> to vector<64x128xbf16>
    %c0_82 = arith.constant 0 : index
    %c0_83 = arith.constant 0 : index
    %89 = vector.load %arg6[%c0_82, %c0_83] : memref<64x128xf32, #tpu.memory_space<vmem>>, vector<64x128xf32>
    %c8 = arith.constant 8 : index
    %c0_84 = arith.constant 0 : index
    %c0_85 = arith.constant 0 : index
    %90 = vector.load %arg3[%c8, %c0_84, %c0_85] : memref<9x128x128xbf16, #tpu.memory_space<vmem>>, vector<1x128x128xbf16>
    %91 = vector.shape_cast %90 : vector<1x128x128xbf16> to vector<128x128xbf16>
    %cst_86 = arith.constant dense<0.000000e+00> : vector<64x128xf32>
    %92 = tpu.matmul %88, %91, %cst_86 {dimension_numbers = #tpu.dot_dimension_numbers<[1], [0], [0], [1], [0, 0, 1, 1], [], []>} : vector<64x128xbf16>, vector<128x128xbf16>, vector<64x128xf32> -> vector<64x128xf32>
    %93 = arith.addf %89, %92 : vector<64x128xf32>
    %c0_87 = arith.constant 0 : index
    %c0_88 = arith.constant 0 : index
    %94 = vector.load %arg6[%c0_87, %c0_88] : memref<64x128xf32, #tpu.memory_space<vmem>>, vector<64x128xf32>
    tpu.vector_store %arg6[%c0_87, %c0_88], %93 {strides = array<i32>} : memref<64x128xf32, #tpu.memory_space<vmem>>, vector<64x128xf32>,
    %c0_89 = arith.constant 0 : index
    %c0_90 = arith.constant 0 : index
    %95 = vector.load %arg6[%c0_89, %c0_90] : memref<64x128xf32, #tpu.memory_space<vmem>>, vector<64x128xf32>
    %c0_91 = arith.constant 0 : index
    %c0_92 = arith.constant 0 : index
    %96 = vector.load %arg4[%c0_91, %c0_92] : memref<1x128xf32, #tpu.memory_space<vmem>>, vector<1x128xf32>
    %97 = vector.broadcast %96 : vector<1x128xf32> to vector<64x128xf32>
    %98 = arith.addf %95, %97 : vector<64x128xf32>
    %99 = arith.truncf %98 : vector<64x128xf32> to vector<64x128xbf16>
    %c0_93 = arith.constant 0 : index
    %c0_94 = arith.constant 0 : index
    %100 = vector.load %arg5[%c0_93, %c0_94] : memref<64x128xbf16, #tpu.memory_space<vmem>>, vector<64x128xbf16>
    tpu.vector_store %arg5[%c0_93, %c0_94], %99 {strides = array<i32>} : memref<64x128xbf16, #tpu.memory_space<vmem>>, vector<64x128xbf16>,
    return
  }
  func.func @transform_0(%arg0: i32, %arg1: i32) -> (i32, i32, i32) {
    %c0_i32 = arith.constant 0 : i32
    %c0_i32_0 = arith.constant 0 : i32
    %c0_i32_1 = arith.constant 0 : i32
    %c0_i32_2 = arith.constant 0 : i32
    return %c0_i32, %c0_i32_0, %c0_i32_1 : i32, i32, i32
  }
  func.func @transform_1(%arg0: i32, %arg1: i32) -> (i32, i32, i32) {
    %c0_i32 = arith.constant 0 : i32
    %c0_i32_0 = arith.constant 0 : i32
    %c0_i32_1 = arith.constant 0 : i32
    %c0_i32_2 = arith.constant 0 : i32
    return %c0_i32, %c0_i32_0, %c0_i32_1 : i32, i32, i32
  }
  func.func @transform_2(%arg0: i32, %arg1: i32) -> (i32, i32) {
    %c0_i32 = arith.constant 0 : i32
    %c0_i32_0 = arith.constant 0 : i32
    %c0_i32_1 = arith.constant 0 : i32
    return %c0_i32, %c0_i32_0 : i32, i32
  }
  func.func @transform_3(%arg0: i32, %arg1: i32) -> (i32, i32) {
    %c1_i32 = arith.constant 1 : i32
    %0 = arith.muli %arg0, %c1_i32 : i32
    %1 = arith.addi %0, %arg1 : i32
    %c0_i32 = arith.constant 0 : i32
    %c0_i32_0 = arith.constant 0 : i32
    return %1, %c0_i32 : i32, i32
  }
}

module attributes {stable_mosaic.version = 11 : i64} {
  func.func @_conv_kernel(%arg0: i32, %arg1: i32, %arg2: memref<36x18x128xbf16, #tpu.memory_space<vmem>>, %arg3: memref<9x128x128xbf16, #tpu.memory_space<vmem>>, %arg4: memref<1x128xf32, #tpu.memory_space<vmem>>, %arg5: memref<1xf32, #tpu.memory_space<smem>>, %arg6: memref<256x128xbf16, #tpu.memory_space<vmem>>, %arg7: memref<256x128xf32, #tpu.memory_space<vmem>>) attributes {dimension_semantics = [#tpu.dimension_semantics<parallel>, #tpu.dimension_semantics<parallel>], iteration_bounds = array<i64: 2, 1>, scalar_prefetch = 0 : i64, scratch_operands = 1 : i64, tpu.core_type = #tpu.core_type<tc>, window_params = [{pipeline_mode = #tpu.pipeline_mode<synchronous>, transform_indices = @transform_0, window_bounds = array<i64: 36, 18, 128>}, {pipeline_mode = #tpu.pipeline_mode<synchronous>, transform_indices = @transform_1, window_bounds = array<i64: 9, 128, 128>}, {pipeline_mode = #tpu.pipeline_mode<synchronous>, transform_indices = @transform_2, window_bounds = array<i64: 1, 128>}, {transform_indices = @transform_3, window_bounds = array<i64: 1>}, {transform_indices = @transform_4, window_bounds = array<i64: 256, 128>}]} {
    %c18_i32 = arith.constant 18 : i32
    %0 = arith.muli %arg0, %c18_i32 : i32
    %c16_i32 = arith.constant 16 : i32
    %1 = arith.muli %arg1, %c16_i32 : i32
    %2 = arith.addi %0, %1 : i32
    %cst = arith.constant 0.000000e+00 : f32
    %3 = vector.broadcast %cst : f32 to vector<256x128xf32>
    %c0 = arith.constant 0 : index
    %c0_0 = arith.constant 0 : index
    %4 = vector.load %arg7[%c0, %c0_0] : memref<256x128xf32, #tpu.memory_space<vmem>>, vector<256x128xf32>
    tpu.vector_store %arg7[%c0, %c0_0], %3 {strides = array<i32>} : memref<256x128xf32, #tpu.memory_space<vmem>>, vector<256x128xf32>,
    %c0_i32 = arith.constant 0 : i32
    %5 = arith.addi %2, %c0_i32 : i32
    %6 = arith.index_cast %5 : i32 to index
    %c0_1 = arith.constant 0 : index
    %c0_2 = arith.constant 0 : index
    %7 = vector.load %arg2[%6, %c0_1, %c0_2] : memref<36x18x128xbf16, #tpu.memory_space<vmem>>, vector<16x16x128xbf16>
    %8 = vector.shape_cast %7 : vector<16x16x128xbf16> to vector<256x128xbf16>
    %c0_3 = arith.constant 0 : index
    %c0_4 = arith.constant 0 : index
    %9 = vector.load %arg7[%c0_3, %c0_4] : memref<256x128xf32, #tpu.memory_space<vmem>>, vector<256x128xf32>
    %c0_5 = arith.constant 0 : index
    %c0_6 = arith.constant 0 : index
    %c0_7 = arith.constant 0 : index
    %10 = vector.load %arg3[%c0_5, %c0_6, %c0_7] : memref<9x128x128xbf16, #tpu.memory_space<vmem>>, vector<1x128x128xbf16>
    %11 = vector.shape_cast %10 : vector<1x128x128xbf16> to vector<128x128xbf16>
    %cst_8 = arith.constant dense<0.000000e+00> : vector<256x128xf32>
    %12 = tpu.matmul %8, %11, %cst_8 {dimension_numbers = #tpu.dot_dimension_numbers<[1], [0], [0], [1], [0, 0, 1, 1], [], []>} : vector<256x128xbf16>, vector<128x128xbf16>, vector<256x128xf32> -> vector<256x128xf32>
    %13 = arith.addf %9, %12 : vector<256x128xf32>
    %c0_9 = arith.constant 0 : index
    %c0_10 = arith.constant 0 : index
    %14 = vector.load %arg7[%c0_9, %c0_10] : memref<256x128xf32, #tpu.memory_space<vmem>>, vector<256x128xf32>
    tpu.vector_store %arg7[%c0_9, %c0_10], %13 {strides = array<i32>} : memref<256x128xf32, #tpu.memory_space<vmem>>, vector<256x128xf32>,
    %c0_i32_11 = arith.constant 0 : i32
    %15 = arith.addi %2, %c0_i32_11 : i32
    %16 = arith.index_cast %15 : i32 to index
    %c1 = arith.constant 1 : index
    %c0_12 = arith.constant 0 : index
    %17 = vector.load %arg2[%16, %c1, %c0_12] : memref<36x18x128xbf16, #tpu.memory_space<vmem>>, vector<16x16x128xbf16>
    %18 = vector.shape_cast %17 : vector<16x16x128xbf16> to vector<256x128xbf16>
    %c0_13 = arith.constant 0 : index
    %c0_14 = arith.constant 0 : index
    %19 = vector.load %arg7[%c0_13, %c0_14] : memref<256x128xf32, #tpu.memory_space<vmem>>, vector<256x128xf32>
    %c1_15 = arith.constant 1 : index
    %c0_16 = arith.constant 0 : index
    %c0_17 = arith.constant 0 : index
    %20 = vector.load %arg3[%c1_15, %c0_16, %c0_17] : memref<9x128x128xbf16, #tpu.memory_space<vmem>>, vector<1x128x128xbf16>
    %21 = vector.shape_cast %20 : vector<1x128x128xbf16> to vector<128x128xbf16>
    %cst_18 = arith.constant dense<0.000000e+00> : vector<256x128xf32>
    %22 = tpu.matmul %18, %21, %cst_18 {dimension_numbers = #tpu.dot_dimension_numbers<[1], [0], [0], [1], [0, 0, 1, 1], [], []>} : vector<256x128xbf16>, vector<128x128xbf16>, vector<256x128xf32> -> vector<256x128xf32>
    %23 = arith.addf %19, %22 : vector<256x128xf32>
    %c0_19 = arith.constant 0 : index
    %c0_20 = arith.constant 0 : index
    %24 = vector.load %arg7[%c0_19, %c0_20] : memref<256x128xf32, #tpu.memory_space<vmem>>, vector<256x128xf32>
    tpu.vector_store %arg7[%c0_19, %c0_20], %23 {strides = array<i32>} : memref<256x128xf32, #tpu.memory_space<vmem>>, vector<256x128xf32>,
    %c0_i32_21 = arith.constant 0 : i32
    %25 = arith.addi %2, %c0_i32_21 : i32
    %26 = arith.index_cast %25 : i32 to index
    %c2 = arith.constant 2 : index
    %c0_22 = arith.constant 0 : index
    %27 = vector.load %arg2[%26, %c2, %c0_22] : memref<36x18x128xbf16, #tpu.memory_space<vmem>>, vector<16x16x128xbf16>
    %28 = vector.shape_cast %27 : vector<16x16x128xbf16> to vector<256x128xbf16>
    %c0_23 = arith.constant 0 : index
    %c0_24 = arith.constant 0 : index
    %29 = vector.load %arg7[%c0_23, %c0_24] : memref<256x128xf32, #tpu.memory_space<vmem>>, vector<256x128xf32>
    %c2_25 = arith.constant 2 : index
    %c0_26 = arith.constant 0 : index
    %c0_27 = arith.constant 0 : index
    %30 = vector.load %arg3[%c2_25, %c0_26, %c0_27] : memref<9x128x128xbf16, #tpu.memory_space<vmem>>, vector<1x128x128xbf16>
    %31 = vector.shape_cast %30 : vector<1x128x128xbf16> to vector<128x128xbf16>
    %cst_28 = arith.constant dense<0.000000e+00> : vector<256x128xf32>
    %32 = tpu.matmul %28, %31, %cst_28 {dimension_numbers = #tpu.dot_dimension_numbers<[1], [0], [0], [1], [0, 0, 1, 1], [], []>} : vector<256x128xbf16>, vector<128x128xbf16>, vector<256x128xf32> -> vector<256x128xf32>
    %33 = arith.addf %29, %32 : vector<256x128xf32>
    %c0_29 = arith.constant 0 : index
    %c0_30 = arith.constant 0 : index
    %34 = vector.load %arg7[%c0_29, %c0_30] : memref<256x128xf32, #tpu.memory_space<vmem>>, vector<256x128xf32>
    tpu.vector_store %arg7[%c0_29, %c0_30], %33 {strides = array<i32>} : memref<256x128xf32, #tpu.memory_space<vmem>>, vector<256x128xf32>,
    %c1_i32 = arith.constant 1 : i32
    %35 = arith.addi %2, %c1_i32 : i32
    %36 = arith.index_cast %35 : i32 to index
    %c0_31 = arith.constant 0 : index
    %c0_32 = arith.constant 0 : index
    %37 = vector.load %arg2[%36, %c0_31, %c0_32] : memref<36x18x128xbf16, #tpu.memory_space<vmem>>, vector<16x16x128xbf16>
    %38 = vector.shape_cast %37 : vector<16x16x128xbf16> to vector<256x128xbf16>
    %c0_33 = arith.constant 0 : index
    %c0_34 = arith.constant 0 : index
    %39 = vector.load %arg7[%c0_33, %c0_34] : memref<256x128xf32, #tpu.memory_space<vmem>>, vector<256x128xf32>
    %c3 = arith.constant 3 : index
    %c0_35 = arith.constant 0 : index
    %c0_36 = arith.constant 0 : index
    %40 = vector.load %arg3[%c3, %c0_35, %c0_36] : memref<9x128x128xbf16, #tpu.memory_space<vmem>>, vector<1x128x128xbf16>
    %41 = vector.shape_cast %40 : vector<1x128x128xbf16> to vector<128x128xbf16>
    %cst_37 = arith.constant dense<0.000000e+00> : vector<256x128xf32>
    %42 = tpu.matmul %38, %41, %cst_37 {dimension_numbers = #tpu.dot_dimension_numbers<[1], [0], [0], [1], [0, 0, 1, 1], [], []>} : vector<256x128xbf16>, vector<128x128xbf16>, vector<256x128xf32> -> vector<256x128xf32>
    %43 = arith.addf %39, %42 : vector<256x128xf32>
    %c0_38 = arith.constant 0 : index
    %c0_39 = arith.constant 0 : index
    %44 = vector.load %arg7[%c0_38, %c0_39] : memref<256x128xf32, #tpu.memory_space<vmem>>, vector<256x128xf32>
    tpu.vector_store %arg7[%c0_38, %c0_39], %43 {strides = array<i32>} : memref<256x128xf32, #tpu.memory_space<vmem>>, vector<256x128xf32>,
    %c1_i32_40 = arith.constant 1 : i32
    %45 = arith.addi %2, %c1_i32_40 : i32
    %46 = arith.index_cast %45 : i32 to index
    %c1_41 = arith.constant 1 : index
    %c0_42 = arith.constant 0 : index
    %47 = vector.load %arg2[%46, %c1_41, %c0_42] : memref<36x18x128xbf16, #tpu.memory_space<vmem>>, vector<16x16x128xbf16>
    %48 = vector.shape_cast %47 : vector<16x16x128xbf16> to vector<256x128xbf16>
    %c0_43 = arith.constant 0 : index
    %c0_44 = arith.constant 0 : index
    %49 = vector.load %arg7[%c0_43, %c0_44] : memref<256x128xf32, #tpu.memory_space<vmem>>, vector<256x128xf32>
    %c4 = arith.constant 4 : index
    %c0_45 = arith.constant 0 : index
    %c0_46 = arith.constant 0 : index
    %50 = vector.load %arg3[%c4, %c0_45, %c0_46] : memref<9x128x128xbf16, #tpu.memory_space<vmem>>, vector<1x128x128xbf16>
    %51 = vector.shape_cast %50 : vector<1x128x128xbf16> to vector<128x128xbf16>
    %cst_47 = arith.constant dense<0.000000e+00> : vector<256x128xf32>
    %52 = tpu.matmul %48, %51, %cst_47 {dimension_numbers = #tpu.dot_dimension_numbers<[1], [0], [0], [1], [0, 0, 1, 1], [], []>} : vector<256x128xbf16>, vector<128x128xbf16>, vector<256x128xf32> -> vector<256x128xf32>
    %53 = arith.addf %49, %52 : vector<256x128xf32>
    %c0_48 = arith.constant 0 : index
    %c0_49 = arith.constant 0 : index
    %54 = vector.load %arg7[%c0_48, %c0_49] : memref<256x128xf32, #tpu.memory_space<vmem>>, vector<256x128xf32>
    tpu.vector_store %arg7[%c0_48, %c0_49], %53 {strides = array<i32>} : memref<256x128xf32, #tpu.memory_space<vmem>>, vector<256x128xf32>,
    %c1_i32_50 = arith.constant 1 : i32
    %55 = arith.addi %2, %c1_i32_50 : i32
    %56 = arith.index_cast %55 : i32 to index
    %c2_51 = arith.constant 2 : index
    %c0_52 = arith.constant 0 : index
    %57 = vector.load %arg2[%56, %c2_51, %c0_52] : memref<36x18x128xbf16, #tpu.memory_space<vmem>>, vector<16x16x128xbf16>
    %58 = vector.shape_cast %57 : vector<16x16x128xbf16> to vector<256x128xbf16>
    %c0_53 = arith.constant 0 : index
    %c0_54 = arith.constant 0 : index
    %59 = vector.load %arg7[%c0_53, %c0_54] : memref<256x128xf32, #tpu.memory_space<vmem>>, vector<256x128xf32>
    %c5 = arith.constant 5 : index
    %c0_55 = arith.constant 0 : index
    %c0_56 = arith.constant 0 : index
    %60 = vector.load %arg3[%c5, %c0_55, %c0_56] : memref<9x128x128xbf16, #tpu.memory_space<vmem>>, vector<1x128x128xbf16>
    %61 = vector.shape_cast %60 : vector<1x128x128xbf16> to vector<128x128xbf16>
    %cst_57 = arith.constant dense<0.000000e+00> : vector<256x128xf32>
    %62 = tpu.matmul %58, %61, %cst_57 {dimension_numbers = #tpu.dot_dimension_numbers<[1], [0], [0], [1], [0, 0, 1, 1], [], []>} : vector<256x128xbf16>, vector<128x128xbf16>, vector<256x128xf32> -> vector<256x128xf32>
    %63 = arith.addf %59, %62 : vector<256x128xf32>
    %c0_58 = arith.constant 0 : index
    %c0_59 = arith.constant 0 : index
    %64 = vector.load %arg7[%c0_58, %c0_59] : memref<256x128xf32, #tpu.memory_space<vmem>>, vector<256x128xf32>
    tpu.vector_store %arg7[%c0_58, %c0_59], %63 {strides = array<i32>} : memref<256x128xf32, #tpu.memory_space<vmem>>, vector<256x128xf32>,
    %c2_i32 = arith.constant 2 : i32
    %65 = arith.addi %2, %c2_i32 : i32
    %66 = arith.index_cast %65 : i32 to index
    %c0_60 = arith.constant 0 : index
    %c0_61 = arith.constant 0 : index
    %67 = vector.load %arg2[%66, %c0_60, %c0_61] : memref<36x18x128xbf16, #tpu.memory_space<vmem>>, vector<16x16x128xbf16>
    %68 = vector.shape_cast %67 : vector<16x16x128xbf16> to vector<256x128xbf16>
    %c0_62 = arith.constant 0 : index
    %c0_63 = arith.constant 0 : index
    %69 = vector.load %arg7[%c0_62, %c0_63] : memref<256x128xf32, #tpu.memory_space<vmem>>, vector<256x128xf32>
    %c6 = arith.constant 6 : index
    %c0_64 = arith.constant 0 : index
    %c0_65 = arith.constant 0 : index
    %70 = vector.load %arg3[%c6, %c0_64, %c0_65] : memref<9x128x128xbf16, #tpu.memory_space<vmem>>, vector<1x128x128xbf16>
    %71 = vector.shape_cast %70 : vector<1x128x128xbf16> to vector<128x128xbf16>
    %cst_66 = arith.constant dense<0.000000e+00> : vector<256x128xf32>
    %72 = tpu.matmul %68, %71, %cst_66 {dimension_numbers = #tpu.dot_dimension_numbers<[1], [0], [0], [1], [0, 0, 1, 1], [], []>} : vector<256x128xbf16>, vector<128x128xbf16>, vector<256x128xf32> -> vector<256x128xf32>
    %73 = arith.addf %69, %72 : vector<256x128xf32>
    %c0_67 = arith.constant 0 : index
    %c0_68 = arith.constant 0 : index
    %74 = vector.load %arg7[%c0_67, %c0_68] : memref<256x128xf32, #tpu.memory_space<vmem>>, vector<256x128xf32>
    tpu.vector_store %arg7[%c0_67, %c0_68], %73 {strides = array<i32>} : memref<256x128xf32, #tpu.memory_space<vmem>>, vector<256x128xf32>,
    %c2_i32_69 = arith.constant 2 : i32
    %75 = arith.addi %2, %c2_i32_69 : i32
    %76 = arith.index_cast %75 : i32 to index
    %c1_70 = arith.constant 1 : index
    %c0_71 = arith.constant 0 : index
    %77 = vector.load %arg2[%76, %c1_70, %c0_71] : memref<36x18x128xbf16, #tpu.memory_space<vmem>>, vector<16x16x128xbf16>
    %78 = vector.shape_cast %77 : vector<16x16x128xbf16> to vector<256x128xbf16>
    %c0_72 = arith.constant 0 : index
    %c0_73 = arith.constant 0 : index
    %79 = vector.load %arg7[%c0_72, %c0_73] : memref<256x128xf32, #tpu.memory_space<vmem>>, vector<256x128xf32>
    %c7 = arith.constant 7 : index
    %c0_74 = arith.constant 0 : index
    %c0_75 = arith.constant 0 : index
    %80 = vector.load %arg3[%c7, %c0_74, %c0_75] : memref<9x128x128xbf16, #tpu.memory_space<vmem>>, vector<1x128x128xbf16>
    %81 = vector.shape_cast %80 : vector<1x128x128xbf16> to vector<128x128xbf16>
    %cst_76 = arith.constant dense<0.000000e+00> : vector<256x128xf32>
    %82 = tpu.matmul %78, %81, %cst_76 {dimension_numbers = #tpu.dot_dimension_numbers<[1], [0], [0], [1], [0, 0, 1, 1], [], []>} : vector<256x128xbf16>, vector<128x128xbf16>, vector<256x128xf32> -> vector<256x128xf32>
    %83 = arith.addf %79, %82 : vector<256x128xf32>
    %c0_77 = arith.constant 0 : index
    %c0_78 = arith.constant 0 : index
    %84 = vector.load %arg7[%c0_77, %c0_78] : memref<256x128xf32, #tpu.memory_space<vmem>>, vector<256x128xf32>
    tpu.vector_store %arg7[%c0_77, %c0_78], %83 {strides = array<i32>} : memref<256x128xf32, #tpu.memory_space<vmem>>, vector<256x128xf32>,
    %c2_i32_79 = arith.constant 2 : i32
    %85 = arith.addi %2, %c2_i32_79 : i32
    %86 = arith.index_cast %85 : i32 to index
    %c2_80 = arith.constant 2 : index
    %c0_81 = arith.constant 0 : index
    %87 = vector.load %arg2[%86, %c2_80, %c0_81] : memref<36x18x128xbf16, #tpu.memory_space<vmem>>, vector<16x16x128xbf16>
    %88 = vector.shape_cast %87 : vector<16x16x128xbf16> to vector<256x128xbf16>
    %c0_82 = arith.constant 0 : index
    %c0_83 = arith.constant 0 : index
    %89 = vector.load %arg7[%c0_82, %c0_83] : memref<256x128xf32, #tpu.memory_space<vmem>>, vector<256x128xf32>
    %c8 = arith.constant 8 : index
    %c0_84 = arith.constant 0 : index
    %c0_85 = arith.constant 0 : index
    %90 = vector.load %arg3[%c8, %c0_84, %c0_85] : memref<9x128x128xbf16, #tpu.memory_space<vmem>>, vector<1x128x128xbf16>
    %91 = vector.shape_cast %90 : vector<1x128x128xbf16> to vector<128x128xbf16>
    %cst_86 = arith.constant dense<0.000000e+00> : vector<256x128xf32>
    %92 = tpu.matmul %88, %91, %cst_86 {dimension_numbers = #tpu.dot_dimension_numbers<[1], [0], [0], [1], [0, 0, 1, 1], [], []>} : vector<256x128xbf16>, vector<128x128xbf16>, vector<256x128xf32> -> vector<256x128xf32>
    %93 = arith.addf %89, %92 : vector<256x128xf32>
    %c0_87 = arith.constant 0 : index
    %c0_88 = arith.constant 0 : index
    %94 = vector.load %arg7[%c0_87, %c0_88] : memref<256x128xf32, #tpu.memory_space<vmem>>, vector<256x128xf32>
    tpu.vector_store %arg7[%c0_87, %c0_88], %93 {strides = array<i32>} : memref<256x128xf32, #tpu.memory_space<vmem>>, vector<256x128xf32>,
    %c0_89 = arith.constant 0 : index
    %c0_90 = arith.constant 0 : index
    %95 = vector.load %arg7[%c0_89, %c0_90] : memref<256x128xf32, #tpu.memory_space<vmem>>, vector<256x128xf32>
    %c0_91 = arith.constant 0 : index
    %c0_92 = arith.constant 0 : index
    %96 = vector.load %arg4[%c0_91, %c0_92] : memref<1x128xf32, #tpu.memory_space<vmem>>, vector<1x128xf32>
    %97 = vector.broadcast %96 : vector<1x128xf32> to vector<256x128xf32>
    %98 = arith.addf %95, %97 : vector<256x128xf32>
    %c0_93 = arith.constant 0 : index
    %99 = memref.load %arg5[%c0_93] : memref<1xf32, #tpu.memory_space<smem>>
    %cst_94 = arith.constant 0.000000e+00 : f32
    %100 = vector.broadcast %cst_94 : f32 to vector<256x128xf32>
    %101 = arith.cmpf ogt, %98, %100 : vector<256x128xf32>
    %102 = vector.broadcast %99 : f32 to vector<256x128xf32>
    %103 = arith.mulf %102, %98 : vector<256x128xf32>
    %104 = arith.select %101, %98, %103 : vector<256x128xi1>, vector<256x128xf32>
    %105 = arith.truncf %104 : vector<256x128xf32> to vector<256x128xbf16>
    %c0_95 = arith.constant 0 : index
    %c0_96 = arith.constant 0 : index
    %106 = vector.load %arg6[%c0_95, %c0_96] : memref<256x128xbf16, #tpu.memory_space<vmem>>, vector<256x128xbf16>
    tpu.vector_store %arg6[%c0_95, %c0_96], %105 {strides = array<i32>} : memref<256x128xbf16, #tpu.memory_space<vmem>>, vector<256x128xbf16>,
    return
  }
  func.func @transform_0(%arg0: i32, %arg1: i32) -> (i32, i32, i32) {
    %c0_i32 = arith.constant 0 : i32
    %c0_i32_0 = arith.constant 0 : i32
    %c0_i32_1 = arith.constant 0 : i32
    %c0_i32_2 = arith.constant 0 : i32
    return %c0_i32, %c0_i32_0, %c0_i32_1 : i32, i32, i32
  }
  func.func @transform_1(%arg0: i32, %arg1: i32) -> (i32, i32, i32) {
    %c0_i32 = arith.constant 0 : i32
    %c0_i32_0 = arith.constant 0 : i32
    %c0_i32_1 = arith.constant 0 : i32
    %c0_i32_2 = arith.constant 0 : i32
    return %c0_i32, %c0_i32_0, %c0_i32_1 : i32, i32, i32
  }
  func.func @transform_2(%arg0: i32, %arg1: i32) -> (i32, i32) {
    %c0_i32 = arith.constant 0 : i32
    %c0_i32_0 = arith.constant 0 : i32
    %c0_i32_1 = arith.constant 0 : i32
    return %c0_i32, %c0_i32_0 : i32, i32
  }
  func.func @transform_3(%arg0: i32, %arg1: i32) -> i32 {
    %c0_i32 = arith.constant 0 : i32
    %c0_i32_0 = arith.constant 0 : i32
    return %c0_i32 : i32
  }
  func.func @transform_4(%arg0: i32, %arg1: i32) -> (i32, i32) {
    %c1_i32 = arith.constant 1 : i32
    %0 = arith.muli %arg0, %c1_i32 : i32
    %1 = arith.addi %0, %arg1 : i32
    %c0_i32 = arith.constant 0 : i32
    %c0_i32_0 = arith.constant 0 : i32
    return %1, %c0_i32 : i32, i32
  }
}

module attributes {stable_mosaic.version = 11 : i64} {
  func.func @_conv_kernel(%arg0: i32, %arg1: i32, %arg2: memref<18x9x128xbf16, #tpu.memory_space<vmem>>, %arg3: memref<4x128x128xbf16, #tpu.memory_space<vmem>>, %arg4: memref<1x128xf32, #tpu.memory_space<vmem>>, %arg5: memref<1xf32, #tpu.memory_space<smem>>, %arg6: memref<64x128xbf16, #tpu.memory_space<vmem>>, %arg7: memref<64x128xbf16, #tpu.memory_space<vmem>>, %arg8: memref<64x128xf32, #tpu.memory_space<vmem>>) attributes {dimension_semantics = [#tpu.dimension_semantics<parallel>, #tpu.dimension_semantics<parallel>], iteration_bounds = array<i64: 2, 1>, scalar_prefetch = 0 : i64, scratch_operands = 1 : i64, tpu.core_type = #tpu.core_type<tc>, window_params = [{pipeline_mode = #tpu.pipeline_mode<synchronous>, transform_indices = @transform_0, window_bounds = array<i64: 18, 9, 128>}, {pipeline_mode = #tpu.pipeline_mode<synchronous>, transform_indices = @transform_1, window_bounds = array<i64: 4, 128, 128>}, {pipeline_mode = #tpu.pipeline_mode<synchronous>, transform_indices = @transform_2, window_bounds = array<i64: 1, 128>}, {transform_indices = @transform_3, window_bounds = array<i64: 1>}, {transform_indices = @transform_4, window_bounds = array<i64: 64, 128>}, {transform_indices = @transform_5, window_bounds = array<i64: 64, 128>}]} {
    %c9_i32 = arith.constant 9 : i32
    %0 = arith.muli %arg0, %c9_i32 : i32
    %c8_i32 = arith.constant 8 : i32
    %1 = arith.muli %arg1, %c8_i32 : i32
    %2 = arith.addi %0, %1 : i32
    %cst = arith.constant 0.000000e+00 : f32
    %3 = vector.broadcast %cst : f32 to vector<64x128xf32>
    %c0 = arith.constant 0 : index
    %c0_0 = arith.constant 0 : index
    %4 = vector.load %arg8[%c0, %c0_0] : memref<64x128xf32, #tpu.memory_space<vmem>>, vector<64x128xf32>
    tpu.vector_store %arg8[%c0, %c0_0], %3 {strides = array<i32>} : memref<64x128xf32, #tpu.memory_space<vmem>>, vector<64x128xf32>,
    %c0_i32 = arith.constant 0 : i32
    %5 = arith.addi %2, %c0_i32 : i32
    %6 = arith.index_cast %5 : i32 to index
    %c0_1 = arith.constant 0 : index
    %c0_2 = arith.constant 0 : index
    %7 = vector.load %arg2[%6, %c0_1, %c0_2] : memref<18x9x128xbf16, #tpu.memory_space<vmem>>, vector<8x8x128xbf16>
    %8 = vector.shape_cast %7 : vector<8x8x128xbf16> to vector<64x128xbf16>
    %c0_3 = arith.constant 0 : index
    %c0_4 = arith.constant 0 : index
    %9 = vector.load %arg8[%c0_3, %c0_4] : memref<64x128xf32, #tpu.memory_space<vmem>>, vector<64x128xf32>
    %c0_5 = arith.constant 0 : index
    %c0_6 = arith.constant 0 : index
    %c0_7 = arith.constant 0 : index
    %10 = vector.load %arg3[%c0_5, %c0_6, %c0_7] : memref<4x128x128xbf16, #tpu.memory_space<vmem>>, vector<1x128x128xbf16>
    %11 = vector.shape_cast %10 : vector<1x128x128xbf16> to vector<128x128xbf16>
    %cst_8 = arith.constant dense<0.000000e+00> : vector<64x128xf32>
    %12 = tpu.matmul %8, %11, %cst_8 {dimension_numbers = #tpu.dot_dimension_numbers<[1], [0], [0], [1], [0, 0, 1, 1], [], []>} : vector<64x128xbf16>, vector<128x128xbf16>, vector<64x128xf32> -> vector<64x128xf32>
    %13 = arith.addf %9, %12 : vector<64x128xf32>
    %c0_9 = arith.constant 0 : index
    %c0_10 = arith.constant 0 : index
    %14 = vector.load %arg8[%c0_9, %c0_10] : memref<64x128xf32, #tpu.memory_space<vmem>>, vector<64x128xf32>
    tpu.vector_store %arg8[%c0_9, %c0_10], %13 {strides = array<i32>} : memref<64x128xf32, #tpu.memory_space<vmem>>, vector<64x128xf32>,
    %c0_i32_11 = arith.constant 0 : i32
    %15 = arith.addi %2, %c0_i32_11 : i32
    %16 = arith.index_cast %15 : i32 to index
    %c1 = arith.constant 1 : index
    %c0_12 = arith.constant 0 : index
    %17 = vector.load %arg2[%16, %c1, %c0_12] : memref<18x9x128xbf16, #tpu.memory_space<vmem>>, vector<8x8x128xbf16>
    %18 = vector.shape_cast %17 : vector<8x8x128xbf16> to vector<64x128xbf16>
    %c0_13 = arith.constant 0 : index
    %c0_14 = arith.constant 0 : index
    %19 = vector.load %arg8[%c0_13, %c0_14] : memref<64x128xf32, #tpu.memory_space<vmem>>, vector<64x128xf32>
    %c1_15 = arith.constant 1 : index
    %c0_16 = arith.constant 0 : index
    %c0_17 = arith.constant 0 : index
    %20 = vector.load %arg3[%c1_15, %c0_16, %c0_17] : memref<4x128x128xbf16, #tpu.memory_space<vmem>>, vector<1x128x128xbf16>
    %21 = vector.shape_cast %20 : vector<1x128x128xbf16> to vector<128x128xbf16>
    %cst_18 = arith.constant dense<0.000000e+00> : vector<64x128xf32>
    %22 = tpu.matmul %18, %21, %cst_18 {dimension_numbers = #tpu.dot_dimension_numbers<[1], [0], [0], [1], [0, 0, 1, 1], [], []>} : vector<64x128xbf16>, vector<128x128xbf16>, vector<64x128xf32> -> vector<64x128xf32>
    %23 = arith.addf %19, %22 : vector<64x128xf32>
    %c0_19 = arith.constant 0 : index
    %c0_20 = arith.constant 0 : index
    %24 = vector.load %arg8[%c0_19, %c0_20] : memref<64x128xf32, #tpu.memory_space<vmem>>, vector<64x128xf32>
    tpu.vector_store %arg8[%c0_19, %c0_20], %23 {strides = array<i32>} : memref<64x128xf32, #tpu.memory_space<vmem>>, vector<64x128xf32>,
    %c1_i32 = arith.constant 1 : i32
    %25 = arith.addi %2, %c1_i32 : i32
    %26 = arith.index_cast %25 : i32 to index
    %c0_21 = arith.constant 0 : index
    %c0_22 = arith.constant 0 : index
    %27 = vector.load %arg2[%26, %c0_21, %c0_22] : memref<18x9x128xbf16, #tpu.memory_space<vmem>>, vector<8x8x128xbf16>
    %28 = vector.shape_cast %27 : vector<8x8x128xbf16> to vector<64x128xbf16>
    %c0_23 = arith.constant 0 : index
    %c0_24 = arith.constant 0 : index
    %29 = vector.load %arg8[%c0_23, %c0_24] : memref<64x128xf32, #tpu.memory_space<vmem>>, vector<64x128xf32>
    %c2 = arith.constant 2 : index
    %c0_25 = arith.constant 0 : index
    %c0_26 = arith.constant 0 : index
    %30 = vector.load %arg3[%c2, %c0_25, %c0_26] : memref<4x128x128xbf16, #tpu.memory_space<vmem>>, vector<1x128x128xbf16>
    %31 = vector.shape_cast %30 : vector<1x128x128xbf16> to vector<128x128xbf16>
    %cst_27 = arith.constant dense<0.000000e+00> : vector<64x128xf32>
    %32 = tpu.matmul %28, %31, %cst_27 {dimension_numbers = #tpu.dot_dimension_numbers<[1], [0], [0], [1], [0, 0, 1, 1], [], []>} : vector<64x128xbf16>, vector<128x128xbf16>, vector<64x128xf32> -> vector<64x128xf32>
    %33 = arith.addf %29, %32 : vector<64x128xf32>
    %c0_28 = arith.constant 0 : index
    %c0_29 = arith.constant 0 : index
    %34 = vector.load %arg8[%c0_28, %c0_29] : memref<64x128xf32, #tpu.memory_space<vmem>>, vector<64x128xf32>
    tpu.vector_store %arg8[%c0_28, %c0_29], %33 {strides = array<i32>} : memref<64x128xf32, #tpu.memory_space<vmem>>, vector<64x128xf32>,
    %c1_i32_30 = arith.constant 1 : i32
    %35 = arith.addi %2, %c1_i32_30 : i32
    %36 = arith.index_cast %35 : i32 to index
    %c1_31 = arith.constant 1 : index
    %c0_32 = arith.constant 0 : index
    %37 = vector.load %arg2[%36, %c1_31, %c0_32] : memref<18x9x128xbf16, #tpu.memory_space<vmem>>, vector<8x8x128xbf16>
    %38 = vector.shape_cast %37 : vector<8x8x128xbf16> to vector<64x128xbf16>
    %c0_33 = arith.constant 0 : index
    %c0_34 = arith.constant 0 : index
    %39 = vector.load %arg8[%c0_33, %c0_34] : memref<64x128xf32, #tpu.memory_space<vmem>>, vector<64x128xf32>
    %c3 = arith.constant 3 : index
    %c0_35 = arith.constant 0 : index
    %c0_36 = arith.constant 0 : index
    %40 = vector.load %arg3[%c3, %c0_35, %c0_36] : memref<4x128x128xbf16, #tpu.memory_space<vmem>>, vector<1x128x128xbf16>
    %41 = vector.shape_cast %40 : vector<1x128x128xbf16> to vector<128x128xbf16>
    %cst_37 = arith.constant dense<0.000000e+00> : vector<64x128xf32>
    %42 = tpu.matmul %38, %41, %cst_37 {dimension_numbers = #tpu.dot_dimension_numbers<[1], [0], [0], [1], [0, 0, 1, 1], [], []>} : vector<64x128xbf16>, vector<128x128xbf16>, vector<64x128xf32> -> vector<64x128xf32>
    %43 = arith.addf %39, %42 : vector<64x128xf32>
    %c0_38 = arith.constant 0 : index
    %c0_39 = arith.constant 0 : index
    %44 = vector.load %arg8[%c0_38, %c0_39] : memref<64x128xf32, #tpu.memory_space<vmem>>, vector<64x128xf32>
    tpu.vector_store %arg8[%c0_38, %c0_39], %43 {strides = array<i32>} : memref<64x128xf32, #tpu.memory_space<vmem>>, vector<64x128xf32>,
    %c0_40 = arith.constant 0 : index
    %c0_41 = arith.constant 0 : index
    %45 = vector.load %arg8[%c0_40, %c0_41] : memref<64x128xf32, #tpu.memory_space<vmem>>, vector<64x128xf32>
    %c0_42 = arith.constant 0 : index
    %c0_43 = arith.constant 0 : index
    %46 = vector.load %arg4[%c0_42, %c0_43] : memref<1x128xf32, #tpu.memory_space<vmem>>, vector<1x128xf32>
    %47 = vector.broadcast %46 : vector<1x128xf32> to vector<64x128xf32>
    %48 = arith.addf %45, %47 : vector<64x128xf32>
    %c0_44 = arith.constant 0 : index
    %49 = memref.load %arg5[%c0_44] : memref<1xf32, #tpu.memory_space<smem>>
    %cst_45 = arith.constant 0.000000e+00 : f32
    %50 = vector.broadcast %cst_45 : f32 to vector<64x128xf32>
    %51 = arith.cmpf ogt, %48, %50 : vector<64x128xf32>
    %52 = vector.broadcast %49 : f32 to vector<64x128xf32>
    %53 = arith.mulf %52, %48 : vector<64x128xf32>
    %54 = arith.select %51, %48, %53 : vector<64x128xi1>, vector<64x128xf32>
    %c0_46 = arith.constant 0 : index
    %c0_47 = arith.constant 0 : index
    %55 = vector.load %arg6[%c0_46, %c0_47] : memref<64x128xbf16, #tpu.memory_space<vmem>>, vector<64x128xbf16>
    %56 = arith.extf %55 : vector<64x128xbf16> to vector<64x128xf32>
    %cst_48 = arith.constant -1.000000e+00 : f32
    %57 = vector.broadcast %cst_48 : f32 to vector<64x128xf32>
    %58 = arith.mulf %57, %56 : vector<64x128xf32>
    %59 = arith.addf %54, %58 : vector<64x128xf32>
    %60 = arith.truncf %59 : vector<64x128xf32> to vector<64x128xbf16>
    %c0_49 = arith.constant 0 : index
    %c0_50 = arith.constant 0 : index
    %61 = vector.load %arg7[%c0_49, %c0_50] : memref<64x128xbf16, #tpu.memory_space<vmem>>, vector<64x128xbf16>
    tpu.vector_store %arg7[%c0_49, %c0_50], %60 {strides = array<i32>} : memref<64x128xbf16, #tpu.memory_space<vmem>>, vector<64x128xbf16>,
    return
  }
  func.func @transform_0(%arg0: i32, %arg1: i32) -> (i32, i32, i32) {
    %c0_i32 = arith.constant 0 : i32
    %c0_i32_0 = arith.constant 0 : i32
    %c0_i32_1 = arith.constant 0 : i32
    %c0_i32_2 = arith.constant 0 : i32
    return %c0_i32, %c0_i32_0, %c0_i32_1 : i32, i32, i32
  }
  func.func @transform_1(%arg0: i32, %arg1: i32) -> (i32, i32, i32) {
    %c0_i32 = arith.constant 0 : i32
    %c0_i32_0 = arith.constant 0 : i32
    %c0_i32_1 = arith.constant 0 : i32
    %c0_i32_2 = arith.constant 0 : i32
    return %c0_i32, %c0_i32_0, %c0_i32_1 : i32, i32, i32
  }
  func.func @transform_2(%arg0: i32, %arg1: i32) -> (i32, i32) {
    %c0_i32 = arith.constant 0 : i32
    %c0_i32_0 = arith.constant 0 : i32
    %c0_i32_1 = arith.constant 0 : i32
    return %c0_i32, %c0_i32_0 : i32, i32
  }
  func.func @transform_3(%arg0: i32, %arg1: i32) -> i32 {
    %c0_i32 = arith.constant 0 : i32
    %c0_i32_0 = arith.constant 0 : i32
    return %c0_i32 : i32
  }
  func.func @transform_4(%arg0: i32, %arg1: i32) -> (i32, i32) {
    %c1_i32 = arith.constant 1 : i32
    %0 = arith.muli %arg0, %c1_i32 : i32
    %1 = arith.addi %0, %arg1 : i32
    %c0_i32 = arith.constant 0 : i32
    %c0_i32_0 = arith.constant 0 : i32
    return %1, %c0_i32 : i32, i32
  }
  func.func @transform_5(%arg0: i32, %arg1: i32) -> (i32, i32) {
    %c1_i32 = arith.constant 1 : i32
    %0 = arith.muli %arg0, %c1_i32 : i32
    %1 = arith.addi %0, %arg1 : i32
    %c0_i32 = arith.constant 0 : i32
    %c0_i32_0 = arith.constant 0 : i32
    return %1, %c0_i32 : i32, i32
  }
}

module attributes {stable_mosaic.version = 11 : i64} {
  func.func @_conv_kernel(%arg0: i32, %arg1: i32, %arg2: memref<36x18x128xbf16, #tpu.memory_space<vmem>>, %arg3: memref<9x128x128xbf16, #tpu.memory_space<vmem>>, %arg4: memref<1x128xf32, #tpu.memory_space<vmem>>, %arg5: memref<1xf32, #tpu.memory_space<smem>>, %arg6: memref<256x128xbf16, #tpu.memory_space<vmem>>, %arg7: memref<256x128xbf16, #tpu.memory_space<vmem>>, %arg8: memref<256x128xf32, #tpu.memory_space<vmem>>) attributes {dimension_semantics = [#tpu.dimension_semantics<parallel>, #tpu.dimension_semantics<parallel>], iteration_bounds = array<i64: 2, 1>, scalar_prefetch = 0 : i64, scratch_operands = 1 : i64, tpu.core_type = #tpu.core_type<tc>, window_params = [{pipeline_mode = #tpu.pipeline_mode<synchronous>, transform_indices = @transform_0, window_bounds = array<i64: 36, 18, 128>}, {pipeline_mode = #tpu.pipeline_mode<synchronous>, transform_indices = @transform_1, window_bounds = array<i64: 9, 128, 128>}, {pipeline_mode = #tpu.pipeline_mode<synchronous>, transform_indices = @transform_2, window_bounds = array<i64: 1, 128>}, {transform_indices = @transform_3, window_bounds = array<i64: 1>}, {transform_indices = @transform_4, window_bounds = array<i64: 256, 128>}, {transform_indices = @transform_5, window_bounds = array<i64: 256, 128>}]} {
    %c18_i32 = arith.constant 18 : i32
    %0 = arith.muli %arg0, %c18_i32 : i32
    %c16_i32 = arith.constant 16 : i32
    %1 = arith.muli %arg1, %c16_i32 : i32
    %2 = arith.addi %0, %1 : i32
    %cst = arith.constant 0.000000e+00 : f32
    %3 = vector.broadcast %cst : f32 to vector<256x128xf32>
    %c0 = arith.constant 0 : index
    %c0_0 = arith.constant 0 : index
    %4 = vector.load %arg8[%c0, %c0_0] : memref<256x128xf32, #tpu.memory_space<vmem>>, vector<256x128xf32>
    tpu.vector_store %arg8[%c0, %c0_0], %3 {strides = array<i32>} : memref<256x128xf32, #tpu.memory_space<vmem>>, vector<256x128xf32>,
    %c0_i32 = arith.constant 0 : i32
    %5 = arith.addi %2, %c0_i32 : i32
    %6 = arith.index_cast %5 : i32 to index
    %c0_1 = arith.constant 0 : index
    %c0_2 = arith.constant 0 : index
    %7 = vector.load %arg2[%6, %c0_1, %c0_2] : memref<36x18x128xbf16, #tpu.memory_space<vmem>>, vector<16x16x128xbf16>
    %8 = vector.shape_cast %7 : vector<16x16x128xbf16> to vector<256x128xbf16>
    %c0_3 = arith.constant 0 : index
    %c0_4 = arith.constant 0 : index
    %9 = vector.load %arg8[%c0_3, %c0_4] : memref<256x128xf32, #tpu.memory_space<vmem>>, vector<256x128xf32>
    %c0_5 = arith.constant 0 : index
    %c0_6 = arith.constant 0 : index
    %c0_7 = arith.constant 0 : index
    %10 = vector.load %arg3[%c0_5, %c0_6, %c0_7] : memref<9x128x128xbf16, #tpu.memory_space<vmem>>, vector<1x128x128xbf16>
    %11 = vector.shape_cast %10 : vector<1x128x128xbf16> to vector<128x128xbf16>
    %cst_8 = arith.constant dense<0.000000e+00> : vector<256x128xf32>
    %12 = tpu.matmul %8, %11, %cst_8 {dimension_numbers = #tpu.dot_dimension_numbers<[1], [0], [0], [1], [0, 0, 1, 1], [], []>} : vector<256x128xbf16>, vector<128x128xbf16>, vector<256x128xf32> -> vector<256x128xf32>
    %13 = arith.addf %9, %12 : vector<256x128xf32>
    %c0_9 = arith.constant 0 : index
    %c0_10 = arith.constant 0 : index
    %14 = vector.load %arg8[%c0_9, %c0_10] : memref<256x128xf32, #tpu.memory_space<vmem>>, vector<256x128xf32>
    tpu.vector_store %arg8[%c0_9, %c0_10], %13 {strides = array<i32>} : memref<256x128xf32, #tpu.memory_space<vmem>>, vector<256x128xf32>,
    %c0_i32_11 = arith.constant 0 : i32
    %15 = arith.addi %2, %c0_i32_11 : i32
    %16 = arith.index_cast %15 : i32 to index
    %c1 = arith.constant 1 : index
    %c0_12 = arith.constant 0 : index
    %17 = vector.load %arg2[%16, %c1, %c0_12] : memref<36x18x128xbf16, #tpu.memory_space<vmem>>, vector<16x16x128xbf16>
    %18 = vector.shape_cast %17 : vector<16x16x128xbf16> to vector<256x128xbf16>
    %c0_13 = arith.constant 0 : index
    %c0_14 = arith.constant 0 : index
    %19 = vector.load %arg8[%c0_13, %c0_14] : memref<256x128xf32, #tpu.memory_space<vmem>>, vector<256x128xf32>
    %c1_15 = arith.constant 1 : index
    %c0_16 = arith.constant 0 : index
    %c0_17 = arith.constant 0 : index
    %20 = vector.load %arg3[%c1_15, %c0_16, %c0_17] : memref<9x128x128xbf16, #tpu.memory_space<vmem>>, vector<1x128x128xbf16>
    %21 = vector.shape_cast %20 : vector<1x128x128xbf16> to vector<128x128xbf16>
    %cst_18 = arith.constant dense<0.000000e+00> : vector<256x128xf32>
    %22 = tpu.matmul %18, %21, %cst_18 {dimension_numbers = #tpu.dot_dimension_numbers<[1], [0], [0], [1], [0, 0, 1, 1], [], []>} : vector<256x128xbf16>, vector<128x128xbf16>, vector<256x128xf32> -> vector<256x128xf32>
    %23 = arith.addf %19, %22 : vector<256x128xf32>
    %c0_19 = arith.constant 0 : index
    %c0_20 = arith.constant 0 : index
    %24 = vector.load %arg8[%c0_19, %c0_20] : memref<256x128xf32, #tpu.memory_space<vmem>>, vector<256x128xf32>
    tpu.vector_store %arg8[%c0_19, %c0_20], %23 {strides = array<i32>} : memref<256x128xf32, #tpu.memory_space<vmem>>, vector<256x128xf32>,
    %c0_i32_21 = arith.constant 0 : i32
    %25 = arith.addi %2, %c0_i32_21 : i32
    %26 = arith.index_cast %25 : i32 to index
    %c2 = arith.constant 2 : index
    %c0_22 = arith.constant 0 : index
    %27 = vector.load %arg2[%26, %c2, %c0_22] : memref<36x18x128xbf16, #tpu.memory_space<vmem>>, vector<16x16x128xbf16>
    %28 = vector.shape_cast %27 : vector<16x16x128xbf16> to vector<256x128xbf16>
    %c0_23 = arith.constant 0 : index
    %c0_24 = arith.constant 0 : index
    %29 = vector.load %arg8[%c0_23, %c0_24] : memref<256x128xf32, #tpu.memory_space<vmem>>, vector<256x128xf32>
    %c2_25 = arith.constant 2 : index
    %c0_26 = arith.constant 0 : index
    %c0_27 = arith.constant 0 : index
    %30 = vector.load %arg3[%c2_25, %c0_26, %c0_27] : memref<9x128x128xbf16, #tpu.memory_space<vmem>>, vector<1x128x128xbf16>
    %31 = vector.shape_cast %30 : vector<1x128x128xbf16> to vector<128x128xbf16>
    %cst_28 = arith.constant dense<0.000000e+00> : vector<256x128xf32>
    %32 = tpu.matmul %28, %31, %cst_28 {dimension_numbers = #tpu.dot_dimension_numbers<[1], [0], [0], [1], [0, 0, 1, 1], [], []>} : vector<256x128xbf16>, vector<128x128xbf16>, vector<256x128xf32> -> vector<256x128xf32>
    %33 = arith.addf %29, %32 : vector<256x128xf32>
    %c0_29 = arith.constant 0 : index
    %c0_30 = arith.constant 0 : index
    %34 = vector.load %arg8[%c0_29, %c0_30] : memref<256x128xf32, #tpu.memory_space<vmem>>, vector<256x128xf32>
    tpu.vector_store %arg8[%c0_29, %c0_30], %33 {strides = array<i32>} : memref<256x128xf32, #tpu.memory_space<vmem>>, vector<256x128xf32>,
    %c1_i32 = arith.constant 1 : i32
    %35 = arith.addi %2, %c1_i32 : i32
    %36 = arith.index_cast %35 : i32 to index
    %c0_31 = arith.constant 0 : index
    %c0_32 = arith.constant 0 : index
    %37 = vector.load %arg2[%36, %c0_31, %c0_32] : memref<36x18x128xbf16, #tpu.memory_space<vmem>>, vector<16x16x128xbf16>
    %38 = vector.shape_cast %37 : vector<16x16x128xbf16> to vector<256x128xbf16>
    %c0_33 = arith.constant 0 : index
    %c0_34 = arith.constant 0 : index
    %39 = vector.load %arg8[%c0_33, %c0_34] : memref<256x128xf32, #tpu.memory_space<vmem>>, vector<256x128xf32>
    %c3 = arith.constant 3 : index
    %c0_35 = arith.constant 0 : index
    %c0_36 = arith.constant 0 : index
    %40 = vector.load %arg3[%c3, %c0_35, %c0_36] : memref<9x128x128xbf16, #tpu.memory_space<vmem>>, vector<1x128x128xbf16>
    %41 = vector.shape_cast %40 : vector<1x128x128xbf16> to vector<128x128xbf16>
    %cst_37 = arith.constant dense<0.000000e+00> : vector<256x128xf32>
    %42 = tpu.matmul %38, %41, %cst_37 {dimension_numbers = #tpu.dot_dimension_numbers<[1], [0], [0], [1], [0, 0, 1, 1], [], []>} : vector<256x128xbf16>, vector<128x128xbf16>, vector<256x128xf32> -> vector<256x128xf32>
    %43 = arith.addf %39, %42 : vector<256x128xf32>
    %c0_38 = arith.constant 0 : index
    %c0_39 = arith.constant 0 : index
    %44 = vector.load %arg8[%c0_38, %c0_39] : memref<256x128xf32, #tpu.memory_space<vmem>>, vector<256x128xf32>
    tpu.vector_store %arg8[%c0_38, %c0_39], %43 {strides = array<i32>} : memref<256x128xf32, #tpu.memory_space<vmem>>, vector<256x128xf32>,
    %c1_i32_40 = arith.constant 1 : i32
    %45 = arith.addi %2, %c1_i32_40 : i32
    %46 = arith.index_cast %45 : i32 to index
    %c1_41 = arith.constant 1 : index
    %c0_42 = arith.constant 0 : index
    %47 = vector.load %arg2[%46, %c1_41, %c0_42] : memref<36x18x128xbf16, #tpu.memory_space<vmem>>, vector<16x16x128xbf16>
    %48 = vector.shape_cast %47 : vector<16x16x128xbf16> to vector<256x128xbf16>
    %c0_43 = arith.constant 0 : index
    %c0_44 = arith.constant 0 : index
    %49 = vector.load %arg8[%c0_43, %c0_44] : memref<256x128xf32, #tpu.memory_space<vmem>>, vector<256x128xf32>
    %c4 = arith.constant 4 : index
    %c0_45 = arith.constant 0 : index
    %c0_46 = arith.constant 0 : index
    %50 = vector.load %arg3[%c4, %c0_45, %c0_46] : memref<9x128x128xbf16, #tpu.memory_space<vmem>>, vector<1x128x128xbf16>
    %51 = vector.shape_cast %50 : vector<1x128x128xbf16> to vector<128x128xbf16>
    %cst_47 = arith.constant dense<0.000000e+00> : vector<256x128xf32>
    %52 = tpu.matmul %48, %51, %cst_47 {dimension_numbers = #tpu.dot_dimension_numbers<[1], [0], [0], [1], [0, 0, 1, 1], [], []>} : vector<256x128xbf16>, vector<128x128xbf16>, vector<256x128xf32> -> vector<256x128xf32>
    %53 = arith.addf %49, %52 : vector<256x128xf32>
    %c0_48 = arith.constant 0 : index
    %c0_49 = arith.constant 0 : index
    %54 = vector.load %arg8[%c0_48, %c0_49] : memref<256x128xf32, #tpu.memory_space<vmem>>, vector<256x128xf32>
    tpu.vector_store %arg8[%c0_48, %c0_49], %53 {strides = array<i32>} : memref<256x128xf32, #tpu.memory_space<vmem>>, vector<256x128xf32>,
    %c1_i32_50 = arith.constant 1 : i32
    %55 = arith.addi %2, %c1_i32_50 : i32
    %56 = arith.index_cast %55 : i32 to index
    %c2_51 = arith.constant 2 : index
    %c0_52 = arith.constant 0 : index
    %57 = vector.load %arg2[%56, %c2_51, %c0_52] : memref<36x18x128xbf16, #tpu.memory_space<vmem>>, vector<16x16x128xbf16>
    %58 = vector.shape_cast %57 : vector<16x16x128xbf16> to vector<256x128xbf16>
    %c0_53 = arith.constant 0 : index
    %c0_54 = arith.constant 0 : index
    %59 = vector.load %arg8[%c0_53, %c0_54] : memref<256x128xf32, #tpu.memory_space<vmem>>, vector<256x128xf32>
    %c5 = arith.constant 5 : index
    %c0_55 = arith.constant 0 : index
    %c0_56 = arith.constant 0 : index
    %60 = vector.load %arg3[%c5, %c0_55, %c0_56] : memref<9x128x128xbf16, #tpu.memory_space<vmem>>, vector<1x128x128xbf16>
    %61 = vector.shape_cast %60 : vector<1x128x128xbf16> to vector<128x128xbf16>
    %cst_57 = arith.constant dense<0.000000e+00> : vector<256x128xf32>
    %62 = tpu.matmul %58, %61, %cst_57 {dimension_numbers = #tpu.dot_dimension_numbers<[1], [0], [0], [1], [0, 0, 1, 1], [], []>} : vector<256x128xbf16>, vector<128x128xbf16>, vector<256x128xf32> -> vector<256x128xf32>
    %63 = arith.addf %59, %62 : vector<256x128xf32>
    %c0_58 = arith.constant 0 : index
    %c0_59 = arith.constant 0 : index
    %64 = vector.load %arg8[%c0_58, %c0_59] : memref<256x128xf32, #tpu.memory_space<vmem>>, vector<256x128xf32>
    tpu.vector_store %arg8[%c0_58, %c0_59], %63 {strides = array<i32>} : memref<256x128xf32, #tpu.memory_space<vmem>>, vector<256x128xf32>,
    %c2_i32 = arith.constant 2 : i32
    %65 = arith.addi %2, %c2_i32 : i32
    %66 = arith.index_cast %65 : i32 to index
    %c0_60 = arith.constant 0 : index
    %c0_61 = arith.constant 0 : index
    %67 = vector.load %arg2[%66, %c0_60, %c0_61] : memref<36x18x128xbf16, #tpu.memory_space<vmem>>, vector<16x16x128xbf16>
    %68 = vector.shape_cast %67 : vector<16x16x128xbf16> to vector<256x128xbf16>
    %c0_62 = arith.constant 0 : index
    %c0_63 = arith.constant 0 : index
    %69 = vector.load %arg8[%c0_62, %c0_63] : memref<256x128xf32, #tpu.memory_space<vmem>>, vector<256x128xf32>
    %c6 = arith.constant 6 : index
    %c0_64 = arith.constant 0 : index
    %c0_65 = arith.constant 0 : index
    %70 = vector.load %arg3[%c6, %c0_64, %c0_65] : memref<9x128x128xbf16, #tpu.memory_space<vmem>>, vector<1x128x128xbf16>
    %71 = vector.shape_cast %70 : vector<1x128x128xbf16> to vector<128x128xbf16>
    %cst_66 = arith.constant dense<0.000000e+00> : vector<256x128xf32>
    %72 = tpu.matmul %68, %71, %cst_66 {dimension_numbers = #tpu.dot_dimension_numbers<[1], [0], [0], [1], [0, 0, 1, 1], [], []>} : vector<256x128xbf16>, vector<128x128xbf16>, vector<256x128xf32> -> vector<256x128xf32>
    %73 = arith.addf %69, %72 : vector<256x128xf32>
    %c0_67 = arith.constant 0 : index
    %c0_68 = arith.constant 0 : index
    %74 = vector.load %arg8[%c0_67, %c0_68] : memref<256x128xf32, #tpu.memory_space<vmem>>, vector<256x128xf32>
    tpu.vector_store %arg8[%c0_67, %c0_68], %73 {strides = array<i32>} : memref<256x128xf32, #tpu.memory_space<vmem>>, vector<256x128xf32>,
    %c2_i32_69 = arith.constant 2 : i32
    %75 = arith.addi %2, %c2_i32_69 : i32
    %76 = arith.index_cast %75 : i32 to index
    %c1_70 = arith.constant 1 : index
    %c0_71 = arith.constant 0 : index
    %77 = vector.load %arg2[%76, %c1_70, %c0_71] : memref<36x18x128xbf16, #tpu.memory_space<vmem>>, vector<16x16x128xbf16>
    %78 = vector.shape_cast %77 : vector<16x16x128xbf16> to vector<256x128xbf16>
    %c0_72 = arith.constant 0 : index
    %c0_73 = arith.constant 0 : index
    %79 = vector.load %arg8[%c0_72, %c0_73] : memref<256x128xf32, #tpu.memory_space<vmem>>, vector<256x128xf32>
    %c7 = arith.constant 7 : index
    %c0_74 = arith.constant 0 : index
    %c0_75 = arith.constant 0 : index
    %80 = vector.load %arg3[%c7, %c0_74, %c0_75] : memref<9x128x128xbf16, #tpu.memory_space<vmem>>, vector<1x128x128xbf16>
    %81 = vector.shape_cast %80 : vector<1x128x128xbf16> to vector<128x128xbf16>
    %cst_76 = arith.constant dense<0.000000e+00> : vector<256x128xf32>
    %82 = tpu.matmul %78, %81, %cst_76 {dimension_numbers = #tpu.dot_dimension_numbers<[1], [0], [0], [1], [0, 0, 1, 1], [], []>} : vector<256x128xbf16>, vector<128x128xbf16>, vector<256x128xf32> -> vector<256x128xf32>
    %83 = arith.addf %79, %82 : vector<256x128xf32>
    %c0_77 = arith.constant 0 : index
    %c0_78 = arith.constant 0 : index
    %84 = vector.load %arg8[%c0_77, %c0_78] : memref<256x128xf32, #tpu.memory_space<vmem>>, vector<256x128xf32>
    tpu.vector_store %arg8[%c0_77, %c0_78], %83 {strides = array<i32>} : memref<256x128xf32, #tpu.memory_space<vmem>>, vector<256x128xf32>,
    %c2_i32_79 = arith.constant 2 : i32
    %85 = arith.addi %2, %c2_i32_79 : i32
    %86 = arith.index_cast %85 : i32 to index
    %c2_80 = arith.constant 2 : index
    %c0_81 = arith.constant 0 : index
    %87 = vector.load %arg2[%86, %c2_80, %c0_81] : memref<36x18x128xbf16, #tpu.memory_space<vmem>>, vector<16x16x128xbf16>
    %88 = vector.shape_cast %87 : vector<16x16x128xbf16> to vector<256x128xbf16>
    %c0_82 = arith.constant 0 : index
    %c0_83 = arith.constant 0 : index
    %89 = vector.load %arg8[%c0_82, %c0_83] : memref<256x128xf32, #tpu.memory_space<vmem>>, vector<256x128xf32>
    %c8 = arith.constant 8 : index
    %c0_84 = arith.constant 0 : index
    %c0_85 = arith.constant 0 : index
    %90 = vector.load %arg3[%c8, %c0_84, %c0_85] : memref<9x128x128xbf16, #tpu.memory_space<vmem>>, vector<1x128x128xbf16>
    %91 = vector.shape_cast %90 : vector<1x128x128xbf16> to vector<128x128xbf16>
    %cst_86 = arith.constant dense<0.000000e+00> : vector<256x128xf32>
    %92 = tpu.matmul %88, %91, %cst_86 {dimension_numbers = #tpu.dot_dimension_numbers<[1], [0], [0], [1], [0, 0, 1, 1], [], []>} : vector<256x128xbf16>, vector<128x128xbf16>, vector<256x128xf32> -> vector<256x128xf32>
    %93 = arith.addf %89, %92 : vector<256x128xf32>
    %c0_87 = arith.constant 0 : index
    %c0_88 = arith.constant 0 : index
    %94 = vector.load %arg8[%c0_87, %c0_88] : memref<256x128xf32, #tpu.memory_space<vmem>>, vector<256x128xf32>
    tpu.vector_store %arg8[%c0_87, %c0_88], %93 {strides = array<i32>} : memref<256x128xf32, #tpu.memory_space<vmem>>, vector<256x128xf32>,
    %c0_89 = arith.constant 0 : index
    %c0_90 = arith.constant 0 : index
    %95 = vector.load %arg8[%c0_89, %c0_90] : memref<256x128xf32, #tpu.memory_space<vmem>>, vector<256x128xf32>
    %c0_91 = arith.constant 0 : index
    %c0_92 = arith.constant 0 : index
    %96 = vector.load %arg4[%c0_91, %c0_92] : memref<1x128xf32, #tpu.memory_space<vmem>>, vector<1x128xf32>
    %97 = vector.broadcast %96 : vector<1x128xf32> to vector<256x128xf32>
    %98 = arith.addf %95, %97 : vector<256x128xf32>
    %c0_93 = arith.constant 0 : index
    %99 = memref.load %arg5[%c0_93] : memref<1xf32, #tpu.memory_space<smem>>
    %cst_94 = arith.constant 0.000000e+00 : f32
    %100 = vector.broadcast %cst_94 : f32 to vector<256x128xf32>
    %101 = arith.cmpf ogt, %98, %100 : vector<256x128xf32>
    %102 = vector.broadcast %99 : f32 to vector<256x128xf32>
    %103 = arith.mulf %102, %98 : vector<256x128xf32>
    %104 = arith.select %101, %98, %103 : vector<256x128xi1>, vector<256x128xf32>
    %c0_95 = arith.constant 0 : index
    %c0_96 = arith.constant 0 : index
    %105 = vector.load %arg6[%c0_95, %c0_96] : memref<256x128xbf16, #tpu.memory_space<vmem>>, vector<256x128xbf16>
    %106 = arith.extf %105 : vector<256x128xbf16> to vector<256x128xf32>
    %cst_97 = arith.constant 1.000000e+00 : f32
    %107 = vector.broadcast %cst_97 : f32 to vector<256x128xf32>
    %108 = arith.mulf %107, %106 : vector<256x128xf32>
    %109 = arith.addf %104, %108 : vector<256x128xf32>
    %110 = arith.truncf %109 : vector<256x128xf32> to vector<256x128xbf16>
    %c0_98 = arith.constant 0 : index
    %c0_99 = arith.constant 0 : index
    %111 = vector.load %arg7[%c0_98, %c0_99] : memref<256x128xbf16, #tpu.memory_space<vmem>>, vector<256x128xbf16>
    tpu.vector_store %arg7[%c0_98, %c0_99], %110 {strides = array<i32>} : memref<256x128xbf16, #tpu.memory_space<vmem>>, vector<256x128xbf16>,
    return
  }
  func.func @transform_0(%arg0: i32, %arg1: i32) -> (i32, i32, i32) {
    %c0_i32 = arith.constant 0 : i32
    %c0_i32_0 = arith.constant 0 : i32
    %c0_i32_1 = arith.constant 0 : i32
    %c0_i32_2 = arith.constant 0 : i32
    return %c0_i32, %c0_i32_0, %c0_i32_1 : i32, i32, i32
  }
  func.func @transform_1(%arg0: i32, %arg1: i32) -> (i32, i32, i32) {
    %c0_i32 = arith.constant 0 : i32
    %c0_i32_0 = arith.constant 0 : i32
    %c0_i32_1 = arith.constant 0 : i32
    %c0_i32_2 = arith.constant 0 : i32
    return %c0_i32, %c0_i32_0, %c0_i32_1 : i32, i32, i32
  }
  func.func @transform_2(%arg0: i32, %arg1: i32) -> (i32, i32) {
    %c0_i32 = arith.constant 0 : i32
    %c0_i32_0 = arith.constant 0 : i32
    %c0_i32_1 = arith.constant 0 : i32
    return %c0_i32, %c0_i32_0 : i32, i32
  }
  func.func @transform_3(%arg0: i32, %arg1: i32) -> i32 {
    %c0_i32 = arith.constant 0 : i32
    %c0_i32_0 = arith.constant 0 : i32
    return %c0_i32 : i32
  }
  func.func @transform_4(%arg0: i32, %arg1: i32) -> (i32, i32) {
    %c1_i32 = arith.constant 1 : i32
    %0 = arith.muli %arg0, %c1_i32 : i32
    %1 = arith.addi %0, %arg1 : i32
    %c0_i32 = arith.constant 0 : i32
    %c0_i32_0 = arith.constant 0 : i32
    return %1, %c0_i32 : i32, i32
  }
  func.func @transform_5(%arg0: i32, %arg1: i32) -> (i32, i32) {
    %c1_i32 = arith.constant 1 : i32
    %0 = arith.muli %arg0, %c1_i32 : i32
    %1 = arith.addi %0, %arg1 : i32
    %c0_i32 = arith.constant 0 : i32
    %c0_i32_0 = arith.constant 0 : i32
    return %1, %c0_i32 : i32, i32
  }
}

</mosaic_0001>

<bundles_post_ra>
// kernel: upblockpix_forward.5
= control target key start
LH: loop header
LB: loop body
LE: loop exit
PB: predicated region body
PF: predicated region fallthrough
CT: control target
= control target key end

     0   :  { %s2908_s12 = smov 0   ;;  %s2910_s13 = smov 0   ;;  %s3505_s0 = inlined_call_operand.vmem [shape: bf16[20,10,128], index: 0, kind: input, shape index: {}]   ;;  %s3506_s1 = inlined_call_operand.vmem [shape: bf16[9,128,128], index: 1, kind: input, shape index: {}]   ;;  %s3507_s2 = inlined_call_operand.vmem [shape: f32[1,128], index: 2, kind: input, shape index: {}]   ;;  %s3508_s3 = inlined_call_operand.vmem [shape: bf16[128,128], index: 3, kind: output, shape index: {}]  }
   0x1   :  { %s2912_s14 = smov 0  }
   0x2 LB: > { %s25_s15 = sadd.s32 1, %s2882_s13  ;;  %p2138_p0 = scmp.ge.s32.totalorder %s2886_s14, 1  ;;  %s2886_s14 = sphi %s2912_s14, %s13_s14   ;;  %s2882_s13 = sphi %s2910_s13, %s3514_s13   ;;  %s2878_s12 = sphi %s2908_s12, %s3513_s12  }
   0x3   : > { %p27_p1 = scmp.ge.s32.totalorder %s25_s15, 2  ;;  %p141_p2 = scmp.lt.s32.totalorder %s2886_s14, 3 }
   0x5   : > { %s3516_s15 = smov (%p27_p1, %s25_s15), 0  ;;  %p142_p3 = pnand %p2138_p0, %p141_p2 }
   0x6   : > { %s2715_s9 = smul.u32 (!%p142_p3), 80, %s2878_s12 }
   0x7   : > { %145 = sbr.rel (%p142_p3) target bundleno = 335 (0x14f), region = 32 }
   0x8   : > { %s2971_s22 = scalar_lea.vmem (!%p142_p3), %s3505_s0, %s2715_s9 }
   0xc   : > { %v2727_v0 = vld [vmem:[%s3506_s1 + $0x38] sm:$0xff]  ;;  %v2726_v2 = vld [vmem:[%s3506_s1 + $0x30] sm:$0xff]  ;;  %v2725_v6 = vld [vmem:[%s3506_s1 + $0x28] sm:$0xff]  ;;  %vm629_vm0 = vcmask 1042432   ;;  %vm630_vm1 = vcmask 1046532  }
   0xd   : > { %v2743_v1 = vld [vmem:[%s3506_s1 + $0xb8] sm:$0xff]  ;;  %2823 = vmatpush.bf16.msra.mxu1 %v2727_v0  ;;  %287 = vmatpush.bf16.msra.mxu0 %v2727_v0  ;;  %v2742_v3 = vld [vmem:[%s3506_s1 + $0xb0] sm:$0xff]  ;;  %v2741_v7 = vld [vmem:[%s3506_s1 + $0xa8] sm:$0xff]  ;;  %vm348_vm3 = vsmask.f32 3328 }
   0xe   : > { %753 = vmatpush.bf16.msra.mxu2 %v2743_v1  ;;  %v2755_v4 = vld [vmem:[%s3506_s1 + $0xf8] sm:$0xff]  ;;  %v2754_v5 = vld [vmem:[%s3506_s1 + $0xf0] sm:$0xff]  ;;  %v2753_v8 = vld [vmem:[%s3506_s1 + $0xe8] sm:$0xff]  ;;  %vm349_vm4 = vsmask.f32 7440 }
   0xf   : > { %907 = vmatpush.bf16.msra.mxu3 %v2755_v4  ;;  %v2724_v9 = vld [vmem:[%s3506_s1 + $0x20] sm:$0xff]  ;;  %v2723_v12 = vld [vmem:[%s3506_s1 + $0x18] sm:$0xff]  ;;  %v599_v16 = vld [vmem:[%s2971_s22 + $0x8] sm:$0xe] }
  0x10   : > { %v2740_v10 = vld [vmem:[%s3506_s1 + $0xa0] sm:$0xff]  ;;  %v2739_v13 = vld [vmem:[%s3506_s1 + $0x98] sm:$0xff]  ;;  %v600_v17 = vld [vmem:[%s2971_s22 + $0xc] sm:$0x1]  ;;  %v2240_v23 = vrot.slane %v599_v16, 9 }
  0x11   : > { %2824 = vmatpush.bf16.msra.mxu1 %v2726_v2  ;;  %288 = vmatpush.bf16.msra.mxu0 %v2726_v2  ;;  %v2752_v11 = vld [vmem:[%s3506_s1 + $0xe0] sm:$0xff]  ;;  %v2751_v18 = vld [vmem:[%s3506_s1 + $0xd8] sm:$0xff]  ;;  %v2722_v19 = vld [vmem:[%s3506_s1 + $0x10] sm:$0xff]  ;;  %v638_v24 = vrot.slane %v600_v17, 5 }
  0x12   : > { %754 = vmatpush.bf16.msra.mxu2 %v2742_v3  ;;  %v597_v14 = vld [vmem:[%s2971_s22] sm:$0xe]  ;;  %v598_v15 = vld [vmem:[%s2971_s22 + $0x4] sm:$0x1]  ;;  %v2738_v20 = vld [vmem:[%s3506_s1 + $0x90] sm:$0xff] }
  0x13   : > { %908 = vmatpush.bf16.msra.mxu3 %v2754_v5  ;;  %v2239_v21 = vrot.slane %v597_v14, 9  ;;  %v634_v22 = vrot.slane %v598_v15, 5  ;;  %vm2989_vm2 = vmor %vm629_vm0, %vm630_vm1  ;;  %v2750_v26 = vld [vmem:[%s3506_s1 + $0xd0] sm:$0xff]  ;;  %v2721_v27 = vld [vmem:[%s3506_s1 + $0x8] sm:$0xff] }
  0x14   : > { %v2737_v28 = vld [vmem:[%s3506_s1 + $0x88] sm:$0xff]  ;;  %v639_v30 = vsel %vm2989_vm2, %v2240_v23, %v638_v24  ;;  %v2720_v31 = vld [vmem:[%s3506_s1] sm:$0xff]  ;;  %v2735_v39 = vld [vmem:[%s3506_s1 + $0x78] sm:$0xff] }
  0x15   : > { %2825 = vmatpush.bf16.msra.mxu1 %v2725_v6  ;;  %289 = vmatpush.bf16.msra.mxu0 %v2725_v6  ;;  %v635_v29 = vsel %vm2989_vm2, %v2239_v21, %v634_v22  ;;  %v2153_v32 = vld [vmem:[%s2971_s22 + $0x20] sm:$0xf]  ;;  %v2749_v33 = vld [vmem:[%s3506_s1 + $0xc8] sm:$0xff]  ;;  %v690_v38 = vunpack.c.l.b16 %v639_v30  ;;  %v2763_v42 = vld [vmem:[%s3506_s1 + $0x138] sm:$0xff] }
  0x16   : > { %755 = vmatpush.bf16.msra.mxu2 %v2741_v7  ;;  %v2718_v34 = vld [vmem:[%s2971_s22 + $0x24] sm:$0xf0]  ;;  %v2145_v35 = vld [vmem:[%s2971_s22] sm:$0xf]  ;;  %v689_v37 = vunpack.c.l.b16 %v635_v29  ;;  %v2783_v43 = vld [vmem:[%s3506_s1 + $0x1b8] sm:$0xff] }
  0x17   : > { %909 = vmatpush.bf16.msra.mxu3 %v2753_v8  ;;  %v2716_v36 = vld [vmem:[%s2971_s22 + $0x4] sm:$0xf0]  ;;  %v2736_v40 = vld [vmem:[%s3506_s1 + $0x80] sm:$0xff]  ;;  %v2154_v45 = vor.u32 %v2718_v34, %v2153_v32  ;;  %v601_v48 = vld [vmem:[%s2971_s22 + $0x10] sm:$0xe] }
  0x18   : > { %v332_v41 = vld [vmem:[%s2971_s22] sm:$0xf]  ;;  %v334_v44 = vld [vmem:[%s2971_s22 + $0x8] sm:$0xf]  ;;  %v2146_v46 = vor.u32 %v2716_v36, %v2145_v35  ;;  %v602_v49 = vld [vmem:[%s2971_s22 + $0x14] sm:$0x1]  ;;  %v697_v50 = vpack.c.b16 %v690_v38, %v689_v37 }
  0x19   : > { %2826 = vmatpush.bf16.msra.mxu1 %v2724_v9  ;;  %290 = vmatpush.bf16.msra.mxu0 %v2724_v9  ;;  %v2748_v47 = vld [vmem:[%s3506_s1 + $0xc0] sm:$0xff]  ;;  %v2322_v51 = vld [vmem:[%s2971_s22 + $0x8] sm:$0xf]  ;;  %v2744_v52 = vld [vmem:[%s2971_s22 + $0xc] sm:$0xf0]  ;;  %v352_v53 = vshrl.u32 %v332_v41, 16 }
  0x1a   : > { %756 = vmatpush.bf16.msra.mxu2 %v2740_v10  ;;  %v355_v54 = vshll.u32 %v332_v41, 16  ;;  %v2734_v55 = vld [vmem:[%s3506_s1 + $0x70] sm:$0xff]  ;;  %v603_v56 = vld [vmem:[%s2971_s22 + $0x18] sm:$0xe]  ;;  %v366_v58 = vshrl.u32 %v334_v44, 16  ;;  %v369_v59 = vshll.u32 %v334_v44, 16  ;;  %v2323_v0 = vor.u32 %v2744_v52, %v2322_v51  ;;  %vm3101_vm5 = vmor %vm348_vm3, %vm349_vm4 }
  0x1b   : > { %910 = vmatpush.bf16.msra.mxu3 %v2752_v11  ;;  %v2791_v57 = vld [vmem:[%s3506_s1 + $0x1f8] sm:$0xff]  ;;  %v2762_v60 = vld [vmem:[%s3506_s1 + $0x130] sm:$0xff]  ;;  %v2733_v63 = vld [vmem:[%s3506_s1 + $0x68] sm:$0xff]  ;;  %v2241_v1 = vrot.slane %v601_v48, 9  ;;  %v642_v3 = vrot.slane %v602_v49, 5  ;;  %v2242_v4 = vrot.slane %v603_v56, 9 }
  0x1c   : > { %v604_v61 = vld [vmem:[%s2971_s22 + $0x1c] sm:$0x1]  ;;  %v2782_v62 = vld [vmem:[%s3506_s1 + $0x1b0] sm:$0xff]  ;;  %v2368_v2 = vld [vmem:[%s2971_s22 + $0x8] sm:$0xf]  ;;  %v354_v5 = vrot.slane %v352_v53, 4 }
  0x1d   : > { %2827 = vmatpush.bf16.msra.mxu1 %v2723_v12  ;;  %291 = vmatpush.bf16.msra.mxu0 %v2723_v12  ;;  %v357_v6 = vrot.slane %v355_v54, 5  ;;  %v2370_v7 = vld [vmem:[%s2971_s22 + $0x10] sm:$0xf]  ;;  %v646_v8 = vrot.slane %v604_v61, 5  ;;  %v333_v9 = vld [vmem:[%s2971_s22 + $0x4] sm:$0x1] }
  0x1e   : > { %757 = vmatpush.bf16.msra.mxu2 %v2739_v13  ;;  %v368_v10 = vrot.slane %v366_v58, 4  ;;  %v371_v11 = vrot.slane %v369_v59, 5  ;;  %v2790_v12 = vld [vmem:[%s3506_s1 + $0x1f0] sm:$0xff]  ;;  %v2761_v13 = vld [vmem:[%s3506_s1 + $0x128] sm:$0xff]  ;;  %v969_v16 = vshrl.u32 %v2368_v2, 16  ;;  %v972_v17 = vshll.u32 %v2368_v2, 16 }
  0x1f   : > { %911 = vmatpush.bf16.msra.mxu3 %v2751_v18  ;;  %v335_v14 = vld [vmem:[%s2971_s22 + $0xc] sm:$0x1]  ;;  %v983_v18 = vshrl.u32 %v2370_v7, 16  ;;  %v358_v21 = vor.u32 %v357_v6, %v354_v5  ;;  %v361_v22 = vshll.u32 %v333_v9, 16  ;;  %v2732_v23 = vld [vmem:[%s3506_s1 + $0x60] sm:$0xff]  ;;  %v647_v24 = vsel %vm2989_vm2, %v2242_v4, %v646_v8  ;;  %v2730_v56 = vld [vmem:[%s3506_s1 + $0x50] sm:$0xff] }
  0x20   : > { %v2781_v15 = vld [vmem:[%s3506_s1 + $0x1a8] sm:$0xff]  ;;  %v2157_v29 = vld [vmem:[%s2971_s22 + $0x30] sm:$0xf]  ;;  %v2719_v30 = vld [vmem:[%s2971_s22 + $0x34] sm:$0xf0]  ;;  %v971_v32 = vrot.slane %v969_v16, 4 }
  0x21   : > { %2828 = vmatpush.bf16.msra.mxu1 %v2722_v19  ;;  %292 = vmatpush.bf16.msra.mxu0 %v2722_v19  ;;  %v986_v19 = vshll.u32 %v2370_v7, 16  ;;  %v2780_v34 = vld [vmem:[%s3506_s1 + $0x1a0] sm:$0xff]  ;;  %v2369_v35 = vld [vmem:[%s2971_s22 + $0xc] sm:$0x1]  ;;  %v2371_v36 = vld [vmem:[%s2971_s22 + $0x14] sm:$0x1] }
  0x22   : > { %758 = vmatpush.bf16.msra.mxu2 %v2738_v20  ;;  %v643_v20 = vsel %vm2989_vm2, %v2241_v1, %v642_v3  ;;  %v985_v37 = vrot.slane %v983_v18, 4  ;;  %v3091_v44 = vrot.slane %v361_v22, 5  ;;  %v978_v51 = vshll.u32 %v2369_v35, 16  ;;  %v336_v53 = vld [vmem:[%s2971_s22 + $0x10] sm:$0xf] }
  0x23   : > { %912 = vmatpush.bf16.msra.mxu3 %v2750_v26  ;;  %v372_v26 = vor.u32 %v371_v11, %v368_v10  ;;  %v988_v38 = vrot.slane %v986_v19, 5  ;;  %v691_v41 = vunpack.c.l.b16 %v643_v20  ;;  %v992_v52 = vshll.u32 %v2371_v36, 16  ;;  %v338_v54 = vld [vmem:[%s2971_s22 + $0x18] sm:$0xf]  ;;  %v2745_v59 = vld [vmem:[%s2971_s22 + $0x1c] sm:$0xf0] }
  0x24   : > { %v2326_v58 = vld [vmem:[%s2971_s22 + $0x18] sm:$0xf]  ;;  %v605_v61 = vld [vmem:[%s2971_s22 + $0x20] sm:$0xe]  ;;  %v607_v1 = vld [vmem:[%s2971_s22 + $0x28] sm:$0xe] }
  0x25   : > { %2829 = vmatpush.bf16.msra.mxu1 %v2721_v27  ;;  %293 = vmatpush.bf16.msra.mxu0 %v2721_v27  ;;  %v375_v27 = vshll.u32 %v335_v14, 16  ;;  %v3105_v48 = vrot.slane %v372_v26, 4  ;;  %v608_v2 = vld [vmem:[%s2971_s22 + $0x2c] sm:$0x1]  ;;  %v380_v3 = vshrl.u32 %v336_v53, 16  ;;  %v383_v4 = vshll.u32 %v336_v53, 16 }
  0x26   : > { %759 = vmatpush.bf16.msra.mxu2 %v2737_v28  ;;  %v2789_v28 = vld [vmem:[%s3506_s1 + $0x1e8] sm:$0xff]  ;;  %v394_v5 = vshrl.u32 %v338_v54, 16  ;;  %v397_v6 = vshll.u32 %v338_v54, 16  ;;  %v2372_v7 = vld [vmem:[%s2971_s22 + $0x18] sm:$0xf]  ;;  %v2758_v8 = vld [vmem:[%s3506_s1 + $0x110] sm:$0xff] }
  0x27   : > { %913 = vmatpush.bf16.msra.mxu3 %v2749_v33  ;;  %v974_v33 = vrot.slane %v972_v17, 5  ;;  %v377_v49 = vrot.slane %v375_v27, 5  ;;  %v980_v11 = vrot.slane %v978_v51, 5  ;;  %v2779_v17 = vld [vmem:[%s3506_s1 + $0x198] sm:$0xff]  ;;  %v2374_v18 = vld [vmem:[%s2971_s22 + $0x20] sm:$0xf] }
  0x28   : > { %v2244_v19 = vrot.slane %v607_v1, 9  ;;  %v654_v20 = vrot.slane %v608_v2, 5  ;;  %v1000_v22 = vshll.u32 %v2372_v7, 16  ;;  %v2757_v26 = vld [vmem:[%s3506_s1 + $0x108] sm:$0xff]  ;;  %v382_v27 = vrot.slane %v380_v3, 4  ;;  %v2771_v53 = vld [vmem:[%s3506_s1 + $0x178] sm:$0xff] }
  0x29   : > { %2830 = vmatpush.bf16.msra.mxu1 %v2720_v31  ;;  %294 = vmatpush.bf16.msra.mxu0 %v2720_v31  ;;  %v2760_v31 = vld [vmem:[%s3506_s1 + $0x120] sm:$0xff]  ;;  %v378_v9 = vsel %vm3101_vm5, %v3105_v48, %v377_v49  ;;  %v342_v3 = vld [vmem:[%s2971_s22 + $0x28] sm:$0xf] }
  0x2a   : > { %760 = vmatpush.bf16.msra.mxu2 %v2736_v40  ;;  %v2717_v40 = vld [vmem:[%s2971_s22 + $0x14] sm:$0xf0]  ;;  %v3146_v36 = vunpack.c.l.b16 %v378_v9  ;;  %v2728_v48 = vld [vmem:[%s3506_s1 + $0x40] sm:$0xff] }
  0x2b   : > { %914 = vmatpush.bf16.msra.mxu3 %v2748_v47  ;;  %v2756_v54 = vld [vmem:[%s3506_s1 + $0x100] sm:$0xff]  ;;  %v2649_v47 = vld [vmem:[%s2971_s22 + $0x30] sm:$0xe] }
  0x2c   : > { %305 = vmatmul.bf16.vlgmr.msra.gmra.mxu1 %v2154_v45  ;;  %295 = vmatmul.bf16.vlgmr.msra.gmra.mxu0 %v2146_v46  ;;  %v2731_v45 = vld [vmem:[%s3506_s1 + $0x58] sm:$0xff] }
  0x2d   : > { %552 = vmatpush.bf16.msrb.mxu1 %v2735_v39  ;;  %1169 = vmatpush.bf16.msrb.mxu0 %v2763_v42  ;;  %v2149_v39 = vld [vmem:[%s2971_s22 + $0x10] sm:$0xf]  ;;  %v692_v42 = vunpack.c.l.b16 %v647_v24  ;;  %v2759_v46 = vld [vmem:[%s3506_s1 + $0x118] sm:$0xff]  ;;  %v2729_v24 = vld [vmem:[%s3506_s1 + $0x48] sm:$0xff] }
  0x2e   : > { %1521 = vmatpush.bf16.msrb.mxu2 %v2783_v43  ;;  %915 = vmatmul.bf16.vlgmr.msra.gmra.mxu3 %v2323_v0  ;;  %v3089_v43 = vrot.slane %v358_v21, 4  ;;  %v606_v0 = vld [vmem:[%s2971_s22 + $0x24] sm:$0x1]  ;;  %v997_v21 = vshrl.u32 %v2372_v7, 16 }
  0x2f   : > { %761 = vmatmul.bf16.vlgmr.msra.gmra.mxu2 %v697_v50  ;;  %1783 = vmatpush.bf16.msrb.mxu3 %v2791_v57  ;;  %v975_v50 = vor.u32 %v974_v33, %v971_v32  ;;  %v2150_v57 = vor.u32 %v2717_v40, %v2149_v39  ;;  %v650_v16 = vrot.slane %v606_v0, 5  ;;  %v339_v32 = vld [vmem:[%s2971_s22 + $0x1c] sm:$0x1]  ;;  %v1011_v33 = vshrl.u32 %v2374_v18, 16  ;;  %v2778_v39 = vld [vmem:[%s3506_s1 + $0x190] sm:$0xff] }
  0x30   : > { %v2787_v40 = vld [vmem:[%s3506_s1 + $0x1d8] sm:$0xff] }
  0x31   : > { %553 = vmatpush.bf16.msrb.mxu1 %v2734_v55  ;;  %1170 = vmatpush.bf16.msrb.mxu0 %v2762_v60  ;;  %v2158_v55 = vor.u32 %v2719_v30, %v2157_v29  ;;  %v989_v60 = vor.u32 %v988_v38, %v985_v37  ;;  %v976_v10 = vrot.slane %v975_v50, 4  ;;  %v396_v29 = vrot.slane %v394_v5, 4 }
  0x32   : > { %1522 = vmatpush.bf16.msrb.mxu2 %v2782_v62  ;;  %v698_v62 = vpack.c.b16 %v692_v42, %v691_v41  ;;  %v399_v30 = vrot.slane %v397_v6, 5  ;;  %v655_v42 = vsel %vm2989_vm2, %v2244_v19, %v654_v20  ;;  %v425_v19 = vshll.u32 %v342_v3, 16 }
  0x33   : > { %1784 = vmatpush.bf16.msrb.mxu3 %v2790_v12  ;;  %v994_v12 = vrot.slane %v992_v52, 5  ;;  %v990_v14 = vrot.slane %v989_v60, 4  ;;  %v981_v37 = vsel %vm3101_vm5, %v976_v10, %v980_v11  ;;  %v403_v52 = vshll.u32 %v339_v32, 16  ;;  %v2330_v10 = vld [vmem:[%s2971_s22 + $0x28] sm:$0xf] }
  0x34   : > { %v400_v51 = vor.u32 %v399_v30, %v396_v29  ;;  %v694_v1 = vunpack.c.l.b16 %v655_v42 }
  0x35   : > { %554 = vmatpush.bf16.msrb.mxu1 %v2733_v63  ;;  %1171 = vmatpush.bf16.msrb.mxu0 %v2761_v13  ;;  %v364_v63 = vsel %vm3101_vm5, %v3089_v43, %v3091_v44  ;;  %v2327_v13 = vor.u32 %v2745_v59, %v2326_v58  ;;  %v995_v38 = vsel %vm3101_vm5, %v990_v14, %v994_v12  ;;  %v2373_v43 = vld [vmem:[%s2971_s22 + $0x1c] sm:$0x1]  ;;  %v2375_v44 = vld [vmem:[%s2971_s22 + $0x24] sm:$0x1]  ;;  %v2376_v14 = vld [vmem:[%s2971_s22 + $0x28] sm:$0xf] }
  0x36   : > { %1523 = vmatpush.bf16.msrb.mxu2 %v2781_v15  ;;  %v2243_v15 = vrot.slane %v605_v61, 9  ;;  %v3144_v35 = vunpack.c.l.b16 %v364_v63  ;;  %v1006_v59 = vshll.u32 %v2373_v43, 16  ;;  %v1020_v60 = vshll.u32 %v2375_v44, 16  ;;  %v3176_v61 = vld [vmem:[%s3506_s1 + $0x238] sm:$0xff] }
  0x37   : > { %1785 = vmatpush.bf16.msrb.mxu3 %v2789_v28  ;;  %v385_v28 = vrot.slane %v383_v4, 5  ;;  %v2770_v4 = vld [vmem:[%s3506_s1 + $0x170] sm:$0xff]  ;;  %v3189_v7 = vrot.slane %v400_v51, 4  ;;  %v1025_v29 = vshrl.u32 %v2376_v14, 16  ;;  %v1028_v30 = vshll.u32 %v2376_v14, 16 }
  0x38   : > { %v651_v41 = vsel %vm2989_vm2, %v2243_v15, %v650_v16  ;;  %v496_v63 = vpack.c.b16 %v3146_v36, %v3144_v35  ;;  %v2746_v15 = vld [vmem:[%s2971_s22 + $0x2c] sm:$0xf0]  ;;  %v3196_v16 = vrot.slane %v1006_v59, 5  ;;  %v2777_v36 = vld [vmem:[%s3506_s1 + $0x188] sm:$0xff] }
  0x39   : > { %555 = vmatpush.bf16.msrb.mxu1 %v2732_v23  ;;  %1172 = vmatpush.bf16.msrb.mxu0 %v2760_v31  ;;  %v2788_v23 = vld [vmem:[%s3506_s1 + $0x1e0] sm:$0xff]  ;;  %v337_v31 = vld [vmem:[%s2971_s22 + $0x14] sm:$0x1]  ;;  %v386_v49 = vor.u32 %v385_v28, %v382_v27  ;;  %v693_v0 = vunpack.c.l.b16 %v651_v41  ;;  %v611_v28 = vld [vmem:[%s2971_s22 + $0x38] sm:$0xe] }
  0x3a   : > { %1524 = vmatpush.bf16.msrb.mxu2 %v2780_v34  ;;  %v1014_v34 = vshll.u32 %v2374_v18, 16  ;;  %v389_v50 = vshll.u32 %v337_v31, 16  ;;  %v422_v18 = vshrl.u32 %v342_v3, 16  ;;  %v610_v27 = vld [vmem:[%s2971_s22 + $0x34] sm:$0x1]  ;;  %v2331_v31 = vor.u32 %v2746_v15, %v2330_v10  ;;  %v2767_v15 = vld [vmem:[%s3506_s1 + $0x158] sm:$0xff] }
  0x3b   : > { %1786 = vmatpush.bf16.msrb.mxu3 %v2788_v23  ;;  %v3185_v5 = vrot.slane %v386_v49, 4  ;;  %v699_v20 = vpack.c.b16 %v694_v1, %v693_v0  ;;  %v609_v23 = vld [vmem:[%s2971_s22 + $0x30] sm:$0xe]  ;;  %v3234_v49 = vld [vmem:[%s3506_s1 + $0x228] sm:$0xff] }
  0x3c   : > { %310 = vmatmul.bf16.gmra.mxu1 %v2158_v55  ;;  %300 = vmatmul.bf16.gmra.mxu0 %v2150_v57  ;;  %v1105_v55 = vunpack.c.l.b16 %v981_v37  ;;  %v1013_v57 = vrot.slane %v1011_v33, 4  ;;  %v1016_v58 = vrot.slane %v1014_v34, 5  ;;  %v3187_v6 = vrot.slane %v389_v50, 5  ;;  %v612_v33 = vld [vmem:[%s2971_s22 + $0x3c] sm:$0x1] }
  0x3d   : > { %556 = vmatpush.bf16.msrb.mxu1 %v2731_v45  ;;  %1173 = vmatpush.bf16.msrb.mxu0 %v2759_v46  ;;  %v999_v45 = vrot.slane %v997_v21, 4  ;;  %v1002_v46 = vrot.slane %v1000_v22, 5  ;;  %v2769_v21 = vld [vmem:[%s3506_s1 + $0x168] sm:$0xff]  ;;  %v341_v37 = vld [vmem:[%s2971_s22 + $0x24] sm:$0x1]  ;;  %v2245_v44 = vrot.slane %v609_v23, 9 }
  0x3e   : > { %1525 = vmatpush.bf16.msrb.mxu2 %v2779_v17  ;;  %920 = vmatmul.bf16.gmra.mxu3 %v2327_v13  ;;  %v1017_v11 = vor.u32 %v1016_v58, %v1013_v57  ;;  %v3198_v17 = vrot.slane %v1020_v60, 5  ;;  %v392_v42 = vsel %vm3101_vm5, %v3185_v5, %v3187_v6  ;;  %v2246_v50 = vrot.slane %v611_v28, 9  ;;  %v2768_v57 = vld [vmem:[%s3506_s1 + $0x160] sm:$0xff]  ;;  %v2377_v60 = vld [vmem:[%s2971_s22 + $0x2c] sm:$0x1] }
  0x3f   : > { %766 = vmatmul.bf16.gmra.mxu2 %v698_v62  ;;  %1787 = vmatpush.bf16.msrb.mxu3 %v2787_v40  ;;  %v340_v62 = vld [vmem:[%s2971_s22 + $0x20] sm:$0xf]  ;;  %v1003_v2 = vor.u32 %v1002_v46, %v999_v45  ;;  %v658_v45 = vrot.slane %v610_v27, 5  ;;  %v343_v46 = vld [vmem:[%s2971_s22 + $0x2c] sm:$0x1]  ;;  %v662_v51 = vrot.slane %v612_v33, 5  ;;  %v490_v3 = vunpack.c.l.b16 %v392_v42 }
  0x40   : > { %v408_v12 = vshrl.u32 %v340_v62, 16  ;;  %v411_v13 = vshll.u32 %v340_v62, 16  ;;  %v1018_v32 = vrot.slane %v1017_v11, 4  ;;  %v417_v59 = vshll.u32 %v341_v37, 16  ;;  %v2785_v62 = vld [vmem:[%s3506_s1 + $0x1c8] sm:$0xff]  ;;  %v3257_v6 = vld [vmem:[%s3506_s1 + $0x220] sm:$0xff] }
  0x41   : > { %557 = vmatpush.bf16.msrb.mxu1 %v2730_v56  ;;  %1174 = vmatpush.bf16.msrb.mxu0 %v2758_v8  ;;  %v1106_v56 = vunpack.c.l.b16 %v995_v38  ;;  %v3191_v8 = vrot.slane %v403_v52, 5  ;;  %v1004_v22 = vrot.slane %v1003_v2, 4  ;;  %v424_v38 = vrot.slane %v422_v18, 4  ;;  %v2776_v52 = vld [vmem:[%s3506_s1 + $0x180] sm:$0xff]  ;;  %v2379_v5 = vld [vmem:[%s2971_s22 + $0x34] sm:$0x1] }
  0x42   : > { %1526 = vmatpush.bf16.msrb.mxu2 %v2778_v39  ;;  %v410_v34 = vrot.slane %v408_v12, 4  ;;  %v413_v35 = vrot.slane %v411_v13, 5  ;;  %v427_v39 = vrot.slane %v425_v19, 5  ;;  %v431_v0 = vshll.u32 %v343_v46, 16  ;;  %v2334_v37 = vld [vmem:[%s2971_s22 + $0x38] sm:$0xf] }
  0x43   : > { %v1113_v9 = vpack.c.b16 %v1106_v56, %v1105_v55  ;;  %v406_v43 = vsel %vm3101_vm5, %v3189_v7, %v3191_v8  ;;  %v1009_v55 = vsel %vm3101_vm5, %v1004_v22, %v3196_v16  ;;  %v1023_v56 = vsel %vm3101_vm5, %v1018_v32, %v3198_v17  ;;  %v2577_v22 = vld [vmem:[%s2971_s22 + $0x10] sm:$0xf]  ;;  %v2580_v42 = vld [vmem:[%s2971_s22 + $0x1c] sm:$0x1]  ;;  %v3290_v46 = vld [vmem:[%s2971_s22 + $0x34] sm:$0x1] }
  0x44   : > { %v414_v58 = vor.u32 %v413_v35, %v410_v34  ;;  %v659_v7 = vsel %vm2989_vm2, %v2245_v44, %v658_v45  ;;  %v663_v8 = vsel %vm2989_vm2, %v2246_v50, %v662_v51  ;;  %v1034_v10 = vshll.u32 %v2377_v60, 16  ;;  %v344_v34 = vld [vmem:[%s2971_s22 + $0x30] sm:$0xf] }
  0x45   : > { %558 = vmatpush.bf16.msrb.mxu1 %v2729_v24  ;;  %1175 = vmatpush.bf16.msrb.mxu0 %v2757_v26  ;;  %v3208_v24 = vld [vmem:[%s3506_s1 + $0x230] sm:$0xff]  ;;  %v1107_v11 = vunpack.c.l.b16 %v1009_v55  ;;  %v1108_v12 = vunpack.c.l.b16 %v1023_v56  ;;  %v419_v14 = vrot.slane %v417_v59, 5  ;;  %v433_v17 = vrot.slane %v431_v0, 5 }
  0x46   : > { %v2378_v26 = vld [vmem:[%s2971_s22 + $0x30] sm:$0xf]  ;;  %1527 = vmatpush.bf16.msrb.mxu2 %v2777_v36  ;;  %v415_v13 = vrot.slane %v414_v58, 4  ;;  %v1048_v19 = vshll.u32 %v2379_v5, 16  ;;  %v1583_v27 = vshrl.u32 %v2577_v22, 16  ;;  %v1586_v35 = vshll.u32 %v2577_v22, 16 }
  0x47   : > { %v1039_v40 = vshrl.u32 %v2378_v26, 16  ;;  %v1042_v41 = vshll.u32 %v2378_v26, 16  ;;  %v1036_v26 = vrot.slane %v1034_v10, 5  ;;  %v2382_v58 = vld [vmem:[%s2971_s22 + $0x40] sm:$0xf]  ;;  %v439_v0 = vshll.u32 %v344_v34, 16 }
  0x48   : > { %v1050_v33 = vrot.slane %v1048_v19, 5  ;;  %v1588_v55 = vrot.slane %v1586_v35, 5  ;;  %v2794_v10 = vld [vmem:[%s3506_s1 + $0x210] sm:$0xff]  ;;  %v2581_v35 = vld [vmem:[%s2971_s22 + $0x20] sm:$0xf] }
  0x49   : > { %559 = vmatpush.bf16.msrb.mxu1 %v2728_v48  ;;  %1176 = vmatpush.bf16.msrb.mxu0 %v2756_v54  ;;  %v2786_v48 = vld [vmem:[%s3506_s1 + $0x1d0] sm:$0xff]  ;;  %v1030_v54 = vrot.slane %v1028_v30, 5  ;;  %v1041_v1 = vrot.slane %v1039_v40, 4  ;;  %v1044_v2 = vrot.slane %v1042_v41, 5  ;;  %v420_v30 = vsel %vm3101_vm5, %v415_v13, %v419_v14 }
  0x4a   : > { %1788 = vmatpush.bf16.msrb.mxu3 %v2786_v48  ;;  %1528 = vmatpush.bf16.msrb.mxu2 %v2776_v52  ;;  %v2578_v41 = vld [vmem:[%s2971_s22 + $0x14] sm:$0x1]  ;;  %v3285_v44 = vunpack.c.l.b16 %v420_v30  ;;  %v436_v48 = vshrl.u32 %v344_v34, 16  ;;  %v2765_v52 = vld [vmem:[%s3506_s1 + $0x148] sm:$0xff]  ;;  %v1067_v13 = vshrl.u32 %v2382_v58, 16  ;;  %v1070_v14 = vshll.u32 %v2382_v58, 16 }
  0x4b   : > { %v1045_v18 = vor.u32 %v1044_v2, %v1041_v1  ;;  %v1592_v59 = vshll.u32 %v2578_v41, 16  ;;  %v441_v22 = vrot.slane %v439_v0, 5 }
  0x4c   : > { %560 = vmatmul.bf16.vlgmr.msrb.gmra.mxu1 %v496_v63  ;;  %1177 = vmatmul.bf16.vlgmr.msrb.gmra.mxu0 %v1113_v9  ;;  %v428_v63 = vor.u32 %v427_v39, %v424_v38  ;;  %v2747_v38 = vld [vmem:[%s2971_s22 + $0x3c] sm:$0xf0]  ;;  %v2579_v39 = vld [vmem:[%s2971_s22 + $0x18] sm:$0xf]  ;;  %v1072_v34 = vrot.slane %v1070_v14, 5 }
  0x4d   : > { %1367 = vmatpush.bf16.msra.mxu1 %v2771_v53  ;;  %1981 = vmatpush.bf16.msra.mxu0 %v3176_v61  ;;  %v1027_v53 = vrot.slane %v1025_v29, 4  ;;  %v1114_v29 = vpack.c.b16 %v1108_v12, %v1107_v11  ;;  %v1046_v32 = vrot.slane %v1045_v18, 4  ;;  %v2335_v50 = vor.u32 %v2747_v38, %v2334_v37  ;;  %v3316_v12 = vld [vmem:[%s2971_s22 + $0x10] sm:$0xf] }
  0x4e   : > { %925 = vmatmul.bf16.gmra.mxu3 %v2331_v31  ;;  %v429_v16 = vrot.slane %v428_v63, 4  ;;  %2831 = vmatpush.bf16.msra.mxu2 %v3176_v61  ;;  %v2766_v61 = vld [vmem:[%s3506_s1 + $0x150] sm:$0xff]  ;;  %v1597_v56 = vshrl.u32 %v2579_v39, 16  ;;  %v1600_v60 = vshll.u32 %v2579_v39, 16  ;;  %v2795_v63 = vld [vmem:[%s3506_s1 + $0x218] sm:$0xff]  ;;  %v1611_v38 = vshrl.u32 %v2581_v35, 16 }
  0x4f   : > { %771 = vmatmul.bf16.gmra.mxu2 %v699_v20  ;;  %v1031_v9 = vor.u32 %v1030_v54, %v1027_v53  ;;  %1789 = vmatpush.bf16.msrb.mxu3 %v2785_v62  ;;  %v695_v20 = vunpack.c.l.b16 %v659_v7  ;;  %v1051_v51 = vsel %vm3101_vm5, %v1046_v32, %v1050_v33  ;;  %v2784_v53 = vld [vmem:[%s3506_s1 + $0x1c0] sm:$0xff]  ;;  %v2380_v54 = vld [vmem:[%s2971_s22 + $0x38] sm:$0xf]  ;;  %v1606_v62 = vshll.u32 %v2580_v42, 16 }
  0x50   : > { %v434_v31 = vsel %vm3101_vm5, %v429_v16, %v433_v17  ;;  %v1056_v5 = vshll.u32 %v2380_v54, 16  ;;  %v1599_v7 = vrot.slane %v1597_v56, 4  ;;  %v1110_v11 = vunpack.c.l.b16 %v1051_v51  ;;  %v2383_v42 = vld [vmem:[%s2971_s22 + $0x44] sm:$0x1] }
  0x51   : > { %1368 = vmatpush.bf16.msra.mxu1 %v2770_v4  ;;  %1982 = vmatpush.bf16.msra.mxu0 %v3208_v24  ;;  %v491_v4 = vunpack.c.l.b16 %v406_v43  ;;  %v1032_v23 = vrot.slane %v1031_v9, 4  ;;  %v1585_v43 = vrot.slane %v1583_v27, 4  ;;  %v3287_v45 = vunpack.c.l.b16 %v434_v31  ;;  %v2764_v9 = vld [vmem:[%s3506_s1 + $0x140] sm:$0xff]  ;;  %v2381_v27 = vld [vmem:[%s2971_s22 + $0x3c] sm:$0x1] }
  0x52   : > { %2832 = vmatpush.bf16.msra.mxu2 %v3208_v24  ;;  %v346_v24 = vld [vmem:[%s2971_s22 + $0x38] sm:$0xf]  ;;  %v1594_v17 = vrot.slane %v1592_v59, 5  ;;  %v1608_v19 = vrot.slane %v1606_v62, 5  ;;  %v1069_v33 = vrot.slane %v1067_v13, 4  ;;  %v1614_v39 = vshll.u32 %v2581_v35, 16 }
  0x53   : > { %v497_v28 = vpack.c.b16 %v491_v4, %v490_v3  ;;  %v1037_v40 = vsel %vm3101_vm5, %v1032_v23, %v1036_v26  ;;  %v450_v1 = vshrl.u32 %v346_v24, 16  ;;  %v453_v2 = vshll.u32 %v346_v24, 16  ;;  %1790 = vmatpush.bf16.msrb.mxu3 %v2784_v53  ;;  %v2582_v56 = vld [vmem:[%s2971_s22 + $0x24] sm:$0x1] }
  0x54   : > { %v1589_v3 = vor.u32 %v1588_v55, %v1585_v43  ;;  %v1053_v4 = vshrl.u32 %v2380_v54, 16  ;;  %v498_v31 = vpack.c.b16 %v3287_v45, %v3285_v44  ;;  %v1616_v53 = vrot.slane %v1614_v39, 5 }
  0x55   : > { %1369 = vmatpush.bf16.msra.mxu1 %v2769_v21  ;;  %1983 = vmatpush.bf16.msra.mxu0 %v3234_v49  ;;  %v696_v21 = vunpack.c.l.b16 %v663_v8  ;;  %v1602_v8 = vrot.slane %v1600_v60, 5  ;;  %v452_v23 = vrot.slane %v450_v1, 4  ;;  %v455_v26 = vrot.slane %v453_v2, 5  ;;  %v2584_v60 = vld [vmem:[%s2971_s22 + $0x2c] sm:$0x1] }
  0x56   : > { %2833 = vmatpush.bf16.msra.mxu2 %v3234_v49  ;;  %v445_v49 = vshll.u32 %v3290_v46, 16  ;;  %v1590_v16 = vrot.slane %v1589_v3, 4  ;;  %v1073_v54 = vor.u32 %v1072_v34, %v1069_v33  ;;  %v1076_v55 = vshll.u32 %v2383_v42, 16  ;;  %v2432_v33 = vld [vmem:[%s2971_s22 + $0x8] sm:$0xe] }
  0x57   : > { %v700_v36 = vpack.c.b16 %v696_v21, %v695_v20  ;;  %v1603_v18 = vor.u32 %v1602_v8, %v1599_v7  ;;  %v347_v20 = vld [vmem:[%s2971_s22 + $0x3c] sm:$0x1]  ;;  %v438_v21 = vrot.slane %v436_v48, 4  ;;  %v456_v46 = vor.u32 %v455_v26, %v452_v23  ;;  %v2535_v23 = vld [vmem:[%s2971_s22 + $0x20] sm:$0xf] }
  0x58   : > { %v459_v41 = vshll.u32 %v347_v20, 16  ;;  %v1062_v48 = vshll.u32 %v2381_v27, 16  ;;  %v447_v59 = vrot.slane %v445_v49, 5  ;;  %v1620_v7 = vshll.u32 %v2582_v56, 16  ;;  %v2585_v27 = vld [vmem:[%s2971_s22 + $0x30] sm:$0xf] }
  0x59   : > { %1370 = vmatpush.bf16.msra.mxu1 %v2768_v57  ;;  %1984 = vmatpush.bf16.msra.mxu0 %v3257_v6  ;;  %v3302_v57 = vunpack.c.l.b16 %v1037_v40  ;;  %v1604_v30 = vrot.slane %v1603_v18, 4  ;;  %v442_v45 = vor.u32 %v441_v22, %v438_v21  ;;  %v1074_v8 = vrot.slane %v1073_v54, 4  ;;  %v2641_v42 = vld [vmem:[%s2971_s22 + $0x10] sm:$0xe] }
  0x5a   : > { %2834 = vmatpush.bf16.msra.mxu2 %v3257_v6  ;;  %v2583_v6 = vld [vmem:[%s2971_s22 + $0x28] sm:$0xf]  ;;  %v461_v0 = vrot.slane %v459_v41, 5  ;;  %v1064_v2 = vrot.slane %v1062_v48, 5  ;;  %v1622_v14 = vrot.slane %v1620_v7, 5 }
  0x5b   : > { %v1609_v37 = vsel %vm3101_vm5, %v1604_v30, %v1608_v19  ;;  %v1115_v40 = vpack.c.b16 %v1110_v11, %v3302_v57  ;;  %v1625_v43 = vshrl.u32 %v2583_v6, 16  ;;  %v1628_v44 = vshll.u32 %v2583_v6, 16  ;;  %v2433_v6 = vld [vmem:[%s2971_s22 + $0xc] sm:$0x1] }
  0x5c   : > { %565 = vmatmul.bf16.gmra.mxu1 %v497_v28  ;;  %1182 = vmatmul.bf16.gmra.mxu0 %v1114_v29  ;;  %v1055_v28 = vrot.slane %v1053_v4, 4  ;;  %v1058_v29 = vrot.slane %v1056_v5, 5  ;;  %v1720_v51 = vunpack.c.l.b16 %v1609_v37  ;;  %v443_v62 = vrot.slane %v442_v45, 4  ;;  %v2792_v4 = vld [vmem:[%s3506_s1 + $0x200] sm:$0xff]  ;;  %v2435_v37 = vld [vmem:[%s2971_s22 + $0x14] sm:$0x1] }
  0x5d   : > { %1371 = vmatpush.bf16.msra.mxu1 %v2767_v15  ;;  %1985 = vmatpush.bf16.msra.mxu0 %v2795_v63  ;;  %v2772_v15 = vld [vmem:[%s2971_s22 + $0x14] sm:$0xf0]  ;;  %v1627_v57 = vrot.slane %v1625_v43, 4  ;;  %v1630_v58 = vrot.slane %v1628_v44, 5  ;;  %v2642_v43 = vld [vmem:[%s2971_s22 + $0x14] sm:$0x1] }
  0x5e   : > { %930 = vmatmul.bf16.gmra.mxu3 %v2335_v50  ;;  %v2532_v32 = vor.u32 %v2772_v15, %v3316_v12  ;;  %2835 = vmatpush.bf16.msra.mxu2 %v2795_v63  ;;  %v1059_v24 = vor.u32 %v1058_v29, %v1055_v28  ;;  %v457_v63 = vrot.slane %v456_v46, 4  ;;  %v1634_v12 = vshll.u32 %v2584_v60, 16  ;;  %v2587_v28 = vld [vmem:[%s2971_s22 + $0x38] sm:$0xf]  ;;  %v2773_v29 = vld [vmem:[%s2971_s22 + $0x24] sm:$0xf0] }
  0x5f   : > { %776 = vmatmul.bf16.gmra.mxu2 %v700_v36  ;;  %v1595_v36 = vsel %vm3101_vm5, %v1590_v16, %v1594_v17  ;;  %v1631_v11 = vor.u32 %v1630_v58, %v1627_v57  ;;  %v1656_v34 = vshll.u32 %v2587_v28, 16  ;;  %v2536_v39 = vor.u32 %v2773_v29, %v2535_v23  ;;  %v2643_v44 = vld [vmem:[%s2971_s22 + $0x18] sm:$0xe]  ;;  %v2644_v45 = vld [vmem:[%s2971_s22 + $0x1c] sm:$0x1] }
  0x60   : > { %v1719_v50 = vunpack.c.l.b16 %v1595_v36  ;;  %v1060_v1 = vrot.slane %v1059_v24, 4  ;;  %v462_v49 = vsel %vm3101_vm5, %v457_v63, %v461_v0  ;;  %v1636_v18 = vrot.slane %v1634_v12, 5  ;;  %v2434_v36 = vld [vmem:[%s2971_s22 + $0x10] sm:$0xe]  ;;  %v2589_v23 = vld [vmem:[%s2971_s22 + $0x40] sm:$0xf] }
  0x61   : > { %1372 = vmatpush.bf16.msra.mxu1 %v2766_v61  ;;  %1986 = vmatpush.bf16.msra.mxu0 %v2794_v10  ;;  %v2793_v61 = vld [vmem:[%s3506_s1 + $0x208] sm:$0xff]  ;;  %v1632_v17 = vrot.slane %v1631_v11, 4  ;;  %v495_v20 = vunpack.c.l.b16 %v462_v49  ;;  %v1248_v54 = vrot.slane %v2433_v6, 5  ;;  %v1252_v56 = vrot.slane %v2435_v37, 5 }
  0x62   : > { %2836 = vmatpush.bf16.msra.mxu2 %v2794_v10  ;;  %v1727_v3 = vpack.c.b16 %v1720_v51, %v1719_v50  ;;  %v448_v10 = vsel %vm3101_vm5, %v443_v62, %v447_v59  ;;  %v1065_v15 = vsel %vm3101_vm5, %v1060_v1, %v1064_v2  ;;  %v1658_v50 = vrot.slane %v1656_v34, 5  ;;  %v2645_v34 = vld [vmem:[%s2971_s22 + $0x20] sm:$0xe]  ;;  %v2647_v37 = vld [vmem:[%s2971_s22 + $0x28] sm:$0xe] }
  0x63   : > { %v494_v19 = vunpack.c.l.b16 %v448_v10  ;;  %v1111_v21 = vunpack.c.l.b16 %v1065_v15  ;;  %v1637_v30 = vsel %vm3101_vm5, %v1632_v17, %v1636_v18  ;;  %v2448_v51 = vrot.slane %v2432_v33, 9  ;;  %v2436_v15 = vld [vmem:[%s2971_s22 + $0x18] sm:$0xe] }
  0x64   : > { %v1722_v41 = vunpack.c.l.b16 %v1637_v30  ;;  %v2657_v57 = vrot.slane %v2641_v42, 9  ;;  %v1862_v59 = vrot.slane %v2642_v43, 5  ;;  %v2658_v60 = vrot.slane %v2643_v44, 9  ;;  %v2774_v17 = vld [vmem:[%s2971_s22 + $0x34] sm:$0xf0] }
  0x65   : > { %1373 = vmatpush.bf16.msra.mxu1 %v2765_v52  ;;  %1987 = vmatpush.bf16.msra.mxu0 %v2793_v61  ;;  %v1613_v52 = vrot.slane %v1611_v38, 4  ;;  %v499_v35 = vpack.c.b16 %v495_v20, %v494_v19  ;;  %v1866_v62 = vrot.slane %v2644_v45, 5  ;;  %v1667_v29 = vshrl.u32 %v2589_v23, 16  ;;  %v2592_v42 = vld [vmem:[%s2971_s22 + $0x4c] sm:$0x1] }
  0x66   : > { %2837 = vmatpush.bf16.msra.mxu2 %v2793_v61  ;;  %v1639_v61 = vshrl.u32 %v2585_v27, 16  ;;  %v1670_v30 = vshll.u32 %v2589_v23, 16  ;;  %v2652_v23 = vld [vmem:[%s2971_s22 + $0x3c] sm:$0x1] }
  0x67   : > { %v1617_v5 = vor.u32 %v1616_v53, %v1613_v52  ;;  %v2586_v52 = vld [vmem:[%s2971_s22 + $0x34] sm:$0x1]  ;;  %v2588_v53 = vld [vmem:[%s2971_s22 + $0x3c] sm:$0x1]  ;;  %v1867_v7 = vsel %vm2989_vm2, %v2658_v60, %v1866_v62 }
  0x68   : > { %v1641_v46 = vrot.slane %v1639_v61, 4  ;;  %v1648_v0 = vshll.u32 %v2586_v52, 16  ;;  %v1662_v2 = vshll.u32 %v2588_v53, 16  ;;  %v2660_v52 = vrot.slane %v2647_v37, 9 }
  0x69   : > { %1374 = vmatpush.bf16.msra.mxu1 %v2764_v9  ;;  %v1078_v9 = vrot.slane %v1076_v55, 5  ;;  %1988 = vmatpush.bf16.msra.mxu0 %v2792_v4  ;;  %v1618_v13 = vrot.slane %v1617_v5, 4  ;;  %v2449_v55 = vrot.slane %v2434_v36, 9  ;;  %v1863_v5 = vsel %vm2989_vm2, %v2657_v57, %v1862_v59 }
  0x6a   : > { %2838 = vmatpush.bf16.msra.mxu2 %v2792_v4  ;;  %v1664_v12 = vrot.slane %v1662_v2, 5  ;;  %v1690_v57 = vshll.u32 %v2592_v42, 16 }
  0x6b   : > { %v1079_v16 = vsel %vm3101_vm5, %v1074_v8, %v1078_v9  ;;  %v1623_v26 = vsel %vm3101_vm5, %v1618_v13, %v1622_v14  ;;  %v1253_v4 = vsel %vm2989_vm2, %v2449_v55, %v1252_v56  ;;  %v1650_v9 = vrot.slane %v1648_v0, 5 }
  0x6c   : > { %570 = vmatmul.bf16.gmra.mxu1 %v498_v31  ;;  %1187 = vmatmul.bf16.gmra.mxu0 %v1115_v40  ;;  %v1112_v22 = vunpack.c.l.b16 %v1079_v16  ;;  %v1642_v31 = vshll.u32 %v2585_v27, 16  ;;  %v1721_v40 = vunpack.c.l.b16 %v1623_v26  ;;  %v1304_v49 = vunpack.c.l.b16 %v1253_v4  ;;  %v2539_v16 = vld [vmem:[%s2971_s22 + $0x30] sm:$0xf]  ;;  %v2591_v26 = vld [vmem:[%s2971_s22 + $0x48] sm:$0xf] }
  0x6d   : > { %v1917_v13 = vunpack.c.l.b16 %v1863_v5  ;;  %v1918_v14 = vunpack.c.l.b16 %v1867_v7  ;;  %v2439_v27 = vld [vmem:[%s2971_s22 + $0x24] sm:$0x1]  ;;  %v1681_v61 = vshrl.u32 %v2591_v26, 16  ;;  %v1684_v6 = vshll.u32 %v2591_v26, 16  ;;  %v2653_v26 = vld [vmem:[%s2971_s22 + $0x40] sm:$0xe] }
  0x6e   : > { %1791 = vmatmul.bf16.vlgmr.msrb.gmra.mxu3 %v1727_v3  ;;  %v1116_v38 = vpack.c.b16 %v1112_v22, %v1111_v21  ;;  %v1644_v24 = vrot.slane %v1642_v31, 5  ;;  %v1728_v58 = vpack.c.b16 %v1722_v41, %v1721_v40  ;;  %v1249_v3 = vsel %vm2989_vm2, %v2448_v51, %v1248_v54  ;;  %v2437_v21 = vld [vmem:[%s2971_s22 + $0x1c] sm:$0x1]  ;;  %v2438_v22 = vld [vmem:[%s2971_s22 + $0x20] sm:$0xe] }
  0x6f   : > { %1529 = vmatmul.bf16.vlgmr.msrb.gmra.mxu2 %v2532_v32  ;;  %v1653_v32 = vshrl.u32 %v2587_v28, 16  ;;  %v1303_v10 = vunpack.c.l.b16 %v1249_v3  ;;  %v2450_v28 = vrot.slane %v2436_v15, 9  ;;  %v1925_v31 = vpack.c.b16 %v1918_v14, %v1917_v13  ;;  %v2590_v41 = vld [vmem:[%s2971_s22 + $0x44] sm:$0x1]  ;;  %v2441_v14 = vld [vmem:[%s2971_s22 + $0x2c] sm:$0x1] }
  0x70   : > { %v1645_v63 = vor.u32 %v1644_v24, %v1641_v46  ;;  %v2540_v36 = vor.u32 %v2774_v17, %v2539_v16  ;;  %v1672_v40 = vrot.slane %v1670_v30, 5  ;;  %v1683_v43 = vrot.slane %v1681_v61, 4  ;;  %v2442_v15 = vld [vmem:[%s2971_s22 + $0x30] sm:$0xe]  ;;  %v2443_v16 = vld [vmem:[%s2971_s22 + $0x34] sm:$0x1] }
  0x71   : > { %v1655_v48 = vrot.slane %v1653_v32, 4  ;;  %v1311_v20 = vpack.c.b16 %v1304_v49, %v1303_v10  ;;  %v1686_v44 = vrot.slane %v1684_v6, 5  ;;  %v1256_v45 = vrot.slane %v2437_v21, 5  ;;  %v2440_v10 = vld [vmem:[%s2971_s22 + $0x28] sm:$0xe] }
  0x72   : > { %v1646_v8 = vrot.slane %v1645_v63, 4  ;;  %v2451_v46 = vrot.slane %v2438_v22, 9  ;;  %v1260_v24 = vrot.slane %v2439_v27, 5  ;;  %v1676_v55 = vshll.u32 %v2590_v41, 16  ;;  %v2650_v21 = vld [vmem:[%s2971_s22 + $0x34] sm:$0x1] }
  0x73   : > { %v1659_v1 = vor.u32 %v1658_v50, %v1655_v48  ;;  %v2659_v48 = vrot.slane %v2645_v34, 9  ;;  %v1687_v56 = vor.u32 %v1686_v44, %v1683_v43  ;;  %v1692_v2 = vrot.slane %v1690_v57, 5  ;;  %v2651_v22 = vld [vmem:[%s2971_s22 + $0x38] sm:$0xe]  ;;  %v2654_v27 = vld [vmem:[%s2971_s22 + $0x44] sm:$0x1] }
  0x74   : > { %v1651_v18 = vsel %vm3101_vm5, %v1646_v8, %v1650_v9  ;;  %v1261_v59 = vsel %vm2989_vm2, %v2451_v46, %v1260_v24  ;;  %v1678_v0 = vrot.slane %v1676_v55, 5  ;;  %v1264_v30 = vrot.slane %v2441_v14, 5 }
  0x75   : > { %v1660_v11 = vrot.slane %v1659_v1, 4  ;;  %v1723_v32 = vunpack.c.l.b16 %v1651_v18  ;;  %v1688_v1 = vrot.slane %v1687_v56, 4  ;;  %v1306_v4 = vunpack.c.l.b16 %v1261_v59  ;;  %v2445_v59 = vld [vmem:[%s2971_s22 + $0x3c] sm:$0x1] }
  0x76   : > { %v2453_v61 = vrot.slane %v2442_v15, 9  ;;  %v1878_v34 = vrot.slane %v2650_v21, 5  ;;  %v1882_v6 = vrot.slane %v2652_v23, 5  ;;  %v1886_v37 = vrot.slane %v2654_v27, 5 }
  0x77   : > { %v1665_v19 = vsel %vm3101_vm5, %v1660_v11, %v1664_v12  ;;  %v1693_v9 = vsel %vm3101_vm5, %v1688_v1, %v1692_v2  ;;  %v2543_v11 = vld [vmem:[%s2971_s22 + $0x40] sm:$0xf]  ;;  %v2775_v12 = vld [vmem:[%s2971_s22 + $0x44] sm:$0xf0] }
  0x78   : > { %v1724_v33 = vunpack.c.l.b16 %v1665_v19  ;;  %v1726_v18 = vunpack.c.l.b16 %v1693_v9  ;;  %v2544_v19 = vor.u32 %v2775_v12, %v2543_v11 }
  0x7a   : > { %v1729_v50 = vpack.c.b16 %v1724_v33, %v1723_v32  ;;  %v2661_v33 = vrot.slane %v2649_v47, 9 }
  0x7c   : > { %575 = vmatmul.bf16.gmra.mxu1 %v499_v35  ;;  %1192 = vmatmul.bf16.gmra.mxu0 %v1116_v38  ;;  %v2646_v35 = vld [vmem:[%s2971_s22 + $0x24] sm:$0x1]  ;;  %v2648_v38 = vld [vmem:[%s2971_s22 + $0x2c] sm:$0x1]  ;;  %v1879_v42 = vsel %vm2989_vm2, %v2661_v33, %v1878_v34 }
  0x7d   : > { %v1870_v51 = vrot.slane %v2646_v35, 5  ;;  %v1874_v53 = vrot.slane %v2648_v38, 5  ;;  %v2662_v35 = vrot.slane %v2651_v22, 9 }
  0x7e   : > { %1796 = vmatmul.bf16.gmra.mxu3 %v1728_v58  ;;  %v1257_v58 = vsel %vm2989_vm2, %v2450_v28, %v1256_v45  ;;  %v2655_v28 = vld [vmem:[%s2971_s22 + $0x48] sm:$0xe] }
  0x7f   : > { %1534 = vmatmul.bf16.gmra.mxu2 %v2536_v39  ;;  %v1669_v39 = vrot.slane %v1667_v29, 4  ;;  %v1871_v60 = vsel %vm2989_vm2, %v2659_v48, %v1870_v51  ;;  %v1875_v62 = vsel %vm2989_vm2, %v2660_v52, %v1874_v53  ;;  %v1305_v3 = vunpack.c.l.b16 %v1257_v58  ;;  %v2656_v29 = vld [vmem:[%s2971_s22 + $0x4c] sm:$0x1]  ;;  %v2444_v58 = vld [vmem:[%s2971_s22 + $0x38] sm:$0xe] }
  0x80   : > { %v1919_v5 = vunpack.c.l.b16 %v1871_v60  ;;  %v1920_v7 = vunpack.c.l.b16 %v1875_v62  ;;  %v2664_v38 = vrot.slane %v2655_v28, 9  ;;  %v1883_v43 = vsel %vm2989_vm2, %v2662_v35, %v1882_v6  ;;  %v2446_v60 = vld [vmem:[%s2971_s22 + $0x40] sm:$0xe]  ;;  %v2447_v62 = vld [vmem:[%s2971_s22 + $0x44] sm:$0x1]  ;;  %s2139_s22 = sshll.u32 %s2878_s12, 3 }
  0x81   : > { %v1673_v54 = vor.u32 %v1672_v40, %v1669_v39  ;;  %v1312_v49 = vpack.c.b16 %v1306_v4, %v1305_v3  ;;  %v1890_v39 = vrot.slane %v2656_v29, 5  ;;  %v1921_v48 = vunpack.c.l.b16 %v1879_v42  ;;  %p163_p4 = scmp.lt.s32.totalorder %s2139_s22, 15 }
  0x82   : > { %v1926_v13 = vpack.c.b16 %v1920_v7, %v1919_v5  ;;  %v2455_v1 = vrot.slane %v2446_v60, 9  ;;  %v1276_v2 = vrot.slane %v2447_v62, 5 }
  0x83   : > { %v1674_v63 = vrot.slane %v1673_v54, 4  ;;  %v1891_v45 = vsel %vm2989_vm2, %v2664_v38, %v1890_v39  ;;  %s3518_s22 = smov (!%p163_p4, %s2139_s22), 15 }
  0x84   : > { %v1924_v52 = vunpack.c.l.b16 %v1891_v45  ;;  %s2140_s6 = sshll.u32 %s3518_s22, 2 }
  0x85   : > { %v1679_v8 = vsel %vm3101_vm5, %v1674_v63, %v1678_v0  ;;  %v2454_v63 = vrot.slane %v2444_v58, 9  ;;  %v1272_v0 = vrot.slane %v2445_v59, 5  ;;  %s3474_s8 = scalar_lea.vmem %s3508_s3, %s2140_s6 }
  0x86   : > { %v1725_v17 = vunpack.c.l.b16 %v1679_v8  ;;  %v1277_v8 = vsel %vm2989_vm2, %v2455_v1, %v1276_v2 }
  0x87   : > { %v1273_v7 = vsel %vm2989_vm2, %v2454_v63, %v1272_v0  ;;  %v1310_v12 = vunpack.c.l.b16 %v1277_v8 }
  0x88   : > { %v1730_v32 = vpack.c.b16 %v1726_v18, %v1725_v17  ;;  %v1309_v11 = vunpack.c.l.b16 %v1273_v7 }
  0x8c   : > { %1375 = vmatmul.bf16.vlgmr.msra.gmra.mxu1 %v1311_v20  ;;  %1989 = vmatmul.bf16.vlgmr.msra.gmra.mxu0 %v1925_v31  ;;  %v2452_v20 = vrot.slane %v2440_v10, 9  ;;  %v1268_v31 = vrot.slane %v2443_v16, 5  ;;  %v1314_v10 = vpack.c.b16 %v1310_v12, %v1309_v11 }
  0x8e   : > { %1801 = vmatmul.bf16.gmra.mxu3 %v1729_v50  ;;  %v1265_v40 = vsel %vm2989_vm2, %v2452_v20, %v1264_v30  ;;  %v1269_v41 = vsel %vm2989_vm2, %v2453_v61, %v1268_v31  ;;  %v1922_v50 = vunpack.c.l.b16 %v1883_v43 }
  0x8f   : > { %1539 = vmatmul.bf16.gmra.mxu2 %v2540_v36  ;;  %v2663_v36 = vrot.slane %v2653_v26, 9  ;;  %v1307_v46 = vunpack.c.l.b16 %v1265_v40  ;;  %v1308_v24 = vunpack.c.l.b16 %v1269_v41 }
  0x90   : > { %v1927_v54 = vpack.c.b16 %v1922_v50, %v1921_v48 }
  0x91   : > { %v1887_v44 = vsel %vm2989_vm2, %v2663_v36, %v1886_v37  ;;  %v1313_v53 = vpack.c.b16 %v1308_v24, %v1307_v46 }
  0x92   : > { %v1923_v51 = vunpack.c.l.b16 %v1887_v44 }
  0x94   : > { %v1928_v57 = vpack.c.b16 %v1924_v52, %v1923_v51 }
  0x9c   : > { %1380 = vmatmul.bf16.gmra.mxu1 %v1312_v49  ;;  %1994 = vmatmul.bf16.gmra.mxu0 %v1926_v13 }
  0x9e   : > { %1806 = vmatmul.bf16.gmra.mxu3 %v1730_v32 }
  0x9f   : > { %1544 = vmatmul.bf16.gmra.mxu2 %v2544_v19 }
  0xa9   : > { %v306_v55 = vpop.f32.mrf.mxu1  ;;  %v296_v56 = vpop.f32.mrf.mxu0 }
  0xac   : > { %1385 = vmatmul.bf16.gmra.mxu1 %v1313_v53  ;;  %1999 = vmatmul.bf16.gmra.mxu0 %v1927_v54 }
  0xaf   : > { %2004 = vmatmul.bf16.vlgmr.msra.gmra.mxu2 %v1928_v57 }
  0xb1   : > { %v308_v4 = vpop.f32.mrf.mxu1  ;;  %v298_v5 = vpop.f32.mrf.mxu0 }
  0xb2   : > { %v762_v3 = vpop.f32.mrf.mxu2  ;;  %v916_v9 = vpop.f32.mrf.mxu3 }
  0xb9   : > { %v311_v13 = vpop.f32.mrf.mxu1  ;;  %v301_v14 = vpop.f32.mrf.mxu0 }
  0xba   : > { %v764_v49 = vpop.f32.mrf.mxu2  ;;  %v3440_v15 = vpop.f32.mrf.mxu3 }
  0xbc   : > { %1390 = vmatmul.bf16.gmra.mxu1 %v1314_v10 }
  0xc1   : > { %v313_v17 = vpop.f32.mrf.mxu1  ;;  %v303_v18 = vpop.f32.mrf.mxu0 }
  0xc2   : > { %v767_v16 = vpop.f32.mrf.mxu2  ;;  %v921_v19 = vpop.f32.mrf.mxu3 }
  0xc9   : > { %v561_v47 = vpop.f32.mrf.mxu1  ;;  %v1178_v21 = vpop.f32.mrf.mxu0 }
  0xca   : > { %v769_v20 = vpop.f32.mrf.mxu2  ;;  %v581_v22 = vadd.f32 %v561_v47, %v296_v56  ;;  %v3442_v23 = vpop.f32.mrf.mxu3 }
  0xcc   : > { %v782_v25 = vadd.f32 %v762_v3, %v581_v22 }
  0xce   : > { %v936_v26 = vadd.f32 %v916_v9, %v782_v25 }
  0xd0   : > { %v1198_v27 = vadd.f32 %v1178_v21, %v936_v26 }
  0xd1   : > { %v563_v29 = vpop.f32.mrf.mxu1  ;;  %v1180_v30 = vpop.f32.mrf.mxu0 }
  0xd2   : > { %v772_v28 = vpop.f32.mrf.mxu2  ;;  %v582_v61 = vadd.f32 %v563_v29, %v298_v5  ;;  %v926_v32 = vpop.f32.mrf.mxu3 }
  0xd4   : > { %v783_v31 = vadd.f32 %v764_v49, %v582_v61 }
  0xd9   : > { %v566_v34 = vpop.f32.mrf.mxu1  ;;  %v1183_v35 = vpop.f32.mrf.mxu0 }
  0xda   : > { %v774_v33 = vpop.f32.mrf.mxu2  ;;  %v583_v6 = vadd.f32 %v566_v34, %v301_v14  ;;  %v3444_v40 = vpop.f32.mrf.mxu3 }
  0xdc   : > { %v784_v36 = vadd.f32 %v767_v16, %v583_v6 }
  0xde   : > { %v938_v37 = vadd.f32 %v921_v19, %v784_v36 }
  0xe0   : > { %v1200_v38 = vadd.f32 %v1183_v35, %v938_v37 }
  0xe1   : > { %v568_v41 = vpop.f32.mrf.mxu1  ;;  %v3446_v42 = vpop.f32.mrf.mxu0 }
  0xe2   : > { %v777_v39 = vpop.f32.mrf.mxu2  ;;  %v584_v43 = vadd.f32 %v568_v41, %v303_v18  ;;  %v931_v50 = vpop.f32.mrf.mxu3 }
  0xe4   : > { %v785_v44 = vadd.f32 %v769_v20, %v584_v43 }
  0xe6   : > { %v939_v34 = vadd.f32 %v3442_v23, %v785_v44 }
  0xe9   : > { %v571_v46 = vpop.f32.mrf.mxu1  ;;  %v1188_v24 = vpop.f32.mrf.mxu0 }
  0xea   : > { %v779_v45 = vpop.f32.mrf.mxu2  ;;  %v585_v48 = vadd.f32 %v571_v46, %v306_v55  ;;  %v3454_v60 = vpop.f32.mrf.mxu3 }
  0xec   : > { %v786_v51 = vadd.f32 %v772_v28, %v585_v48 }
  0xee   : > { %v940_v52 = vadd.f32 %v926_v32, %v786_v51 }
  0xf0   : > { %v3448_v53 = vadd.f32 %v1188_v24, %v940_v52 }
  0xf1   : > { %v573_v56 = vpop.f32.mrf.mxu1  ;;  %v3450_v57 = vpop.f32.mrf.mxu0 }
  0xf2   : > { %v1530_v54 = vpop.f32.mrf.mxu2  ;;  %v586_v58 = vadd.f32 %v573_v56, %v308_v4  ;;  %v1792_v3 = vpop.f32.mrf.mxu3 }
  0xf4   : > { %v3452_v59 = vadd.f32 %v774_v33, %v586_v58 }
  0xf9   : > { %v576_v63 = vpop.f32.mrf.mxu1  ;;  %v1193_v0 = vpop.f32.mrf.mxu0 }
  0xfa   : > { %v1532_v62 = vpop.f32.mrf.mxu2  ;;  %v587_v1 = vadd.f32 %v576_v63, %v311_v13  ;;  %v1794_v12 = vpop.f32.mrf.mxu3  ;;  %v937_v13 = vadd.f32 %v3440_v15, %v783_v31 }
  0xfc   : > { %v788_v55 = vadd.f32 %v777_v39, %v587_v1  ;;  %v1199_v19 = vadd.f32 %v1180_v30, %v937_v13  ;;  %v1201_v39 = vadd.f32 %v3446_v42, %v939_v34  ;;  %v941_v42 = vadd.f32 %v3444_v40, %v3452_v59 }
  0xfe   : > { %v942_v2 = vadd.f32 %v931_v50, %v788_v55 }
 0x100   : > { %v3456_v5 = vadd.f32 %v1193_v0, %v942_v2  ;;  %v1203_v0 = vadd.f32 %v3450_v57, %v941_v42 }
 0x101   : > { %v578_v8 = vpop.f32.mrf.mxu1  ;;  %v3458_v9 = vpop.f32.mrf.mxu0 }
 0x102   : > { %v1535_v7 = vpop.f32.mrf.mxu2  ;;  %v588_v11 = vadd.f32 %v578_v8, %v313_v17  ;;  %v1797_v25 = vpop.f32.mrf.mxu3 }
 0x104   : > { %v3460_v4 = vadd.f32 %v779_v45, %v588_v11 }
 0x106   : > { %v943_v57 = vadd.f32 %v3454_v60, %v3460_v4 }
 0x109   : > { %v1376_v10 = vpop.f32.mrf.mxu1  ;;  %v1990_v49 = vpop.f32.mrf.mxu0 }
 0x10a   : > { %v1396_v14 = vadd.f32 %v1376_v10, %v1198_v27  ;;  %v1537_v16 = vpop.f32.mrf.mxu2  ;;  %v3467_v27 = vld [vmem:[%s3507_s2] ss:$0 sm:$0xff]  ;;  %v1799_v6 = vpop.f32.mrf.mxu3 }
 0x10c   : > { %v1550_v18 = vadd.f32 %v1530_v54, %v1396_v14 }
 0x10e   : > { %v1812_v21 = vadd.f32 %v1792_v3, %v1550_v18 }
 0x110   : > { %v2010_v28 = vadd.f32 %v1990_v49, %v1812_v21 }
 0x111   : > { %v1378_v20 = vpop.f32.mrf.mxu1  ;;  %v1992_v47 = vpop.f32.mrf.mxu0 }
 0x112   : > { %v1397_v22 = vadd.f32 %v1378_v20, %v1199_v19  ;;  %v1540_v17 = vpop.f32.mrf.mxu2  ;;  %v2038_v31 = vadd.f32 %v3467_v27, %v2010_v28  ;;  %v1802_v50 = vpop.f32.mrf.mxu3  ;;  %v1205_v20 = vadd.f32 %v3458_v9, %v943_v57 }
 0x114   : > { %v1551_v26 = vadd.f32 %v1532_v62, %v1397_v22 }
 0x116   : > { %v1813_v29 = vadd.f32 %v1794_v12, %v1551_v26 }
 0x118   : > { %v2011_v15 = vadd.f32 %v1992_v47, %v1813_v29 }
 0x119   : > { %v1381_v61 = vpop.f32.mrf.mxu1  ;;  %v1995_v30 = vpop.f32.mrf.mxu0 }
 0x11a   : > { %v2039_v32 = vadd.f32 %v3467_v27, %v2011_v15  ;;  %v1398_v33 = vadd.f32 %v1381_v61, %v1200_v38  ;;  %v1542_v37 = vpop.f32.mrf.mxu2  ;;  %v1804_v1 = vpop.f32.mrf.mxu3 }
 0x11c   : > { %v2803_v35 = vpack.c.bf16 %v2039_v32, %v2038_v31  ;;  %v1552_v36 = vadd.f32 %v1535_v7, %v1398_v33 }
 0x11e   : > { %2804 = vst [vmem:[%s3474_s8] sm:$0xff] %v2803_v35   ;;  %v1814_v45 = vadd.f32 %v1797_v25, %v1552_v36 }
 0x120   : > { %v2012_v24 = vadd.f32 %v1995_v30, %v1814_v45 }
 0x121   : > { %v1383_v41 = vpop.f32.mrf.mxu1  ;;  %v1997_v43 = vpop.f32.mrf.mxu0 }
 0x122   : > { %v1399_v38 = vadd.f32 %v1383_v41, %v1201_v39  ;;  %v1545_v52 = vpop.f32.mrf.mxu2  ;;  %v2040_v23 = vadd.f32 %v3467_v27, %v2012_v24 }
 0x124   : > { %v1553_v46 = vadd.f32 %v1537_v16, %v1399_v38  ;;  %v1807_v16 = vpop.f32.mrf.mxu3 }
 0x126   : > { %v1815_v48 = vadd.f32 %v1799_v6, %v1553_v46 }
 0x128   : > { %v2013_v51 = vadd.f32 %v1997_v43, %v1815_v48 }
 0x129   : > { %v1386_v54 = vpop.f32.mrf.mxu1  ;;  %v2000_v58 = vpop.f32.mrf.mxu0 }
 0x12a   : > { %v2041_v44 = vadd.f32 %v3467_v27, %v2013_v51  ;;  %v1400_v56 = vadd.f32 %v1386_v54, %v3448_v53  ;;  %v1547_v7 = vpop.f32.mrf.mxu2 }
 0x12c   : > { %v2808_v62 = vpack.c.bf16 %v2041_v44, %v2040_v23  ;;  %v1554_v63 = vadd.f32 %v1540_v17, %v1400_v56  ;;  %v1809_v26 = vpop.f32.mrf.mxu3 }
 0x12e   : > { %2820 = vst [vmem:[%s3474_s8 + $0x8] sm:$0xff] %v2808_v62   ;;  %v1816_v2 = vadd.f32 %v1802_v50, %v1554_v63 }
 0x130   : > { %v2014_v12 = vadd.f32 %v2000_v58, %v1816_v2 }
 0x131   : > { %v1388_v55 = vpop.f32.mrf.mxu1  ;;  %v2002_v11 = vpop.f32.mrf.mxu0 }
 0x132   : > { %v1401_v3 = vadd.f32 %v1388_v55, %v1203_v0  ;;  %v2042_v14 = vadd.f32 %v3467_v27, %v2014_v12  ;;  %v2005_v18 = vpop.f32.mrf.mxu2 }
 0x134   : > { %v1555_v8 = vadd.f32 %v1542_v37, %v1401_v3 }
 0x136   : > { %v1817_v10 = vadd.f32 %v1804_v1, %v1555_v8 }
 0x138   : > { %v2015_v53 = vadd.f32 %v2002_v11, %v1817_v10 }
 0x139   : > { %v1391_v49 = vpop.f32.mrf.mxu1 }
 0x13a   : > { %v2043_v40 = vadd.f32 %v3467_v27, %v2015_v53  ;;  %v1402_v59 = vadd.f32 %v1391_v49, %v3456_v5  ;;  %v2007_v29 = vpop.f32.mrf.mxu2 }
 0x13c   : > { %v2813_v13 = vpack.c.bf16 %v2043_v40, %v2042_v14  ;;  %v1556_v19 = vadd.f32 %v1545_v52, %v1402_v59 }
 0x13e   : > { %2821 = vst [vmem:[%s3474_s8 + $0x10] sm:$0xff] %v2813_v13   ;;  %v1818_v21 = vadd.f32 %v1807_v16, %v1556_v19 }
 0x140   : > { %v2016_v17 = vadd.f32 %v2005_v18, %v1818_v21 }
 0x141   : > { %v1393_v47 = vpop.f32.mrf.mxu1 }
 0x142   : > { %v1403_v22 = vadd.f32 %v1393_v47, %v1205_v20  ;;  %v2044_v15 = vadd.f32 %v3467_v27, %v2016_v17 }
 0x144   : > { %v1557_v25 = vadd.f32 %v1547_v7, %v1403_v22 }
 0x146   : > { %v1819_v28 = vadd.f32 %v1809_v26, %v1557_v25 }
 0x148   : > { %v2017_v5 = vadd.f32 %v2007_v29, %v1819_v28 }
 0x14a   : > { %v2045_v60 = vadd.f32 %v3467_v27, %v2017_v5 }
 0x14c   : > { %v2818_v4 = vpack.c.bf16 %v2045_v60, %v2044_v15 }
 0x14e   : > { %2822 = vst [vmem:[%s3474_s8 + $0x18] sm:$0xff] %v2818_v4  }
 0x14f PF: > { %s13_s14 = sadd.s32 1, %s2886_s14   ;;  %s3513_s12 = smov %s2882_s13 }
 0x150   : > { %p10_p5 = scmp.ge.s32.totalorder %s13_s14, 4   ;;  %s3514_s13 = smov %s3516_s15 }
 0x152   :  { %12 = sbr.rel (!%p10_p5) target bundleno = 2 (0x2), region = 70 }

// kernel: upblockpix_forward.6
= control target key start
LH: loop header
LB: loop body
LE: loop exit
PB: predicated region body
PF: predicated region fallthrough
CT: control target
= control target key end

     0   :  { %s6731_s17 = smov 0   ;;  %s6733_s18 = smov 0   ;;  %s8221_s0 = inlined_call_operand.vmem [shape: bf16[36,18,128], index: 0, kind: input, shape index: {}]   ;;  %s8222_s1 = inlined_call_operand.vmem [shape: bf16[9,128,128], index: 1, kind: input, shape index: {}]   ;;  %s8223_s2 = inlined_call_operand.vmem [shape: f32[1,128], index: 2, kind: input, shape index: {}]   ;;  %s8224_s3 = inlined_call_operand.<no memory space> [shape: f32[1], index: 3, kind: input, shape index: {}]   ;;  %s8225_s4 = inlined_call_operand.vmem [shape: bf16[512,128], index: 4, kind: output, shape index: {}]  }
   0x1   :  { %9 = sst [smem:[#allocation3]] %s8224_s3  ;;  %s6735_s19 = smov 0  }
   0x2 LB: > { %s27_s3 = sadd.s32 1, %s6697_s18  ;;  %p5492_p0 = scmp.ge.s32.totalorder %s6701_s19, 1  ;;  %s6701_s19 = sphi %s6735_s19, %s15_s19   ;;  %s6697_s18 = sphi %s6733_s18, %s8252_s18   ;;  %s6693_s17 = sphi %s6731_s17, %s8251_s17  }
   0x3   : > { %p29_p1 = scmp.ge.s32.totalorder %s27_s3, 2  ;;  %p167_p2 = scmp.lt.s32.totalorder %s6701_s19, 3 }
   0x5   : > { %s8254_s3 = smov (%p29_p1, %s27_s3), 0  ;;  %p168_p3 = pnand %p5492_p0, %p167_p2 }
   0x7   : > { %171 = sbr.rel (%p168_p3) target bundleno = 758 (0x2f6), region = 36 }
   0xc   : > { %v6437_v0 = vld [vmem:[%s8222_s1 + $0x38] sm:$0xff]  ;;  %v6436_v1 = vld [vmem:[%s8222_s1 + $0x30] sm:$0xff]  ;;  %v6435_v2 = vld [vmem:[%s8222_s1 + $0x28] sm:$0xff]  ;;  %s6413_s8 = smul.u32 216, %s6693_s17  ;;  %vm660_vm0 = vsmask.f32 3328 }
   0xd   : > { %6629 = vmatpush.bf16.msra.mxu1 %v6437_v0  ;;  %6630 = vmatpush.bf16.msra.mxu2 %v6437_v0  ;;  %v6434_v3 = vld [vmem:[%s8222_s1 + $0x20] sm:$0xff]  ;;  %v6433_v4 = vld [vmem:[%s8222_s1 + $0x18] sm:$0xff]  ;;  %v6432_v5 = vld [vmem:[%s8222_s1 + $0x10] sm:$0xff]  ;;  %vm661_vm1 = vsmask.f32 7440  ;;  %vm1457_vm2 = vcmask 1042432  }
   0xe   : > { %6631 = vmatpush.bf16.msra.mxu3 %v6437_v0  ;;  %459 = vmatpush.bf16.msra.mxu0 %v6437_v0  ;;  %v6431_v6 = vld [vmem:[%s8222_s1 + $0x8] sm:$0xff]  ;;  %v6430_v7 = vld [vmem:[%s8222_s1] sm:$0xff]  ;;  %s6779_s13 = scalar_lea.vmem %s8221_s0, %s6413_s8  ;;  %v6453_v8 = vld [vmem:[%s8222_s1 + $0xb8] sm:$0xff]  ;;  %vm1458_vm3 = vcmask 1046532   ;;  %s7907_s9 = sld [smem:[#allocation3]] }
   0xf   : > { %v6477_v9 = vld [vmem:[%s8222_s1 + $0xf8] sm:$0xff]  ;;  %v6418_v10 = vld [vmem:[%s6779_s13 + $0x30] sm:$0xff]  ;;  %v6422_v11 = vld [vmem:[%s6779_s13 + $0x60] sm:$0xff]  ;;  %s5493_s10 = sshll.u32 %s6693_s17, 5 }
  0x10   : > { %v6426_v12 = vld [vmem:[%s6779_s13 + $0x90] sm:$0xff]  ;;  %v6414_v13 = vld [vmem:[%s6779_s13] sm:$0xff]  ;;  %v6445_v14 = vld [vmem:[%s8222_s1 + $0x78] sm:$0xff]  ;;  %p7924_p4 = scmp.lt.s32.totalorder %s5493_s10, 63 }
  0x11   : > { %6632 = vmatpush.bf16.msra.mxu1 %v6436_v1  ;;  %6633 = vmatpush.bf16.msra.mxu2 %v6436_v1  ;;  %v6485_v15 = vld [vmem:[%s8222_s1 + $0x138] sm:$0xff]  ;;  %v6452_v16 = vld [vmem:[%s8222_s1 + $0xb0] sm:$0xff]  ;;  %v6451_v20 = vld [vmem:[%s8222_s1 + $0xa8] sm:$0xff] }
  0x12   : > { %6634 = vmatpush.bf16.msra.mxu3 %v6436_v1  ;;  %460 = vmatpush.bf16.msra.mxu0 %v6436_v1  ;;  %v6476_v17 = vld [vmem:[%s8222_s1 + $0xf0] sm:$0xff]  ;;  %v6475_v21 = vld [vmem:[%s8222_s1 + $0xe8] sm:$0xff]  ;;  %v6450_v24 = vld [vmem:[%s8222_s1 + $0xa0] sm:$0xff]  ;;  %s8256_s10 = smov (!%p7924_p4, %s5493_s10), 63 }
  0x13   : > { %v6444_v18 = vld [vmem:[%s8222_s1 + $0x70] sm:$0xff]  ;;  %v6443_v22 = vld [vmem:[%s8222_s1 + $0x68] sm:$0xff]  ;;  %v6474_v25 = vld [vmem:[%s8222_s1 + $0xe0] sm:$0xff]  ;;  %s5494_s17 = sshll.u32 %s8256_s10, 2 }
  0x14   : > { %v6484_v19 = vld [vmem:[%s8222_s1 + $0x130] sm:$0xff]  ;;  %v6483_v23 = vld [vmem:[%s8222_s1 + $0x128] sm:$0xff]  ;;  %v6442_v26 = vld [vmem:[%s8222_s1 + $0x60] sm:$0xff]  ;;  %s7969_s20 = scalar_lea.vmem %s8225_s4, %s5494_s17 }
  0x15   : > { %6635 = vmatpush.bf16.msra.mxu1 %v6435_v2  ;;  %6636 = vmatpush.bf16.msra.mxu2 %v6435_v2  ;;  %v6482_v27 = vld [vmem:[%s8222_s1 + $0x120] sm:$0xff]  ;;  %v6449_v28 = vld [vmem:[%s8222_s1 + $0x98] sm:$0xff]  ;;  %v6423_v31 = vld [vmem:[%s6779_s13 + $0x6c] sm:$0xff] }
  0x16   : > { %6637 = vmatpush.bf16.msra.mxu3 %v6435_v2  ;;  %461 = vmatpush.bf16.msra.mxu0 %v6435_v2  ;;  %v6473_v29 = vld [vmem:[%s8222_s1 + $0xd8] sm:$0xff]  ;;  %v6415_v33 = vld [vmem:[%s6779_s13 + $0xc] sm:$0xff]  ;;  %v6446_v44 = vld [vmem:[%s8222_s1 + $0x80] sm:$0xff] }
  0x17   : > { %v6419_v30 = vld [vmem:[%s6779_s13 + $0x3c] sm:$0xff]  ;;  %v6448_v36 = vld [vmem:[%s8222_s1 + $0x90] sm:$0xff]  ;;  %v6447_v40 = vld [vmem:[%s8222_s1 + $0x88] sm:$0xff] }
  0x18   : > { %v6427_v32 = vld [vmem:[%s6779_s13 + $0x9c] sm:$0xff]  ;;  %v6472_v37 = vld [vmem:[%s8222_s1 + $0xd0] sm:$0xff]  ;;  %v6471_v41 = vld [vmem:[%s8222_s1 + $0xc8] sm:$0xff] }
  0x19   : > { %6638 = vmatpush.bf16.msra.mxu1 %v6434_v3  ;;  %6639 = vmatpush.bf16.msra.mxu2 %v6434_v3  ;;  %v6441_v34 = vld [vmem:[%s8222_s1 + $0x58] sm:$0xff]  ;;  %v6440_v38 = vld [vmem:[%s8222_s1 + $0x50] sm:$0xff]  ;;  %v6439_v42 = vld [vmem:[%s8222_s1 + $0x48] sm:$0xff] }
  0x1a   : > { %6640 = vmatpush.bf16.msra.mxu3 %v6434_v3  ;;  %462 = vmatpush.bf16.msra.mxu0 %v6434_v3  ;;  %v6481_v35 = vld [vmem:[%s8222_s1 + $0x118] sm:$0xff]  ;;  %v6480_v39 = vld [vmem:[%s8222_s1 + $0x110] sm:$0xff]  ;;  %v6479_v43 = vld [vmem:[%s8222_s1 + $0x108] sm:$0xff] }
  0x1b   : > { %v6470_v45 = vld [vmem:[%s8222_s1 + $0xc0] sm:$0xff]  ;;  %v6420_v48 = vld [vmem:[%s6779_s13 + $0x48] sm:$0xff]  ;;  %v6424_v49 = vld [vmem:[%s6779_s13 + $0x78] sm:$0xff] }
  0x1c   : > { %v6438_v46 = vld [vmem:[%s8222_s1 + $0x40] sm:$0xff]  ;;  %v6428_v50 = vld [vmem:[%s6779_s13 + $0xa8] sm:$0xff]  ;;  %v6416_v51 = vld [vmem:[%s6779_s13 + $0x18] sm:$0xff] }
  0x1d   : > { %6641 = vmatpush.bf16.msra.mxu1 %v6433_v4  ;;  %6642 = vmatpush.bf16.msra.mxu2 %v6433_v4  ;;  %v6478_v47 = vld [vmem:[%s8222_s1 + $0x100] sm:$0xff]  ;;  %v6517_v54 = vld [vmem:[%s8222_s1 + $0x1b8] sm:$0xff]  ;;  %v5850_v57 = vld [vmem:[%s6779_s13 + $0xc] sm:$0xf] }
  0x1e   : > { %6643 = vmatpush.bf16.msra.mxu3 %v6433_v4  ;;  %463 = vmatpush.bf16.msra.mxu0 %v6433_v4  ;;  %v612_v52 = vld [vmem:[%s6779_s13] sm:$0xf]  ;;  %v613_v53 = vld [vmem:[%s6779_s13 + $0x4] sm:$0xf]  ;;  %v6525_v55 = vld [vmem:[%s8222_s1 + $0x1f8] sm:$0xff]  ;;  %v2317_v0 = vshrl.u32 %v5850_v57, 16 }
  0x1f   : > { %v6493_v56 = vld [vmem:[%s8222_s1 + $0x178] sm:$0xff]  ;;  %v5851_v58 = vld [vmem:[%s6779_s13 + $0x10] sm:$0xf]  ;;  %v664_v60 = vshrl.u32 %v612_v52, 16  ;;  %v667_v61 = vshll.u32 %v612_v52, 16  ;;  %v673_v62 = vshll.u32 %v613_v53, 16  ;;  %vm6923_vm4 = vmor %vm660_vm0, %vm661_vm1 }
  0x20   : > { %v6533_v59 = vld [vmem:[%s8222_s1 + $0x238] sm:$0xff]  ;;  %v677_v63 = vshrl.u32 %v613_v53, 16  ;;  %v2320_v1 = vshll.u32 %v5850_v57, 16  ;;  %v2326_v2 = vshll.u32 %v5851_v58, 16  ;;  %v2330_v3 = vshrl.u32 %v5851_v58, 16  ;;  %vm6930_vm5 = vmor %vm1457_vm2, %vm1458_vm3 }
  0x21   : > { %6644 = vmatpush.bf16.msra.mxu1 %v6432_v5  ;;  %6645 = vmatpush.bf16.msra.mxu2 %v6432_v5  ;;  %v614_v4 = vld [vmem:[%s6779_s13 + $0x8] sm:$0x1]  ;;  %v617_v57 = vld [vmem:[%s6779_s13 + $0x14] sm:$0x1] }
  0x22   : > { %6646 = vmatpush.bf16.msra.mxu3 %v6432_v5  ;;  %464 = vmatpush.bf16.msra.mxu0 %v6432_v5  ;;  %v666_v5 = vrot.slane %v664_v60, 4 }
  0x25   : > { %6647 = vmatpush.bf16.msra.mxu1 %v6431_v6  ;;  %6648 = vmatpush.bf16.msra.mxu2 %v6431_v6 }
  0x26   : > { %6649 = vmatpush.bf16.msra.mxu3 %v6431_v6  ;;  %465 = vmatpush.bf16.msra.mxu0 %v6431_v6  ;;  %v669_v6 = vrot.slane %v667_v61, 5 }
  0x29   : > { %6650 = vmatpush.bf16.msra.mxu1 %v6430_v7  ;;  %6651 = vmatpush.bf16.msra.mxu2 %v6430_v7 }
  0x2a   : > { %6652 = vmatpush.bf16.msra.mxu3 %v6430_v7  ;;  %466 = vmatpush.bf16.msra.mxu0 %v6430_v7  ;;  %v6906_v7 = vrot.slane %v673_v62, 5  ;;  %v1365_v62 = vld [vmem:[%s6779_s13 + $0x10] sm:$0xf] }
  0x2c   : > { %487 = vmatmul.bf16.vlgmr.msra.gmra.mxu1 %v6418_v10  ;;  %507 = vmatmul.bf16.vlgmr.msra.gmra.mxu2 %v6422_v11  ;;  %v2319_v10 = vrot.slane %v2317_v0, 4  ;;  %v2322_v11 = vrot.slane %v2320_v1, 5 }
  0x2d   : > { %1733 = vmatpush.bf16.msrb.mxu2 %v6453_v8  ;;  %527 = vmatmul.bf16.vlgmr.msra.gmra.mxu3 %v6426_v12  ;;  %v679_v8 = vrot.slane %v677_v63, 4  ;;  %v6909_v12 = vrot.slane %v2326_v2, 5 }
  0x2e   : > { %2115 = vmatpush.bf16.msrb.mxu3 %v6477_v9  ;;  %467 = vmatmul.bf16.vlgmr.msra.gmra.mxu0 %v6414_v13  ;;  %v1362_v9 = vld [vmem:[%s6779_s13 + $0x4] sm:$0xf]  ;;  %v2332_v13 = vrot.slane %v2330_v3, 4 }
  0x2f   : > { %1208 = vmatpush.bf16.msrb.mxu1 %v6445_v14  ;;  %2861 = vmatpush.bf16.msrb.mxu0 %v6485_v15  ;;  %v683_v14 = vshll.u32 %v614_v4, 16  ;;  %v5852_v15 = vld [vmem:[%s6779_s13 + $0x14] sm:$0x1] }
  0x31   : > { %1734 = vmatpush.bf16.msrb.mxu2 %v6452_v16  ;;  %v1462_v16 = vrot.slane %v1362_v9, 5 }
  0x32   : > { %2116 = vmatpush.bf16.msrb.mxu3 %v6476_v17  ;;  %v6421_v17 = vld [vmem:[%s6779_s13 + $0x54] sm:$0xff] }
  0x33   : > { %1209 = vmatpush.bf16.msrb.mxu1 %v6444_v18  ;;  %2862 = vmatpush.bf16.msrb.mxu0 %v6484_v19  ;;  %v6425_v18 = vld [vmem:[%s6779_s13 + $0x84] sm:$0xff]  ;;  %v670_v19 = vor.u32 %v669_v6, %v666_v5 }
  0x35   : > { %1735 = vmatpush.bf16.msrb.mxu2 %v6451_v20  ;;  %v680_v20 = vor.u32 %v679_v8, %v6906_v7 }
  0x36   : > { %2117 = vmatpush.bf16.msrb.mxu3 %v6475_v21  ;;  %v1361_v21 = vld [vmem:[%s6779_s13] sm:$0xe] }
  0x37   : > { %1210 = vmatpush.bf16.msrb.mxu1 %v6443_v22  ;;  %2863 = vmatpush.bf16.msrb.mxu0 %v6483_v23  ;;  %v6429_v22 = vld [vmem:[%s6779_s13 + $0xb4] sm:$0xff]  ;;  %v6417_v23 = vld [vmem:[%s6779_s13 + $0x24] sm:$0xff] }
  0x39   : > { %1736 = vmatpush.bf16.msrb.mxu2 %v6450_v24  ;;  %v2323_v24 = vor.u32 %v2322_v11, %v2319_v10  ;;  %v707_v10 = vshll.u32 %v617_v57, 16 }
  0x3a   : > { %2118 = vmatpush.bf16.msrb.mxu3 %v6474_v25  ;;  %v2333_v25 = vor.u32 %v2332_v13, %v6909_v12  ;;  %v1469_v13 = vrot.slane %v1365_v62, 5  ;;  %v620_v62 = vld [vmem:[%s6779_s13 + $0x20] sm:$0x1] }
  0x3b   : > { %1211 = vmatpush.bf16.msrb.mxu1 %v6442_v26  ;;  %2864 = vmatpush.bf16.msrb.mxu0 %v6482_v27  ;;  %v2336_v26 = vshll.u32 %v5852_v15, 16  ;;  %v685_v27 = vrot.slane %v683_v14, 5  ;;  %v1364_v14 = vld [vmem:[%s6779_s13 + $0xc] sm:$0xe] }
  0x3c   : > { %492 = vmatmul.bf16.gmra.mxu1 %v6419_v30  ;;  %512 = vmatmul.bf16.gmra.mxu2 %v6423_v31  ;;  %v1464_v30 = vrot.slane %v1462_v16, 4  ;;  %v615_v31 = vld [vmem:[%s6779_s13 + $0xc] sm:$0xf] }
  0x3d   : > { %1737 = vmatpush.bf16.msrb.mxu2 %v6449_v28  ;;  %532 = vmatmul.bf16.gmra.mxu3 %v6427_v32  ;;  %v1363_v28 = vld [vmem:[%s6779_s13 + $0x8] sm:$0x1]  ;;  %v616_v32 = vld [vmem:[%s6779_s13 + $0x10] sm:$0xf] }
  0x3e   : > { %2119 = vmatpush.bf16.msrb.mxu3 %v6473_v29  ;;  %472 = vmatmul.bf16.gmra.mxu0 %v6415_v33  ;;  %v5641_v29 = vrot.slane %v1361_v21, 9  ;;  %v6454_v21 = vld [vmem:[%s6779_s13 + $0xc] sm:$0xff] }
  0x3f   : > { %1212 = vmatpush.bf16.msrb.mxu1 %v6441_v34  ;;  %2865 = vmatpush.bf16.msrb.mxu0 %v6481_v35  ;;  %v671_v34 = vrot.slane %v670_v19, 4  ;;  %v681_v35 = vrot.slane %v680_v20, 4  ;;  %v1366_v20 = vld [vmem:[%s6779_s13 + $0x14] sm:$0x1] }
  0x40   : > { %v1463_v52 = vsel %vm6930_vm5, %v5641_v29, %v1462_v16 }
  0x41   : > { %1738 = vmatpush.bf16.msrb.mxu2 %v6448_v36  ;;  %v5853_v36 = vld [vmem:[%s6779_s13 + $0x18] sm:$0xf]  ;;  %v686_v53 = vsel %vm6923_vm4, %v681_v35, %v685_v27  ;;  %v1621_v5 = vunpack.c.l.b16 %v1463_v52  ;;  %v1471_v27 = vrot.slane %v1469_v13, 4  ;;  %v6516_v35 = vld [vmem:[%s8222_s1 + $0x1b0] sm:$0xff] }
  0x42   : > { %2120 = vmatpush.bf16.msrb.mxu3 %v6472_v37  ;;  %v5854_v37 = vld [vmem:[%s6779_s13 + $0x1c] sm:$0xf]  ;;  %v1097_v4 = vunpack.c.l.b16 %v686_v53 }
  0x43   : > { %1213 = vmatpush.bf16.msrb.mxu1 %v6440_v38  ;;  %2866 = vmatpush.bf16.msrb.mxu0 %v6480_v39  ;;  %v1465_v39 = vrot.slane %v1363_v28, 5  ;;  %v1472_v28 = vrot.slane %v1366_v20, 5 }
  0x45   : > { %1739 = vmatpush.bf16.msrb.mxu2 %v6447_v40  ;;  %v2324_v40 = vrot.slane %v2323_v24, 4 }
  0x46   : > { %2121 = vmatpush.bf16.msrb.mxu3 %v6471_v41  ;;  %v2334_v41 = vrot.slane %v2333_v25, 4 }
  0x47   : > { %1214 = vmatpush.bf16.msrb.mxu1 %v6439_v42  ;;  %2867 = vmatpush.bf16.msrb.mxu0 %v6479_v43  ;;  %v2338_v42 = vrot.slane %v2336_v26, 5  ;;  %v688_v43 = vshrl.u32 %v615_v31, 16  ;;  %v5642_v26 = vrot.slane %v1364_v14, 9 }
  0x49   : > { %1740 = vmatpush.bf16.msrb.mxu2 %v6446_v44  ;;  %v691_v44 = vshll.u32 %v615_v31, 16  ;;  %v690_v58 = vrot.slane %v688_v43, 4  ;;  %v5857_v43 = vld [vmem:[%s6779_s13 + $0x28] sm:$0xf] }
  0x4a   : > { %2122 = vmatpush.bf16.msrb.mxu3 %v6470_v45  ;;  %v697_v45 = vshll.u32 %v616_v32, 16 }
  0x4b   : > { %1215 = vmatpush.bf16.msrb.mxu1 %v6438_v46  ;;  %2868 = vmatpush.bf16.msrb.mxu0 %v6478_v47  ;;  %v701_v46 = vshrl.u32 %v616_v32, 16  ;;  %v2341_v47 = vshrl.u32 %v5853_v36, 16  ;;  %v618_v32 = vld [vmem:[%s6779_s13 + $0x18] sm:$0xf] }
  0x4c   : > { %497 = vmatmul.bf16.gmra.mxu1 %v6420_v48  ;;  %517 = vmatmul.bf16.gmra.mxu2 %v6424_v49  ;;  %v2344_v48 = vshll.u32 %v5853_v36, 16  ;;  %v2350_v49 = vshll.u32 %v5854_v37, 16  ;;  %v6949_v60 = vrot.slane %v697_v45, 5  ;;  %v6524_v36 = vld [vmem:[%s8222_s1 + $0x1f0] sm:$0xff]  ;;  %v1473_v45 = vsel %vm6930_vm5, %v1471_v27, %v1472_v28 }
  0x4d   : > { %537 = vmatmul.bf16.gmra.mxu3 %v6428_v50  ;;  %3765 = vmatpush.bf16.msra.mxu2 %v6517_v54  ;;  %v2354_v50 = vshrl.u32 %v5854_v37, 16  ;;  %v1466_v54 = vsel %vm6930_vm5, %v1464_v30, %v1465_v39  ;;  %v703_v61 = vrot.slane %v701_v46, 4  ;;  %v2343_v63 = vrot.slane %v2341_v47, 4  ;;  %v6492_v37 = vld [vmem:[%s8222_s1 + $0x170] sm:$0xff] }
  0x4e   : > { %477 = vmatmul.bf16.gmra.mxu0 %v6416_v51  ;;  %4511 = vmatpush.bf16.msra.mxu3 %v6525_v55  ;;  %v676_v51 = vsel %vm6923_vm4, %v671_v34, %v6906_v7  ;;  %v2329_v55 = vsel %vm6923_vm4, %v2324_v40, %v6909_v12  ;;  %v2346_v0 = vrot.slane %v2344_v48, 5  ;;  %v6952_v1 = vrot.slane %v2350_v49, 5  ;;  %v5855_v7 = vld [vmem:[%s6779_s13 + $0x20] sm:$0x1]  ;;  %v619_v34 = vld [vmem:[%s6779_s13 + $0x1c] sm:$0xf] }
  0x4f   : > { %3383 = vmatpush.bf16.msra.mxu1 %v6493_v56  ;;  %5033 = vmatpush.bf16.msra.mxu0 %v6533_v59  ;;  %v2339_v56 = vsel %vm6923_vm4, %v2334_v41, %v2338_v42  ;;  %v693_v59 = vrot.slane %v691_v44, 5  ;;  %v2356_v2 = vrot.slane %v2354_v50, 4  ;;  %v1096_v3 = vunpack.c.l.b16 %v676_v51  ;;  %v5856_v42 = vld [vmem:[%s6779_s13 + $0x24] sm:$0xf]  ;;  %v6532_v44 = vld [vmem:[%s8222_s1 + $0x230] sm:$0xff] }
  0x50   : > { %v1622_v6 = vunpack.c.l.b16 %v1466_v54  ;;  %v2749_v8 = vunpack.c.l.b16 %v2329_v55  ;;  %v2750_v9 = vunpack.c.l.b16 %v2339_v56  ;;  %v704_v12 = vor.u32 %v703_v61, %v6949_v60 }
  0x51   : > { %v694_v11 = vor.u32 %v693_v59, %v690_v58  ;;  %v2347_v15 = vor.u32 %v2346_v0, %v2343_v63  ;;  %v2357_v16 = vor.u32 %v2356_v2, %v6952_v1  ;;  %v1470_v41 = vsel %vm6930_vm5, %v5642_v26, %v1469_v13  ;;  %3766 = vmatpush.bf16.msra.mxu2 %v6516_v35  ;;  %v5860_v35 = vld [vmem:[%s6779_s13 + $0x34] sm:$0xf] }
  0x52   : > { %v1653_v19 = vpack.c.b16 %v1622_v6, %v1621_v5  ;;  %v705_v25 = vrot.slane %v704_v12, 4  ;;  %4512 = vmatpush.bf16.msra.mxu3 %v6524_v36  ;;  %v712_v48 = vshrl.u32 %v618_v32, 16  ;;  %v715_v49 = vshll.u32 %v618_v32, 16 }
  0x53   : > { %v695_v24 = vrot.slane %v694_v11, 4  ;;  %v2348_v29 = vrot.slane %v2347_v15, 4  ;;  %v2358_v30 = vrot.slane %v2357_v16, 4  ;;  %v721_v50 = vshll.u32 %v619_v34, 16  ;;  %3384 = vmatpush.bf16.msra.mxu1 %v6492_v37  ;;  %5034 = vmatpush.bf16.msra.mxu0 %v6532_v44  ;;  %v6455_v15 = vld [vmem:[%s6779_s13 + $0x18] sm:$0xff] }
  0x54   : > { %v725_v51 = vshrl.u32 %v619_v34, 16  ;;  %v2365_v52 = vshrl.u32 %v5856_v42, 16  ;;  %v2368_v53 = vshll.u32 %v5856_v42, 16  ;;  %v2374_v54 = vshll.u32 %v5857_v43, 16 }
  0x55   : > { %v700_v39 = vsel %vm6923_vm4, %v695_v24, %v6949_v60  ;;  %v2353_v46 = vsel %vm6923_vm4, %v2348_v29, %v6952_v1  ;;  %v2378_v55 = vshrl.u32 %v5857_v43, 16  ;;  %v1623_v58 = vunpack.c.l.b16 %v1470_v41  ;;  %v622_v24 = vld [vmem:[%s6779_s13 + $0x28] sm:$0xf]  ;;  %v5859_v29 = vld [vmem:[%s6779_s13 + $0x30] sm:$0xf] }
  0x56   : > { %v1098_v56 = vunpack.c.l.b16 %v700_v39  ;;  %v1624_v59 = vunpack.c.l.b16 %v1473_v45  ;;  %v2751_v60 = vunpack.c.l.b16 %v2353_v46  ;;  %v714_v63 = vrot.slane %v712_v48, 4 }
  0x57   : > { %v717_v0 = vrot.slane %v715_v49, 5  ;;  %v723_v1 = vrot.slane %v721_v50, 5  ;;  %v727_v2 = vrot.slane %v725_v51, 4  ;;  %v2370_v5 = vrot.slane %v2368_v53, 5 }
  0x58   : > { %v2376_v6 = vrot.slane %v2374_v54, 5  ;;  %v1654_v11 = vpack.c.b16 %v1624_v59, %v1623_v58  ;;  %v745_v39 = vshll.u32 %v622_v24, 16  ;;  %v2389_v41 = vshrl.u32 %v5859_v29, 16 }
  0x59   : > { %v718_v12 = vor.u32 %v717_v0, %v714_v63  ;;  %v728_v13 = vor.u32 %v727_v2, %v723_v1  ;;  %v2392_v42 = vshll.u32 %v5859_v29, 16  ;;  %v2398_v45 = vshll.u32 %v5860_v35, 16 }
  0x5a   : > { %v2402_v46 = vshrl.u32 %v5860_v35, 16  ;;  %v7012_v53 = vrot.slane %v745_v39, 5  ;;  %v2391_v58 = vrot.slane %v2389_v41, 4  ;;  %v5863_v41 = vld [vmem:[%s6779_s13 + $0x40] sm:$0xf] }
  0x5b   : > { %v729_v26 = vrot.slane %v728_v13, 4  ;;  %v2394_v59 = vrot.slane %v2392_v42, 5  ;;  %v7016_v63 = vrot.slane %v2398_v45, 5 }
  0x5c   : > { %502 = vmatmul.bf16.gmra.mxu1 %v6421_v17  ;;  %522 = vmatmul.bf16.gmra.mxu2 %v6425_v18  ;;  %v2360_v17 = vshll.u32 %v5855_v7, 16  ;;  %v1128_v18 = vpack.c.b16 %v1097_v4, %v1096_v3  ;;  %v1368_v3 = vld [vmem:[%s6779_s13 + $0x1c] sm:$0xf]  ;;  %v2367_v4 = vrot.slane %v2365_v52, 4  ;;  %v2380_v7 = vrot.slane %v2378_v55, 4 }
  0x5d   : > { %542 = vmatmul.bf16.gmra.mxu3 %v6429_v22  ;;  %v2781_v22 = vpack.c.b16 %v2750_v9, %v2749_v8  ;;  %v5858_v8 = vld [vmem:[%s6779_s13 + $0x2c] sm:$0x1]  ;;  %v1476_v14 = vrot.slane %v1368_v3, 5  ;;  %v2404_v0 = vrot.slane %v2402_v46, 4  ;;  %v5861_v3 = vld [vmem:[%s6779_s13 + $0x38] sm:$0x1] }
  0x5e   : > { %482 = vmatmul.bf16.gmra.mxu0 %v6417_v23  ;;  %v709_v23 = vrot.slane %v707_v10, 5  ;;  %v2362_v31 = vrot.slane %v2360_v17, 5  ;;  %v731_v10 = vshll.u32 %v620_v62, 16  ;;  %v1367_v17 = vld [vmem:[%s6779_s13 + $0x18] sm:$0xe]  ;;  %v2384_v20 = vshll.u32 %v5858_v8, 16 }
  0x5f   : > { %v5643_v27 = vrot.slane %v1367_v17, 9  ;;  %v1478_v28 = vrot.slane %v1476_v14, 4  ;;  %v1371_v62 = vld [vmem:[%s6779_s13 + $0x28] sm:$0xf]  ;;  %v2395_v8 = vor.u32 %v2394_v59, %v2391_v58  ;;  %v2405_v13 = vor.u32 %v2404_v0, %v7016_v63  ;;  %v624_v17 = vld [vmem:[%s6779_s13 + $0x30] sm:$0xf] }
  0x60   : > { %v710_v40 = vsel %vm6923_vm4, %v705_v25, %v709_v23  ;;  %v2363_v47 = vsel %vm6923_vm4, %v2358_v30, %v2362_v31  ;;  %v621_v23 = vld [vmem:[%s6779_s13 + $0x24] sm:$0xf]  ;;  %v719_v25 = vrot.slane %v718_v12, 4  ;;  %v2386_v34 = vrot.slane %v2384_v20, 5  ;;  %v1372_v12 = vld [vmem:[%s6779_s13 + $0x2c] sm:$0x1] }
  0x61   : > { %v1099_v57 = vunpack.c.l.b16 %v710_v40  ;;  %v2752_v61 = vunpack.c.l.b16 %v2363_v47  ;;  %v736_v36 = vshrl.u32 %v621_v23, 16  ;;  %v739_v37 = vshll.u32 %v621_v23, 16  ;;  %v6491_v46 = vld [vmem:[%s8222_s1 + $0x168] sm:$0xff] }
  0x62   : > { %v749_v40 = vshrl.u32 %v622_v24, 16  ;;  %v724_v43 = vsel %vm6923_vm4, %v719_v25, %v723_v1  ;;  %v1477_v47 = vsel %vm6930_vm5, %v5643_v27, %v1476_v14  ;;  %v2408_v14 = vshll.u32 %v5861_v3, 16  ;;  %3385 = vmatpush.bf16.msra.mxu1 %v6491_v46 }
  0x63   : > { %v1129_v9 = vpack.c.b16 %v1099_v57, %v1098_v56  ;;  %v2782_v16 = vpack.c.b16 %v2752_v61, %v2751_v60  ;;  %v738_v51 = vrot.slane %v736_v36, 4  ;;  %v741_v52 = vrot.slane %v739_v37, 5  ;;  %v623_v57 = vld [vmem:[%s6779_s13 + $0x2c] sm:$0x1]  ;;  %v5862_v36 = vld [vmem:[%s6779_s13 + $0x3c] sm:$0xf] }
  0x64   : > { %v751_v54 = vrot.slane %v749_v40, 4  ;;  %v1100_v55 = vunpack.c.l.b16 %v724_v43  ;;  %v1625_v60 = vunpack.c.l.b16 %v1477_v47  ;;  %v1486_v24 = vrot.slane %v1372_v12, 5  ;;  %v6457_v12 = vld [vmem:[%s6779_s13 + $0x30] sm:$0xff] }
  0x65   : > { %v2396_v25 = vrot.slane %v2395_v8, 4  ;;  %v2410_v27 = vrot.slane %v2408_v14, 5  ;;  %v763_v29 = vshll.u32 %v624_v17, 16 }
  0x67   : > { %v2401_v42 = vsel %vm6923_vm4, %v2396_v25, %v7016_v63  ;;  %v765_v45 = vrot.slane %v763_v29, 5 }
  0x68   : > { %v2755_v59 = vunpack.c.l.b16 %v2401_v42 }
  0x6c   : > { %1216 = vmatmul.bf16.vlgmr.msrb.gmra.mxu1 %v1128_v18  ;;  %1741 = vmatmul.bf16.vlgmr.msrb.gmra.mxu2 %v1653_v19  ;;  %v2371_v18 = vor.u32 %v2370_v5, %v2367_v4  ;;  %v2381_v19 = vor.u32 %v2380_v7, %v2376_v6  ;;  %v742_v4 = vor.u32 %v741_v52, %v738_v51  ;;  %v1483_v7 = vrot.slane %v1371_v62, 5  ;;  %v626_v51 = vld [vmem:[%s6779_s13 + $0x38] sm:$0x1]  ;;  %v1374_v62 = vld [vmem:[%s6779_s13 + $0x34] sm:$0xf] }
  0x6d   : > { %2123 = vmatmul.bf16.vlgmr.msrb.gmra.mxu3 %v6454_v21  ;;  %v1369_v21 = vld [vmem:[%s6779_s13 + $0x20] sm:$0x1]  ;;  %v752_v5 = vor.u32 %v751_v54, %v7012_v53  ;;  %v2422_v52 = vshll.u32 %v5863_v41, 16  ;;  %v6531_v54 = vld [vmem:[%s8222_s1 + $0x228] sm:$0xff]  ;;  %v779_v0 = vshll.u32 %v626_v51, 16 }
  0x6e   : > { %2869 = vmatmul.bf16.vlgmr.msrb.gmra.mxu0 %v2781_v22  ;;  %v733_v22 = vrot.slane %v731_v10, 5  ;;  %v1479_v30 = vrot.slane %v1369_v21, 5  ;;  %v2372_v31 = vrot.slane %v2371_v18, 4  ;;  %v2382_v32 = vrot.slane %v2381_v19, 4  ;;  %v625_v21 = vld [vmem:[%s6779_s13 + $0x34] sm:$0xf] }
  0x6f   : > { %v743_v18 = vrot.slane %v742_v4, 4  ;;  %v753_v19 = vrot.slane %v752_v5, 4  ;;  %v1485_v23 = vrot.slane %v1483_v7, 4  ;;  %5035 = vmatpush.bf16.msra.mxu0 %v6531_v54  ;;  %v2424_v3 = vrot.slane %v2422_v52, 5  ;;  %v629_v51 = vld [vmem:[%s6779_s13 + $0x44] sm:$0x1] }
  0x70   : > { %v734_v44 = vsel %vm6923_vm4, %v729_v26, %v733_v22  ;;  %v1480_v48 = vsel %vm6930_vm5, %v1478_v28, %v1479_v30  ;;  %v2377_v49 = vsel %vm6923_vm4, %v2372_v31, %v2376_v6  ;;  %v2387_v50 = vsel %vm6923_vm4, %v2382_v32, %v2386_v34  ;;  %v6515_v32 = vld [vmem:[%s8222_s1 + $0x1a8] sm:$0xff]  ;;  %v1377_v54 = vld [vmem:[%s6779_s13 + $0x40] sm:$0xf] }
  0x71   : > { %v1101_v56 = vunpack.c.l.b16 %v734_v44  ;;  %v1626_v61 = vunpack.c.l.b16 %v1480_v48  ;;  %v2753_v1 = vunpack.c.l.b16 %v2377_v49  ;;  %v2754_v2 = vunpack.c.l.b16 %v2387_v50  ;;  %v6523_v34 = vld [vmem:[%s8222_s1 + $0x1e8] sm:$0xff]  ;;  %3767 = vmatpush.bf16.msra.mxu2 %v6515_v32 }
  0x72   : > { %v755_v6 = vshll.u32 %v623_v57, 16  ;;  %v2406_v26 = vrot.slane %v2405_v13, 4  ;;  %v760_v28 = vshrl.u32 %v624_v17, 16  ;;  %v769_v30 = vshll.u32 %v625_v21, 16  ;;  %4513 = vmatpush.bf16.msra.mxu3 %v6523_v34 }
  0x73   : > { %v1655_v10 = vpack.c.b16 %v1626_v61, %v1625_v60  ;;  %v773_v31 = vshrl.u32 %v625_v21, 16  ;;  %v748_v35 = vsel %vm6923_vm4, %v743_v18, %v7012_v53  ;;  %v1487_v40 = vsel %vm6930_vm5, %v1485_v23, %v1486_v24  ;;  %v628_v23 = vld [vmem:[%s6779_s13 + $0x40] sm:$0xf] }
  0x74   : > { %v757_v20 = vrot.slane %v755_v6, 5  ;;  %v2411_v43 = vsel %vm6923_vm4, %v2406_v26, %v2410_v27  ;;  %v762_v44 = vrot.slane %v760_v28, 4  ;;  %v7051_v47 = vrot.slane %v769_v30, 5  ;;  %v5864_v6 = vld [vmem:[%s6779_s13 + $0x44] sm:$0x1] }
  0x75   : > { %v775_v48 = vrot.slane %v773_v31, 4  ;;  %v2413_v49 = vshrl.u32 %v5862_v36, 16  ;;  %v2416_v50 = vshll.u32 %v5862_v36, 16  ;;  %v2426_v53 = vshrl.u32 %v5863_v41, 16  ;;  %v5865_v27 = vld [vmem:[%s6779_s13 + $0x48] sm:$0xf] }
  0x76   : > { %v758_v37 = vsel %vm6923_vm4, %v753_v19, %v757_v20  ;;  %v1628_v58 = vunpack.c.l.b16 %v1487_v40  ;;  %v2756_v60 = vunpack.c.l.b16 %v2411_v43  ;;  %v766_v61 = vor.u32 %v765_v45, %v762_v44  ;;  %v5866_v28 = vld [vmem:[%s6779_s13 + $0x4c] sm:$0xf] }
  0x77   : > { %v776_v63 = vor.u32 %v775_v48, %v7051_v47  ;;  %v2428_v4 = vrot.slane %v2426_v53, 4  ;;  %v1490_v5 = vrot.slane %v1374_v62, 5  ;;  %v2432_v18 = vshll.u32 %v5864_v6, 16 }
  0x78   : > { %v767_v13 = vrot.slane %v766_v61, 4  ;;  %v793_v36 = vshll.u32 %v628_v23, 16  ;;  %v2440_v40 = vshll.u32 %v5865_v27, 16  ;;  %v2446_v41 = vshll.u32 %v5866_v28, 16  ;;  %v5867_v61 = vld [vmem:[%s6779_s13 + $0x50] sm:$0x1] }
  0x79   : > { %v777_v14 = vrot.slane %v776_v63, 4  ;;  %v2429_v17 = vor.u32 %v2428_v4, %v2424_v3  ;;  %v1492_v20 = vrot.slane %v1490_v5, 4  ;;  %v2434_v30 = vrot.slane %v2432_v18, 5 }
  0x7a   : > { %v772_v24 = vsel %vm6923_vm4, %v767_v13, %v7051_v47  ;;  %v2450_v42 = vshrl.u32 %v5866_v28, 16  ;;  %v7081_v52 = vrot.slane %v793_v36, 5  ;;  %v5868_v28 = vld [vmem:[%s6779_s13 + $0x54] sm:$0xf] }
  0x7b   : > { %v2430_v29 = vrot.slane %v2429_v17, 4  ;;  %v1104_v43 = vunpack.c.l.b16 %v772_v24  ;;  %v6514_v24 = vld [vmem:[%s8222_s1 + $0x1a0] sm:$0xff] }
  0x7c   : > { %1221 = vmatmul.bf16.gmra.mxu1 %v1129_v9  ;;  %1746 = vmatmul.bf16.gmra.mxu2 %v1654_v11  ;;  %v1130_v9 = vpack.c.b16 %v1101_v56, %v1100_v55  ;;  %v1370_v11 = vld [vmem:[%s6779_s13 + $0x24] sm:$0xe]  ;;  %v1102_v55 = vunpack.c.l.b16 %v748_v35  ;;  %v1103_v56 = vunpack.c.l.b16 %v758_v37  ;;  %v797_v37 = vshrl.u32 %v628_v23, 16  ;;  %v631_v23 = vld [vmem:[%s6779_s13 + $0x4c] sm:$0xf] }
  0x7d   : > { %2128 = vmatmul.bf16.gmra.mxu3 %v6455_v15  ;;  %v6456_v15 = vld [vmem:[%s6779_s13 + $0x24] sm:$0xff]  ;;  %v5644_v22 = vrot.slane %v1370_v11, 9  ;;  %v1375_v11 = vld [vmem:[%s6779_s13 + $0x38] sm:$0x1]  ;;  %v2435_v46 = vsel %vm6923_vm4, %v2430_v29, %v2434_v30  ;;  %3768 = vmatpush.bf16.msra.mxu2 %v6514_v24 }
  0x7e   : > { %2874 = vmatmul.bf16.gmra.mxu0 %v2782_v16  ;;  %v2783_v16 = vpack.c.b16 %v2754_v2, %v2753_v1  ;;  %v2415_v1 = vrot.slane %v2413_v49, 4  ;;  %v2418_v2 = vrot.slane %v2416_v50, 5  ;;  %v1493_v21 = vrot.slane %v1375_v11, 5  ;;  %v5869_v29 = vld [vmem:[%s6779_s13 + $0x58] sm:$0xf] }
  0x7f   : > { %v1484_v39 = vsel %vm6930_vm5, %v5644_v22, %v1483_v7  ;;  %v1131_v7 = vpack.c.b16 %v1103_v56, %v1102_v55  ;;  %v627_v22 = vld [vmem:[%s6779_s13 + $0x3c] sm:$0xf]  ;;  %v799_v53 = vrot.slane %v797_v37, 4  ;;  %v2442_v56 = vrot.slane %v2440_v40, 5 }
  0x80   : > { %v1627_v57 = vunpack.c.l.b16 %v1484_v39  ;;  %v784_v31 = vshrl.u32 %v627_v22, 16  ;;  %v787_v32 = vshll.u32 %v627_v22, 16  ;;  %v1494_v35 = vsel %vm6930_vm5, %v1492_v20, %v1493_v21  ;;  %v630_v22 = vld [vmem:[%s6779_s13 + $0x48] sm:$0xf] }
  0x81   : > { %v2437_v39 = vshrl.u32 %v5865_v27, 16  ;;  %v1630_v50 = vunpack.c.l.b16 %v1494_v35  ;;  %v811_v35 = vshll.u32 %v630_v22, 16  ;;  %v817_v40 = vshll.u32 %v631_v23, 16 }
  0x82   : > { %v1656_v8 = vpack.c.b16 %v1628_v58, %v1627_v57  ;;  %v786_v47 = vrot.slane %v784_v31, 4  ;;  %v789_v48 = vrot.slane %v787_v32, 5  ;;  %v7084_v57 = vrot.slane %v2446_v41, 5 }
  0x83   : > { %v2439_v55 = vrot.slane %v2437_v39, 4  ;;  %v2452_v58 = vrot.slane %v2450_v42, 4  ;;  %v821_v41 = vshrl.u32 %v631_v23, 16  ;;  %v6490_v42 = vld [vmem:[%s8222_s1 + $0x160] sm:$0xff] }
  0x84   : > { %v790_v62 = vor.u32 %v789_v48, %v786_v47  ;;  %v2474_v47 = vshrl.u32 %v5869_v29, 16  ;;  %3386 = vmatpush.bf16.msra.mxu1 %v6490_v42  ;;  %v5871_v42 = vld [vmem:[%s6779_s13 + $0x60] sm:$0xf] }
  0x85   : > { %v2443_v6 = vor.u32 %v2442_v56, %v2439_v55  ;;  %v813_v55 = vrot.slane %v811_v35, 5 }
  0x86   : > { %v791_v13 = vrot.slane %v790_v62, 4  ;;  %v5870_v62 = vld [vmem:[%s6779_s13 + $0x5c] sm:$0x1] }
  0x8c   : > { %1226 = vmatmul.bf16.gmra.mxu1 %v1130_v9  ;;  %1751 = vmatmul.bf16.gmra.mxu2 %v1655_v10  ;;  %v2784_v9 = vpack.c.b16 %v2756_v60, %v2755_v59  ;;  %v1373_v10 = vld [vmem:[%s6779_s13 + $0x30] sm:$0xe]  ;;  %v2758_v60 = vunpack.c.l.b16 %v2435_v46  ;;  %v2470_v46 = vshll.u32 %v5869_v29, 16 }
  0x8d   : > { %2133 = vmatmul.bf16.gmra.mxu3 %v6456_v15  ;;  %v781_v15 = vrot.slane %v779_v0, 5  ;;  %v5645_v19 = vrot.slane %v1373_v10, 9  ;;  %v800_v0 = vor.u32 %v799_v53, %v7081_v52  ;;  %v6458_v10 = vld [vmem:[%s6779_s13 + $0x3c] sm:$0xff] }
  0x8e   : > { %2879 = vmatmul.bf16.gmra.mxu0 %v2783_v16  ;;  %v2419_v16 = vor.u32 %v2418_v2, %v2415_v1  ;;  %v803_v1 = vshll.u32 %v629_v51, 16  ;;  %v1376_v2 = vld [vmem:[%s6779_s13 + $0x3c] sm:$0xe]  ;;  %v6530_v51 = vld [vmem:[%s8222_s1 + $0x220] sm:$0xff] }
  0x8f   : > { %v782_v25 = vsel %vm6923_vm4, %v777_v14, %v781_v15  ;;  %v1491_v34 = vsel %vm6930_vm5, %v5645_v19, %v1490_v5  ;;  %v1378_v5 = vld [vmem:[%s6779_s13 + $0x44] sm:$0x1]  ;;  %v5646_v14 = vrot.slane %v1376_v2, 9  ;;  %v801_v15 = vrot.slane %v800_v0, 4  ;;  %5036 = vmatpush.bf16.msra.mxu0 %v6530_v51 }
  0x90   : > { %v2420_v26 = vrot.slane %v2419_v16, 4  ;;  %v1105_v44 = vunpack.c.l.b16 %v782_v25  ;;  %v1629_v49 = vunpack.c.l.b16 %v1491_v34  ;;  %v805_v16 = vrot.slane %v803_v1, 5  ;;  %v6522_v25 = vld [vmem:[%s8222_s1 + $0x1e0] sm:$0xff] }
  0x91   : > { %v1500_v18 = vrot.slane %v1378_v5, 5  ;;  %v2444_v19 = vrot.slane %v2443_v6, 4  ;;  %v808_v34 = vshrl.u32 %v630_v22, 16  ;;  %4514 = vmatpush.bf16.msra.mxu3 %v6522_v25  ;;  %v7139_v1 = vrot.slane %v2470_v46, 5  ;;  %v633_v22 = vld [vmem:[%s6779_s13 + $0x54] sm:$0xf] }
  0x92   : > { %v2425_v45 = vsel %vm6923_vm4, %v2420_v26, %v2424_v3  ;;  %v1132_v63 = vpack.c.b16 %v1105_v44, %v1104_v43  ;;  %v1497_v3 = vrot.slane %v1377_v54, 5  ;;  %v1657_v4 = vpack.c.b16 %v1630_v50, %v1629_v49 }
  0x93   : > { %v2757_v59 = vunpack.c.l.b16 %v2425_v45  ;;  %v796_v26 = vsel %vm6923_vm4, %v791_v13, %v7081_v52  ;;  %v806_v31 = vsel %vm6923_vm4, %v801_v15, %v805_v16  ;;  %v2449_v37 = vsel %vm6923_vm4, %v2444_v19, %v7084_v57  ;;  %v6459_v16 = vld [vmem:[%s6779_s13 + $0x48] sm:$0xff] }
  0x94   : > { %v1499_v17 = vrot.slane %v1497_v3, 4  ;;  %v1498_v27 = vsel %vm6930_vm5, %v5646_v14, %v1497_v3  ;;  %v2461_v44 = vshrl.u32 %v5868_v28, 16  ;;  %v2464_v45 = vshll.u32 %v5868_v28, 16 }
  0x95   : > { %v2785_v11 = vpack.c.b16 %v2758_v60, %v2757_v59  ;;  %v1106_v49 = vunpack.c.l.b16 %v796_v26  ;;  %v1631_v50 = vunpack.c.l.b16 %v1498_v27  ;;  %v1107_v52 = vunpack.c.l.b16 %v806_v31  ;;  %v634_v31 = vld [vmem:[%s6779_s13 + $0x58] sm:$0xf] }
  0x96   : > { %v1501_v32 = vsel %vm6930_vm5, %v1499_v17, %v1500_v18  ;;  %v810_v54 = vrot.slane %v808_v34, 4  ;;  %v2759_v56 = vunpack.c.l.b16 %v2449_v37  ;;  %v7135_v59 = vrot.slane %v817_v40, 5  ;;  %v1381_v18 = vld [vmem:[%s6779_s13 + $0x50] sm:$0x1] }
  0x97   : > { %v1632_v53 = vunpack.c.l.b16 %v1501_v32  ;;  %v823_v60 = vrot.slane %v821_v41, 4  ;;  %v2466_v0 = vrot.slane %v2464_v45, 5  ;;  %v2476_v2 = vrot.slane %v2474_v47, 4 }
  0x98   : > { %v814_v5 = vor.u32 %v813_v55, %v810_v54  ;;  %v2480_v14 = vshll.u32 %v5870_v62, 16  ;;  %v1507_v28 = vrot.slane %v1381_v18, 5  ;;  %v832_v35 = vshrl.u32 %v633_v22, 16 }
  0x99   : > { %v835_v37 = vshll.u32 %v633_v22, 16  ;;  %v841_v40 = vshll.u32 %v634_v31, 16  ;;  %v845_v41 = vshrl.u32 %v634_v31, 16 }
  0x9a   : > { %v815_v23 = vrot.slane %v814_v5, 4  ;;  %v2482_v29 = vrot.slane %v2480_v14, 5  ;;  %v834_v54 = vrot.slane %v832_v35, 4  ;;  %v1383_v5 = vld [vmem:[%s6779_s13 + $0x58] sm:$0xf] }
  0x9b   : > { %v837_v55 = vrot.slane %v835_v37, 5  ;;  %v847_v62 = vrot.slane %v845_v41, 4 }
  0x9c   : > { %1231 = vmatmul.bf16.gmra.mxu1 %v1131_v7  ;;  %1756 = vmatmul.bf16.gmra.mxu2 %v1656_v8  ;;  %v2453_v7 = vor.u32 %v2452_v58, %v7084_v57  ;;  %v2456_v8 = vshll.u32 %v5867_v61, 16  ;;  %v632_v58 = vld [vmem:[%s6779_s13 + $0x50] sm:$0x1]  ;;  %v1380_v61 = vld [vmem:[%s6779_s13 + $0x4c] sm:$0xf]  ;;  %v820_v46 = vsel %vm6923_vm4, %v815_v23, %v7135_v59  ;;  %v1511_v23 = vrot.slane %v1383_v5, 5 }
  0x9d   : > { %2138 = vmatmul.bf16.gmra.mxu3 %v6457_v12  ;;  %v827_v6 = vshll.u32 %v632_v58, 16  ;;  %v1504_v13 = vrot.slane %v1380_v61, 5  ;;  %v2488_v58 = vshll.u32 %v5871_v42, 16  ;;  %v7180_v61 = vrot.slane %v841_v40, 5 }
  0x9e   : > { %2884 = vmatmul.bf16.gmra.mxu0 %v2784_v9  ;;  %v2454_v20 = vrot.slane %v2453_v7, 4  ;;  %v2458_v21 = vrot.slane %v2456_v8, 5  ;;  %v1658_v8 = vpack.c.b16 %v1632_v53, %v1631_v50 }
  0x9f   : > { %v829_v24 = vrot.slane %v827_v6, 5  ;;  %v1506_v27 = vrot.slane %v1504_v13, 4 }
  0xa0   : > { %v2459_v39 = vsel %vm6923_vm4, %v2454_v20, %v2458_v21  ;;  %v2477_v20 = vor.u32 %v2476_v2, %v7139_v1 }
  0xa1   : > { %v2760_v57 = vunpack.c.l.b16 %v2459_v39  ;;  %v1508_v50 = vsel %vm6930_vm5, %v1506_v27, %v1507_v28  ;;  %v1384_v27 = vld [vmem:[%s6779_s13 + $0x5c] sm:$0x1] }
  0xa2   : > { %v2478_v34 = vrot.slane %v2477_v20, 4  ;;  %v1634_v2 = vunpack.c.l.b16 %v1508_v50  ;;  %v848_v20 = vor.u32 %v847_v62, %v7180_v61  ;;  %v637_v50 = vld [vmem:[%s6779_s13 + $0x64] sm:$0xf] }
  0xa3   : > { %v2786_v17 = vpack.c.b16 %v2760_v57, %v2759_v56  ;;  %v2485_v57 = vshrl.u32 %v5871_v42, 16  ;;  %v869_v5 = vshrl.u32 %v637_v50, 16 }
  0xa4   : > { %v2483_v53 = vsel %vm6923_vm4, %v2478_v34, %v2482_v29  ;;  %v6460_v29 = vld [vmem:[%s6779_s13 + $0x54] sm:$0xff]  ;;  %v849_v42 = vrot.slane %v848_v20, 4 }
  0xa5   : > { %v2487_v14 = vrot.slane %v2485_v57, 4  ;;  %v6513_v57 = vld [vmem:[%s8222_s1 + $0x198] sm:$0xff] }
  0xa6   : > { %3769 = vmatpush.bf16.msra.mxu2 %v6513_v57 }
  0xa9   : > { %v7091_v9 = vpop.f32.mrf.mxu1 }
  0xab   : > { %v7094_v12 = vpop.f32.mrf.mxu0 }
  0xac   : > { %1236 = vmatmul.bf16.gmra.mxu1 %v1132_v63  ;;  %1761 = vmatmul.bf16.gmra.mxu2 %v1657_v4  ;;  %v2463_v63 = vrot.slane %v2461_v44, 4  ;;  %v1133_v4 = vpack.c.b16 %v1107_v52, %v1106_v49  ;;  %v5872_v44 = vld [vmem:[%s6779_s13 + $0x64] sm:$0xf] }
  0xad   : > { %2143 = vmatmul.bf16.gmra.mxu3 %v6458_v10  ;;  %v824_v10 = vor.u32 %v823_v60, %v7135_v59  ;;  %v2494_v59 = vshll.u32 %v5872_v44, 16  ;;  %v2498_v60 = vshrl.u32 %v5872_v44, 16 }
  0xae   : > { %2889 = vmatmul.bf16.gmra.mxu0 %v2785_v11  ;;  %v1379_v11 = vld [vmem:[%s6779_s13 + $0x48] sm:$0xe]  ;;  %v2467_v19 = vor.u32 %v2466_v0, %v2463_v63  ;;  %v1108_v63 = vunpack.c.l.b16 %v820_v46  ;;  %v1513_v46 = vrot.slane %v1511_v23, 4 }
  0xaf   : > { %v7111_v30 = vpop.f32.mrf.mxu2  ;;  %v5647_v25 = vrot.slane %v1379_v11, 9  ;;  %v825_v26 = vrot.slane %v824_v10, 4  ;;  %v838_v10 = vor.u32 %v837_v55, %v834_v54  ;;  %v1382_v11 = vld [vmem:[%s6779_s13 + $0x54] sm:$0xe]  ;;  %v2500_v18 = vrot.slane %v2498_v60, 4 }
  0xb0   : > { %v7117_v36 = vpop.f32.mrf.mxu3  ;;  %v2468_v32 = vrot.slane %v2467_v19, 4  ;;  %v5648_v34 = vrot.slane %v1382_v11, 9 }
  0xb1   : > { %v7127_v43 = vpop.f32.mrf.mxu1  ;;  %v830_v47 = vsel %vm6923_vm4, %v825_v26, %v829_v24  ;;  %v1505_v49 = vsel %vm6930_vm5, %v5647_v25, %v1504_v13  ;;  %v5873_v13 = vld [vmem:[%s6779_s13 + $0x68] sm:$0x1] }
  0xb2   : > { %v2473_v52 = vsel %vm6923_vm4, %v2468_v32, %v7139_v1  ;;  %v1109_v0 = vunpack.c.l.b16 %v830_v47  ;;  %v1633_v1 = vunpack.c.l.b16 %v1505_v49  ;;  %v839_v32 = vrot.slane %v838_v10, 4  ;;  %v636_v49 = vld [vmem:[%s6779_s13 + $0x60] sm:$0xf] }
  0xb3   : > { %v7129_v48 = vpop.f32.mrf.mxu0  ;;  %v2761_v6 = vunpack.c.l.b16 %v2473_v52  ;;  %v2504_v35 = vshll.u32 %v5873_v13, 16  ;;  %v1514_v47 = vrot.slane %v1384_v27, 5  ;;  %v5874_v52 = vld [vmem:[%s6779_s13 + $0x6c] sm:$0xf]  ;;  %v1512_v54 = vsel %vm6930_vm5, %v5648_v34, %v1511_v23  ;;  %v6489_v27 = vld [vmem:[%s8222_s1 + $0x158] sm:$0xff] }
  0xb4   : > { %v1134_v25 = vpack.c.b16 %v1109_v0, %v1108_v63  ;;  %v1659_v26 = vpack.c.b16 %v1634_v2, %v1633_v1  ;;  %v856_v63 = vshrl.u32 %v636_v49, 16  ;;  %v859_v0 = vshll.u32 %v636_v49, 16  ;;  %v638_v34 = vld [vmem:[%s6779_s13 + $0x68] sm:$0x1]  ;;  %3387 = vmatpush.bf16.msra.mxu1 %v6489_v27 }
  0xb5   : > { %v2506_v55 = vrot.slane %v2504_v35, 5  ;;  %v1515_v2 = vsel %vm6930_vm5, %v1513_v46, %v1514_v47  ;;  %v2512_v10 = vshll.u32 %v5874_v52, 16  ;;  %v875_v57 = vshll.u32 %v638_v34, 16 }
  0xb7   : > { %v7141_v3 = vpop.f32.mrf.mxu2 }
  0xb8   : > { %v7143_v7 = vpop.f32.mrf.mxu3 }
  0xb9   : > { %v7147_v15 = vpop.f32.mrf.mxu1 }
  0xbb   : > { %v7152_v21 = vpop.f32.mrf.mxu0 }
  0xbc   : > { %1241 = vmatmul.bf16.gmra.mxu1 %v1133_v4  ;;  %1766 = vmatmul.bf16.gmra.mxu2 %v1658_v8  ;;  %v635_v4 = vld [vmem:[%s6779_s13 + $0x5c] sm:$0x1]  ;;  %v2762_v8 = vunpack.c.l.b16 %v2483_v53  ;;  %v844_v53 = vsel %vm6923_vm4, %v839_v32, %v7180_v61  ;;  %v1636_v32 = vunpack.c.l.b16 %v1515_v2 }
  0xbd   : > { %2148 = vmatmul.bf16.gmra.mxu3 %v6459_v16  ;;  %v2490_v16 = vrot.slane %v2488_v58, 5  ;;  %v851_v22 = vshll.u32 %v635_v4, 16  ;;  %v5875_v58 = vld [vmem:[%s6779_s13 + $0x70] sm:$0xf]  ;;  %v865_v4 = vshll.u32 %v637_v50, 16 }
  0xbe   : > { %2894 = vmatmul.bf16.gmra.mxu0 %v2786_v17  ;;  %v7186_v17 = vrot.slane %v2494_v59, 5  ;;  %v2787_v31 = vpack.c.b16 %v2762_v8, %v2761_v6  ;;  %v6521_v59 = vld [vmem:[%s8222_s1 + $0x1d8] sm:$0xff]  ;;  %v2509_v8 = vshrl.u32 %v5874_v52, 16  ;;  %v2518_v11 = vshll.u32 %v5875_v58, 16  ;;  %v5876_v50 = vld [vmem:[%s6779_s13 + $0x74] sm:$0x1] }
  0xbf   : > { %v7156_v39 = vpop.f32.mrf.mxu2  ;;  %v2491_v40 = vor.u32 %v2490_v16, %v2487_v14  ;;  %v853_v44 = vrot.slane %v851_v22, 5  ;;  %4515 = vmatpush.bf16.msra.mxu3 %v6521_v59  ;;  %v2522_v13 = vshrl.u32 %v5875_v58, 16  ;;  %v1110_v16 = vunpack.c.l.b16 %v844_v53 }
  0xc0   : > { %v7160_v45 = vpop.f32.mrf.mxu3  ;;  %v2501_v41 = vor.u32 %v2500_v18, %v7186_v17  ;;  %v1635_v18 = vunpack.c.l.b16 %v1512_v54  ;;  %v7239_v35 = vrot.slane %v865_v4, 5  ;;  %v6461_v4 = vld [vmem:[%s6779_s13 + $0x60] sm:$0xff] }
  0xc1   : > { %v7171_v51 = vpop.f32.mrf.mxu1  ;;  %v2492_v60 = vrot.slane %v2491_v40, 4  ;;  %v854_v61 = vsel %vm6923_vm4, %v849_v42, %v853_v44  ;;  %v1386_v40 = vld [vmem:[%s6779_s13 + $0x64] sm:$0xf]  ;;  %v2514_v42 = vrot.slane %v2512_v10, 5  ;;  %v7242_v44 = vrot.slane %v2518_v11, 5 }
  0xc2   : > { %v2502_v62 = vrot.slane %v2501_v41, 4  ;;  %v2511_v41 = vrot.slane %v2509_v8, 4  ;;  %v2524_v46 = vrot.slane %v2522_v13, 4  ;;  %v1518_v58 = vrot.slane %v1386_v40, 5  ;;  %v1387_v8 = vld [vmem:[%s6779_s13 + $0x68] sm:$0x1] }
  0xc3   : > { %v7178_v56 = vpop.f32.mrf.mxu0  ;;  %v2497_v22 = vsel %vm6923_vm4, %v2492_v60, %v7186_v17  ;;  %v871_v17 = vrot.slane %v869_v5, 4  ;;  %v1660_v60 = vpack.c.b16 %v1636_v32, %v1635_v18  ;;  %v639_v13 = vld [vmem:[%s6779_s13 + $0x6c] sm:$0xf]  ;;  %v1521_v18 = vrot.slane %v1387_v8, 5 }
  0xc4   : > { %v2507_v23 = vsel %vm6923_vm4, %v2502_v62, %v2506_v55  ;;  %v2763_v47 = vunpack.c.l.b16 %v2497_v22  ;;  %v1385_v62 = vld [vmem:[%s6779_s13 + $0x60] sm:$0xe]  ;;  %v880_v32 = vshrl.u32 %v639_v13, 16  ;;  %v883_v34 = vshll.u32 %v639_v13, 16 }
  0xc5   : > { %v2764_v49 = vunpack.c.l.b16 %v2507_v23  ;;  %v872_v55 = vor.u32 %v871_v17, %v7239_v35  ;;  %v877_v23 = vrot.slane %v875_v57, 5 }
  0xc7   : > { %v7188_v19 = vpop.f32.mrf.mxu2  ;;  %v2788_v5 = vpack.c.b16 %v2764_v49, %v2763_v47  ;;  %v873_v22 = vrot.slane %v872_v55, 4  ;;  %v5877_v47 = vld [vmem:[%s6779_s13 + $0x78] sm:$0xf]  ;;  %v5878_v49 = vld [vmem:[%s6779_s13 + $0x7c] sm:$0xf] }
  0xc8   : > { %v7191_v24 = vpop.f32.mrf.mxu3  ;;  %v2542_v8 = vshll.u32 %v5878_v49, 16 }
  0xc9   : > { %8230 = vst [vmem:[#allocation4_spill] sm:$0xff] %v7191_v24  ;;  %v7194_v28 = vpop.f32.mrf.mxu1 }
  0xcb   : > { %v7197_v37 = vpop.f32.mrf.mxu0 }
  0xcc   : > { %1246 = vmatmul.bf16.gmra.mxu1 %v1134_v25  ;;  %1771 = vmatmul.bf16.gmra.mxu2 %v1659_v26  ;;  %v858_v25 = vrot.slane %v856_v63, 4  ;;  %v861_v26 = vrot.slane %v859_v0, 5  ;;  %v2515_v63 = vor.u32 %v2514_v42, %v2511_v41  ;;  %v2525_v0 = vor.u32 %v2524_v46, %v7242_v44 }
  0xcd   : > { %2153 = vmatmul.bf16.gmra.mxu3 %v6460_v29  ;;  %v6529_v29 = vld [vmem:[%s8222_s1 + $0x218] sm:$0xff] }
  0xce   : > { %2899 = vmatmul.bf16.gmra.mxu0 %v2787_v31  ;;  %v1111_v31 = vunpack.c.l.b16 %v854_v61  ;;  %v862_v52 = vor.u32 %v861_v26, %v858_v25  ;;  %v2528_v61 = vshll.u32 %v5876_v50, 16  ;;  %v5649_v25 = vrot.slane %v1385_v62, 9 }
  0xcf   : > { %v7215_v1 = vpop.f32.mrf.mxu2  ;;  %5037 = vmatpush.bf16.msra.mxu0 %v6529_v29  ;;  %v1520_v26 = vrot.slane %v1518_v58, 4  ;;  %v2516_v27 = vrot.slane %v2515_v63, 4  ;;  %v2526_v29 = vrot.slane %v2525_v0, 4 }
  0xd0   : > { %v7221_v6 = vpop.f32.mrf.mxu3  ;;  %v1135_v54 = vpack.c.b16 %v1111_v31, %v1110_v16  ;;  %v863_v11 = vrot.slane %v862_v52, 4  ;;  %v640_v16 = vld [vmem:[%s6779_s13 + $0x70] sm:$0xf]  ;;  %v2530_v31 = vrot.slane %v2528_v61, 5  ;;  %v1519_v46 = vsel %vm6930_vm5, %v5649_v25, %v1518_v58  ;;  %v641_v61 = vld [vmem:[%s6779_s13 + $0x74] sm:$0x1] }
  0xd1   : > { %8231 = vst [vmem:[#allocation5_spill] sm:$0xff] %v7221_v6  ;;  %v7223_v14 = vpop.f32.mrf.mxu1  ;;  %v889_v17 = vshll.u32 %v640_v16, 16  ;;  %v893_v40 = vshrl.u32 %v640_v16, 16  ;;  %v878_v52 = vsel %vm6923_vm4, %v873_v22, %v877_v23  ;;  %v2521_v55 = vsel %vm6923_vm4, %v2516_v27, %v7242_v44 }
  0xd2   : > { %v868_v42 = vsel %vm6923_vm4, %v863_v11, %v7239_v35  ;;  %v2531_v35 = vsel %vm6923_vm4, %v2526_v29, %v2530_v31  ;;  %v882_v58 = vrot.slane %v880_v32, 4  ;;  %v2546_v11 = vshrl.u32 %v5878_v49, 16  ;;  %v1389_v29 = vld [vmem:[%s6779_s13 + $0x70] sm:$0xf]  ;;  %v1388_v31 = vld [vmem:[%s6779_s13 + $0x6c] sm:$0xe] }
  0xd3   : > { %v7225_v20 = vpop.f32.mrf.mxu0  ;;  %v7282_v62 = vrot.slane %v889_v17, 5  ;;  %v895_v63 = vrot.slane %v893_v40, 4  ;;  %v1112_v44 = vunpack.c.l.b16 %v868_v42  ;;  %v1637_v13 = vunpack.c.l.b16 %v1519_v46  ;;  %v5879_v46 = vld [vmem:[%s6779_s13 + $0x80] sm:$0x1] }
  0xd4   : > { %v1113_v16 = vunpack.c.l.b16 %v878_v52  ;;  %v2765_v23 = vunpack.c.l.b16 %v2521_v55  ;;  %v2766_v25 = vunpack.c.l.b16 %v2531_v35  ;;  %v899_v27 = vshll.u32 %v641_v61, 16 }
  0xd5   : > { %v7290_v17 = vrot.slane %v2542_v8, 5  ;;  %v2548_v40 = vrot.slane %v2546_v11, 4  ;;  %v1525_v35 = vrot.slane %v1389_v29, 5 }
  0xd6   : > { %v1136_v49 = vpack.c.b16 %v1113_v16, %v1112_v44  ;;  %v2789_v55 = vpack.c.b16 %v2766_v25, %v2765_v23  ;;  %v901_v61 = vrot.slane %v899_v27, 5  ;;  %v642_v16 = vld [vmem:[%s6779_s13 + $0x78] sm:$0xf]  ;;  %v643_v25 = vld [vmem:[%s6779_s13 + $0x7c] sm:$0xf] }
  0xd7   : > { %v7245_v53 = vpop.f32.mrf.mxu2  ;;  %v2549_v44 = vor.u32 %v2548_v40, %v7290_v17  ;;  %v904_v27 = vshrl.u32 %v642_v16, 16  ;;  %v907_v29 = vshll.u32 %v642_v16, 16 }
  0xd8   : > { %v7248_v59 = vpop.f32.mrf.mxu3 }
  0xd9   : > { %8232 = vst [vmem:[#allocation6_spill] sm:$0xff] %v7248_v59  ;;  %v7252_v2 = vpop.f32.mrf.mxu1 }
  0xdb   : > { %v7256_v10 = vpop.f32.mrf.mxu0 }
  0xdc   : > { %1251 = vmatmul.bf16.gmra.mxu1 %v1135_v54  ;;  %1776 = vmatmul.bf16.gmra.mxu2 %v1660_v60  ;;  %v1522_v54 = vsel %vm6930_vm5, %v1520_v26, %v1521_v18  ;;  %v885_v60 = vrot.slane %v883_v34, 5  ;;  %v896_v18 = vor.u32 %v895_v63, %v7282_v62 }
  0xdd   : > { %2158 = vmatmul.bf16.gmra.mxu3 %v6461_v4  ;;  %v2533_v4 = vshrl.u32 %v5877_v47, 16  ;;  %v1638_v22 = vunpack.c.l.b16 %v1522_v54  ;;  %v6462_v54 = vld [vmem:[%s6779_s13 + $0x6c] sm:$0xff] }
  0xde   : > { %2904 = vmatmul.bf16.gmra.mxu0 %v2788_v5  ;;  %v2536_v5 = vshll.u32 %v5877_v47, 16  ;;  %v886_v26 = vor.u32 %v885_v60, %v882_v58  ;;  %v897_v63 = vrot.slane %v896_v18, 4 }
  0xdf   : > { %v7260_v41 = vpop.f32.mrf.mxu2  ;;  %v2535_v32 = vrot.slane %v2533_v4, 4  ;;  %v1661_v52 = vpack.c.b16 %v1638_v22, %v1637_v13  ;;  %v1390_v4 = vld [vmem:[%s6779_s13 + $0x74] sm:$0x1]  ;;  %v2552_v13 = vshll.u32 %v5879_v46, 16  ;;  %v1527_v22 = vrot.slane %v1525_v35, 4 }
  0xe0   : > { %v7269_v50 = vpop.f32.mrf.mxu3  ;;  %v2538_v34 = vrot.slane %v2536_v5, 5  ;;  %v887_v60 = vrot.slane %v886_v26, 4  ;;  %v5650_v5 = vrot.slane %v1388_v31, 9  ;;  %v1528_v23 = vrot.slane %v1390_v4, 5  ;;  %v5880_v26 = vld [vmem:[%s6779_s13 + $0x84] sm:$0xf] }
  0xe1   : > { %8233 = vst [vmem:[#allocation7_spill] sm:$0xff] %v7269_v50  ;;  %v7280_v57 = vpop.f32.mrf.mxu1  ;;  %v6512_v31 = vld [vmem:[%s8222_s1 + $0x190] sm:$0xff]  ;;  %v902_v40 = vsel %vm6923_vm4, %v897_v63, %v901_v61  ;;  %v906_v63 = vrot.slane %v904_v27, 4  ;;  %v909_v61 = vrot.slane %v907_v29, 5 }
  0xe2   : > { %v2539_v50 = vor.u32 %v2538_v34, %v2535_v32  ;;  %v1526_v18 = vsel %vm6930_vm5, %v5650_v5, %v1525_v35  ;;  %v5881_v32 = vld [vmem:[%s6779_s13 + $0x88] sm:$0xf]  ;;  %v6520_v34 = vld [vmem:[%s8222_s1 + $0x1d0] sm:$0xff]  ;;  %3770 = vmatpush.bf16.msra.mxu2 %v6512_v31  ;;  %v2557_v35 = vshrl.u32 %v5880_v26, 16  ;;  %v1115_v6 = vunpack.c.l.b16 %v902_v40 }
  0xe3   : > { %v7284_v0 = vpop.f32.mrf.mxu0  ;;  %4516 = vmatpush.bf16.msra.mxu3 %v6520_v34  ;;  %v2566_v16 = vshll.u32 %v5881_v32, 16 }
  0xe4   : > { %v2540_v46 = vrot.slane %v2539_v50, 4  ;;  %v1529_v50 = vsel %vm6930_vm5, %v1527_v22, %v1528_v23  ;;  %v6528_v22 = vld [vmem:[%s8222_s1 + $0x210] sm:$0xff]  ;;  %v644_v23 = vld [vmem:[%s6779_s13 + $0x80] sm:$0x1] }
  0xe5   : > { %v1640_v31 = vunpack.c.l.b16 %v1529_v50  ;;  %v7338_v34 = vrot.slane %v2566_v16, 5  ;;  %5038 = vmatpush.bf16.msra.mxu0 %v6528_v22 }
  0xe7   : > { %v7292_v42 = vpop.f32.mrf.mxu2 }
  0xe8   : > { %v7295_v47 = vpop.f32.mrf.mxu3 }
  0xe9   : > { %8234 = vst [vmem:[#allocation8_spill] sm:$0xff] %v7295_v47  ;;  %v1217_v58 = vpop.f32.mrf.mxu1  ;;  %v2570_v47 = vshrl.u32 %v5881_v32, 16  ;;  %v1392_v32 = vld [vmem:[%s6779_s13 + $0x7c] sm:$0xf] }
  0xea   : > { %v1297_v8 = vadd.f32 %v1217_v58, %v7094_v12  ;;  %v892_v12 = vsel %vm6923_vm4, %v887_v60, %v7282_v62  ;;  %v2554_v62 = vrot.slane %v2552_v13, 5  ;;  %v2560_v58 = vshll.u32 %v5880_v26, 16 }
  0xeb   : > { %v7300_v11 = vpop.f32.mrf.mxu0  ;;  %v1114_v5 = vunpack.c.l.b16 %v892_v12  ;;  %v6488_v12 = vld [vmem:[%s8222_s1 + $0x150] sm:$0xff]  ;;  %v2572_v40 = vrot.slane %v2570_v47, 4 }
  0xec   : > { %1256 = vmatmul.bf16.gmra.mxu1 %v1136_v49  ;;  %1781 = vmatmul.bf16.gmra.mxu2 %v1661_v52  ;;  %v2550_v49 = vrot.slane %v2549_v44, 4  ;;  %v2562_v29 = vrot.slane %v2560_v58, 5  ;;  %v1391_v58 = vld [vmem:[%s6779_s13 + $0x78] sm:$0xe] }
  0xed   : > { %2163 = vmatmul.bf16.gmra.mxu3 %v6462_v54  ;;  %v913_v54 = vshll.u32 %v643_v25, 16  ;;  %3388 = vmatpush.bf16.msra.mxu1 %v6488_v12  ;;  %v1393_v12 = vld [vmem:[%s6779_s13 + $0x80] sm:$0x1]  ;;  %v2573_v22 = vor.u32 %v2572_v40, %v7338_v34  ;;  %v646_v40 = vld [vmem:[%s6779_s13 + $0x88] sm:$0xf] }
  0xee   : > { %2909 = vmatmul.bf16.gmra.mxu0 %v2789_v55  ;;  %v917_v55 = vshrl.u32 %v643_v25, 16  ;;  %v2555_v26 = vsel %vm6923_vm4, %v2550_v49, %v2554_v62  ;;  %v910_v62 = vor.u32 %v909_v61, %v906_v63  ;;  %v6463_v61 = vld [vmem:[%s6779_s13 + $0x78] sm:$0xff] }
  0xef   : > { %v1742_v52 = vpop.f32.mrf.mxu2  ;;  %v7335_v27 = vrot.slane %v913_v54, 5  ;;  %v2768_v49 = vunpack.c.l.b16 %v2555_v26  ;;  %v923_v54 = vshll.u32 %v644_v23, 16 }
  0xf0   : > { %v1822_v60 = vadd.f32 %v1742_v52, %v1297_v8  ;;  %v2124_v4 = vpop.f32.mrf.mxu3  ;;  %v2545_v8 = vsel %vm6923_vm4, %v2540_v46, %v7290_v17  ;;  %v1639_v17 = vunpack.c.l.b16 %v1526_v18  ;;  %v5882_v52 = vld [vmem:[%s6779_s13 + $0x8c] sm:$0x1]  ;;  %v1532_v18 = vrot.slane %v1392_v32, 5 }
  0xf1   : > { %v1219_v59 = vpop.f32.mrf.mxu1  ;;  %v2767_v46 = vunpack.c.l.b16 %v2545_v8  ;;  %v2576_v8 = vshll.u32 %v5882_v52, 16  ;;  %v911_v23 = vrot.slane %v910_v62, 4  ;;  %v2574_v52 = vrot.slane %v2573_v22, 4 }
  0xf2   : > { %v2204_v44 = vadd.f32 %v2124_v4, %v1822_v60  ;;  %v1298_v13 = vadd.f32 %v1219_v59, %v7129_v48  ;;  %v919_v48 = vrot.slane %v917_v55, 4  ;;  %v2559_v59 = vrot.slane %v2557_v35, 4 }
  0xf3   : > { %v2872_v25 = vpop.f32.mrf.mxu0  ;;  %v1137_v55 = vpack.c.b16 %v1115_v6, %v1114_v5  ;;  %v1662_v47 = vpack.c.b16 %v1640_v31, %v1639_v17  ;;  %v2790_v26 = vpack.c.b16 %v2768_v49, %v2767_v46  ;;  %v1534_v17 = vrot.slane %v1532_v18, 4 }
  0xf4   : > { %v920_v35 = vor.u32 %v919_v48, %v7335_v27  ;;  %v2563_v4 = vor.u32 %v2562_v29, %v2559_v59  ;;  %v925_v48 = vrot.slane %v923_v54, 5  ;;  %v5651_v59 = vrot.slane %v1391_v58, 9  ;;  %v645_v29 = vld [vmem:[%s6779_s13 + $0x84] sm:$0xf] }
  0xf5   : > { %v1535_v31 = vrot.slane %v1393_v12, 5  ;;  %v2578_v46 = vrot.slane %v2576_v8, 5  ;;  %v7352_v49 = vadd.f32 %v7300_v11, %v2204_v44  ;;  %v928_v62 = vshrl.u32 %v645_v29, 16 }
  0xf6   : > { %v2564_v32 = vrot.slane %v2563_v4, 4  ;;  %v931_v54 = vshll.u32 %v645_v29, 16  ;;  %v937_v58 = vshll.u32 %v646_v40, 16  ;;  %v941_v4 = vshrl.u32 %v646_v40, 16  ;;  %v647_v29 = vld [vmem:[%s6779_s13 + $0x8c] sm:$0x1] }
  0xf7   : > { %v1744_v60 = vpop.f32.mrf.mxu2  ;;  %v1536_v11 = vsel %vm6930_vm5, %v1534_v17, %v1535_v31 }
  0xf8   : > { %v1823_v16 = vadd.f32 %v1744_v60, %v1298_v13  ;;  %v2126_v50 = vpop.f32.mrf.mxu3  ;;  %v921_v13 = vrot.slane %v920_v35, 4  ;;  %v5883_v60 = vld [vmem:[%s6779_s13 + $0x90] sm:$0xf]  ;;  %v916_v35 = vsel %vm6923_vm4, %v911_v23, %v7335_v27  ;;  %v2569_v44 = vsel %vm6923_vm4, %v2564_v32, %v7338_v34 }
  0xf9   : > { %v1222_v63 = vpop.f32.mrf.mxu1  ;;  %v2581_v12 = vshrl.u32 %v5883_v60, 16  ;;  %v2584_v22 = vshll.u32 %v5883_v60, 16  ;;  %v943_v34 = vrot.slane %v941_v4, 4  ;;  %v1642_v32 = vunpack.c.l.b16 %v1536_v11  ;;  %v1395_v60 = vld [vmem:[%s6779_s13 + $0x88] sm:$0xf] }
  0xfa   : > { %v2205_v24 = vadd.f32 %v2126_v50, %v1823_v16  ;;  %v1299_v6 = vadd.f32 %v1222_v63, %v7152_v21  ;;  %v926_v50 = vsel %vm6923_vm4, %v921_v13, %v925_v48  ;;  %v930_v63 = vrot.slane %v928_v62, 4  ;;  %v1394_v4 = vld [vmem:[%s6779_s13 + $0x84] sm:$0xe] }
  0xfb   : > { %v7347_v5 = vpop.f32.mrf.mxu0  ;;  %v7374_v13 = vrot.slane %v937_v58, 5  ;;  %v1117_v17 = vunpack.c.l.b16 %v926_v50  ;;  %v2769_v40 = vunpack.c.l.b16 %v2569_v44  ;;  %v2586_v62 = vrot.slane %v2584_v22, 5 }
  0xfc   : > { %1261 = vmatmul.bf16.gmra.mxu1 %v1137_v55  ;;  %1786 = vmatmul.bf16.gmra.mxu2 %v1662_v47  ;;  %v7354_v21 = vadd.f32 %v2872_v25, %v2205_v24  ;;  %v5884_v55 = vld [vmem:[%s6779_s13 + $0x94] sm:$0xf]  ;;  %v1533_v24 = vsel %vm6930_vm5, %v5651_v59, %v1532_v18  ;;  %v2579_v47 = vsel %vm6923_vm4, %v2574_v52, %v2578_v46  ;;  %v2583_v46 = vrot.slane %v2581_v12, 4 }
  0xfd   : > { %2168 = vmatmul.bf16.gmra.mxu3 %v6463_v61  ;;  %v933_v61 = vrot.slane %v931_v54, 5  ;;  %v2594_v18 = vshrl.u32 %v5884_v55, 16  ;;  %v1641_v31 = vunpack.c.l.b16 %v1533_v24  ;;  %v2770_v52 = vunpack.c.l.b16 %v2579_v47  ;;  %v1396_v47 = vld [vmem:[%s6779_s13 + $0x8c] sm:$0x1] }
  0xfe   : > { %2914 = vmatmul.bf16.gmra.mxu0 %v2790_v26  ;;  %v2590_v26 = vshll.u32 %v5884_v55, 16  ;;  %v947_v54 = vshll.u32 %v647_v29, 16  ;;  %v1539_v12 = vrot.slane %v1395_v60, 5  ;;  %v2587_v22 = vor.u32 %v2586_v62, %v2583_v46  ;;  %v649_v62 = vld [vmem:[%s6779_s13 + $0x94] sm:$0xf] }
  0xff   : > { %v1747_v16 = vpop.f32.mrf.mxu2  ;;  %v934_v58 = vor.u32 %v933_v61, %v930_v63  ;;  %v1663_v24 = vpack.c.b16 %v1642_v32, %v1641_v31  ;;  %v5652_v63 = vrot.slane %v1394_v4, 9  ;;  %v1542_v32 = vrot.slane %v1396_v47, 5  ;;  %v6511_v4 = vld [vmem:[%s8222_s1 + $0x188] sm:$0xff] }
 0x100   : > { %v1824_v25 = vadd.f32 %v1747_v16, %v1299_v6  ;;  %v2129_v27 = vpop.f32.mrf.mxu3  ;;  %v1116_v6 = vunpack.c.l.b16 %v916_v35  ;;  %v7377_v55 = vrot.slane %v2590_v26, 5  ;;  %v944_v16 = vor.u32 %v943_v34, %v7374_v13  ;;  %v6464_v26 = vld [vmem:[%s6779_s13 + $0x84] sm:$0xff]  ;;  %3771 = vmatpush.bf16.msra.mxu2 %v6511_v4 }
 0x101   : > { %v1224_v8 = vpop.f32.mrf.mxu1  ;;  %v949_v29 = vrot.slane %v947_v54, 5  ;;  %v2588_v46 = vrot.slane %v2587_v22, 4  ;;  %v5886_v54 = vld [vmem:[%s6779_s13 + $0x9c] sm:$0xf] }
 0x102   : > { %v2206_v23 = vadd.f32 %v2129_v27, %v1824_v25  ;;  %v1300_v48 = vadd.f32 %v1224_v8, %v7178_v56  ;;  %v2596_v56 = vrot.slane %v2594_v18, 4  ;;  %v5885_v25 = vld [vmem:[%s6779_s13 + $0x98] sm:$0x1]  ;;  %v1138_v50 = vpack.c.b16 %v1117_v17, %v1116_v6 }
 0x103   : > { %v2877_v59 = vpop.f32.mrf.mxu0  ;;  %v2791_v27 = vpack.c.b16 %v2770_v52, %v2769_v40  ;;  %v2600_v18 = vshll.u32 %v5885_v25, 16  ;;  %v945_v31 = vrot.slane %v944_v16, 4  ;;  %v648_v40 = vld [vmem:[%s6779_s13 + $0x90] sm:$0xf]  ;;  %v1541_v52 = vrot.slane %v1539_v12, 4 }
 0x104   : > { %v2597_v61 = vor.u32 %v2596_v56, %v7377_v55  ;;  %v7392_v60 = vadd.f32 %v7347_v5, %v2206_v23  ;;  %v5887_v25 = vld [vmem:[%s6779_s13 + $0xa0] sm:$0xf]  ;;  %v2608_v47 = vshll.u32 %v5886_v54, 16 }
 0x105   : > { %v2602_v16 = vrot.slane %v2600_v18, 5  ;;  %v950_v23 = vsel %vm6923_vm4, %v945_v31, %v949_v29  ;;  %v2593_v18 = vsel %vm6923_vm4, %v2588_v46, %v7377_v55  ;;  %v6527_v55 = vld [vmem:[%s8222_s1 + $0x208] sm:$0xff] }
 0x106   : > { %v1119_v29 = vunpack.c.l.b16 %v950_v23  ;;  %5039 = vmatpush.bf16.msra.mxu0 %v6527_v55  ;;  %v2771_v23 = vunpack.c.l.b16 %v2593_v18 }
 0x107   : > { %v1749_v35 = vpop.f32.mrf.mxu2 }
 0x108   : > { %v1825_v11 = vadd.f32 %v1749_v35, %v1300_v48  ;;  %v2131_v44 = vpop.f32.mrf.mxu3  ;;  %v935_v48 = vrot.slane %v934_v58, 4  ;;  %v2598_v58 = vrot.slane %v2597_v61, 4  ;;  %v6519_v35 = vld [vmem:[%s8222_s1 + $0x1c8] sm:$0xff] }
 0x109   : > { %v1227_v8 = vpop.f32.mrf.mxu1  ;;  %4517 = vmatpush.bf16.msra.mxu3 %v6519_v35 }
 0x10a   : > { %v2207_v34 = vadd.f32 %v2131_v44, %v1825_v11  ;;  %v1301_v6 = vadd.f32 %v1227_v8, %v7197_v37  ;;  %v1540_v37 = vsel %vm6930_vm5, %v5652_v63, %v1539_v12  ;;  %v940_v5 = vsel %vm6923_vm4, %v935_v48, %v7374_v13 }
 0x10b   : > { %v7386_v17 = vpop.f32.mrf.mxu0  ;;  %v961_v11 = vshll.u32 %v649_v62, 16  ;;  %v965_v44 = vshrl.u32 %v649_v62, 16  ;;  %v1543_v8 = vsel %vm6930_vm5, %v1541_v52, %v1542_v32  ;;  %v2618_v13 = vshrl.u32 %v5887_v25, 16  ;;  %v6487_v52 = vld [vmem:[%s8222_s1 + $0x148] sm:$0xff] }
 0x10c   : > { %1266 = vmatmul.bf16.gmra.mxu1 %v1138_v50  ;;  %1791 = vmatmul.bf16.gmra.mxu2 %v1663_v24  ;;  %v7394_v56 = vadd.f32 %v2877_v59, %v2207_v34  ;;  %v952_v59 = vshrl.u32 %v648_v40, 16  ;;  %v955_v50 = vshll.u32 %v648_v40, 16  ;;  %v1118_v61 = vunpack.c.l.b16 %v940_v5  ;;  %v650_v40 = vld [vmem:[%s6779_s13 + $0x98] sm:$0x1] }
 0x10d   : > { %2173 = vmatmul.bf16.gmra.mxu3 %v6464_v26  ;;  %v2614_v26 = vshll.u32 %v5887_v25, 16  ;;  %v2603_v34 = vsel %vm6923_vm4, %v2598_v58, %v2602_v16  ;;  %v7425_v46 = vrot.slane %v961_v11, 5  ;;  %v2610_v16 = vrot.slane %v2608_v47, 5  ;;  %v1398_v25 = vld [vmem:[%s6779_s13 + $0x94] sm:$0xf]  ;;  %3389 = vmatpush.bf16.msra.mxu1 %v6487_v52 }
 0x10e   : > { %8235 = vst [vmem:[#allocation9_spill] sm:$0xff] %v7394_v56  ;;  %2919 = vmatmul.bf16.gmra.mxu0 %v2791_v27  ;;  %v2605_v27 = vshrl.u32 %v5886_v54, 16  ;;  %v954_v62 = vrot.slane %v952_v59, 4  ;;  %v957_v32 = vrot.slane %v955_v50, 5  ;;  %v967_v54 = vrot.slane %v965_v44, 4 }
 0x10f   : > { %v1752_v24 = vpop.f32.mrf.mxu2  ;;  %v1644_v4 = vunpack.c.l.b16 %v1543_v8  ;;  %v7428_v35 = vrot.slane %v2614_v26, 5  ;;  %v2620_v5 = vrot.slane %v2618_v13, 4  ;;  %v2772_v59 = vunpack.c.l.b16 %v2603_v34  ;;  %v1397_v47 = vld [vmem:[%s6779_s13 + $0x90] sm:$0xe] }
 0x110   : > { %v1826_v12 = vadd.f32 %v1752_v24, %v1301_v6  ;;  %v2134_v22 = vpop.f32.mrf.mxu3  ;;  %v2607_v58 = vrot.slane %v2605_v27, 4  ;;  %v971_v50 = vshll.u32 %v650_v40, 16  ;;  %v5888_v24 = vld [vmem:[%s6779_s13 + $0xa4] sm:$0x1]  ;;  %v1139_v11 = vpack.c.b16 %v1119_v29, %v1118_v61  ;;  %v6465_v40 = vld [vmem:[%s6779_s13 + $0x90] sm:$0xff] }
 0x111   : > { %v1229_v63 = vpop.f32.mrf.mxu1  ;;  %v958_v44 = vor.u32 %v957_v32, %v954_v62  ;;  %v968_v27 = vor.u32 %v967_v54, %v7425_v46  ;;  %v2621_v52 = vor.u32 %v2620_v5, %v7428_v35  ;;  %v2624_v18 = vshll.u32 %v5888_v24, 16 }
 0x112   : > { %v2208_v48 = vadd.f32 %v2134_v22, %v1826_v12  ;;  %v1302_v6 = vadd.f32 %v1229_v63, %v7225_v20  ;;  %v1643_v20 = vunpack.c.l.b16 %v1540_v37  ;;  %v1399_v37 = vld [vmem:[%s6779_s13 + $0x98] sm:$0x1]  ;;  %v1546_v22 = vrot.slane %v1398_v25, 5  ;;  %v651_v25 = vld [vmem:[%s6779_s13 + $0x9c] sm:$0xf] }
 0x113   : > { %v2882_v31 = vpop.f32.mrf.mxu0  ;;  %v2611_v8 = vor.u32 %v2610_v16, %v2607_v58  ;;  %v2792_v55 = vpack.c.b16 %v2772_v59, %v2771_v23  ;;  %v973_v56 = vrot.slane %v971_v50, 5  ;;  %v5653_v32 = vrot.slane %v1397_v47, 9  ;;  %v652_v59 = vld [vmem:[%s6779_s13 + $0xa0] sm:$0xf]  ;;  %v5890_v47 = vld [vmem:[%s6779_s13 + $0xac] sm:$0xf] }
 0x114   : > { %v1664_v13 = vpack.c.b16 %v1644_v4, %v1643_v20  ;;  %v1549_v54 = vrot.slane %v1399_v37, 5  ;;  %v959_v58 = vrot.slane %v958_v44, 4  ;;  %v1548_v16 = vrot.slane %v1546_v22, 4  ;;  %v5889_v44 = vld [vmem:[%s6779_s13 + $0xa8] sm:$0xf] }
 0x115   : > { %v2612_v20 = vrot.slane %v2611_v8, 4  ;;  %v2622_v4 = vrot.slane %v2621_v52, 4  ;;  %v2626_v5 = vrot.slane %v2624_v18, 5  ;;  %v7441_v23 = vadd.f32 %v7386_v17, %v2208_v48 }
 0x116   : > { %v976_v50 = vshrl.u32 %v651_v25, 16  ;;  %v979_v24 = vshll.u32 %v651_v25, 16  ;;  %v1550_v48 = vsel %vm6930_vm5, %v1548_v16, %v1549_v54  ;;  %v2632_v18 = vshll.u32 %v5889_v44, 16 }
 0x117   : > { %v1754_v12 = vpop.f32.mrf.mxu2  ;;  %v1646_v25 = vunpack.c.l.b16 %v1550_v48 }
 0x118   : > { %v1827_v26 = vadd.f32 %v1754_v12, %v1302_v6  ;;  %v2136_v63 = vpop.f32.mrf.mxu3  ;;  %v969_v6 = vrot.slane %v968_v27, 4  ;;  %v1547_v12 = vsel %vm6930_vm5, %v5653_v32, %v1546_v22  ;;  %v2627_v22 = vsel %vm6923_vm4, %v2622_v4, %v2626_v5  ;;  %v653_v4 = vld [vmem:[%s6779_s13 + $0xa4] sm:$0x1] }
 0x119   : > { %v1232_v34 = vpop.f32.mrf.mxu1  ;;  %v981_v52 = vrot.slane %v979_v24, 5  ;;  %v1645_v54 = vunpack.c.l.b16 %v1547_v12 }
 0x11a   : > { %v2209_v61 = vadd.f32 %v2136_v63, %v1827_v26  ;;  %v1303_v29 = vadd.f32 %v1232_v34, %v7256_v10  ;;  %v974_v17 = vsel %vm6923_vm4, %v969_v6, %v973_v56  ;;  %v985_v26 = vshll.u32 %v652_v59, 16 }
 0x11b   : > { %v7437_v62 = vpop.f32.mrf.mxu0  ;;  %v989_v63 = vshrl.u32 %v652_v59, 16  ;;  %v2629_v56 = vshrl.u32 %v5889_v44, 16  ;;  %v1121_v32 = vunpack.c.l.b16 %v974_v17  ;;  %v1401_v59 = vld [vmem:[%s6779_s13 + $0xa0] sm:$0xf]  ;;  %v5891_v17 = vld [vmem:[%s6779_s13 + $0xb0] sm:$0x1] }
 0x11c   : > { %1271 = vmatmul.bf16.gmra.mxu1 %v1139_v11  ;;  %1796 = vmatmul.bf16.gmra.mxu2 %v1664_v13  ;;  %v7443_v10 = vadd.f32 %v2882_v31, %v2209_v61  ;;  %v964_v11 = vsel %vm6923_vm4, %v959_v58, %v7425_v46  ;;  %v2617_v31 = vsel %vm6923_vm4, %v2612_v20, %v7428_v35  ;;  %v978_v46 = vrot.slane %v976_v50, 4  ;;  %v1400_v50 = vld [vmem:[%s6779_s13 + $0x9c] sm:$0xe] }
 0x11d   : > { %2178 = vmatmul.bf16.gmra.mxu3 %v6465_v40  ;;  %v2642_v61 = vshrl.u32 %v5890_v47, 16  ;;  %v7463_v58 = vrot.slane %v985_v26, 5  ;;  %v991_v6 = vrot.slane %v989_v63, 4  ;;  %v2773_v16 = vunpack.c.l.b16 %v2617_v31  ;;  %v6466_v26 = vld [vmem:[%s6779_s13 + $0x9c] sm:$0xff] }
 0x11e   : > { %2924 = vmatmul.bf16.gmra.mxu0 %v2792_v55  ;;  %v2638_v55 = vshll.u32 %v5890_v47, 16  ;;  %v2774_v20 = vunpack.c.l.b16 %v2627_v22  ;;  %v982_v5 = vor.u32 %v981_v52, %v978_v46  ;;  %v2631_v24 = vrot.slane %v2629_v56, 4 }
 0x11f   : > { %v1757_v27 = vpop.f32.mrf.mxu2  ;;  %v992_v31 = vor.u32 %v991_v6, %v7463_v58  ;;  %v5654_v46 = vrot.slane %v1400_v50, 9  ;;  %v1553_v52 = vrot.slane %v1401_v59, 5  ;;  %v655_v6 = vld [vmem:[%s6779_s13 + $0xac] sm:$0xf] }
 0x120   : > { %v1828_v37 = vadd.f32 %v1757_v27, %v1303_v29  ;;  %v2139_v8 = vpop.f32.mrf.mxu3  ;;  %v1120_v29 = vunpack.c.l.b16 %v964_v11  ;;  %v7468_v44 = vrot.slane %v2638_v55, 5  ;;  %v2644_v27 = vrot.slane %v2642_v61, 4  ;;  %v1402_v55 = vld [vmem:[%s6779_s13 + $0xa4] sm:$0x1] }
 0x121   : > { %v1234_v13 = vpop.f32.mrf.mxu1  ;;  %v2793_v63 = vpack.c.b16 %v2774_v20, %v2773_v16  ;;  %v1555_v59 = vrot.slane %v1553_v52, 4  ;;  %v1556_v50 = vrot.slane %v1402_v55, 5 }
 0x122   : > { %v2210_v34 = vadd.f32 %v2139_v8, %v1828_v37  ;;  %v1304_v40 = vadd.f32 %v1234_v13, %v7284_v0  ;;  %v2634_v0 = vrot.slane %v2632_v18, 5  ;;  %v1140_v12 = vpack.c.b16 %v1121_v32, %v1120_v29 }
 0x123   : > { %v2887_v35 = vpop.f32.mrf.mxu0  ;;  %v1665_v37 = vpack.c.b16 %v1646_v25, %v1645_v54  ;;  %v995_v8 = vshll.u32 %v653_v4, 16  ;;  %v983_v13 = vrot.slane %v982_v5, 4  ;;  %v2648_v29 = vshll.u32 %v5891_v17, 16  ;;  %v654_v25 = vld [vmem:[%s6779_s13 + $0xa8] sm:$0xf] }
 0x124   : > { %v2635_v61 = vor.u32 %v2634_v0, %v2631_v24  ;;  %v993_v32 = vrot.slane %v992_v31, 4  ;;  %v7480_v16 = vadd.f32 %v7437_v62, %v2210_v34  ;;  %v7489_v5 = vsel %vm6930_vm5, %v5654_v46, %v1553_v52  ;;  %v6510_v24 = vld [vmem:[%s8222_s1 + $0x180] sm:$0xff]  ;;  %v5892_v62 = vld [vmem:[%s6779_s13 + $0xb4] sm:$0xf] }
 0x125   : > { %v997_v54 = vrot.slane %v995_v8, 5  ;;  %v988_v4 = vsel %vm6923_vm4, %v983_v13, %v7463_v58  ;;  %v6518_v34 = vld [vmem:[%s8222_s1 + $0x1c0] sm:$0xff]  ;;  %v2650_v58 = vrot.slane %v2648_v29, 5  ;;  %v1000_v17 = vshrl.u32 %v654_v25, 16  ;;  %3772 = vmatpush.bf16.msra.mxu2 %v6510_v24 }
 0x126   : > { %v2636_v0 = vrot.slane %v2635_v61, 4  ;;  %4518 = vmatpush.bf16.msra.mxu3 %v6518_v34  ;;  %v2656_v13 = vshll.u32 %v5892_v62, 16  ;;  %v1647_v46 = vunpack.c.l.b16 %v7489_v5 }
 0x127   : > { %v1759_v11 = vpop.f32.mrf.mxu2  ;;  %v1002_v5 = vrot.slane %v1000_v17, 4 }
 0x128   : > { %v1829_v48 = vadd.f32 %v1759_v11, %v1304_v40  ;;  %v2141_v47 = vpop.f32.mrf.mxu3  ;;  %v2645_v40 = vor.u32 %v2644_v27, %v7468_v44  ;;  %v5893_v11 = vld [vmem:[%s6779_s13 + $0xb8] sm:$0xf]  ;;  %v2641_v29 = vsel %vm6923_vm4, %v2636_v0, %v7468_v44 }
 0x129   : > { %v1237_v22 = vpop.f32.mrf.mxu1  ;;  %v2662_v52 = vshll.u32 %v5893_v11, 16  ;;  %v2775_v0 = vunpack.c.l.b16 %v2641_v29 }
 0x12a   : > { %v2211_v56 = vadd.f32 %v2141_v47, %v1829_v48  ;;  %v2646_v27 = vrot.slane %v2645_v40, 4  ;;  %v1003_v48 = vshll.u32 %v654_v25, 16  ;;  %v1009_v47 = vshll.u32 %v655_v6, 16  ;;  %v6526_v25 = vld [vmem:[%s8222_s1 + $0x200] sm:$0xff] }
 0x12b   : > { %v7473_v18 = vpop.f32.mrf.mxu0  ;;  %v1122_v40 = vunpack.c.l.b16 %v988_v4  ;;  %5040 = vmatpush.bf16.msra.mxu0 %v6526_v25  ;;  %v6467_v25 = vld [vmem:[%s6779_s13 + $0xa8] sm:$0xff] }
 0x12c   : > { %1276 = vmatmul.bf16.gmra.mxu1 %v1140_v12  ;;  %1801 = vmatmul.bf16.gmra.mxu2 %v1665_v37  ;;  %v7482_v20 = vadd.f32 %v2887_v35, %v2211_v56  ;;  %v1305_v35 = vadd.f32 %v1237_v22, %v7091_v9  ;;  %v1013_v37 = vshrl.u32 %v655_v6, 16  ;;  %v1557_v22 = vsel %vm6930_vm5, %v1555_v59, %v1556_v50  ;;  %v656_v6 = vld [vmem:[%s6779_s13 + $0xb0] sm:$0x1] }
 0x12d   : > { %2183 = vmatmul.bf16.gmra.mxu3 %v6466_v26  ;;  %v998_v26 = vsel %vm6923_vm4, %v993_v32, %v997_v54  ;;  %v2666_v56 = vshrl.u32 %v5893_v11, 16  ;;  %v2651_v32 = vsel %vm6923_vm4, %v2646_v27, %v2650_v58  ;;  %v6486_v54 = vld [vmem:[%s8222_s1 + $0x140] sm:$0xff]  ;;  %v1005_v59 = vrot.slane %v1003_v48, 5  ;;  %v5894_v48 = vld [vmem:[%s6779_s13 + $0xbc] sm:$0x1] }
 0x12e   : > { %8236 = vst [vmem:[#allocation10_spill] sm:$0xff] %v7482_v20  ;;  %2929 = vmatmul.bf16.gmra.mxu0 %v2793_v63  ;;  %v2653_v63 = vshrl.u32 %v5892_v62, 16  ;;  %v7517_v4 = vrot.slane %v1009_v47, 5  ;;  %v1015_v50 = vrot.slane %v1013_v37, 4  ;;  %v1123_v24 = vunpack.c.l.b16 %v998_v26  ;;  %v1404_v62 = vld [vmem:[%s6779_s13 + $0xac] sm:$0xf]  ;;  %3390 = vmatpush.bf16.msra.mxu1 %v6486_v54 }
 0x12f   : > { %v1762_v12 = vpop.f32.mrf.mxu2  ;;  %v1648_v44 = vunpack.c.l.b16 %v1557_v22  ;;  %v2776_v27 = vunpack.c.l.b16 %v2651_v32  ;;  %v7520_v58 = vrot.slane %v2662_v52, 5  ;;  %v2668_v11 = vrot.slane %v2666_v56, 4  ;;  %v1405_v54 = vld [vmem:[%s6779_s13 + $0xb0] sm:$0x1] }
 0x130   : > { %v1830_v31 = vadd.f32 %v1762_v12, %v1305_v35  ;;  %v2144_v8 = vpop.f32.mrf.mxu3  ;;  %v2655_v34 = vrot.slane %v2653_v63, 4  ;;  %v2658_v35 = vrot.slane %v2656_v13, 5  ;;  %v1019_v17 = vshll.u32 %v656_v6, 16 }
 0x131   : > { %v1239_v9 = vpop.f32.mrf.mxu1  ;;  %v1006_v37 = vor.u32 %v1005_v59, %v1002_v5  ;;  %v1560_v26 = vrot.slane %v1404_v62, 5  ;;  %v1141_v22 = vpack.c.b16 %v1123_v24, %v1122_v40  ;;  %v1666_v29 = vpack.c.b16 %v1648_v44, %v1647_v46 }
 0x132   : > { %v2212_v55 = vadd.f32 %v2144_v8, %v1830_v31  ;;  %v1306_v12 = vadd.f32 %v1239_v9, %v7127_v43  ;;  %v1016_v31 = vor.u32 %v1015_v50, %v7517_v4  ;;  %v1403_v8 = vld [vmem:[%s6779_s13 + $0xa8] sm:$0xe]  ;;  %v2659_v32 = vor.u32 %v2658_v35, %v2655_v34 }
 0x133   : > { %v2892_v61 = vpop.f32.mrf.mxu0  ;;  %v2794_v56 = vpack.c.b16 %v2776_v27, %v2775_v0  ;;  %v2669_v20 = vor.u32 %v2668_v11, %v7520_v58  ;;  %v2672_v43 = vshll.u32 %v5894_v48, 16  ;;  %v1021_v5 = vrot.slane %v1019_v17, 5  ;;  %v657_v0 = vld [vmem:[%s6779_s13 + $0xb4] sm:$0xf]  ;;  %v658_v11 = vld [vmem:[%s6779_s13 + $0xb8] sm:$0xf] }
 0x134   : > { %v5655_v59 = vrot.slane %v1403_v8, 9  ;;  %v1007_v50 = vrot.slane %v1006_v37, 4  ;;  %v1017_v62 = vrot.slane %v1016_v31, 4  ;;  %v1563_v40 = vrot.slane %v1405_v54, 5  ;;  %v5895_v17 = vld [vmem:[%s6779_s13 + $0xc0] sm:$0xf] }
 0x135   : > { %v2660_v46 = vrot.slane %v2659_v32, 4  ;;  %v7530_v24 = vadd.f32 %v7473_v18, %v2212_v55  ;;  %v2670_v34 = vrot.slane %v2669_v20, 4  ;;  %v2674_v35 = vrot.slane %v2672_v43, 5 }
 0x136   : > { %v1022_v18 = vsel %vm6923_vm4, %v1017_v62, %v1021_v5  ;;  %v1561_v55 = vsel %vm6930_vm5, %v5655_v59, %v1560_v26  ;;  %v1024_v8 = vshrl.u32 %v657_v0, 16  ;;  %v659_v62 = vld [vmem:[%s6779_s13 + $0xbc] sm:$0x1] }
 0x137   : > { %v1764_v47 = vpop.f32.mrf.mxu2 }
 0x138   : > { %v1831_v63 = vadd.f32 %v1764_v47, %v1306_v12  ;;  %v2146_v13 = vpop.f32.mrf.mxu3  ;;  %v1562_v12 = vrot.slane %v1560_v26, 4  ;;  %v1012_v47 = vsel %vm6923_vm4, %v1007_v50, %v7517_v4  ;;  %v2675_v4 = vsel %vm6923_vm4, %v2670_v34, %v2674_v35  ;;  %v1407_v35 = vld [vmem:[%s6779_s13 + $0xb8] sm:$0xf] }
 0x139   : > { %v1242_v52 = vpop.f32.mrf.mxu1  ;;  %v2677_v26 = vshrl.u32 %v5895_v17, 16  ;;  %v1124_v43 = vunpack.c.l.b16 %v1012_v47  ;;  %v2778_v50 = vunpack.c.l.b16 %v2675_v4 }
 0x13a   : > { %v2213_v9 = vadd.f32 %v2146_v13, %v1831_v63  ;;  %v1307_v27 = vadd.f32 %v1242_v52, %v7147_v15  ;;  %v1564_v20 = vsel %vm6930_vm5, %v1562_v12, %v1563_v40  ;;  %v2665_v15 = vsel %vm6923_vm4, %v2660_v46, %v7520_v58 }
 0x13b   : > { %v2895_v6 = vpop.f32.mrf.mxu0  ;;  %v1027_v63 = vshll.u32 %v657_v0, 16  ;;  %v2680_v52 = vshll.u32 %v5895_v17, 16  ;;  %v1649_v58 = vunpack.c.l.b16 %v1561_v55  ;;  %v1650_v5 = vunpack.c.l.b16 %v1564_v20  ;;  %v1406_v17 = vld [vmem:[%s6779_s13 + $0xb4] sm:$0xe] }
 0x13c   : > { %1281 = vmatmul.bf16.gmra.mxu1 %v1141_v22  ;;  %1806 = vmatmul.bf16.gmra.mxu2 %v1666_v29  ;;  %v7532_v44 = vadd.f32 %v2892_v61, %v2213_v9  ;;  %v5896_v61 = vld [vmem:[%s6779_s13 + $0xc4] sm:$0xf]  ;;  %v1033_v22 = vshll.u32 %v658_v11, 16  ;;  %v1037_v29 = vshrl.u32 %v658_v11, 16  ;;  %v1125_v9 = vunpack.c.l.b16 %v1022_v18 }
 0x13d   : > { %2188 = vmatmul.bf16.gmra.mxu3 %v6467_v25  ;;  %v2686_v25 = vshll.u32 %v5896_v61, 16  ;;  %v2777_v59 = vunpack.c.l.b16 %v2665_v15  ;;  %v1026_v12 = vrot.slane %v1024_v8, 4  ;;  %v1029_v40 = vrot.slane %v1027_v63, 5 }
 0x13e   : > { %2934 = vmatmul.bf16.gmra.mxu0 %v2794_v56  ;;  %v2690_v56 = vshrl.u32 %v5896_v61, 16  ;;  %v7554_v46 = vrot.slane %v1033_v22, 5  ;;  %v1039_v34 = vrot.slane %v1037_v29, 4  ;;  %v2679_v0 = vrot.slane %v2677_v26, 4  ;;  %v5897_v61 = vld [vmem:[%s6779_s13 + $0xc8] sm:$0x1] }
 0x13f   : > { %v1767_v48 = vpop.f32.mrf.mxu2  ;;  %v7561_v47 = vrot.slane %v2686_v25, 5  ;;  %v1142_v20 = vpack.c.b16 %v1125_v9, %v1124_v43  ;;  %v1667_v15 = vpack.c.b16 %v1650_v5, %v1649_v58  ;;  %v2795_v8 = vpack.c.b16 %v2778_v50, %v2777_v59  ;;  %v6203_v5 = vld [vmem:[%s6779_s13 + $0x18] sm:$0xf]  ;;  %v6204_v59 = vld [vmem:[%s6779_s13 + $0x1c] sm:$0xf] }
 0x140   : > { %v1832_v37 = vadd.f32 %v1767_v48, %v1307_v27  ;;  %v2149_v31 = vpop.f32.mrf.mxu3  ;;  %v2682_v48 = vrot.slane %v2680_v52, 5  ;;  %v2692_v18 = vrot.slane %v2690_v56, 4  ;;  %v1043_v63 = vshll.u32 %v659_v62, 16 }
 0x141   : > { %v1244_v13 = vpop.f32.mrf.mxu1  ;;  %v1030_v22 = vor.u32 %v1029_v40, %v1026_v12  ;;  %v5656_v29 = vrot.slane %v1406_v17, 9  ;;  %v1567_v26 = vrot.slane %v1407_v35, 5  ;;  %v2696_v43 = vshll.u32 %v5897_v61, 16 }
 0x142   : > { %v2214_v54 = vadd.f32 %v2149_v31, %v1832_v37  ;;  %v1308_v11 = vadd.f32 %v1244_v13, %v7171_v51  ;;  %v1040_v51 = vor.u32 %v1039_v34, %v7554_v46  ;;  %v1408_v13 = vld [vmem:[%s6779_s13 + $0xbc] sm:$0x1]  ;;  %v2683_v25 = vor.u32 %v2682_v48, %v2679_v0 }
 0x143   : > { %v2897_v32 = vpop.f32.mrf.mxu0  ;;  %v2693_v56 = vor.u32 %v2692_v18, %v7561_v47  ;;  %v1045_v9 = vrot.slane %v1043_v63, 5  ;;  %v1570_v58 = vrot.slane %v1408_v13, 5  ;;  %v1031_v62 = vrot.slane %v1030_v22, 4  ;;  %v5947_v13 = vld [vmem:[%s6779_s13 + $0x10] sm:$0xf] }
 0x144   : > { %v7557_v27 = vadd.f32 %v2895_v6, %v2214_v54  ;;  %v6468_v6 = vld [vmem:[%s6779_s13 + $0xb4] sm:$0xff]  ;;  %v1041_v12 = vrot.slane %v1040_v51, 4  ;;  %v1568_v40 = vsel %vm6930_vm5, %v5656_v29, %v1567_v26  ;;  %v1569_v34 = vrot.slane %v1567_v26, 4 }
 0x145   : > { %v2684_v0 = vrot.slane %v2683_v25, 4  ;;  %v2698_v17 = vrot.slane %v2696_v43, 5  ;;  %v3967_v18 = vshrl.u32 %v6203_v5, 16 }
 0x147   : > { %v1769_v55 = vpop.f32.mrf.mxu2  ;;  %v2689_v22 = vsel %vm6923_vm4, %v2684_v0, %v7561_v47  ;;  %v6300_v47 = vld [vmem:[%s6779_s13 + $0x1c] sm:$0xf] }
 0x148   : > { %v1833_v37 = vadd.f32 %v1769_v55, %v1308_v11  ;;  %v2151_v31 = vpop.f32.mrf.mxu3  ;;  %v2694_v11 = vrot.slane %v2693_v56, 4  ;;  %v3970_v55 = vshll.u32 %v6203_v5, 16  ;;  %v2779_v5 = vunpack.c.l.b16 %v2689_v22 }
 0x149   : > { %v1247_v4 = vpop.f32.mrf.mxu1 }
 0x14a   : > { %v2215_v54 = vadd.f32 %v2151_v31, %v1833_v37  ;;  %v1309_v35 = vadd.f32 %v1247_v4, %v7194_v28  ;;  %v1046_v28 = vsel %vm6923_vm4, %v1041_v12, %v1045_v9  ;;  %v2699_v51 = vsel %vm6923_vm4, %v2694_v11, %v2698_v17  ;;  %v6205_v9 = vld [vmem:[%s6779_s13 + $0x20] sm:$0x1] }
 0x14b   : > { %v2900_v52 = vpop.f32.mrf.mxu0  ;;  %v3972_v29 = vrot.slane %v3970_v55, 5  ;;  %v1127_v56 = vunpack.c.l.b16 %v1046_v28  ;;  %v3112_v12 = vrot.slane %v5947_v13, 5  ;;  %v3986_v11 = vshll.u32 %v6205_v9, 16  ;;  %v5948_v55 = vld [vmem:[%s6779_s13 + $0x14] sm:$0x1] }
 0x14c   : > { %1286 = vmatmul.bf16.gmra.mxu1 %v1142_v20  ;;  %1811 = vmatmul.bf16.gmra.mxu2 %v1667_v15  ;;  %v7570_v50 = vadd.f32 %v2897_v32, %v2215_v54  ;;  %v3976_v20 = vshll.u32 %v6204_v59, 16  ;;  %v3980_v32 = vshrl.u32 %v6204_v59, 16  ;;  %v1036_v15 = vsel %vm6923_vm4, %v1031_v62, %v7554_v46  ;;  %v6207_v9 = vld [vmem:[%s6779_s13 + $0x28] sm:$0xf] }
 0x14d   : > { %2193 = vmatmul.bf16.gmra.mxu3 %v6468_v6  ;;  %v1651_v6 = vunpack.c.l.b16 %v1568_v40  ;;  %v3969_v46 = vrot.slane %v3967_v18, 4  ;;  %v1126_v25 = vunpack.c.l.b16 %v1036_v15  ;;  %v2780_v59 = vunpack.c.l.b16 %v2699_v51  ;;  %v6299_v15 = vld [vmem:[%s6779_s13 + $0x18] sm:$0xe] }
 0x14e   : > { %2939 = vmatmul.bf16.gmra.mxu0 %v2795_v8  ;;  %v1571_v8 = vsel %vm6930_vm5, %v1569_v34, %v1570_v58  ;;  %v7588_v26 = vrot.slane %v3976_v20, 5  ;;  %v3982_v54 = vrot.slane %v3980_v32, 4  ;;  %v5946_v34 = vld [vmem:[%s6779_s13 + $0xc] sm:$0xe]  ;;  %v4762_v20 = vrot.slane %v6300_v47, 5 }
 0x14f   : > { %v1772_v48 = vpop.f32.mrf.mxu2  ;;  %v1652_v43 = vunpack.c.l.b16 %v1571_v8  ;;  %v1143_v18 = vpack.c.b16 %v1127_v56, %v1126_v25  ;;  %v5994_v8 = vrot.slane %v5946_v34, 9  ;;  %v3115_v22 = vrot.slane %v5948_v55, 5 }
 0x150   : > { %v1834_v61 = vadd.f32 %v1772_v48, %v1309_v35  ;;  %v2154_v37 = vpop.f32.mrf.mxu3  ;;  %v3973_v35 = vor.u32 %v3972_v29, %v3969_v46  ;;  %v3983_v0 = vor.u32 %v3982_v54, %v7588_v26  ;;  %v3988_v46 = vrot.slane %v3986_v11, 5 }
 0x151   : > { %v1249_v31 = vpop.f32.mrf.mxu1  ;;  %v4764_v29 = vrot.slane %v4762_v20, 4 }
 0x152   : > { %v2216_v63 = vadd.f32 %v2154_v37, %v1834_v61  ;;  %v1310_v62 = vadd.f32 %v1249_v31, %v7223_v14  ;;  %v6469_v61 = vld [vmem:[%s6779_s13 + $0xc0] sm:$0xff]  ;;  %v2796_v37 = vpack.c.b16 %v2780_v59, %v2779_v5  ;;  %v3974_v51 = vrot.slane %v3973_v35, 4 }
 0x153   : > { %v2902_v4 = vpop.f32.mrf.mxu0  ;;  %v6301_v14 = vld [vmem:[%s6779_s13 + $0x20] sm:$0x1]  ;;  %v3984_v13 = vrot.slane %v3983_v0, 4  ;;  %v3113_v59 = vsel %vm6930_vm5, %v5994_v8, %v3112_v12 }
 0x154   : > { %v7591_v58 = vadd.f32 %v2900_v52, %v2216_v63  ;;  %v1668_v52 = vpack.c.b16 %v1652_v43, %v1651_v6  ;;  %v3114_v63 = vrot.slane %v3112_v12, 4  ;;  %v6347_v6 = vrot.slane %v6299_v15, 9  ;;  %v6206_v43 = vld [vmem:[%s6779_s13 + $0x24] sm:$0xf] }
 0x155   : > { %v4765_v54 = vrot.slane %v6301_v14, 5  ;;  %v3989_v34 = vsel %vm6923_vm4, %v3984_v13, %v3988_v46  ;;  %v3991_v0 = vshrl.u32 %v6206_v43, 16  ;;  %v3994_v11 = vshll.u32 %v6206_v43, 16  ;;  %v5950_v14 = vld [vmem:[%s6779_s13 + $0x1c] sm:$0xf] }
 0x156   : > { %v3116_v47 = vsel %vm6930_vm5, %v3114_v63, %v3115_v22  ;;  %v6208_v13 = vld [vmem:[%s6779_s13 + $0x2c] sm:$0x1] }
 0x157   : > { %v1774_v40 = vpop.f32.mrf.mxu2  ;;  %v4766_v35 = vsel %vm6930_vm5, %v4764_v29, %v4765_v54  ;;  %v3272_v55 = vunpack.c.l.b16 %v3116_v47  ;;  %v3996_v8 = vrot.slane %v3994_v11, 5  ;;  %v5949_v47 = vld [vmem:[%s6779_s13 + $0x18] sm:$0xe] }
 0x158   : > { %v1835_v17 = vadd.f32 %v1774_v40, %v1310_v62  ;;  %v2156_v48 = vpop.f32.mrf.mxu3  ;;  %v3979_v62 = vsel %vm6923_vm4, %v3974_v51, %v7588_v26  ;;  %v5995_v11 = vrot.slane %v5949_v47, 9 }
 0x159   : > { %v1252_v32 = vpop.f32.mrf.mxu1 }
 0x15a   : > { %v2217_v31 = vadd.f32 %v2156_v48, %v1835_v17  ;;  %v1311_v56 = vadd.f32 %v1252_v32, %v7252_v2  ;;  %v4763_v2 = vsel %vm6930_vm5, %v6347_v6, %v4762_v20  ;;  %v4000_v17 = vshll.u32 %v6207_v9, 16  ;;  %v6303_v6 = vld [vmem:[%s6779_s13 + $0x28] sm:$0xf] }
 0x15b   : > { %v2905_v28 = vpop.f32.mrf.mxu0  ;;  %v4004_v48 = vshrl.u32 %v6207_v9, 16  ;;  %v4399_v32 = vunpack.c.l.b16 %v3979_v62  ;;  %v4922_v20 = vunpack.c.l.b16 %v4766_v35  ;;  %v3119_v9 = vrot.slane %v5950_v14, 5 }
 0x15c   : > { %1291 = vmatmul.bf16.gmra.mxu1 %v1143_v18  ;;  %1816 = vmatmul.bf16.gmra.mxu2 %v1668_v52  ;;  %v7601_v25 = vadd.f32 %v2902_v4, %v2217_v31  ;;  %v3271_v52 = vunpack.c.l.b16 %v3113_v59  ;;  %v3993_v31 = vrot.slane %v3991_v0, 4  ;;  %v7622_v63 = vrot.slane %v4000_v17, 5  ;;  %v6304_v0 = vld [vmem:[%s6779_s13 + $0x2c] sm:$0x1] }
 0x15d   : > { %2198 = vmatmul.bf16.gmra.mxu3 %v6469_v61  ;;  %v4400_v61 = vunpack.c.l.b16 %v3989_v34  ;;  %v4006_v22 = vrot.slane %v4004_v48, 4  ;;  %v4769_v35 = vrot.slane %v6303_v6, 5  ;;  %v3121_v17 = vrot.slane %v3119_v9, 4  ;;  %v6209_v48 = vld [vmem:[%s6779_s13 + $0x30] sm:$0xf] }
 0x15e   : > { %2944 = vmatmul.bf16.gmra.mxu0 %v2796_v37  ;;  %v4921_v37 = vunpack.c.l.b16 %v4763_v2  ;;  %v3997_v62 = vor.u32 %v3996_v8, %v3993_v31  ;;  %v5951_v2 = vld [vmem:[%s6779_s13 + $0x20] sm:$0x1]  ;;  %v4772_v8 = vrot.slane %v6304_v0, 5  ;;  %v6211_v0 = vld [vmem:[%s6779_s13 + $0x38] sm:$0x1] }
 0x15f   : > { %v1777_v5 = vpop.f32.mrf.mxu2  ;;  %v4431_v43 = vpack.c.b16 %v4400_v61, %v4399_v32  ;;  %v4771_v31 = vrot.slane %v4769_v35, 4 }
 0x160   : > { %v1836_v40 = vadd.f32 %v1777_v5, %v1311_v56  ;;  %v2159_v4 = vpop.f32.mrf.mxu3  ;;  %v3303_v56 = vpack.c.b16 %v3272_v55, %v3271_v52  ;;  %v4953_v59 = vpack.c.b16 %v4922_v20, %v4921_v37  ;;  %v3122_v55 = vrot.slane %v5951_v2, 5 }
 0x161   : > { %v1254_v12 = vpop.f32.mrf.mxu1  ;;  %v3998_v32 = vrot.slane %v3997_v62, 4  ;;  %v4773_v62 = vsel %vm6930_vm5, %v4771_v31, %v4772_v8  ;;  %v4034_v8 = vshll.u32 %v6211_v0, 16 }
 0x162   : > { %v2218_v18 = vadd.f32 %v2159_v4, %v1836_v40  ;;  %v1312_v51 = vadd.f32 %v1254_v12, %v7280_v57  ;;  %v4007_v57 = vor.u32 %v4006_v22, %v7622_v63  ;;  %v4010_v40 = vshll.u32 %v6208_v13, 16  ;;  %v6302_v12 = vld [vmem:[%s6779_s13 + $0x24] sm:$0xe] }
 0x163   : > { %v2907_v26 = vpop.f32.mrf.mxu0  ;;  %v6348_v14 = vrot.slane %v6302_v12, 9  ;;  %v4018_v13 = vshll.u32 %v6209_v48, 16 }
 0x164   : > { %v7619_v15 = vadd.f32 %v2905_v28, %v2218_v18  ;;  %v6494_v28 = vld [vmem:[%s6779_s13 + $0x18] sm:$0xff]  ;;  %v6210_v18 = vld [vmem:[%s6779_s13 + $0x34] sm:$0xf]  ;;  %v4008_v61 = vrot.slane %v4007_v57, 4  ;;  %v4012_v37 = vrot.slane %v4010_v40, 5 }
 0x165   : > { %v4028_v6 = vshrl.u32 %v6210_v18, 16  ;;  %v4770_v47 = vsel %vm6930_vm5, %v6348_v14, %v4769_v35  ;;  %v4020_v40 = vrot.slane %v4018_v13, 5  ;;  %v6495_v13 = vld [vmem:[%s6779_s13 + $0x24] sm:$0xff] }
 0x166   : > { %v4923_v35 = vunpack.c.l.b16 %v4770_v47 }
 0x167   : > { %v1779_v46 = vpop.f32.mrf.mxu2  ;;  %v4030_v2 = vrot.slane %v4028_v6, 4 }
 0x168   : > { %v1837_v29 = vadd.f32 %v1779_v46, %v1312_v51  ;;  %v2161_v54 = vpop.f32.mrf.mxu3  ;;  %v4015_v51 = vshrl.u32 %v6209_v48, 16  ;;  %v4024_v46 = vshll.u32 %v6210_v18, 16  ;;  %v4924_v18 = vunpack.c.l.b16 %v4773_v62 }
 0x169   : > { %v1257_v5 = vpop.f32.mrf.mxu1 }
 0x16a   : > { %v2219_v4 = vadd.f32 %v2161_v54, %v1837_v29  ;;  %v1313_v20 = vadd.f32 %v1257_v5, %v7111_v30  ;;  %v4003_v30 = vsel %vm6923_vm4, %v3998_v32, %v7622_v63  ;;  %v4017_v57 = vrot.slane %v4015_v51, 4 }
 0x16b   : > { %v2910_v34 = vpop.f32.mrf.mxu0 }
 0x16c   : > { %3391 = vmatmul.bf16.vlgmr.msra.gmra.mxu1 %v3303_v56  ;;  %3773 = vmatmul.bf16.vlgmr.msra.gmra.mxu2 %v6494_v28  ;;  %v7635_v52 = vadd.f32 %v2907_v26, %v2219_v4  ;;  %v3120_v56 = vsel %vm6930_vm5, %v5995_v11, %v3119_v9  ;;  %v3123_v28 = vsel %vm6930_vm5, %v3121_v17, %v3122_v55  ;;  %v5953_v9 = vld [vmem:[%s6779_s13 + $0x28] sm:$0xf]  ;;  %v7652_v4 = vrot.slane %v4024_v46, 5  ;;  %v6306_v55 = vld [vmem:[%s6779_s13 + $0x34] sm:$0xf] }
 0x16d   : > { %4519 = vmatmul.bf16.vlgmr.msra.gmra.mxu3 %v4431_v43  ;;  %v3273_v63 = vunpack.c.l.b16 %v3120_v56  ;;  %v3274_v12 = vunpack.c.l.b16 %v3123_v28  ;;  %v4401_v17 = vunpack.c.l.b16 %v4003_v30  ;;  %v4021_v14 = vor.u32 %v4020_v40, %v4017_v57  ;;  %v5954_v46 = vld [vmem:[%s6779_s13 + $0x2c] sm:$0x1]  ;;  %v6305_v28 = vld [vmem:[%s6779_s13 + $0x30] sm:$0xe] }
 0x16e   : > { %5041 = vmatmul.bf16.vlgmr.msra.gmra.mxu0 %v4953_v59  ;;  %v4013_v59 = vsel %vm6923_vm4, %v4008_v61, %v4012_v37  ;;  %v3126_v61 = vrot.slane %v5953_v9, 5  ;;  %v4031_v31 = vor.u32 %v4030_v2, %v7652_v4  ;;  %v4776_v6 = vrot.slane %v6306_v55, 5 }
 0x16f   : > { %v1782_v22 = vpop.f32.mrf.mxu2  ;;  %v4402_v48 = vunpack.c.l.b16 %v4013_v59  ;;  %v3304_v51 = vpack.c.b16 %v3274_v12, %v3273_v63  ;;  %v4954_v56 = vpack.c.b16 %v4924_v18, %v4923_v35  ;;  %v3129_v47 = vrot.slane %v5954_v46, 5 }
 0x170   : > { %v1838_v29 = vadd.f32 %v1782_v22, %v1313_v20  ;;  %v2164_v26 = vpop.f32.mrf.mxu3  ;;  %v5952_v20 = vld [vmem:[%s6779_s13 + $0x24] sm:$0xe]  ;;  %v3128_v59 = vrot.slane %v3126_v61, 4  ;;  %v4022_v62 = vrot.slane %v4021_v14, 4  ;;  %v4032_v9 = vrot.slane %v4031_v31, 4 }
 0x171   : > { %v1259_v54 = vpop.f32.mrf.mxu1  ;;  %v4036_v57 = vrot.slane %v4034_v8, 5  ;;  %v6349_v40 = vrot.slane %v6305_v28, 9  ;;  %v4778_v2 = vrot.slane %v4776_v6, 4 }
 0x172   : > { %v2220_v43 = vadd.f32 %v2164_v26, %v1838_v29  ;;  %v1314_v32 = vadd.f32 %v1259_v54, %v7141_v3  ;;  %v4432_v26 = vpack.c.b16 %v4402_v48, %v4401_v17  ;;  %v6307_v3 = vld [vmem:[%s6779_s13 + $0x38] sm:$0x1]  ;;  %v6212_v17 = vld [vmem:[%s6779_s13 + $0x3c] sm:$0xf]  ;;  %v6213_v48 = vld [vmem:[%s6779_s13 + $0x40] sm:$0xf]  ;;  %v3130_v55 = vsel %vm6930_vm5, %v3128_v59, %v3129_v47 }
 0x173   : > { %v2912_v5 = vpop.f32.mrf.mxu0  ;;  %v4779_v63 = vrot.slane %v6307_v3, 5  ;;  %v4039_v31 = vshrl.u32 %v6212_v17, 16  ;;  %v4042_v8 = vshll.u32 %v6212_v17, 16  ;;  %v3276_v46 = vunpack.c.l.b16 %v3130_v55  ;;  %v5956_v3 = vld [vmem:[%s6779_s13 + $0x34] sm:$0xf] }
 0x174   : > { %v7655_v11 = vadd.f32 %v2910_v34, %v2220_v43  ;;  %v5996_v43 = vrot.slane %v5952_v20, 9  ;;  %v4037_v20 = vsel %vm6923_vm4, %v4032_v9, %v4036_v57  ;;  %v6214_v9 = vld [vmem:[%s6779_s13 + $0x44] sm:$0x1]  ;;  %v5955_v55 = vld [vmem:[%s6779_s13 + $0x30] sm:$0xe] }
 0x175   : > { %v4780_v14 = vsel %vm6930_vm5, %v4778_v2, %v4779_v63 }
 0x176   : > { %v3127_v18 = vsel %vm6930_vm5, %v5996_v43, %v3126_v61  ;;  %v4044_v43 = vrot.slane %v4042_v8, 5  ;;  %v5997_v8 = vrot.slane %v5955_v55, 9 }
 0x177   : > { %v1784_v37 = vpop.f32.mrf.mxu2 }
 0x178   : > { %v1839_v34 = vadd.f32 %v1784_v37, %v1314_v32  ;;  %v2166_v22 = vpop.f32.mrf.mxu3  ;;  %v4027_v32 = vsel %vm6923_vm4, %v4022_v62, %v7652_v4 }
 0x179   : > { %v1262_v29 = vpop.f32.mrf.mxu1 }
 0x17a   : > { %v2221_v54 = vadd.f32 %v2166_v22, %v1839_v34  ;;  %v1315_v0 = vadd.f32 %v1262_v29, %v7156_v39  ;;  %v4777_v39 = vsel %vm6930_vm5, %v6349_v40, %v4776_v6  ;;  %v4048_v34 = vshll.u32 %v6213_v48, 16  ;;  %v6309_v40 = vld [vmem:[%s6779_s13 + $0x40] sm:$0xf] }
 0x17b   : > { %v2915_v30 = vpop.f32.mrf.mxu0  ;;  %v4052_v22 = vshrl.u32 %v6213_v48, 16  ;;  %v4403_v29 = vunpack.c.l.b16 %v4027_v32  ;;  %v4926_v6 = vunpack.c.l.b16 %v4780_v14  ;;  %v3133_v48 = vrot.slane %v5956_v3, 5 }
 0x17c   : > { %3396 = vmatmul.bf16.gmra.mxu1 %v3304_v51  ;;  %3778 = vmatmul.bf16.gmra.mxu2 %v6495_v13  ;;  %v7665_v12 = vadd.f32 %v2912_v5, %v2221_v54  ;;  %v3275_v13 = vunpack.c.l.b16 %v3127_v18  ;;  %v4041_v54 = vrot.slane %v4039_v31, 4  ;;  %v7686_v59 = vrot.slane %v4048_v34, 5  ;;  %v6310_v31 = vld [vmem:[%s6779_s13 + $0x44] sm:$0x1] }
 0x17d   : > { %4524 = vmatmul.bf16.gmra.mxu3 %v4432_v26  ;;  %v4404_v26 = vunpack.c.l.b16 %v4037_v20  ;;  %v4054_v47 = vrot.slane %v4052_v22, 4  ;;  %v4783_v14 = vrot.slane %v6309_v40, 5  ;;  %v3135_v34 = vrot.slane %v3133_v48, 4  ;;  %v6215_v22 = vld [vmem:[%s6779_s13 + $0x48] sm:$0xf] }
 0x17e   : > { %5046 = vmatmul.bf16.gmra.mxu0 %v4954_v56  ;;  %v4925_v56 = vunpack.c.l.b16 %v4777_v39  ;;  %v4045_v32 = vor.u32 %v4044_v43, %v4041_v54  ;;  %v5957_v39 = vld [vmem:[%s6779_s13 + $0x38] sm:$0x1]  ;;  %v4786_v43 = vrot.slane %v6310_v31, 5  ;;  %v6217_v31 = vld [vmem:[%s6779_s13 + $0x50] sm:$0x1] }
 0x17f   : > { %v1787_v35 = vpop.f32.mrf.mxu2  ;;  %v4433_v17 = vpack.c.b16 %v4404_v26, %v4403_v29  ;;  %v4785_v54 = vrot.slane %v4783_v14, 4 }
 0x180   : > { %v1840_v37 = vadd.f32 %v1787_v35, %v1315_v0  ;;  %v2169_v5 = vpop.f32.mrf.mxu3  ;;  %v3305_v0 = vpack.c.b16 %v3276_v46, %v3275_v13  ;;  %v4955_v18 = vpack.c.b16 %v4926_v6, %v4925_v56  ;;  %v3136_v46 = vrot.slane %v5957_v39, 5 }
 0x181   : > { %v1264_v61 = vpop.f32.mrf.mxu1  ;;  %v4046_v29 = vrot.slane %v4045_v32, 4  ;;  %v4787_v32 = vsel %vm6930_vm5, %v4785_v54, %v4786_v43  ;;  %v4082_v43 = vshll.u32 %v6217_v31, 16 }
 0x182   : > { %v2222_v51 = vadd.f32 %v2169_v5, %v1840_v37  ;;  %v1316_v62 = vadd.f32 %v1264_v61, %v7188_v19  ;;  %v4055_v19 = vor.u32 %v4054_v47, %v7686_v59  ;;  %v4058_v37 = vshll.u32 %v6214_v9, 16  ;;  %v6308_v61 = vld [vmem:[%s6779_s13 + $0x3c] sm:$0xe] }
 0x183   : > { %v2917_v4 = vpop.f32.mrf.mxu0  ;;  %v6350_v3 = vrot.slane %v6308_v61, 9  ;;  %v4066_v9 = vshll.u32 %v6215_v22, 16 }
 0x184   : > { %v7683_v28 = vadd.f32 %v2915_v30, %v2222_v51  ;;  %v6496_v30 = vld [vmem:[%s6779_s13 + $0x30] sm:$0xff]  ;;  %v6216_v51 = vld [vmem:[%s6779_s13 + $0x4c] sm:$0xf]  ;;  %v4056_v26 = vrot.slane %v4055_v19, 4  ;;  %v4060_v56 = vrot.slane %v4058_v37, 5 }
 0x185   : > { %v4076_v40 = vshrl.u32 %v6216_v51, 16  ;;  %v4784_v55 = vsel %vm6930_vm5, %v6350_v3, %v4783_v14  ;;  %v4068_v37 = vrot.slane %v4066_v9, 5  ;;  %v6497_v9 = vld [vmem:[%s6779_s13 + $0x3c] sm:$0xff] }
 0x186   : > { %v4927_v14 = vunpack.c.l.b16 %v4784_v55 }
 0x187   : > { %v1789_v57 = vpop.f32.mrf.mxu2  ;;  %v4078_v39 = vrot.slane %v4076_v40, 4 }
 0x188   : > { %v1841_v2 = vadd.f32 %v1789_v57, %v1316_v62  ;;  %v2171_v63 = vpop.f32.mrf.mxu3  ;;  %v4063_v62 = vshrl.u32 %v6215_v22, 16  ;;  %v4072_v57 = vshll.u32 %v6216_v51, 16  ;;  %v4928_v51 = vunpack.c.l.b16 %v4787_v32 }
 0x189   : > { %v1267_v35 = vpop.f32.mrf.mxu1 }
 0x18a   : > { %v2223_v5 = vadd.f32 %v2171_v63, %v1841_v2  ;;  %v1317_v6 = vadd.f32 %v1267_v35, %v7215_v1  ;;  %v4051_v1 = vsel %vm6923_vm4, %v4046_v29, %v7686_v59  ;;  %v4065_v19 = vrot.slane %v4063_v62, 4 }
 0x18b   : > { %v2920_v20 = vpop.f32.mrf.mxu0 }
 0x18c   : > { %3401 = vmatmul.bf16.gmra.mxu1 %v3305_v0  ;;  %3783 = vmatmul.bf16.gmra.mxu2 %v6496_v30  ;;  %v7699_v13 = vadd.f32 %v2917_v4, %v2223_v5  ;;  %v3134_v0 = vsel %vm6930_vm5, %v5997_v8, %v3133_v48  ;;  %v3137_v30 = vsel %vm6930_vm5, %v3135_v34, %v3136_v46  ;;  %v5959_v48 = vld [vmem:[%s6779_s13 + $0x40] sm:$0xf]  ;;  %v7716_v5 = vrot.slane %v4072_v57, 5  ;;  %v6312_v46 = vld [vmem:[%s6779_s13 + $0x4c] sm:$0xf] }
 0x18d   : > { %4529 = vmatmul.bf16.gmra.mxu3 %v4433_v17  ;;  %v3277_v59 = vunpack.c.l.b16 %v3134_v0  ;;  %v3278_v61 = vunpack.c.l.b16 %v3137_v30  ;;  %v4405_v34 = vunpack.c.l.b16 %v4051_v1  ;;  %v4069_v3 = vor.u32 %v4068_v37, %v4065_v19  ;;  %v5960_v57 = vld [vmem:[%s6779_s13 + $0x44] sm:$0x1]  ;;  %v6311_v30 = vld [vmem:[%s6779_s13 + $0x48] sm:$0xe] }
 0x18e   : > { %5051 = vmatmul.bf16.gmra.mxu0 %v4955_v18  ;;  %v4061_v18 = vsel %vm6923_vm4, %v4056_v26, %v4060_v56  ;;  %v3140_v26 = vrot.slane %v5959_v48, 5  ;;  %v4079_v54 = vor.u32 %v4078_v39, %v7716_v5  ;;  %v4790_v40 = vrot.slane %v6312_v46, 5 }
 0x18f   : > { %v1792_v47 = vpop.f32.mrf.mxu2  ;;  %v4406_v22 = vunpack.c.l.b16 %v4061_v18  ;;  %v3306_v62 = vpack.c.b16 %v3278_v61, %v3277_v59  ;;  %v4956_v0 = vpack.c.b16 %v4928_v51, %v4927_v14  ;;  %v3143_v55 = vrot.slane %v5960_v57, 5 }
 0x190   : > { %v1842_v2 = vadd.f32 %v1792_v47, %v1317_v6  ;;  %v2174_v4 = vpop.f32.mrf.mxu3  ;;  %v5958_v6 = vld [vmem:[%s6779_s13 + $0x3c] sm:$0xe]  ;;  %v3142_v18 = vrot.slane %v3140_v26, 4  ;;  %v4070_v32 = vrot.slane %v4069_v3, 4  ;;  %v4080_v48 = vrot.slane %v4079_v54, 4 }
 0x191   : > { %v1269_v63 = vpop.f32.mrf.mxu1  ;;  %v4084_v19 = vrot.slane %v4082_v43, 5  ;;  %v6351_v37 = vrot.slane %v6311_v30, 9  ;;  %v4792_v39 = vrot.slane %v4790_v40, 4 }
 0x192   : > { %v2224_v17 = vadd.f32 %v2174_v4, %v1842_v2  ;;  %v1318_v29 = vadd.f32 %v1269_v63, %v7245_v53  ;;  %v4434_v4 = vpack.c.b16 %v4406_v22, %v4405_v34  ;;  %v6313_v53 = vld [vmem:[%s6779_s13 + $0x50] sm:$0x1]  ;;  %v6218_v34 = vld [vmem:[%s6779_s13 + $0x54] sm:$0xf]  ;;  %v6219_v22 = vld [vmem:[%s6779_s13 + $0x58] sm:$0xf]  ;;  %v3144_v46 = vsel %vm6930_vm5, %v3142_v18, %v3143_v55 }
 0x193   : > { %v2922_v35 = vpop.f32.mrf.mxu0  ;;  %v4793_v59 = vrot.slane %v6313_v53, 5  ;;  %v4087_v54 = vshrl.u32 %v6218_v34, 16  ;;  %v4090_v43 = vshll.u32 %v6218_v34, 16  ;;  %v3280_v57 = vunpack.c.l.b16 %v3144_v46  ;;  %v5962_v53 = vld [vmem:[%s6779_s13 + $0x4c] sm:$0xf] }
 0x194   : > { %v7719_v8 = vadd.f32 %v2920_v20, %v2224_v17  ;;  %v5998_v17 = vrot.slane %v5958_v6, 9  ;;  %v4085_v6 = vsel %vm6923_vm4, %v4080_v48, %v4084_v19  ;;  %v6220_v48 = vld [vmem:[%s6779_s13 + $0x5c] sm:$0x1]  ;;  %v5961_v46 = vld [vmem:[%s6779_s13 + $0x48] sm:$0xe] }
 0x195   : > { %v4794_v3 = vsel %vm6930_vm5, %v4792_v39, %v4793_v59 }
 0x196   : > { %v3141_v51 = vsel %vm6930_vm5, %v5998_v17, %v3140_v26  ;;  %v4092_v17 = vrot.slane %v4090_v43, 5  ;;  %v5999_v43 = vrot.slane %v5961_v46, 9 }
 0x197   : > { %v1794_v56 = vpop.f32.mrf.mxu2 }
 0x198   : > { %v1843_v20 = vadd.f32 %v1794_v56, %v1318_v29  ;;  %v2176_v47 = vpop.f32.mrf.mxu3  ;;  %v4075_v29 = vsel %vm6923_vm4, %v4070_v32, %v7716_v5 }
 0x199   : > { %v1272_v2 = vpop.f32.mrf.mxu1 }
 0x19a   : > { %v2225_v63 = vadd.f32 %v2176_v47, %v1843_v20  ;;  %v1319_v31 = vadd.f32 %v1272_v2, %v7260_v41  ;;  %v4791_v41 = vsel %vm6930_vm5, %v6351_v37, %v4790_v40  ;;  %v4096_v20 = vshll.u32 %v6219_v22, 16  ;;  %v6315_v37 = vld [vmem:[%s6779_s13 + $0x58] sm:$0xf] }
 0x19b   : > { %v2925_v1 = vpop.f32.mrf.mxu0  ;;  %v4100_v47 = vshrl.u32 %v6219_v22, 16  ;;  %v4407_v2 = vunpack.c.l.b16 %v4075_v29  ;;  %v4930_v40 = vunpack.c.l.b16 %v4794_v3  ;;  %v3147_v22 = vrot.slane %v5962_v53, 5 }
 0x19c   : > { %3406 = vmatmul.bf16.gmra.mxu1 %v3306_v62  ;;  %3788 = vmatmul.bf16.gmra.mxu2 %v6497_v9  ;;  %v7729_v61 = vadd.f32 %v2922_v35, %v2225_v63  ;;  %v3279_v9 = vunpack.c.l.b16 %v3141_v51  ;;  %v4089_v63 = vrot.slane %v4087_v54, 4  ;;  %v7750_v18 = vrot.slane %v4096_v20, 5  ;;  %v6316_v54 = vld [vmem:[%s6779_s13 + $0x5c] sm:$0x1] }
 0x19d   : > { %4534 = vmatmul.bf16.gmra.mxu3 %v4434_v4  ;;  %v4408_v4 = vunpack.c.l.b16 %v4085_v6  ;;  %v4102_v55 = vrot.slane %v4100_v47, 4  ;;  %v4797_v3 = vrot.slane %v6315_v37, 5  ;;  %v3149_v20 = vrot.slane %v3147_v22, 4  ;;  %v6221_v47 = vld [vmem:[%s6779_s13 + $0x60] sm:$0xf] }
 0x19e   : > { %5056 = vmatmul.bf16.gmra.mxu0 %v4956_v0  ;;  %v4929_v0 = vunpack.c.l.b16 %v4791_v41  ;;  %v4093_v29 = vor.u32 %v4092_v17, %v4089_v63  ;;  %v5963_v41 = vld [vmem:[%s6779_s13 + $0x50] sm:$0x1]  ;;  %v4800_v17 = vrot.slane %v6316_v54, 5  ;;  %v6223_v54 = vld [vmem:[%s6779_s13 + $0x68] sm:$0x1] }
 0x19f   : > { %v1797_v14 = vpop.f32.mrf.mxu2  ;;  %v4435_v34 = vpack.c.b16 %v4408_v4, %v4407_v2  ;;  %v4799_v63 = vrot.slane %v4797_v3, 4 }
 0x1a0   : > { %v1844_v56 = vadd.f32 %v1797_v14, %v1319_v31  ;;  %v2179_v35 = vpop.f32.mrf.mxu3  ;;  %v3307_v31 = vpack.c.b16 %v3280_v57, %v3279_v9  ;;  %v4957_v51 = vpack.c.b16 %v4930_v40, %v4929_v0  ;;  %v3150_v57 = vrot.slane %v5963_v41, 5 }
 0x1a1   : > { %v1274_v26 = vpop.f32.mrf.mxu1  ;;  %v4094_v2 = vrot.slane %v4093_v29, 4  ;;  %v4801_v29 = vsel %vm6930_vm5, %v4799_v63, %v4800_v17  ;;  %v4130_v17 = vshll.u32 %v6223_v54, 16 }
 0x1a2   : > { %v2226_v62 = vadd.f32 %v2179_v35, %v1844_v56  ;;  %v1320_v32 = vadd.f32 %v1274_v26, %v7292_v42  ;;  %v4103_v42 = vor.u32 %v4102_v55, %v7750_v18  ;;  %v4106_v56 = vshll.u32 %v6220_v48, 16  ;;  %v6314_v26 = vld [vmem:[%s6779_s13 + $0x54] sm:$0xe] }
 0x1a3   : > { %v2927_v5 = vpop.f32.mrf.mxu0  ;;  %v6352_v53 = vrot.slane %v6314_v26, 9  ;;  %v4114_v48 = vshll.u32 %v6221_v47, 16 }
 0x1a4   : > { %v7747_v30 = vadd.f32 %v2925_v1, %v2226_v62  ;;  %v6498_v1 = vld [vmem:[%s6779_s13 + $0x48] sm:$0xff]  ;;  %v6222_v62 = vld [vmem:[%s6779_s13 + $0x64] sm:$0xf]  ;;  %v4104_v4 = vrot.slane %v4103_v42, 4  ;;  %v4108_v0 = vrot.slane %v4106_v56, 5 }
 0x1a5   : > { %v4124_v37 = vshrl.u32 %v6222_v62, 16  ;;  %v4798_v46 = vsel %vm6930_vm5, %v6352_v53, %v4797_v3  ;;  %v4116_v56 = vrot.slane %v4114_v48, 5  ;;  %v6499_v48 = vld [vmem:[%s6779_s13 + $0x54] sm:$0xff] }
 0x1a6   : > { %v4931_v3 = vunpack.c.l.b16 %v4798_v46 }
 0x1a7   : > { %v1799_v19 = vpop.f32.mrf.mxu2  ;;  %v4126_v41 = vrot.slane %v4124_v37, 4 }
 0x1a8   : > { %v1845_v39 = vadd.f32 %v1799_v19, %v1320_v32  ;;  %v2181_v59 = vpop.f32.mrf.mxu3  ;;  %v4111_v32 = vshrl.u32 %v6221_v47, 16  ;;  %v4120_v19 = vshll.u32 %v6222_v62, 16  ;;  %v4932_v62 = vunpack.c.l.b16 %v4801_v29 }
 0x1a9   : > { %v1277_v14 = vpop.f32.mrf.mxu1 }
 0x1aa   : > { %v2227_v35 = vadd.f32 %v2181_v59, %v1845_v39  ;;  %v1321_v40 = vadd.f32 %v1277_v14, %v7117_v36  ;;  %v4099_v36 = vsel %vm6923_vm4, %v4094_v2, %v7750_v18  ;;  %v4113_v42 = vrot.slane %v4111_v32, 4 }
 0x1ab   : > { %v2930_v6 = vpop.f32.mrf.mxu0 }
 0x1ac   : > { %3411 = vmatmul.bf16.gmra.mxu1 %v3307_v31  ;;  %3793 = vmatmul.bf16.gmra.mxu2 %v6498_v1  ;;  %v7763_v9 = vadd.f32 %v2927_v5, %v2227_v35  ;;  %v3148_v31 = vsel %vm6930_vm5, %v5999_v43, %v3147_v22  ;;  %v3151_v1 = vsel %vm6930_vm5, %v3149_v20, %v3150_v57  ;;  %v5965_v22 = vld [vmem:[%s6779_s13 + $0x58] sm:$0xf]  ;;  %v7780_v35 = vrot.slane %v4120_v19, 5  ;;  %v6318_v57 = vld [vmem:[%s6779_s13 + $0x64] sm:$0xf] }
 0x1ad   : > { %4539 = vmatmul.bf16.gmra.mxu3 %v4435_v34  ;;  %v3281_v18 = vunpack.c.l.b16 %v3148_v31  ;;  %v3282_v26 = vunpack.c.l.b16 %v3151_v1  ;;  %v4409_v20 = vunpack.c.l.b16 %v4099_v36  ;;  %v4117_v53 = vor.u32 %v4116_v56, %v4113_v42  ;;  %v5966_v19 = vld [vmem:[%s6779_s13 + $0x5c] sm:$0x1]  ;;  %v6317_v1 = vld [vmem:[%s6779_s13 + $0x60] sm:$0xe] }
 0x1ae   : > { %5061 = vmatmul.bf16.gmra.mxu0 %v4957_v51  ;;  %v4109_v51 = vsel %vm6923_vm4, %v4104_v4, %v4108_v0  ;;  %v3154_v4 = vrot.slane %v5965_v22, 5  ;;  %v4127_v63 = vor.u32 %v4126_v41, %v7780_v35  ;;  %v4804_v37 = vrot.slane %v6318_v57, 5 }
 0x1af   : > { %v1802_v55 = vpop.f32.mrf.mxu2  ;;  %v4410_v47 = vunpack.c.l.b16 %v4109_v51  ;;  %v3308_v32 = vpack.c.b16 %v3282_v26, %v3281_v18  ;;  %v4958_v31 = vpack.c.b16 %v4932_v62, %v4931_v3  ;;  %v3157_v46 = vrot.slane %v5966_v19, 5 }
 0x1b0   : > { %v1846_v39 = vadd.f32 %v1802_v55, %v1321_v40  ;;  %v2184_v5 = vpop.f32.mrf.mxu3  ;;  %v5964_v40 = vld [vmem:[%s6779_s13 + $0x54] sm:$0xe]  ;;  %v3156_v51 = vrot.slane %v3154_v4, 4  ;;  %v4118_v29 = vrot.slane %v4117_v53, 4  ;;  %v4128_v22 = vrot.slane %v4127_v63, 4 }
 0x1b1   : > { %v1279_v59 = vpop.f32.mrf.mxu1  ;;  %v4132_v42 = vrot.slane %v4130_v17, 5  ;;  %v6353_v56 = vrot.slane %v6317_v1, 9  ;;  %v4806_v41 = vrot.slane %v4804_v37, 4 }
 0x1b2   : > { %v2228_v34 = vadd.f32 %v2184_v5, %v1846_v39  ;;  %v1322_v2 = vadd.f32 %v1279_v59, %v7143_v7  ;;  %v4436_v5 = vpack.c.b16 %v4410_v47, %v4409_v20  ;;  %v6319_v7 = vld [vmem:[%s6779_s13 + $0x68] sm:$0x1]  ;;  %v6224_v20 = vld [vmem:[%s6779_s13 + $0x6c] sm:$0xf]  ;;  %v6225_v47 = vld [vmem:[%s6779_s13 + $0x70] sm:$0xf]  ;;  %v3158_v57 = vsel %vm6930_vm5, %v3156_v51, %v3157_v46 }
 0x1b3   : > { %v2932_v14 = vpop.f32.mrf.mxu0  ;;  %v4807_v18 = vrot.slane %v6319_v7, 5  ;;  %v4135_v63 = vshrl.u32 %v6224_v20, 16  ;;  %v4138_v17 = vshll.u32 %v6224_v20, 16  ;;  %v3284_v19 = vunpack.c.l.b16 %v3158_v57  ;;  %v5968_v7 = vld [vmem:[%s6779_s13 + $0x64] sm:$0xf] }
 0x1b4   : > { %v7783_v43 = vadd.f32 %v2930_v6, %v2228_v34  ;;  %v6000_v34 = vrot.slane %v5964_v40, 9  ;;  %v4133_v40 = vsel %vm6923_vm4, %v4128_v22, %v4132_v42  ;;  %v6226_v42 = vld [vmem:[%s6779_s13 + $0x74] sm:$0x1] }
 0x1b5   : > { %v4808_v53 = vsel %vm6930_vm5, %v4806_v41, %v4807_v18  ;;  %v6321_v41 = vld [vmem:[%s6779_s13 + $0x70] sm:$0xf] }
 0x1b6   : > { %v3155_v62 = vsel %vm6930_vm5, %v6000_v34, %v3154_v4  ;;  %v4140_v34 = vrot.slane %v4138_v17, 5  ;;  %v6320_v17 = vld [vmem:[%s6779_s13 + $0x6c] sm:$0xe] }
 0x1b7   : > { %v1804_v0 = vpop.f32.mrf.mxu2 }
 0x1b8   : > { %v1847_v6 = vadd.f32 %v1804_v0, %v1322_v2  ;;  %v2186_v55 = vpop.f32.mrf.mxu3  ;;  %v4123_v2 = vsel %vm6923_vm4, %v4118_v29, %v7780_v35  ;;  %v8237_v29 = vld [vmem:[#allocation4_spill] sm:$0xff] }
 0x1b9   : > { %v1282_v39 = vpop.f32.mrf.mxu1 }
 0x1ba   : > { %v2229_v59 = vadd.f32 %v2186_v55, %v1847_v6  ;;  %v1323_v54 = vadd.f32 %v1282_v39, %v7160_v45  ;;  %v4805_v45 = vsel %vm6930_vm5, %v6353_v56, %v4804_v37  ;;  %v4144_v6 = vshll.u32 %v6225_v47, 16 }
 0x1bb   : > { %v2935_v36 = vpop.f32.mrf.mxu0  ;;  %v4148_v55 = vshrl.u32 %v6225_v47, 16  ;;  %v4411_v39 = vunpack.c.l.b16 %v4123_v2  ;;  %v4934_v37 = vunpack.c.l.b16 %v4808_v53  ;;  %v5967_v2 = vld [vmem:[%s6779_s13 + $0x60] sm:$0xe] }
 0x1bc   : > { %3416 = vmatmul.bf16.gmra.mxu1 %v3308_v32  ;;  %3798 = vmatmul.bf16.gmra.mxu2 %v6499_v48  ;;  %v7793_v26 = vadd.f32 %v2932_v14, %v2229_v59  ;;  %v3283_v48 = vunpack.c.l.b16 %v3155_v62  ;;  %v4137_v59 = vrot.slane %v4135_v63, 4  ;;  %v7814_v51 = vrot.slane %v4144_v6, 5  ;;  %v6322_v6 = vld [vmem:[%s6779_s13 + $0x74] sm:$0x1] }
 0x1bd   : > { %4544 = vmatmul.bf16.gmra.mxu3 %v4436_v5  ;;  %v4412_v5 = vunpack.c.l.b16 %v4133_v40  ;;  %v4150_v46 = vrot.slane %v4148_v55, 4  ;;  %v4154_v40 = vshll.u32 %v6226_v42, 16  ;;  %v4811_v63 = vrot.slane %v6321_v41, 5 }
 0x1be   : > { %5066 = vmatmul.bf16.gmra.mxu0 %v4958_v31  ;;  %v4933_v31 = vunpack.c.l.b16 %v4805_v45  ;;  %v3309_v20 = vpack.c.b16 %v3284_v19, %v3283_v48  ;;  %v6001_v55 = vrot.slane %v5967_v2, 9  ;;  %v6227_v48 = vld [vmem:[%s6779_s13 + $0x78] sm:$0xf]  ;;  %v6228_v19 = vld [vmem:[%s6779_s13 + $0x7c] sm:$0xf] }
 0x1bf   : > { %v1807_v3 = vpop.f32.mrf.mxu2  ;;  %v4437_v47 = vpack.c.b16 %v4412_v5, %v4411_v39  ;;  %v4162_v41 = vshll.u32 %v6227_v48, 16 }
 0x1c0   : > { %v1848_v0 = vadd.f32 %v1807_v3, %v1323_v54  ;;  %v2189_v14 = vpop.f32.mrf.mxu3  ;;  %v3161_v3 = vrot.slane %v5968_v7, 5  ;;  %v4959_v57 = vpack.c.b16 %v4934_v37, %v4933_v31  ;;  %v4156_v7 = vrot.slane %v4154_v40, 5 }
 0x1c1   : > { %v1284_v4 = vpop.f32.mrf.mxu1 }
 0x1c2   : > { %v2230_v32 = vadd.f32 %v2189_v14, %v1848_v0  ;;  %v1324_v22 = vadd.f32 %v1284_v4, %v8237_v29  ;;  %v4141_v0 = vor.u32 %v4140_v34, %v4137_v59  ;;  %v4151_v14 = vor.u32 %v4150_v46, %v7814_v51  ;;  %v5969_v4 = vld [vmem:[%s6779_s13 + $0x68] sm:$0x1] }
 0x1c3   : > { %v2937_v35 = vpop.f32.mrf.mxu0  ;;  %v3164_v5 = vrot.slane %v5969_v4, 5  ;;  %v8238_v59 = vld [vmem:[#allocation5_spill] sm:$0xff]  ;;  %v6354_v46 = vrot.slane %v6320_v17, 9  ;;  %v4813_v29 = vrot.slane %v4811_v63, 4  ;;  %v4164_v4 = vrot.slane %v4162_v41, 5 }
 0x1c4   : > { %v7811_v1 = vadd.f32 %v2935_v36, %v2230_v32  ;;  %v6500_v36 = vld [vmem:[%s6779_s13 + $0x60] sm:$0xff]  ;;  %v3163_v32 = vrot.slane %v3161_v3, 4  ;;  %v4142_v31 = vrot.slane %v4141_v0, 4  ;;  %v4152_v37 = vrot.slane %v4151_v14, 4 }
 0x1c5   : > { %v4812_v40 = vsel %vm6930_vm5, %v6354_v46, %v4811_v63 }
 0x1c6   : > { %v4157_v14 = vsel %vm6923_vm4, %v4152_v37, %v4156_v7  ;;  %v4935_v63 = vunpack.c.l.b16 %v4812_v40  ;;  %v6324_v7 = vld [vmem:[%s6779_s13 + $0x7c] sm:$0xf] }
 0x1c7   : > { %v1809_v56 = vpop.f32.mrf.mxu2 }
 0x1c8   : > { %v1849_v18 = vadd.f32 %v1809_v56, %v1324_v22  ;;  %v2191_v54 = vpop.f32.mrf.mxu3  ;;  %v4814_v22 = vrot.slane %v6322_v6, 5  ;;  %v4159_v56 = vshrl.u32 %v6227_v48, 16  ;;  %v6229_v48 = vld [vmem:[%s6779_s13 + $0x80] sm:$0x1] }
 0x1c9   : > { %v1287_v62 = vpop.f32.mrf.mxu1 }
 0x1ca   : > { %v2231_v45 = vadd.f32 %v2191_v54, %v1849_v18  ;;  %v1325_v34 = vadd.f32 %v1287_v62, %v8238_v59  ;;  %v4168_v18 = vshll.u32 %v6228_v19, 16  ;;  %v4172_v54 = vshrl.u32 %v6228_v19, 16  ;;  %v8239_v59 = vld [vmem:[#allocation6_spill] sm:$0xff] }
 0x1cb   : > { %v2940_v53 = vpop.f32.mrf.mxu0  ;;  %v4147_v62 = vsel %vm6923_vm4, %v4142_v31, %v7814_v51  ;;  %v4414_v31 = vunpack.c.l.b16 %v4157_v14  ;;  %v6323_v14 = vld [vmem:[%s6779_s13 + $0x78] sm:$0xe] }
 0x1cc   : > { %3421 = vmatmul.bf16.gmra.mxu1 %v3309_v20  ;;  %3803 = vmatmul.bf16.gmra.mxu2 %v6500_v36  ;;  %v7827_v39 = vadd.f32 %v2937_v35, %v2231_v45  ;;  %v4815_v45 = vsel %vm6930_vm5, %v4813_v29, %v4814_v22  ;;  %v7843_v17 = vrot.slane %v4168_v18, 5  ;;  %v4174_v6 = vrot.slane %v4172_v54, 4  ;;  %v5970_v29 = vld [vmem:[%s6779_s13 + $0x6c] sm:$0xe]  ;;  %v5972_v22 = vld [vmem:[%s6779_s13 + $0x74] sm:$0x1] }
 0x1cd   : > { %4549 = vmatmul.bf16.gmra.mxu3 %v4437_v47  ;;  %v3162_v47 = vsel %vm6930_vm5, %v6001_v55, %v3161_v3  ;;  %v4161_v3 = vrot.slane %v4159_v56, 4  ;;  %v4936_v37 = vunpack.c.l.b16 %v4815_v45  ;;  %v4178_v18 = vshll.u32 %v6229_v48, 16 }
 0x1ce   : > { %5071 = vmatmul.bf16.gmra.mxu0 %v4959_v57  ;;  %v3165_v57 = vsel %vm6930_vm5, %v3163_v32, %v3164_v5  ;;  %v3285_v51 = vunpack.c.l.b16 %v3162_v47  ;;  %v5971_v32 = vld [vmem:[%s6779_s13 + $0x70] sm:$0xf]  ;;  %v4413_v5 = vunpack.c.l.b16 %v4147_v62  ;;  %v4175_v41 = vor.u32 %v4174_v6, %v7843_v17 }
 0x1cf   : > { %v1812_v42 = vpop.f32.mrf.mxu2  ;;  %v3286_v55 = vunpack.c.l.b16 %v3165_v57  ;;  %v4165_v56 = vor.u32 %v4164_v4, %v4161_v3  ;;  %v4818_v47 = vrot.slane %v6324_v7, 5  ;;  %v4180_v48 = vrot.slane %v4178_v18, 5 }
 0x1d0   : > { %v1850_v20 = vadd.f32 %v1812_v42, %v1325_v34  ;;  %v2194_v36 = vpop.f32.mrf.mxu3  ;;  %v3168_v42 = vrot.slane %v5971_v32, 5  ;;  %v4438_v62 = vpack.c.b16 %v4414_v31, %v4413_v5  ;;  %v3171_v32 = vrot.slane %v5972_v22, 5  ;;  %v8241_v5 = vld [vmem:[#allocation7_spill] sm:$0xff] }
 0x1d1   : > { %v1289_v35 = vpop.f32.mrf.mxu1  ;;  %v4166_v4 = vrot.slane %v4165_v56, 4  ;;  %v4176_v6 = vrot.slane %v4175_v41, 4 }
 0x1d2   : > { %v2232_v2 = vadd.f32 %v2194_v36, %v1850_v20  ;;  %v1326_v34 = vadd.f32 %v1289_v35, %v8239_v59  ;;  %v3310_v20 = vpack.c.b16 %v3286_v55, %v3285_v51  ;;  %v6501_v36 = vld [vmem:[%s6779_s13 + $0x6c] sm:$0xff]  ;;  %v6325_v35 = vld [vmem:[%s6779_s13 + $0x80] sm:$0x1]  ;;  %v6002_v59 = vrot.slane %v5970_v29, 9 }
 0x1d3   : > { %v2942_v0 = vpop.f32.mrf.mxu0  ;;  %v3170_v3 = vrot.slane %v3168_v42, 4  ;;  %v6355_v51 = vrot.slane %v6323_v14, 9  ;;  %v4820_v55 = vrot.slane %v4818_v47, 4  ;;  %v4821_v7 = vrot.slane %v6325_v35, 5 }
 0x1d4   : > { %v7847_v19 = vadd.f32 %v2940_v53, %v2232_v2  ;;  %v4960_v2 = vpack.c.b16 %v4936_v37, %v4935_v63  ;;  %v6230_v63 = vld [vmem:[%s6779_s13 + $0x84] sm:$0xf]  ;;  %v6231_v37 = vld [vmem:[%s6779_s13 + $0x88] sm:$0xf]  ;;  %v3169_v29 = vsel %vm6930_vm5, %v6002_v59, %v3168_v42  ;;  %v4171_v56 = vsel %vm6923_vm4, %v4166_v4, %v7843_v17 }
 0x1d5   : > { %v3172_v22 = vsel %vm6930_vm5, %v3170_v3, %v3171_v32  ;;  %v4181_v18 = vsel %vm6923_vm4, %v4176_v6, %v4180_v48  ;;  %v3287_v14 = vunpack.c.l.b16 %v3169_v29  ;;  %v6327_v29 = vld [vmem:[%s6779_s13 + $0x88] sm:$0xf] }
 0x1d6   : > { %v3288_v35 = vunpack.c.l.b16 %v3172_v22  ;;  %v4416_v59 = vunpack.c.l.b16 %v4181_v18  ;;  %v5975_v18 = vld [vmem:[%s6779_s13 + $0x80] sm:$0x1] }
 0x1d7   : > { %v1814_v46 = vpop.f32.mrf.mxu2 }
 0x1d8   : > { %v1851_v53 = vadd.f32 %v1814_v46, %v1326_v34  ;;  %v2196_v54 = vpop.f32.mrf.mxu3 }
 0x1d9   : > { %v1292_v57 = vpop.f32.mrf.mxu1 }
 0x1da   : > { %v2233_v40 = vadd.f32 %v2196_v54, %v1851_v53  ;;  %v1327_v31 = vadd.f32 %v1292_v57, %v8241_v5  ;;  %v4819_v53 = vsel %vm6930_vm5, %v6355_v51, %v4818_v47  ;;  %v4822_v54 = vsel %vm6930_vm5, %v4820_v55, %v4821_v7  ;;  %v5974_v47 = vld [vmem:[%s6779_s13 + $0x7c] sm:$0xf]  ;;  %v8243_v7 = vld [vmem:[#allocation8_spill] sm:$0xff] }
 0x1db   : > { %v2945_v45 = vpop.f32.mrf.mxu0  ;;  %v4192_v57 = vshll.u32 %v6231_v37, 16  ;;  %v4937_v32 = vunpack.c.l.b16 %v4819_v53  ;;  %v4938_v3 = vunpack.c.l.b16 %v4822_v54 }
 0x1dc   : > { %3426 = vmatmul.bf16.gmra.mxu1 %v3310_v20  ;;  %3808 = vmatmul.bf16.gmra.mxu2 %v6501_v36  ;;  %v7857_v34 = vadd.f32 %v2942_v0, %v2233_v40  ;;  %v4183_v20 = vshrl.u32 %v6230_v63, 16  ;;  %v4186_v36 = vshll.u32 %v6230_v63, 16  ;;  %v4415_v40 = vunpack.c.l.b16 %v4171_v56 }
 0x1dd   : > { %4554 = vmatmul.bf16.gmra.mxu3 %v4438_v62  ;;  %v4196_v62 = vshrl.u32 %v6231_v37, 16  ;;  %v7878_v51 = vrot.slane %v4192_v57, 5  ;;  %v5973_v37 = vld [vmem:[%s6779_s13 + $0x78] sm:$0xe]  ;;  %v4961_v54 = vpack.c.b16 %v4938_v3, %v4937_v32 }
 0x1de   : > { %8240 = vst [vmem:[#allocation4_spill] sm:$0xff] %v7857_v34  ;;  %5076 = vmatmul.bf16.gmra.mxu0 %v4960_v2  ;;  %v4185_v6 = vrot.slane %v4183_v20, 4  ;;  %v4188_v48 = vrot.slane %v4186_v36, 5 }
 0x1df   : > { %v1817_v46 = vpop.f32.mrf.mxu2  ;;  %v4198_v55 = vrot.slane %v4196_v62, 4 }
 0x1e0   : > { %v1852_v41 = vadd.f32 %v1817_v46, %v1327_v31  ;;  %v2199_v0 = vpop.f32.mrf.mxu3  ;;  %v6232_v31 = vld [vmem:[%s6779_s13 + $0x8c] sm:$0x1]  ;;  %v3175_v46 = vrot.slane %v5974_v47, 5  ;;  %v4189_v20 = vor.u32 %v4188_v48, %v4185_v6  ;;  %v4825_v47 = vrot.slane %v6327_v29, 5  ;;  %v6234_v6 = vld [vmem:[%s6779_s13 + $0x94] sm:$0xf] }
 0x1e1   : > { %v1294_v42 = vpop.f32.mrf.mxu1  ;;  %v4199_v36 = vor.u32 %v4198_v55, %v7878_v51 }
 0x1e2   : > { %v2234_v2 = vadd.f32 %v2199_v0, %v1852_v41  ;;  %v1328_v5 = vadd.f32 %v1294_v42, %v8243_v7  ;;  %v3311_v41 = vpack.c.b16 %v3288_v35, %v3287_v14  ;;  %v4439_v0 = vpack.c.b16 %v4416_v59, %v4415_v40  ;;  %v6328_v14 = vld [vmem:[%s6779_s13 + $0x8c] sm:$0x1]  ;;  %v6233_v35 = vld [vmem:[%s6779_s13 + $0x90] sm:$0xf] }
 0x1e3   : > { %v2947_v17 = vpop.f32.mrf.mxu0  ;;  %v4202_v42 = vshll.u32 %v6232_v31, 16  ;;  %v3177_v7 = vrot.slane %v3175_v46, 4  ;;  %v4190_v59 = vrot.slane %v4189_v20, 4  ;;  %v4200_v32 = vrot.slane %v4199_v36, 4 }
 0x1e4   : > { %v7876_v4 = vadd.f32 %v2945_v45, %v2234_v2  ;;  %v6502_v45 = vld [vmem:[%s6779_s13 + $0x78] sm:$0xff]  ;;  %v6003_v2 = vrot.slane %v5973_v37, 9  ;;  %v4827_v31 = vrot.slane %v4825_v47, 4  ;;  %v4828_v37 = vrot.slane %v6328_v14, 5 }
 0x1e5   : > { %v4204_v3 = vrot.slane %v4202_v42, 5 }
 0x1e6   : > { %8242 = vst [vmem:[#allocation5_spill] sm:$0xff] %v7876_v4 }
 0x1e7   : > { %v1819_v63 = vpop.f32.mrf.mxu2 }
 0x1e8   : > { %v1853_v22 = vadd.f32 %v1819_v63, %v1328_v5  ;;  %v2201_v56 = vpop.f32.mrf.mxu3  ;;  %v3178_v5 = vrot.slane %v5975_v18, 5  ;;  %v6326_v63 = vld [vmem:[%s6779_s13 + $0x84] sm:$0xe]  ;;  %v4216_v18 = vshll.u32 %v6234_v6, 16 }
 0x1e9   : > { %v3392_v53 = vpop.f32.mrf.mxu1  ;;  %v6356_v55 = vrot.slane %v6326_v63, 9 }
 0x1ea   : > { %v2235_v57 = vadd.f32 %v2201_v56, %v1853_v22  ;;  %v3472_v48 = vadd.f32 %v3392_v53, %v7352_v49  ;;  %v3176_v22 = vsel %vm6930_vm5, %v6003_v2, %v3175_v46  ;;  %v4207_v56 = vshrl.u32 %v6233_v35, 16 }
 0x1eb   : > { %v5042_v62 = vpop.f32.mrf.mxu0  ;;  %v4195_v49 = vsel %vm6923_vm4, %v4190_v59, %v7878_v51  ;;  %v4205_v46 = vsel %vm6923_vm4, %v4200_v32, %v4204_v3  ;;  %v4826_v42 = vsel %vm6930_vm5, %v6356_v55, %v4825_v47  ;;  %v3289_v2 = vunpack.c.l.b16 %v3176_v22  ;;  %v5977_v51 = vld [vmem:[%s6779_s13 + $0x88] sm:$0xf]  ;;  %v7917_v55 = vld [vmem:[%s8223_s2] ss:$0 sm:$0xff] }
 0x1ec   : > { %3431 = vmatmul.bf16.gmra.mxu1 %v3311_v41  ;;  %3813 = vmatmul.bf16.gmra.mxu2 %v6502_v45  ;;  %v7890_v40 = vadd.f32 %v2947_v17, %v2235_v57  ;;  %v3179_v17 = vsel %vm6930_vm5, %v3177_v7, %v3178_v5  ;;  %v4829_v57 = vsel %vm6930_vm5, %v4827_v31, %v4828_v37  ;;  %v4209_v5 = vrot.slane %v4207_v56, 4  ;;  %v5976_v37 = vld [vmem:[%s6779_s13 + $0x84] sm:$0xe] }
 0x1ed   : > { %4559 = vmatmul.bf16.gmra.mxu3 %v4439_v0  ;;  %v4210_v0 = vshll.u32 %v6233_v35, 16  ;;  %v3290_v7 = vunpack.c.l.b16 %v3179_v17  ;;  %v7911_v14 = vrot.slane %v4216_v18, 5  ;;  %v4417_v59 = vunpack.c.l.b16 %v4195_v49 }
 0x1ee   : > { %8244 = vst [vmem:[#allocation6_spill] sm:$0xff] %v7890_v40  ;;  %5081 = vmatmul.bf16.gmra.mxu0 %v4961_v54  ;;  %v4220_v54 = vshrl.u32 %v6234_v6, 16  ;;  %v4418_v47 = vunpack.c.l.b16 %v4205_v46  ;;  %v4939_v32 = vunpack.c.l.b16 %v4826_v42  ;;  %v4940_v3 = vunpack.c.l.b16 %v4829_v57  ;;  %v6235_v6 = vld [vmem:[%s6779_s13 + $0x98] sm:$0x1]  ;;  %v6239_v40 = vld [vmem:[%s6779_s13 + $0xa8] sm:$0xf] }
 0x1ef   : > { %v3774_v29 = vpop.f32.mrf.mxu2  ;;  %v4212_v63 = vrot.slane %v4210_v0, 5  ;;  %v3312_v17 = vpack.c.b16 %v3290_v7, %v3289_v2  ;;  %v3182_v56 = vrot.slane %v5977_v51, 5  ;;  %v5978_v0 = vld [vmem:[%s6779_s13 + $0x8c] sm:$0x1]  ;;  %v6004_v46 = vrot.slane %v5976_v37, 9 }
 0x1f0   : > { %v3854_v41 = vadd.f32 %v3774_v29, %v3472_v48  ;;  %v4520_v45 = vpop.f32.mrf.mxu3  ;;  %v4222_v35 = vrot.slane %v4220_v54, 4  ;;  %v6330_v29 = vld [vmem:[%s6779_s13 + $0x94] sm:$0xf]  ;;  %v4226_v54 = vshll.u32 %v6235_v6, 16  ;;  %v4440_v49 = vpack.c.b16 %v4418_v47, %v4417_v59  ;;  %v6329_v51 = vld [vmem:[%s6779_s13 + $0x90] sm:$0xe] }
 0x1f1   : > { %v3394_v20 = vpop.f32.mrf.mxu1  ;;  %v4832_v42 = vrot.slane %v6330_v29, 5  ;;  %v6237_v6 = vld [vmem:[%s6779_s13 + $0xa0] sm:$0xf]  ;;  %v6357_v37 = vrot.slane %v6329_v51, 9 }
 0x1f2   : > { %v4600_v53 = vadd.f32 %v4520_v45, %v3854_v41  ;;  %v3473_v31 = vadd.f32 %v3394_v20, %v7354_v21  ;;  %v6503_v45 = vld [vmem:[%s6779_s13 + $0x84] sm:$0xff]  ;;  %v4213_v21 = vor.u32 %v4212_v63, %v4209_v5  ;;  %v4223_v18 = vor.u32 %v4222_v35, %v7911_v14  ;;  %v6236_v35 = vld [vmem:[%s6779_s13 + $0x9c] sm:$0xf] }
 0x1f3   : > { %v5044_v36 = vpop.f32.mrf.mxu0  ;;  %v3184_v5 = vrot.slane %v3182_v56, 4  ;;  %v3185_v63 = vrot.slane %v5978_v0, 5  ;;  %v4834_v29 = vrot.slane %v4832_v42, 4  ;;  %v4833_v51 = vsel %vm6930_vm5, %v6357_v37, %v4832_v42 }
 0x1f4   : > { %v5122_v48 = vadd.f32 %v5042_v62, %v4600_v53  ;;  %v4962_v53 = vpack.c.b16 %v4940_v3, %v4939_v32  ;;  %v4214_v47 = vrot.slane %v4213_v21, 4  ;;  %v4224_v32 = vrot.slane %v4223_v18, 4 }
 0x1f5   : > { %v4228_v3 = vrot.slane %v4226_v54, 5  ;;  %v4234_v21 = vshll.u32 %v6236_v35, 16  ;;  %v4240_v18 = vshll.u32 %v6237_v6, 16  ;;  %v4244_v54 = vshrl.u32 %v6237_v6, 16 }
 0x1f6   : > { %v5222_v57 = vadd.f32 %v7917_v55, %v5122_v48  ;;  %v3183_v48 = vsel %vm6930_vm5, %v6004_v46, %v3182_v56  ;;  %v3186_v46 = vsel %vm6930_vm5, %v3184_v5, %v3185_v63 }
 0x1f7   : > { %v3776_v22 = vpop.f32.mrf.mxu2  ;;  %v4246_v6 = vrot.slane %v4244_v54, 4  ;;  %v3291_v37 = vunpack.c.l.b16 %v3183_v48 }
 0x1f8   : > { %v3855_v41 = vadd.f32 %v3776_v22, %v3473_v31  ;;  %v4522_v62 = vpop.f32.mrf.mxu3  ;;  %v6331_v31 = vld [vmem:[%s6779_s13 + $0x98] sm:$0x1]  ;;  %v7937_v22 = vstv %s7907_s9  ;;  %vm5255_vm6 = vcmp.gt.f32.partialorder %v5222_v57, 0.0 }
 0x1f9   : > { %v3397_v20 = vpop.f32.mrf.mxu1 }
 0x1fa   : > { %v4601_v2 = vadd.f32 %v4522_v62, %v3855_v41  ;;  %v4835_v41 = vrot.slane %v6331_v31, 5  ;;  %v5288_v62 = vmul.f32 %v7937_v22, %v5222_v57 }
 0x1fb   : > { %v7932_v7 = vpop.f32.mrf.mxu0 }
 0x1fc   : > { %v5123_v59 = vadd.f32 %v5044_v36, %v4601_v2  ;;  %3436 = vmatmul.bf16.gmra.mxu1 %v3312_v17  ;;  %3818 = vmatmul.bf16.gmra.mxu2 %v6503_v45  ;;  %v3474_v36 = vadd.f32 %v3397_v20, %v7392_v60  ;;  %v4231_v17 = vshrl.u32 %v6236_v35, 16  ;;  %v4219_v60 = vsel %vm6923_vm4, %v4214_v47, %v7911_v14 }
 0x1fd   : > { %4564 = vmatmul.bf16.gmra.mxu3 %v4440_v49  ;;  %v4229_v20 = vsel %vm6923_vm4, %v4224_v32, %v4228_v3  ;;  %v4836_v31 = vsel %vm6930_vm5, %v4834_v29, %v4835_v41  ;;  %v5320_v35 = vsel %vm5255_vm6, %v5222_v57, %v5288_v62  ;;  %v4236_v32 = vrot.slane %v4234_v21, 5  ;;  %v6238_v41 = vld [vmem:[%s6779_s13 + $0xa4] sm:$0x1] }
 0x1fe   : > { %5086 = vmatmul.bf16.gmra.mxu0 %v4962_v53  ;;  %v5223_v0 = vadd.f32 %v7917_v55, %v5123_v59  ;;  %v5980_v59 = vld [vmem:[%s6779_s13 + $0x94] sm:$0xf]  ;;  %v4233_v47 = vrot.slane %v4231_v17, 4  ;;  %v7972_v3 = vrot.slane %v4240_v18, 5  ;;  %v3292_v57 = vunpack.c.l.b16 %v3186_v46 }
 0x1ff   : > { %v3779_v45 = vpop.f32.mrf.mxu2  ;;  %v4419_v29 = vunpack.c.l.b16 %v4219_v60  ;;  %v4420_v62 = vunpack.c.l.b16 %v4229_v20  ;;  %v4250_v46 = vshll.u32 %v6238_v41, 16  ;;  %v6334_v41 = vld [vmem:[%s6779_s13 + $0xa4] sm:$0x1] }
 0x200   : > { %vm5256_vm7 = vcmp.gt.f32.partialorder %v5223_v0, 0.0  ;;  %v5289_v56 = vmul.f32 %v7937_v22, %v5223_v0  ;;  %v3856_v49 = vadd.f32 %v3779_v45, %v3474_v36  ;;  %v4525_v53 = vpop.f32.mrf.mxu3  ;;  %v4942_v36 = vunpack.c.l.b16 %v4836_v31  ;;  %v5979_v45 = vld [vmem:[%s6779_s13 + $0x90] sm:$0xe] }
 0x201   : > { %v3399_v2 = vpop.f32.mrf.mxu1  ;;  %v4237_v54 = vor.u32 %v4236_v32, %v4233_v47  ;;  %v4247_v48 = vor.u32 %v4246_v6, %v7972_v3  ;;  %v6504_v31 = vld [vmem:[%s6779_s13 + $0x90] sm:$0xff] }
 0x202   : > { %v5321_v5 = vsel %vm5256_vm7, %v5223_v0, %v5289_v56  ;;  %v4602_v14 = vadd.f32 %v4525_v53, %v3856_v49  ;;  %v4941_v0 = vunpack.c.l.b16 %v4833_v51  ;;  %v3189_v56 = vrot.slane %v5980_v59, 5  ;;  %v6333_v49 = vld [vmem:[%s6779_s13 + $0xa0] sm:$0xf]  ;;  %v8246_v53 = vld [vmem:[#allocation9_spill] sm:$0xff] }
 0x203   : > { %v5049_v63 = vpop.f32.mrf.mxu0  ;;  %v6537_v42 = vpack.c.bf16 %v5321_v5, %v5320_v35  ;;  %v3475_v21 = vadd.f32 %v3399_v2, %v8246_v53  ;;  %v3313_v51 = vpack.c.b16 %v3292_v57, %v3291_v37  ;;  %v5981_v35 = vld [vmem:[%s6779_s13 + $0x98] sm:$0x1]  ;;  %v6005_v5 = vrot.slane %v5979_v45, 9  ;;  %v6332_v53 = vld [vmem:[%s6779_s13 + $0x9c] sm:$0xe] }
 0x204   : > { %v5124_v17 = vadd.f32 %v7932_v7, %v4602_v14  ;;  %v4839_v59 = vrot.slane %v6333_v49, 5  ;;  %v4441_v7 = vpack.c.b16 %v4420_v62, %v4419_v29  ;;  %v4963_v14 = vpack.c.b16 %v4942_v36, %v4941_v0 }
 0x205   : > { %6538 = vst [vmem:[%s7969_s20] sm:$0xff] %v6537_v42   ;;  %v3191_v2 = vrot.slane %v3189_v56, 4  ;;  %v4238_v4 = vrot.slane %v4237_v54, 4  ;;  %v4248_v34 = vrot.slane %v4247_v48, 4  ;;  %v4252_v37 = vrot.slane %v4250_v46, 5 }
 0x206   : > { %v5224_v47 = vadd.f32 %v7917_v55, %v5124_v17  ;;  %v3190_v29 = vsel %vm6930_vm5, %v6005_v5, %v3189_v56  ;;  %v6358_v62 = vrot.slane %v6332_v53, 9  ;;  %v4841_v0 = vrot.slane %v4839_v59, 4 }
 0x207   : > { %v3781_v18 = vpop.f32.mrf.mxu2  ;;  %v4842_v36 = vrot.slane %v6334_v41, 5  ;;  %v4255_v45 = vshrl.u32 %v6239_v40, 16  ;;  %v4258_v49 = vshll.u32 %v6239_v40, 16  ;;  %v4253_v40 = vsel %vm6923_vm4, %v4248_v34, %v4252_v37  ;;  %v6241_v37 = vld [vmem:[%s6779_s13 + $0xb0] sm:$0x1] }
 0x208   : > { %v3857_v60 = vadd.f32 %v3781_v18, %v3475_v21  ;;  %v4527_v20 = vpop.f32.mrf.mxu3  ;;  %v6240_v21 = vld [vmem:[%s6779_s13 + $0xac] sm:$0xf]  ;;  %v3192_v18 = vrot.slane %v5981_v35, 5  ;;  %vm5257_vm8 = vcmp.gt.f32.partialorder %v5224_v47, 0.0 }
 0x209   : > { %v3402_v42 = vpop.f32.mrf.mxu1  ;;  %v4264_v17 = vshll.u32 %v6240_v21, 16  ;;  %v4268_v48 = vshrl.u32 %v6240_v21, 16 }
 0x20a   : > { %v4603_v32 = vadd.f32 %v4527_v20, %v3857_v60  ;;  %v5290_v60 = vmul.f32 %v7937_v22, %v5224_v47  ;;  %v3193_v56 = vsel %vm6930_vm5, %v3191_v2, %v3192_v18  ;;  %v4243_v20 = vsel %vm6923_vm4, %v4238_v4, %v7972_v3 }
 0x20b   : > { %v5052_v6 = vpop.f32.mrf.mxu0  ;;  %v4260_v4 = vrot.slane %v4258_v49, 5  ;;  %v8006_v3 = vrot.slane %v4264_v17, 5  ;;  %v4270_v41 = vrot.slane %v4268_v48, 4  ;;  %v3294_v18 = vunpack.c.l.b16 %v3193_v56  ;;  %v5982_v49 = vld [vmem:[%s6779_s13 + $0x9c] sm:$0xe] }
 0x20c   : > { %v5125_v57 = vadd.f32 %v5049_v63, %v4603_v32  ;;  %3441 = vmatmul.bf16.gmra.mxu1 %v3313_v51  ;;  %3823 = vmatmul.bf16.gmra.mxu2 %v6504_v31  ;;  %v3476_v63 = vadd.f32 %v3402_v42, %v7441_v23  ;;  %v4840_v23 = vsel %vm6930_vm5, %v6358_v62, %v4839_v59  ;;  %v3293_v59 = vunpack.c.l.b16 %v3190_v29  ;;  %v5984_v17 = vld [vmem:[%s6779_s13 + $0xa4] sm:$0x1]  ;;  %v6336_v29 = vld [vmem:[%s6779_s13 + $0xac] sm:$0xf] }
 0x20d   : > { %4569 = vmatmul.bf16.gmra.mxu3 %v4441_v7  ;;  %v4843_v42 = vsel %vm6930_vm5, %v4841_v0, %v4842_v36  ;;  %v5983_v7 = vld [vmem:[%s6779_s13 + $0xa0] sm:$0xf]  ;;  %v5322_v34 = vsel %vm5257_vm8, %v5224_v47, %v5290_v60  ;;  %v4422_v0 = vunpack.c.l.b16 %v4253_v40  ;;  %v4943_v36 = vunpack.c.l.b16 %v4840_v23 }
 0x20e   : > { %5091 = vmatmul.bf16.gmra.mxu0 %v4963_v14  ;;  %v5225_v54 = vadd.f32 %v7917_v55, %v5125_v57  ;;  %v4257_v14 = vrot.slane %v4255_v45, 4  ;;  %v4421_v57 = vunpack.c.l.b16 %v4243_v20  ;;  %v3196_v62 = vrot.slane %v5983_v7, 5 }
 0x20f   : > { %v3784_v46 = vpop.f32.mrf.mxu2  ;;  %v4944_v45 = vunpack.c.l.b16 %v4843_v42  ;;  %v4274_v48 = vshll.u32 %v6241_v37, 16  ;;  %v3314_v56 = vpack.c.b16 %v3294_v18, %v3293_v59  ;;  %v6006_v40 = vrot.slane %v5982_v49, 9 }
 0x210   : > { %vm5258_vm9 = vcmp.gt.f32.partialorder %v5225_v54, 0.0  ;;  %v5291_v51 = vmul.f32 %v7937_v22, %v5225_v54  ;;  %v3858_v31 = vadd.f32 %v3784_v46, %v3476_v63  ;;  %v4530_v35 = vpop.f32.mrf.mxu3  ;;  %v4261_v47 = vor.u32 %v4260_v4, %v4257_v14 }
 0x211   : > { %v3404_v5 = vpop.f32.mrf.mxu1  ;;  %v4271_v63 = vor.u32 %v4270_v41, %v8006_v3  ;;  %v3199_v23 = vrot.slane %v5984_v17, 5  ;;  %v4442_v7 = vpack.c.b16 %v4422_v0, %v4421_v57  ;;  %v6335_v41 = vld [vmem:[%s6779_s13 + $0xa8] sm:$0xe]  ;;  %v3197_v18 = vsel %vm6930_vm5, %v6006_v40, %v3196_v62  ;;  %v6242_v57 = vld [vmem:[%s6779_s13 + $0xb4] sm:$0xf] }
 0x212   : > { %v5323_v2 = vsel %vm5258_vm9, %v5225_v54, %v5291_v51  ;;  %v4604_v53 = vadd.f32 %v4530_v35, %v3858_v31  ;;  %v3477_v54 = vadd.f32 %v3404_v5, %v7443_v10  ;;  %v6505_v31 = vld [vmem:[%s6779_s13 + $0x9c] sm:$0xff]  ;;  %v3198_v35 = vrot.slane %v3196_v62, 4  ;;  %v6243_v0 = vld [vmem:[%s6779_s13 + $0xb8] sm:$0xf] }
 0x213   : > { %v5054_v32 = vpop.f32.mrf.mxu0  ;;  %v6542_v21 = vpack.c.bf16 %v5323_v2, %v5322_v34  ;;  %v4262_v10 = vrot.slane %v4261_v47, 4  ;;  %v4846_v5 = vrot.slane %v6336_v29, 5  ;;  %v4272_v2 = vrot.slane %v4271_v63, 4 }
 0x214   : > { %v5126_v60 = vadd.f32 %v5052_v6, %v4604_v53  ;;  %v4964_v6 = vpack.c.b16 %v4944_v45, %v4943_v36  ;;  %v4276_v53 = vrot.slane %v4274_v48, 5  ;;  %v3200_v37 = vsel %vm6930_vm5, %v3198_v35, %v3199_v23 }
 0x215   : > { %6614 = vst [vmem:[%s7969_s20 + $0x8] sm:$0xff] %v6542_v21   ;;  %v6337_v21 = vld [vmem:[%s6779_s13 + $0xb0] sm:$0x1]  ;;  %v4267_v36 = vsel %vm6923_vm4, %v4262_v10, %v8006_v3  ;;  %v6359_v45 = vrot.slane %v6335_v41, 9  ;;  %v4848_v49 = vrot.slane %v4846_v5, 4  ;;  %v4279_v63 = vshrl.u32 %v6242_v57, 16 }
 0x216   : > { %v5226_v14 = vadd.f32 %v7917_v55, %v5126_v60  ;;  %v4849_v17 = vrot.slane %v6337_v21, 5  ;;  %v4277_v60 = vsel %vm6923_vm4, %v4272_v2, %v4276_v53  ;;  %v4282_v48 = vshll.u32 %v6242_v57, 16  ;;  %v6244_v57 = vld [vmem:[%s6779_s13 + $0xbc] sm:$0x1] }
 0x217   : > { %v3786_v46 = vpop.f32.mrf.mxu2  ;;  %v4288_v29 = vshll.u32 %v6243_v0, 16  ;;  %v3296_v40 = vunpack.c.l.b16 %v3200_v37  ;;  %v4423_v10 = vunpack.c.l.b16 %v4267_v36  ;;  %v4424_v53 = vunpack.c.l.b16 %v4277_v60  ;;  %v5985_v36 = vld [vmem:[%s6779_s13 + $0xa8] sm:$0xe] }
 0x218   : > { %v3859_v51 = vadd.f32 %v3786_v46, %v3477_v54  ;;  %v4532_v20 = vpop.f32.mrf.mxu3  ;;  %vm5259_vm10 = vcmp.gt.f32.partialorder %v5226_v14, 0.0  ;;  %v4850_v35 = vsel %vm6930_vm5, %v4848_v49, %v4849_v17  ;;  %v4281_v41 = vrot.slane %v4279_v63, 4  ;;  %v5987_v17 = vld [vmem:[%s6779_s13 + $0xb0] sm:$0x1] }
 0x219   : > { %v3407_v42 = vpop.f32.mrf.mxu1  ;;  %v4284_v21 = vrot.slane %v4282_v48, 5  ;;  %v4443_v60 = vpack.c.b16 %v4424_v53, %v4423_v10  ;;  %v6340_v10 = vld [vmem:[%s6779_s13 + $0xbc] sm:$0x1] }
 0x21a   : > { %v4605_v4 = vadd.f32 %v4532_v20, %v3859_v51  ;;  %v3478_v62 = vadd.f32 %v3407_v42, %v7480_v16  ;;  %v4292_v51 = vshrl.u32 %v6243_v0, 16  ;;  %v4847_v16 = vsel %vm6930_vm5, %v6359_v45, %v4846_v5  ;;  %v8247_v45 = vld [vmem:[#allocation10_spill] sm:$0xff] }
 0x21b   : > { %v5057_v34 = vpop.f32.mrf.mxu0  ;;  %v4946_v5 = vunpack.c.l.b16 %v4850_v35 }
 0x21c   : > { %v5127_v59 = vadd.f32 %v5054_v32, %v4605_v4  ;;  %3446 = vmatmul.bf16.gmra.mxu1 %v3314_v56  ;;  %3828 = vmatmul.bf16.gmra.mxu2 %v6505_v31  ;;  %v5292_v32 = vmul.f32 %v7937_v22, %v5226_v14  ;;  %v3295_v31 = vunpack.c.l.b16 %v3197_v18  ;;  %v5986_v4 = vld [vmem:[%s6779_s13 + $0xac] sm:$0xf]  ;;  %v8040_v18 = vrot.slane %v4288_v29, 5 }
 0x21d   : > { %4574 = vmatmul.bf16.gmra.mxu3 %v4442_v7  ;;  %v4294_v37 = vrot.slane %v4292_v51, 4  ;;  %v6506_v29 = vld [vmem:[%s6779_s13 + $0xa8] sm:$0xff] }
 0x21e   : > { %5096 = vmatmul.bf16.gmra.mxu0 %v4964_v6  ;;  %v5227_v47 = vadd.f32 %v7917_v55, %v5127_v59  ;;  %v5324_v23 = vsel %vm5259_vm10, %v5226_v14, %v5292_v32  ;;  %v4945_v59 = vunpack.c.l.b16 %v4847_v16  ;;  %v3203_v14 = vrot.slane %v5986_v4, 5  ;;  %v6339_v32 = vld [vmem:[%s6779_s13 + $0xb8] sm:$0xf] }
 0x21f   : > { %v3789_v54 = vpop.f32.mrf.mxu2  ;;  %v3206_v16 = vrot.slane %v5987_v17, 5  ;;  %v4853_v35 = vrot.slane %v6339_v32, 5 }
 0x220   : > { %vm5260_vm11 = vcmp.gt.f32.partialorder %v5227_v47, 0.0  ;;  %v5293_v3 = vmul.f32 %v7937_v22, %v5227_v47  ;;  %v3860_v46 = vadd.f32 %v3789_v54, %v3478_v62  ;;  %v4535_v56 = vpop.f32.mrf.mxu3  ;;  %v3315_v62 = vpack.c.b16 %v3296_v40, %v3295_v31 }
 0x221   : > { %v3409_v20 = vpop.f32.mrf.mxu1  ;;  %v4285_v54 = vor.u32 %v4284_v21, %v4281_v41  ;;  %v6245_v41 = vld [vmem:[%s6779_s13 + $0xc0] sm:$0xf]  ;;  %v6246_v21 = vld [vmem:[%s6779_s13 + $0xc4] sm:$0xf] }
 0x222   : > { %v5325_v42 = vsel %vm5260_vm11, %v5227_v47, %v5293_v3  ;;  %v4606_v7 = vadd.f32 %v4535_v56, %v3860_v46  ;;  %v3479_v49 = vadd.f32 %v3409_v20, %v8247_v45  ;;  %v4965_v3 = vpack.c.b16 %v4946_v5, %v4945_v59 }
 0x223   : > { %v5059_v6 = vpop.f32.mrf.mxu0  ;;  %v6547_v2 = vpack.c.bf16 %v5325_v42, %v5324_v23  ;;  %v4295_v46 = vor.u32 %v4294_v37, %v8040_v18  ;;  %v4298_v56 = vshll.u32 %v6244_v57, 16  ;;  %v3205_v20 = vrot.slane %v3203_v14, 4  ;;  %v6338_v42 = vld [vmem:[%s6779_s13 + $0xb4] sm:$0xe] }
 0x224   : > { %v5128_v0 = vadd.f32 %v5057_v34, %v4606_v7  ;;  %v6007_v34 = vrot.slane %v5985_v36, 9  ;;  %v4286_v7 = vrot.slane %v4285_v54, 4  ;;  %v6360_v37 = vrot.slane %v6338_v42, 9 }
 0x225   : > { %6615 = vst [vmem:[%s7969_s20 + $0x10] sm:$0xff] %v6547_v2   ;;  %v4296_v2 = vrot.slane %v4295_v46, 4  ;;  %v4300_v53 = vrot.slane %v4298_v56, 5  ;;  %v3207_v5 = vsel %vm6930_vm5, %v3205_v20, %v3206_v16  ;;  %v4855_v57 = vrot.slane %v4853_v35, 4 }
 0x226   : > { %v5228_v31 = vadd.f32 %v7917_v55, %v5128_v0  ;;  %v3204_v59 = vsel %vm6930_vm5, %v6007_v34, %v3203_v14  ;;  %v4303_v17 = vshrl.u32 %v6245_v41, 16  ;;  %v4306_v32 = vshll.u32 %v6245_v41, 16 }
 0x227   : > { %v3791_v47 = vpop.f32.mrf.mxu2  ;;  %v4316_v54 = vshrl.u32 %v6246_v21, 16 }
 0x228   : > { %v3861_v63 = vadd.f32 %v3791_v47, %v3479_v49  ;;  %v4537_v48 = vpop.f32.mrf.mxu3  ;;  %v5294_v0 = vmul.f32 %v7937_v22, %v5228_v31  ;;  %v4856_v49 = vrot.slane %v6340_v10, 5  ;;  %vm5261_vm12 = vcmp.gt.f32.partialorder %v5228_v31, 0.0 }
 0x229   : > { %v3412_v51 = vpop.f32.mrf.mxu1  ;;  %v4312_v47 = vshll.u32 %v6246_v21, 16  ;;  %v4308_v42 = vrot.slane %v4306_v32, 5 }
 0x22a   : > { %v4607_v40 = vadd.f32 %v4537_v48, %v3861_v63  ;;  %v3480_v45 = vadd.f32 %v3412_v51, %v7530_v24  ;;  %v3297_v48 = vunpack.c.l.b16 %v3204_v59  ;;  %v4301_v24 = vsel %vm6923_vm4, %v4296_v2, %v4300_v53  ;;  %v5988_v59 = vld [vmem:[%s6779_s13 + $0xb4] sm:$0xe] }
 0x22b   : > { %v5062_v23 = vpop.f32.mrf.mxu0  ;;  %v5326_v46 = vsel %vm5261_vm12, %v5228_v31, %v5294_v0  ;;  %v4857_v20 = vsel %vm6930_vm5, %v4855_v57, %v4856_v49  ;;  %v4426_v10 = vunpack.c.l.b16 %v4301_v24  ;;  %v8073_v2 = vrot.slane %v4312_v47, 5  ;;  %v6342_v57 = vld [vmem:[%s6779_s13 + $0xc4] sm:$0xf]  ;;  %v5990_v47 = vld [vmem:[%s6779_s13 + $0xbc] sm:$0x1] }
 0x22c   : > { %v5129_v4 = vadd.f32 %v5059_v6, %v4607_v40  ;;  %3451 = vmatmul.bf16.gmra.mxu1 %v3315_v62  ;;  %3833 = vmatmul.bf16.gmra.mxu2 %v6506_v29  ;;  %v4291_v29 = vsel %vm6923_vm4, %v4286_v7, %v8040_v18  ;;  %v3298_v40 = vunpack.c.l.b16 %v3207_v5  ;;  %v4305_v18 = vrot.slane %v4303_v17, 4  ;;  %v6507_v17 = vld [vmem:[%s6779_s13 + $0xb4] sm:$0xff] }
 0x22d   : > { %4579 = vmatmul.bf16.gmra.mxu3 %v4443_v60  ;;  %v4425_v7 = vunpack.c.l.b16 %v4291_v29  ;;  %v4948_v53 = vunpack.c.l.b16 %v4857_v20 }
 0x22e   : > { %5101 = vmatmul.bf16.gmra.mxu0 %v4965_v3  ;;  %v5229_v6 = vadd.f32 %v7917_v55, %v5129_v4  ;;  %v4854_v3 = vsel %vm6930_vm5, %v6360_v37, %v4853_v35  ;;  %v5989_v4 = vld [vmem:[%s6779_s13 + $0xb8] sm:$0xf]  ;;  %v4318_v35 = vrot.slane %v4316_v54, 4  ;;  %v6247_v37 = vld [vmem:[%s6779_s13 + $0xc8] sm:$0x1]  ;;  %v4860_v54 = vrot.slane %v6342_v57, 5 }
 0x22f   : > { %v3794_v36 = vpop.f32.mrf.mxu2  ;;  %v4947_v31 = vunpack.c.l.b16 %v4854_v3  ;;  %v3210_v0 = vrot.slane %v5989_v4, 5  ;;  %v4444_v32 = vpack.c.b16 %v4426_v10, %v4425_v7  ;;  %v6341_v3 = vld [vmem:[%s6779_s13 + $0xc0] sm:$0xe] }
 0x230   : > { %vm5262_vm13 = vcmp.gt.f32.partialorder %v5229_v6, 0.0  ;;  %v5295_v14 = vmul.f32 %v7937_v22, %v5229_v6  ;;  %v3862_v62 = vadd.f32 %v3794_v36, %v3480_v45  ;;  %v4540_v60 = vpop.f32.mrf.mxu3  ;;  %v3316_v36 = vpack.c.b16 %v3298_v40, %v3297_v48  ;;  %v6248_v40 = vld [vmem:[%s6779_s13 + $0xcc] sm:$0xf] }
 0x231   : > { %v3414_v63 = vpop.f32.mrf.mxu1  ;;  %v6361_v7 = vrot.slane %v6341_v3, 9  ;;  %v4862_v10 = vrot.slane %v4860_v54, 4 }
 0x232   : > { %v5327_v56 = vsel %vm5262_vm13, %v5229_v6, %v5295_v14  ;;  %v4608_v51 = vadd.f32 %v4540_v60, %v3862_v62  ;;  %v3481_v21 = vadd.f32 %v3414_v63, %v7532_v44  ;;  %v4309_v6 = vor.u32 %v4308_v42, %v4305_v18 }
 0x233   : > { %v5064_v34 = vpop.f32.mrf.mxu0  ;;  %v6552_v16 = vpack.c.bf16 %v5327_v56, %v5326_v46  ;;  %v4319_v14 = vor.u32 %v4318_v35, %v8073_v2  ;;  %v6008_v44 = vrot.slane %v5988_v59, 9  ;;  %v4322_v60 = vshll.u32 %v6247_v37, 16 }
 0x234   : > { %v5130_v41 = vadd.f32 %v5062_v23, %v4608_v51  ;;  %v4966_v23 = vpack.c.b16 %v4948_v53, %v4947_v31  ;;  %v3212_v46 = vrot.slane %v3210_v0, 4  ;;  %v3213_v56 = vrot.slane %v5990_v47, 5  ;;  %v6343_v51 = vld [vmem:[%s6779_s13 + $0xc8] sm:$0x1] }
 0x235   : > { %6616 = vst [vmem:[%s7969_s20 + $0x18] sm:$0xff] %v6552_v16   ;;  %v4310_v48 = vrot.slane %v4309_v6, 4  ;;  %v4320_v16 = vrot.slane %v4319_v14, 4  ;;  %v3211_v18 = vsel %vm6930_vm5, %v6008_v44, %v3210_v0  ;;  %v4324_v42 = vrot.slane %v4322_v60, 5 }
 0x236   : > { %v5230_v63 = vadd.f32 %v7917_v55, %v5130_v41  ;;  %v4863_v53 = vrot.slane %v6343_v51, 5  ;;  %v4327_v37 = vshrl.u32 %v6248_v40, 16  ;;  %v4330_v6 = vshll.u32 %v6248_v40, 16 }
 0x237   : > { %v3796_v5 = vpop.f32.mrf.mxu2  ;;  %v4315_v59 = vsel %vm6923_vm4, %v4310_v48, %v8073_v2  ;;  %v3299_v44 = vunpack.c.l.b16 %v3211_v18  ;;  %v5992_v48 = vld [vmem:[%s6779_s13 + $0xc4] sm:$0xf]  ;;  %v6345_v18 = vld [vmem:[%s6779_s13 + $0xd0] sm:$0xf] }
 0x238   : > { %v3863_v45 = vadd.f32 %v3796_v5, %v3481_v21  ;;  %v4542_v49 = vpop.f32.mrf.mxu3  ;;  %v5296_v4 = vmul.f32 %v7937_v22, %v5230_v63  ;;  %vm5263_vm14 = vcmp.gt.f32.partialorder %v5230_v63, 0.0  ;;  %v3214_v21 = vsel %vm6930_vm5, %v3212_v46, %v3213_v56 }
 0x239   : > { %v3417_v62 = vpop.f32.mrf.mxu1  ;;  %v3300_v60 = vunpack.c.l.b16 %v3214_v21  ;;  %v4329_v46 = vrot.slane %v4327_v37, 4 }
 0x23a   : > { %v4609_v29 = vadd.f32 %v4542_v49, %v3863_v45  ;;  %v3482_v31 = vadd.f32 %v3417_v62, %v7557_v27  ;;  %v4325_v27 = vsel %vm6923_vm4, %v4320_v16, %v4324_v42  ;;  %v4861_v49 = vsel %vm6930_vm5, %v6361_v7, %v4860_v54  ;;  %v6250_v42 = vld [vmem:[%s6779_s13 + $0xd4] sm:$0x1] }
 0x23b   : > { %v5067_v24 = vpop.f32.mrf.mxu0  ;;  %v4864_v62 = vsel %vm6930_vm5, %v4862_v10, %v4863_v53  ;;  %v4428_v3 = vunpack.c.l.b16 %v4325_v27  ;;  %v4332_v54 = vrot.slane %v4330_v6, 5  ;;  %v4949_v56 = vunpack.c.l.b16 %v4861_v49  ;;  %v6344_v27 = vld [vmem:[%s6779_s13 + $0xcc] sm:$0xe] }
 0x23c   : > { %v5131_v20 = vadd.f32 %v5064_v34, %v4609_v29  ;;  %3456 = vmatmul.bf16.gmra.mxu1 %v3316_v36  ;;  %3838 = vmatmul.bf16.gmra.mxu2 %v6507_v17  ;;  %v6249_v34 = vld [vmem:[%s6779_s13 + $0xd0] sm:$0xf]  ;;  %v4427_v29 = vunpack.c.l.b16 %v4315_v59  ;;  %v3317_v10 = vpack.c.b16 %v3300_v60, %v3299_v44  ;;  %v6362_v44 = vrot.slane %v6344_v27, 9 }
 0x23d   : > { %4584 = vmatmul.bf16.gmra.mxu3 %v4444_v32  ;;  %v4336_v36 = vshll.u32 %v6249_v34, 16  ;;  %v4340_v17 = vshrl.u32 %v6249_v34, 16  ;;  %v5328_v32 = vsel %vm5263_vm14, %v5230_v63, %v5296_v4  ;;  %v4950_v63 = vunpack.c.l.b16 %v4864_v62  ;;  %v5991_v34 = vld [vmem:[%s6779_s13 + $0xc0] sm:$0xe] }
 0x23e   : > { %5106 = vmatmul.bf16.gmra.mxu0 %v4966_v23  ;;  %v5231_v35 = vadd.f32 %v7917_v55, %v5131_v20  ;;  %v4445_v53 = vpack.c.b16 %v4428_v3, %v4427_v29  ;;  %v4333_v21 = vor.u32 %v4332_v54, %v4329_v46  ;;  %v6009_v49 = vrot.slane %v5991_v34, 9 }
 0x23f   : > { %v3799_v41 = vpop.f32.mrf.mxu2  ;;  %v8107_v51 = vrot.slane %v4336_v36, 5  ;;  %v4342_v20 = vrot.slane %v4340_v17, 4  ;;  %v4967_v37 = vpack.c.b16 %v4950_v63, %v4949_v56  ;;  %v6346_v36 = vld [vmem:[%s6779_s13 + $0xd4] sm:$0x1] }
 0x240   : > { %vm5264_vm15 = vcmp.gt.f32.partialorder %v5231_v35, 0.0  ;;  %v5297_v57 = vmul.f32 %v7937_v22, %v5231_v35  ;;  %v3864_v5 = vadd.f32 %v3799_v41, %v3482_v31  ;;  %v4545_v0 = vpop.f32.mrf.mxu3  ;;  %v6508_v31 = vld [vmem:[%s6779_s13 + $0xc0] sm:$0xff]  ;;  %v3217_v41 = vrot.slane %v5992_v48, 5 }
 0x241   : > { %v3419_v45 = vpop.f32.mrf.mxu1  ;;  %v4870_v54 = vrot.slane %v6346_v36, 5 }
 0x242   : > { %v5329_v2 = vsel %vm5264_vm15, %v5231_v35, %v5297_v57  ;;  %v4610_v47 = vadd.f32 %v4545_v0, %v3864_v5  ;;  %v3483_v40 = vadd.f32 %v3419_v45, %v7570_v50  ;;  %v5993_v57 = vld [vmem:[%s6779_s13 + $0xc8] sm:$0x1]  ;;  %v4346_v5 = vshll.u32 %v6250_v42, 16 }
 0x243   : > { %v5069_v14 = vpop.f32.mrf.mxu0  ;;  %v6557_v23 = vpack.c.bf16 %v5329_v2, %v5328_v32  ;;  %v4867_v50 = vrot.slane %v6345_v18, 5  ;;  %v3219_v32 = vrot.slane %v3217_v41, 4  ;;  %v3220_v2 = vrot.slane %v5993_v57, 5 }
 0x244   : > { %v5132_v16 = vadd.f32 %v5067_v24, %v4610_v47  ;;  %v4343_v24 = vor.u32 %v4342_v20, %v8107_v51  ;;  %v4334_v47 = vrot.slane %v4333_v21, 4  ;;  %v3218_v20 = vsel %vm6930_vm5, %v6009_v49, %v3217_v41 }
 0x245   : > { %6617 = vst [vmem:[%s7969_s20 + $0x20] sm:$0xff] %v6557_v23   ;;  %v4348_v23 = vrot.slane %v4346_v5, 5  ;;  %v4869_v60 = vrot.slane %v4867_v50, 4  ;;  %v4868_v18 = vsel %vm6930_vm5, %v6362_v44, %v4867_v50  ;;  %v3301_v34 = vunpack.c.l.b16 %v3218_v20 }
 0x246   : > { %v5232_v0 = vadd.f32 %v7917_v55, %v5132_v16  ;;  %v4344_v62 = vrot.slane %v4343_v24, 4 }
 0x247   : > { %v3801_v7 = vpop.f32.mrf.mxu2 }
 0x248   : > { %v3865_v4 = vadd.f32 %v3801_v7, %v3483_v40  ;;  %v4547_v35 = vpop.f32.mrf.mxu3  ;;  %v5298_v29 = vmul.f32 %v7937_v22, %v5232_v0  ;;  %vm5265_vm0 = vcmp.gt.f32.partialorder %v5232_v0, 0.0  ;;  %v3221_v40 = vsel %vm6930_vm5, %v3219_v32, %v3220_v2 }
 0x249   : > { %v3422_v59 = vpop.f32.mrf.mxu1  ;;  %v4349_v42 = vsel %vm6923_vm4, %v4344_v62, %v4348_v23  ;;  %v3302_v41 = vunpack.c.l.b16 %v3221_v40 }
 0x24a   : > { %v4611_v6 = vadd.f32 %v4547_v35, %v3865_v4  ;;  %v3484_v46 = vadd.f32 %v3422_v59, %v7591_v58  ;;  %v4339_v58 = vsel %vm6923_vm4, %v4334_v47, %v8107_v51  ;;  %v5330_v7 = vsel %vm5265_vm0, %v5232_v0, %v5298_v29 }
 0x24b   : > { %v5072_v45 = vpop.f32.mrf.mxu0  ;;  %v4429_v21 = vunpack.c.l.b16 %v4339_v58  ;;  %v4430_v51 = vunpack.c.l.b16 %v4349_v42  ;;  %v4951_v59 = vunpack.c.l.b16 %v4868_v18  ;;  %v3318_v0 = vpack.c.b16 %v3302_v41, %v3301_v34 }
 0x24c   : > { %v5133_v17 = vadd.f32 %v5069_v14, %v4611_v6  ;;  %3461 = vmatmul.bf16.gmra.mxu1 %v3317_v10  ;;  %3843 = vmatmul.bf16.gmra.mxu2 %v6508_v31  ;;  %v4871_v31 = vsel %vm6930_vm5, %v4869_v60, %v4870_v54  ;;  %v6509_v6 = vld [vmem:[%s6779_s13 + $0xcc] sm:$0xff] }
 0x24d   : > { %4589 = vmatmul.bf16.gmra.mxu3 %v4445_v53  ;;  %v4952_v33 = vunpack.c.l.b16 %v4871_v31  ;;  %v4446_v38 = vpack.c.b16 %v4430_v51, %v4429_v21 }
 0x24e   : > { %5111 = vmatmul.bf16.gmra.mxu0 %v4967_v37  ;;  %v5233_v3 = vadd.f32 %v7917_v55, %v5133_v17 }
 0x24f   : > { %v3804_v14 = vpop.f32.mrf.mxu2  ;;  %v4968_v49 = vpack.c.b16 %v4952_v33, %v4951_v59 }
 0x250   : > { %vm5266_vm1 = vcmp.gt.f32.partialorder %v5233_v3, 0.0  ;;  %v5299_v56 = vmul.f32 %v7937_v22, %v5233_v3  ;;  %v3866_v63 = vadd.f32 %v3804_v14, %v3484_v46  ;;  %v4550_v48 = vpop.f32.mrf.mxu3 }
 0x251   : > { %v3424_v16 = vpop.f32.mrf.mxu1 }
 0x252   : > { %v5331_v10 = vsel %vm5266_vm1, %v5233_v3, %v5299_v56  ;;  %v4612_v4 = vadd.f32 %v4550_v48, %v3866_v63  ;;  %v3485_v57 = vadd.f32 %v3424_v16, %v7601_v25 }
 0x253   : > { %v5074_v35 = vpop.f32.mrf.mxu0  ;;  %v6562_v53 = vpack.c.bf16 %v5331_v10, %v5330_v7 }
 0x254   : > { %v5134_v37 = vadd.f32 %v5072_v45, %v4612_v4 }
 0x255   : > { %6618 = vst [vmem:[%s7969_s20 + $0x28] sm:$0xff] %v6562_v53  }
 0x256   : > { %v5234_v36 = vadd.f32 %v7917_v55, %v5134_v37 }
 0x257   : > { %v3806_v24 = vpop.f32.mrf.mxu2 }
 0x258   : > { %v3867_v5 = vadd.f32 %v3806_v24, %v3485_v57  ;;  %v4552_v50 = vpop.f32.mrf.mxu3  ;;  %v5300_v25 = vmul.f32 %v7937_v22, %v5234_v36  ;;  %vm5267_vm2 = vcmp.gt.f32.partialorder %v5234_v36, 0.0 }
 0x259   : > { %v3427_v27 = vpop.f32.mrf.mxu1 }
 0x25a   : > { %v4613_v17 = vadd.f32 %v4552_v50, %v3867_v5  ;;  %v3486_v47 = vadd.f32 %v3427_v27, %v7619_v15  ;;  %v5332_v3 = vsel %vm5267_vm2, %v5234_v36, %v5300_v25 }
 0x25b   : > { %v5077_v32 = vpop.f32.mrf.mxu0 }
 0x25c   : > { %v5135_v2 = vadd.f32 %v5074_v35, %v4613_v17  ;;  %3466 = vmatmul.bf16.gmra.mxu1 %v3318_v0  ;;  %3848 = vmatmul.bf16.gmra.mxu2 %v6509_v6  ;;  %v8156_v0 = vld [vmem:[%s8223_s2] ss:$0 sm:$0xff] }
 0x25d   : > { %4594 = vmatmul.bf16.gmra.mxu3 %v4446_v38 }
 0x25e   : > { %5116 = vmatmul.bf16.gmra.mxu0 %v4968_v49  ;;  %v5235_v45 = vadd.f32 %v7917_v55, %v5135_v2 }
 0x25f   : > { %v3809_v62 = vpop.f32.mrf.mxu2 }
 0x260   : > { %vm5268_vm3 = vcmp.gt.f32.partialorder %v5235_v45, 0.0  ;;  %v5301_v23 = vmul.f32 %v7937_v22, %v5235_v45  ;;  %v3868_v44 = vadd.f32 %v3809_v62, %v3486_v47  ;;  %v4555_v60 = vpop.f32.mrf.mxu3 }
 0x261   : > { %v3429_v29 = vpop.f32.mrf.mxu1 }
 0x262   : > { %v5333_v46 = vsel %vm5268_vm3, %v5235_v45, %v5301_v23  ;;  %v4614_v54 = vadd.f32 %v4555_v60, %v3868_v44  ;;  %v3487_v48 = vadd.f32 %v3429_v29, %v7635_v52 }
 0x263   : > { %v5079_v14 = vpop.f32.mrf.mxu0  ;;  %v6567_v56 = vpack.c.bf16 %v5333_v46, %v5332_v3 }
 0x264   : > { %v5136_v63 = vadd.f32 %v5077_v32, %v4614_v54 }
 0x265   : > { %6619 = vst [vmem:[%s7969_s20 + $0x30] sm:$0xff] %v6567_v56  }
 0x266   : > { %v5236_v58 = vadd.f32 %v7917_v55, %v5136_v63 }
 0x267   : > { %v3811_v20 = vpop.f32.mrf.mxu2 }
 0x268   : > { %v3869_v16 = vadd.f32 %v3811_v20, %v3487_v48  ;;  %v4557_v15 = vpop.f32.mrf.mxu3  ;;  %v5302_v10 = vmul.f32 %v7937_v22, %v5236_v58  ;;  %vm5269_vm4 = vcmp.gt.f32.partialorder %v5236_v58, 0.0 }
 0x269   : > { %v3432_v40 = vpop.f32.mrf.mxu1 }
 0x26a   : > { %v4615_v42 = vadd.f32 %v4557_v15, %v3869_v16  ;;  %v3488_v35 = vadd.f32 %v3432_v40, %v7655_v11  ;;  %v5334_v21 = vsel %vm5269_vm4, %v5236_v58, %v5302_v10 }
 0x26b   : > { %v5082_v18 = vpop.f32.mrf.mxu0 }
 0x26c   : > { %v5137_v7 = vadd.f32 %v5079_v14, %v4615_v42 }
 0x26e   : > { %v5237_v4 = vadd.f32 %v7917_v55, %v5137_v7 }
 0x26f   : > { %v3814_v31 = vpop.f32.mrf.mxu2 }
 0x270   : > { %vm5270_vm5 = vcmp.gt.f32.partialorder %v5237_v4, 0.0  ;;  %v5303_v52 = vmul.f32 %v7937_v22, %v5237_v4  ;;  %v3870_v53 = vadd.f32 %v3814_v31, %v3488_v35  ;;  %v4560_v34 = vpop.f32.mrf.mxu3 }
 0x271   : > { %v3434_v41 = vpop.f32.mrf.mxu1 }
 0x272   : > { %v5335_v51 = vsel %vm5270_vm5, %v5237_v4, %v5303_v52  ;;  %v4616_v59 = vadd.f32 %v4560_v34, %v3870_v53  ;;  %v3489_v24 = vadd.f32 %v3434_v41, %v7665_v12 }
 0x273   : > { %v5084_v33 = vpop.f32.mrf.mxu0  ;;  %v6572_v37 = vpack.c.bf16 %v5335_v51, %v5334_v21 }
 0x274   : > { %v5138_v57 = vadd.f32 %v5082_v18, %v4616_v59 }
 0x275   : > { %6620 = vst [vmem:[%s7969_s20 + $0x38] sm:$0xff] %v6572_v37  }
 0x276   : > { %v5238_v6 = vadd.f32 %v8156_v0, %v5138_v57 }
 0x277   : > { %v3816_v55 = vpop.f32.mrf.mxu2 }
 0x278   : > { %v3871_v5 = vadd.f32 %v3816_v55, %v3489_v24  ;;  %v4562_v11 = vpop.f32.mrf.mxu3  ;;  %v5304_v36 = vmul.f32 %v7937_v22, %v5238_v6  ;;  %vm5271_vm6 = vcmp.gt.f32.partialorder %v5238_v6, 0.0 }
 0x279   : > { %v3437_v50 = vpop.f32.mrf.mxu1 }
 0x27a   : > { %v4617_v27 = vadd.f32 %v4562_v11, %v3871_v5  ;;  %v3490_v12 = vadd.f32 %v3437_v50, %v7683_v28  ;;  %v5336_v62 = vsel %vm5271_vm6, %v5238_v6, %v5304_v36 }
 0x27b   : > { %v5087_v38 = vpop.f32.mrf.mxu0 }
 0x27c   : > { %v5139_v49 = vadd.f32 %v5084_v33, %v4617_v27 }
 0x27e   : > { %v5239_v17 = vadd.f32 %v8156_v0, %v5139_v49 }
 0x27f   : > { %v3819_v32 = vpop.f32.mrf.mxu2 }
 0x280   : > { %vm5272_vm7 = vcmp.gt.f32.partialorder %v5239_v17, 0.0  ;;  %v5305_v2 = vmul.f32 %v7937_v22, %v5239_v17  ;;  %v3872_v25 = vadd.f32 %v3819_v32, %v3490_v12  ;;  %v4565_v45 = vpop.f32.mrf.mxu3 }
 0x281   : > { %v3439_v47 = vpop.f32.mrf.mxu1 }
 0x282   : > { %v5337_v23 = vsel %vm5272_vm7, %v5239_v17, %v5305_v2  ;;  %v4618_v44 = vadd.f32 %v4565_v45, %v3872_v25  ;;  %v3491_v46 = vadd.f32 %v3439_v47, %v7699_v13 }
 0x283   : > { %v5089_v60 = vpop.f32.mrf.mxu0  ;;  %v6577_v29 = vpack.c.bf16 %v5337_v23, %v5336_v62 }
 0x284   : > { %v5140_v3 = vadd.f32 %v5087_v38, %v4618_v44 }
 0x285   : > { %6621 = vst [vmem:[%s7969_s20 + $0x40] sm:$0xff] %v6577_v29  }
 0x286   : > { %v5240_v63 = vadd.f32 %v8156_v0, %v5140_v3 }
 0x287   : > { %v3821_v54 = vpop.f32.mrf.mxu2 }
 0x288   : > { %v3873_v14 = vadd.f32 %v3821_v54, %v3491_v46  ;;  %v4567_v28 = vpop.f32.mrf.mxu3  ;;  %v5306_v15 = vmul.f32 %v7937_v22, %v5240_v63  ;;  %vm5273_vm8 = vcmp.gt.f32.partialorder %v5240_v63, 0.0 }
 0x289   : > { %v3442_v56 = vpop.f32.mrf.mxu1 }
 0x28a   : > { %v4619_v48 = vadd.f32 %v4567_v28, %v3873_v14  ;;  %v3492_v58 = vadd.f32 %v3442_v56, %v7719_v8  ;;  %v5338_v4 = vsel %vm5273_vm8, %v5240_v63, %v5306_v15 }
 0x28b   : > { %v5092_v20 = vpop.f32.mrf.mxu0 }
 0x28c   : > { %v5141_v16 = vadd.f32 %v5089_v60, %v4619_v48 }
 0x28e   : > { %v5241_v40 = vadd.f32 %v8156_v0, %v5141_v16 }
 0x28f   : > { %v3824_v42 = vpop.f32.mrf.mxu2 }
 0x290   : > { %vm5274_vm9 = vcmp.gt.f32.partialorder %v5241_v40, 0.0  ;;  %v5307_v13 = vmul.f32 %v7937_v22, %v5241_v40  ;;  %v3874_v18 = vadd.f32 %v3824_v42, %v3492_v58  ;;  %v4570_v7 = vpop.f32.mrf.mxu3 }
 0x291   : > { %v3444_v10 = vpop.f32.mrf.mxu1 }
 0x292   : > { %v5339_v35 = vsel %vm5274_vm9, %v5241_v40, %v5307_v13  ;;  %v4620_v31 = vadd.f32 %v4570_v7, %v3874_v18  ;;  %v3493_v41 = vadd.f32 %v3444_v10, %v7729_v61 }
 0x293   : > { %v5094_v52 = vpop.f32.mrf.mxu0  ;;  %v6582_v53 = vpack.c.bf16 %v5339_v35, %v5338_v4 }
 0x294   : > { %v5142_v34 = vadd.f32 %v5092_v20, %v4620_v31 }
 0x295   : > { %6622 = vst [vmem:[%s7969_s20 + $0x48] sm:$0xff] %v6582_v53  }
 0x296   : > { %v5242_v33 = vadd.f32 %v8156_v0, %v5142_v34 }
 0x297   : > { %v3826_v21 = vpop.f32.mrf.mxu2 }
 0x298   : > { %v3875_v51 = vadd.f32 %v3826_v21, %v3493_v41  ;;  %v4572_v8 = vpop.f32.mrf.mxu3  ;;  %v5308_v55 = vmul.f32 %v7937_v22, %v5242_v33  ;;  %vm5275_vm10 = vcmp.gt.f32.partialorder %v5242_v33, 0.0 }
 0x299   : > { %v3447_v59 = vpop.f32.mrf.mxu1 }
 0x29a   : > { %v4621_v37 = vadd.f32 %v4572_v8, %v3875_v51  ;;  %v3494_v11 = vadd.f32 %v3447_v59, %v7747_v30  ;;  %v5340_v49 = vsel %vm5275_vm10, %v5242_v33, %v5308_v55 }
 0x29b   : > { %v5097_v57 = vpop.f32.mrf.mxu0 }
 0x29c   : > { %v5143_v24 = vadd.f32 %v5094_v52, %v4621_v37 }
 0x29e   : > { %v5243_v5 = vadd.f32 %v8156_v0, %v5143_v24 }
 0x29f   : > { %v3829_v50 = vpop.f32.mrf.mxu2 }
 0x2a0   : > { %vm5276_vm11 = vcmp.gt.f32.partialorder %v5243_v5, 0.0  ;;  %v5309_v61 = vmul.f32 %v7937_v22, %v5243_v5  ;;  %v3876_v6 = vadd.f32 %v3829_v50, %v3494_v11  ;;  %v4575_v27 = vpop.f32.mrf.mxu3 }
 0x2a1   : > { %v3449_v38 = vpop.f32.mrf.mxu1 }
 0x2a2   : > { %v5341_v36 = vsel %vm5276_vm11, %v5243_v5, %v5309_v61  ;;  %v4622_v17 = vadd.f32 %v4575_v27, %v3876_v6  ;;  %v3495_v25 = vadd.f32 %v3449_v38, %v7763_v9 }
 0x2a3   : > { %v5099_v12 = vpop.f32.mrf.mxu0  ;;  %v6587_v32 = vpack.c.bf16 %v5341_v36, %v5340_v49 }
 0x2a4   : > { %v5144_v2 = vadd.f32 %v5097_v57, %v4622_v17 }
 0x2a5   : > { %6623 = vst [vmem:[%s7969_s20 + $0x50] sm:$0xff] %v6587_v32  }
 0x2a6   : > { %v5244_v23 = vadd.f32 %v8156_v0, %v5144_v2 }
 0x2a7   : > { %v3831_v45 = vpop.f32.mrf.mxu2 }
 0x2a8   : > { %v3877_v47 = vadd.f32 %v3831_v45, %v3495_v25  ;;  %v4577_v30 = vpop.f32.mrf.mxu3  ;;  %v5310_v3 = vmul.f32 %v7937_v22, %v5244_v23  ;;  %vm5277_vm12 = vcmp.gt.f32.partialorder %v5244_v23, 0.0 }
 0x2a9   : > { %v3452_v62 = vpop.f32.mrf.mxu1 }
 0x2aa   : > { %v4623_v44 = vadd.f32 %v4577_v30, %v3877_v47  ;;  %v3496_v54 = vadd.f32 %v3452_v62, %v7783_v43  ;;  %v5342_v48 = vsel %vm5277_vm12, %v5244_v23, %v5310_v3 }
 0x2ab   : > { %v5102_v60 = vpop.f32.mrf.mxu0 }
 0x2ac   : > { %v5145_v29 = vadd.f32 %v5099_v12, %v4623_v44 }
 0x2ae   : > { %v5245_v46 = vadd.f32 %v8156_v0, %v5145_v29 }
 0x2af   : > { %v3834_v14 = vpop.f32.mrf.mxu2 }
 0x2b0   : > { %vm5278_vm13 = vcmp.gt.f32.partialorder %v5245_v46, 0.0  ;;  %v5311_v9 = vmul.f32 %v7937_v22, %v5245_v46  ;;  %v3878_v28 = vadd.f32 %v3834_v14, %v3496_v54  ;;  %v4580_v56 = vpop.f32.mrf.mxu3 }
 0x2b1   : > { %v3454_v63 = vpop.f32.mrf.mxu1 }
 0x2b2   : > { %v5343_v20 = vsel %vm5278_vm13, %v5245_v46, %v5311_v9  ;;  %v4624_v16 = vadd.f32 %v4580_v56, %v3878_v28  ;;  %v3497_v42 = vadd.f32 %v3454_v63, %v7793_v26 }
 0x2b3   : > { %v5104_v15 = vpop.f32.mrf.mxu0  ;;  %v6592_v40 = vpack.c.bf16 %v5343_v20, %v5342_v48  ;;  %v8249_v20 = vld [vmem:[#allocation5_spill] sm:$0xff] }
 0x2b4   : > { %v5146_v58 = vadd.f32 %v5102_v60, %v4624_v16  ;;  %v8248_v60 = vld [vmem:[#allocation4_spill] sm:$0xff] }
 0x2b5   : > { %6624 = vst [vmem:[%s7969_s20 + $0x58] sm:$0xff] %v6592_v40  }
 0x2b6   : > { %v5246_v10 = vadd.f32 %v8156_v0, %v5146_v58 }
 0x2b7   : > { %v3836_v13 = vpop.f32.mrf.mxu2 }
 0x2b8   : > { %v3879_v18 = vadd.f32 %v3836_v13, %v3497_v42  ;;  %v4582_v43 = vpop.f32.mrf.mxu3  ;;  %v5312_v52 = vmul.f32 %v7937_v22, %v5246_v10  ;;  %vm5279_vm14 = vcmp.gt.f32.partialorder %v5246_v10, 0.0 }
 0x2b9   : > { %v3457_v7 = vpop.f32.mrf.mxu1 }
 0x2ba   : > { %v4625_v4 = vadd.f32 %v4582_v43, %v3879_v18  ;;  %v3498_v34 = vadd.f32 %v3457_v7, %v7811_v1  ;;  %v5344_v59 = vsel %vm5279_vm14, %v5246_v10, %v5312_v52 }
 0x2bb   : > { %v5107_v35 = vpop.f32.mrf.mxu0 }
 0x2bc   : > { %v5147_v31 = vadd.f32 %v5104_v15, %v4625_v4 }
 0x2be   : > { %v5247_v53 = vadd.f32 %v8156_v0, %v5147_v31  ;;  %v8250_v31 = vld [vmem:[#allocation6_spill] sm:$0xff] }
 0x2bf   : > { %v3839_v41 = vpop.f32.mrf.mxu2 }
 0x2c0   : > { %vm5280_vm15 = vcmp.gt.f32.partialorder %v5247_v53, 0.0  ;;  %v5313_v26 = vmul.f32 %v7937_v22, %v5247_v53  ;;  %v3880_v21 = vadd.f32 %v3839_v41, %v3498_v34  ;;  %v4585_v51 = vpop.f32.mrf.mxu3 }
 0x2c1   : > { %v3459_v8 = vpop.f32.mrf.mxu1 }
 0x2c2   : > { %v5345_v33 = vsel %vm5280_vm15, %v5247_v53, %v5313_v26  ;;  %v4626_v37 = vadd.f32 %v4585_v51, %v3880_v21  ;;  %v3499_v5 = vadd.f32 %v3459_v8, %v7827_v39 }
 0x2c3   : > { %v6597_v57 = vpack.c.bf16 %v5345_v33, %v5344_v59  ;;  %v5109_v24 = vpop.f32.mrf.mxu0 }
 0x2c4   : > { %v5148_v55 = vadd.f32 %v5107_v35, %v4626_v37 }
 0x2c5   : > { %6625 = vst [vmem:[%s7969_s20 + $0x60] sm:$0xff] %v6597_v57  }
 0x2c6   : > { %v5248_v6 = vadd.f32 %v8156_v0, %v5148_v55 }
 0x2c7   : > { %v3841_v11 = vpop.f32.mrf.mxu2 }
 0x2c8   : > { %v3881_v50 = vadd.f32 %v3841_v11, %v3499_v5  ;;  %v4587_v1 = vpop.f32.mrf.mxu3  ;;  %v5314_v36 = vmul.f32 %v7937_v22, %v5248_v6  ;;  %vm5281_vm0 = vcmp.gt.f32.partialorder %v5248_v6, 0.0 }
 0x2c9   : > { %v3462_v61 = vpop.f32.mrf.mxu1 }
 0x2ca   : > { %v4627_v27 = vadd.f32 %v4587_v1, %v3881_v50  ;;  %v3500_v12 = vadd.f32 %v3462_v61, %v7847_v19  ;;  %v5346_v47 = vsel %vm5281_vm0, %v5248_v6, %v5314_v36 }
 0x2cb   : > { %v5112_v49 = vpop.f32.mrf.mxu0 }
 0x2cc   : > { %v5149_v38 = vadd.f32 %v5109_v24, %v4627_v27 }
 0x2ce   : > { %v5249_v17 = vadd.f32 %v8156_v0, %v5149_v38 }
 0x2cf   : > { %v3844_v32 = vpop.f32.mrf.mxu2 }
 0x2d0   : > { %vm5282_vm1 = vcmp.gt.f32.partialorder %v5249_v17, 0.0  ;;  %v5315_v39 = vmul.f32 %v7937_v22, %v5249_v17  ;;  %v3882_v2 = vadd.f32 %v3844_v32, %v3500_v12  ;;  %v4590_v25 = vpop.f32.mrf.mxu3 }
 0x2d1   : > { %v3464_v45 = vpop.f32.mrf.mxu1 }
 0x2d2   : > { %v5347_v30 = vsel %vm5282_vm1, %v5249_v17, %v5315_v39  ;;  %v4628_v62 = vadd.f32 %v4590_v25, %v3882_v2  ;;  %v3501_v29 = vadd.f32 %v3464_v45, %v8248_v60 }
 0x2d3   : > { %v6602_v23 = vpack.c.bf16 %v5347_v30, %v5346_v47  ;;  %v5114_v3 = vpop.f32.mrf.mxu0 }
 0x2d4   : > { %v5150_v44 = vadd.f32 %v5112_v49, %v4628_v62 }
 0x2d5   : > { %6626 = vst [vmem:[%s7969_s20 + $0x68] sm:$0xff] %v6602_v23  }
 0x2d6   : > { %v5250_v9 = vadd.f32 %v8156_v0, %v5150_v44 }
 0x2d7   : > { %v3846_v46 = vpop.f32.mrf.mxu2 }
 0x2d8   : > { %v3883_v54 = vadd.f32 %v3846_v46, %v3501_v29  ;;  %v4592_v19 = vpop.f32.mrf.mxu3  ;;  %v5316_v63 = vmul.f32 %v7937_v22, %v5250_v9  ;;  %vm5283_vm2 = vcmp.gt.f32.partialorder %v5250_v9, 0.0 }
 0x2d9   : > { %v3467_v14 = vpop.f32.mrf.mxu1 }
 0x2da   : > { %v4629_v28 = vadd.f32 %v4592_v19, %v3883_v54  ;;  %v3502_v16 = vadd.f32 %v3467_v14, %v8249_v20  ;;  %v5348_v18 = vsel %vm5283_vm2, %v5250_v9, %v5316_v63 }
 0x2db   : > { %v5117_v13 = vpop.f32.mrf.mxu0 }
 0x2dc   : > { %v5151_v56 = vadd.f32 %v5114_v3, %v4629_v28 }
 0x2de   : > { %v5251_v48 = vadd.f32 %v8156_v0, %v5151_v56 }
 0x2df   : > { %v3849_v15 = vpop.f32.mrf.mxu2 }
 0x2e0   : > { %vm5284_vm3 = vcmp.gt.f32.partialorder %v5251_v48, 0.0  ;;  %v5317_v40 = vmul.f32 %v7937_v22, %v5251_v48  ;;  %v3884_v58 = vadd.f32 %v3849_v15, %v3502_v16  ;;  %v4595_v42 = vpop.f32.mrf.mxu3 }
 0x2e1   : > { %v3469_v4 = vpop.f32.mrf.mxu1 }
 0x2e2   : > { %v5349_v43 = vsel %vm5284_vm3, %v5251_v48, %v5317_v40  ;;  %v4630_v7 = vadd.f32 %v4595_v42, %v3884_v58  ;;  %v3503_v52 = vadd.f32 %v3469_v4, %v8250_v31 }
 0x2e3   : > { %v6607_v10 = vpack.c.bf16 %v5349_v43, %v5348_v18  ;;  %v5119_v51 = vpop.f32.mrf.mxu0 }
 0x2e4   : > { %v5152_v35 = vadd.f32 %v5117_v13, %v4630_v7 }
 0x2e5   : > { %6627 = vst [vmem:[%s7969_s20 + $0x70] sm:$0xff] %v6607_v10  }
 0x2e6   : > { %v5252_v26 = vadd.f32 %v8156_v0, %v5152_v35 }
 0x2e7   : > { %v3851_v53 = vpop.f32.mrf.mxu2 }
 0x2e8   : > { %v3885_v34 = vadd.f32 %v3851_v53, %v3503_v52  ;;  %v4597_v41 = vpop.f32.mrf.mxu3  ;;  %v5318_v59 = vmul.f32 %v7937_v22, %v5252_v26  ;;  %vm5285_vm4 = vcmp.gt.f32.partialorder %v5252_v26, 0.0 }
 0x2ea   : > { %v4631_v21 = vadd.f32 %v4597_v41, %v3885_v34  ;;  %v5350_v57 = vsel %vm5285_vm4, %v5252_v26, %v5318_v59 }
 0x2ec   : > { %v5153_v8 = vadd.f32 %v5119_v51, %v4631_v21 }
 0x2ee   : > { %v5253_v33 = vadd.f32 %v8156_v0, %v5153_v8 }
 0x2f0   : > { %vm5286_vm5 = vcmp.gt.f32.partialorder %v5253_v33, 0.0  ;;  %v5319_v37 = vmul.f32 %v7937_v22, %v5253_v33 }
 0x2f2   : > { %v5351_v24 = vsel %vm5286_vm5, %v5253_v33, %v5319_v37 }
 0x2f3   : > { %v6612_v55 = vpack.c.bf16 %v5351_v24, %v5350_v57 }
 0x2f5   : > { %6628 = vst [vmem:[%s7969_s20 + $0x78] sm:$0xff] %v6612_v55  }
 0x2f6 PF: > { %s15_s19 = sadd.s32 1, %s6701_s19   ;;  %s8251_s17 = smov %s6697_s18 }
 0x2f7   : > { %p12_p5 = scmp.ge.s32.totalorder %s15_s19, 4   ;;  %s8252_s18 = smov %s8254_s3 }
 0x2f9   :  { %14 = sbr.rel (!%p12_p5) target bundleno = 2 (0x2), region = 74 }

// kernel: upblockpix_forward.7
= control target key start
LH: loop header
LB: loop body
LE: loop exit
PB: predicated region body
PF: predicated region fallthrough
CT: control target
= control target key end

     0   :  { %s1681_s20 = smov 0   ;;  %s1683_s21 = smov 0   ;;  %s1950_s0 = inlined_call_operand.vmem [shape: bf16[18,9,128], index: 0, kind: input, shape index: {}]   ;;  %s1951_s1 = inlined_call_operand.vmem [shape: bf16[4,128,128], index: 1, kind: input, shape index: {}]   ;;  %s1952_s2 = inlined_call_operand.vmem [shape: f32[1,128], index: 2, kind: input, shape index: {}]   ;;  %s1953_s3 = inlined_call_operand.<no memory space> [shape: f32[1], index: 3, kind: input, shape index: {}]   ;;  %s1954_s4 = inlined_call_operand.vmem [shape: bf16[128,128], index: 4, kind: input, shape index: {}]   ;;  %s1955_s5 = inlined_call_operand.vmem [shape: bf16[128,128], index: 5, kind: output, shape index: {}]  }
   0x1   :  { %10 = sst [smem:[#allocation3]] %s1953_s3  ;;  %s1685_s22 = smov 0  }
   0x2 LB: > { %s28_s3 = sadd.s32 1, %s1642_s21  ;;  %p1274_p0 = scmp.ge.s32.totalorder %s1646_s22, 1  ;;  %s1646_s22 = sphi %s1685_s22, %s16_s22   ;;  %s1642_s21 = sphi %s1683_s21, %s1959_s21   ;;  %s1638_s20 = sphi %s1681_s20, %s1958_s20  }
   0x3   : > { %p30_p1 = scmp.ge.s32.totalorder %s28_s3, 2  ;;  %p207_p2 = scmp.lt.s32.totalorder %s1646_s22, 3 }
   0x5   : > { %s1961_s3 = smov (%p30_p1, %s28_s3), 0  ;;  %p208_p3 = pnand %p1274_p0, %p207_p2 }
   0x6   : > { %s1516_s14 = smul.u32 (!%p208_p3), 72, %s1638_s20  ;;  %s1275_s26 = sshll.u32 (!%p208_p3), %s1638_s20, 3 }
   0x7   : > { %211 = sbr.rel (%p208_p3) target bundleno = 248 (0xf8), region = 40  ;;  %p239_p4 = scmp.lt.s32.totalorder (!%p208_p3), %s1275_s26, 15 }
   0x8   : > { %s1741_s28 = scalar_lea.vmem (!%p208_p3), %s1950_s0, %s1516_s14 }
   0xc   : > { %v1528_v0 = vld [vmem:[%s1951_s1 + $0x38] sm:$0xff]  ;;  %v1527_v4 = vld [vmem:[%s1951_s1 + $0x30] sm:$0xff]  ;;  %v1526_v8 = vld [vmem:[%s1951_s1 + $0x28] sm:$0xff]  ;;  %vm432_vm0 = vsmask.f32 3328  ;;  %s1963_s26 = smov (!%p239_p4, %s1275_s26), 15 }
   0xd   : > { %v1536_v1 = vld [vmem:[%s1951_s1 + $0x78] sm:$0xff]  ;;  %371 = vmatpush.bf16.msra.mxu0 %v1528_v0  ;;  %v1535_v5 = vld [vmem:[%s1951_s1 + $0x70] sm:$0xff]  ;;  %v1534_v9 = vld [vmem:[%s1951_s1 + $0x68] sm:$0xff]  ;;  %vm433_vm1 = vsmask.f32 7440  ;;  %s1276_s27 = sshll.u32 %s1963_s26, 2 }
   0xe   : > { %v1548_v2 = vld [vmem:[%s1951_s1 + $0xb8] sm:$0xff]  ;;  %636 = vmatpush.bf16.msra.mxu1 %v1536_v1  ;;  %v1547_v6 = vld [vmem:[%s1951_s1 + $0xb0] sm:$0xff]  ;;  %v1546_v10 = vld [vmem:[%s1951_s1 + $0xa8] sm:$0xff]  ;;  %s1906_s7 = scalar_lea.vmem %s1954_s4, %s1276_s27  ;;  %s1920_s10 = scalar_lea.vmem %s1955_s5, %s1276_s27 }
   0xf   : > { %v1556_v3 = vld [vmem:[%s1951_s1 + $0xf8] sm:$0xff]  ;;  %790 = vmatpush.bf16.msra.mxu2 %v1548_v2  ;;  %v1555_v7 = vld [vmem:[%s1951_s1 + $0xf0] sm:$0xff]  ;;  %v1554_v11 = vld [vmem:[%s1951_s1 + $0xe8] sm:$0xff] }
  0x10   : > { %1052 = vmatpush.bf16.msra.mxu3 %v1556_v3  ;;  %v1525_v12 = vld [vmem:[%s1951_s1 + $0x20] sm:$0xff]  ;;  %v418_v18 = vld [vmem:[%s1741_s28 + $0x8] sm:$0xf]  ;;  %v419_v19 = vld [vmem:[%s1741_s28 + $0xc] sm:$0x1] }
  0x11   : > { %372 = vmatpush.bf16.msra.mxu0 %v1527_v4  ;;  %v1533_v13 = vld [vmem:[%s1951_s1 + $0x60] sm:$0xff]  ;;  %v1524_v22 = vld [vmem:[%s1951_s1 + $0x18] sm:$0xff]  ;;  %v450_v25 = vshrl.u32 %v418_v18, 16  ;;  %v453_v26 = vshll.u32 %v418_v18, 16  ;;  %v459_v27 = vshll.u32 %v419_v19, 16  ;;  %v1523_v43 = vld [vmem:[%s1951_s1 + $0x10] sm:$0xff] }
  0x12   : > { %637 = vmatpush.bf16.msra.mxu1 %v1535_v5  ;;  %v1545_v14 = vld [vmem:[%s1951_s1 + $0xa0] sm:$0xff]  ;;  %v1532_v23 = vld [vmem:[%s1951_s1 + $0x58] sm:$0xff]  ;;  %v1450_v32 = vld [vmem:[%s1741_s28 + $0x8] sm:$0xf] }
  0x13   : > { %791 = vmatpush.bf16.msra.mxu2 %v1547_v6  ;;  %v1553_v15 = vld [vmem:[%s1951_s1 + $0xe0] sm:$0xff]  ;;  %v1544_v28 = vld [vmem:[%s1951_s1 + $0x98] sm:$0xff]  ;;  %v452_v34 = vrot.slane %v450_v25, 4  ;;  %v455_v35 = vrot.slane %v453_v26, 5  ;;  %v461_v36 = vrot.slane %v459_v27, 5  ;;  %v852_v41 = vshrl.u32 %v1450_v32, 16  ;;  %vm1786_vm2 = vmor %vm432_vm0, %vm433_vm1 }
  0x14   : > { %1053 = vmatpush.bf16.msra.mxu3 %v1555_v7  ;;  %v416_v16 = vld [vmem:[%s1741_s28] sm:$0xf]  ;;  %v417_v17 = vld [vmem:[%s1741_s28 + $0x4] sm:$0x1]  ;;  %v1552_v29 = vld [vmem:[%s1951_s1 + $0xd8] sm:$0xff]  ;;  %v855_v42 = vshll.u32 %v1450_v32, 16 }
  0x15   : > { %373 = vmatpush.bf16.msra.mxu0 %v1526_v8  ;;  %v436_v20 = vshrl.u32 %v416_v16, 16  ;;  %v439_v21 = vshll.u32 %v416_v16, 16  ;;  %v445_v24 = vshll.u32 %v417_v17, 16  ;;  %v1451_v37 = vld [vmem:[%s1741_s28 + $0xc] sm:$0x1]  ;;  %v456_v44 = vor.u32 %v455_v35, %v452_v34  ;;  %v1531_v48 = vld [vmem:[%s1951_s1 + $0x50] sm:$0xff] }
  0x16   : > { %638 = vmatpush.bf16.msra.mxu1 %v1534_v9  ;;  %v1452_v39 = vld [vmem:[%s1741_s28 + $0x10] sm:$0xf]  ;;  %v1453_v40 = vld [vmem:[%s1741_s28 + $0x14] sm:$0x1]  ;;  %v861_v45 = vshll.u32 %v1451_v37, 16  ;;  %v854_v52 = vrot.slane %v852_v41, 4 }
  0x17   : > { %792 = vmatpush.bf16.msra.mxu2 %v1546_v10  ;;  %v438_v30 = vrot.slane %v436_v20, 4  ;;  %v441_v31 = vrot.slane %v439_v21, 5  ;;  %v447_v33 = vrot.slane %v445_v24, 5  ;;  %v866_v46 = vshrl.u32 %v1452_v39, 16  ;;  %v1543_v49 = vld [vmem:[%s1951_s1 + $0x90] sm:$0xff]  ;;  %v1522_v60 = vld [vmem:[%s1951_s1 + $0x8] sm:$0xff] }
  0x18   : > { %1054 = vmatpush.bf16.msra.mxu3 %v1554_v11  ;;  %v869_v47 = vshll.u32 %v1452_v39, 16  ;;  %v857_v53 = vrot.slane %v855_v42, 5  ;;  %v875_v54 = vshll.u32 %v1453_v40, 16  ;;  %v1551_v55 = vld [vmem:[%s1951_s1 + $0xd0] sm:$0xff]  ;;  %v457_v56 = vrot.slane %v456_v44, 4  ;;  %v1530_v0 = vld [vmem:[%s1951_s1 + $0x48] sm:$0xff] }
  0x19   : > { %374 = vmatpush.bf16.msra.mxu0 %v1525_v12  ;;  %v442_v38 = vor.u32 %v441_v31, %v438_v30  ;;  %v868_v57 = vrot.slane %v866_v46, 4  ;;  %v420_v59 = vld [vmem:[%s1741_s28 + $0x10] sm:$0xf]  ;;  %v863_v62 = vrot.slane %v861_v45, 5  ;;  %v422_v63 = vld [vmem:[%s1741_s28 + $0x18] sm:$0xf] }
  0x1a   : > { %639 = vmatpush.bf16.msra.mxu1 %v1533_v13  ;;  %v871_v58 = vrot.slane %v869_v47, 5  ;;  %v858_v61 = vor.u32 %v857_v53, %v854_v52  ;;  %v1542_v1 = vld [vmem:[%s1951_s1 + $0x88] sm:$0xff]  ;;  %v877_v5 = vrot.slane %v875_v54, 5  ;;  %v464_v6 = vshrl.u32 %v420_v59, 16  ;;  %v1810_v7 = vld [vmem:[%s1741_s28] sm:$0xf] }
  0x1b   : > { %793 = vmatpush.bf16.msra.mxu2 %v1545_v14  ;;  %v443_v51 = vrot.slane %v442_v38, 4  ;;  %v1550_v2 = vld [vmem:[%s1951_s1 + $0xc8] sm:$0xff]  ;;  %v462_v9 = vsel %vm1786_vm2, %v457_v56, %v461_v36  ;;  %v467_v11 = vshll.u32 %v420_v59, 16  ;;  %v1537_v13 = vld [vmem:[%s1741_s28 + $0xc] sm:$0xf0]  ;;  %v478_v16 = vshrl.u32 %v422_v63, 16 }
  0x1c   : > { %1055 = vmatpush.bf16.msra.mxu3 %v1553_v15  ;;  %v872_v4 = vor.u32 %v871_v58, %v868_v57  ;;  %v1517_v8 = vld [vmem:[%s1741_s28 + $0x4] sm:$0xf0]  ;;  %v859_v10 = vrot.slane %v858_v61, 4  ;;  %v466_v15 = vrot.slane %v464_v6, 4  ;;  %v481_v17 = vshll.u32 %v422_v63, 16  ;;  %v1521_v18 = vld [vmem:[%s1951_s1] sm:$0xff] }
  0x1d   : > { %375 = vmatpush.bf16.msra.mxu0 %v1524_v22  ;;  %v448_v3 = vsel %vm1786_vm2, %v443_v51, %v447_v33  ;;  %v1404_v12 = vld [vmem:[%s1741_s28 + $0x8] sm:$0xf]  ;;  %v421_v21 = vld [vmem:[%s1741_s28 + $0x14] sm:$0x1]  ;;  %v469_v22 = vrot.slane %v467_v11, 5  ;;  %v573_v24 = vunpack.c.l.b16 %v462_v9  ;;  %v480_v27 = vrot.slane %v478_v16, 4 }
  0x1e   : > { %640 = vmatpush.bf16.msra.mxu1 %v1532_v23  ;;  %v873_v14 = vrot.slane %v872_v4, 4  ;;  %v572_v19 = vunpack.c.l.b16 %v448_v3  ;;  %v864_v20 = vsel %vm1786_vm2, %v859_v10, %v863_v62  ;;  %v1454_v23 = vld [vmem:[%s1741_s28 + $0x18] sm:$0xf]  ;;  %v423_v26 = vld [vmem:[%s1741_s28 + $0x1c] sm:$0x1]  ;;  %v1529_v30 = vld [vmem:[%s1951_s1 + $0x40] sm:$0xff]  ;;  %v1284_v32 = vor.u32 %v1517_v8, %v1810_v7 }
  0x1f   : > { %794 = vmatpush.bf16.msra.mxu2 %v1544_v28  ;;  %v483_v28 = vrot.slane %v481_v17, 5  ;;  %v1541_v31 = vld [vmem:[%s1951_s1 + $0x80] sm:$0xff]  ;;  %v988_v33 = vunpack.c.l.b16 %v864_v20  ;;  %v1455_v35 = vld [vmem:[%s1741_s28 + $0x1c] sm:$0x1]  ;;  %v470_v37 = vor.u32 %v469_v22, %v466_v15  ;;  %v473_v38 = vshll.u32 %v421_v21, 16 }
  0x20   : > { %1056 = vmatpush.bf16.msra.mxu3 %v1552_v29  ;;  %v878_v25 = vsel %vm1786_vm2, %v873_v14, %v877_v5  ;;  %v1456_v29 = vld [vmem:[%s1741_s28 + $0x20] sm:$0xf]  ;;  %v1457_v39 = vld [vmem:[%s1741_s28 + $0x24] sm:$0x1]  ;;  %v880_v40 = vshrl.u32 %v1454_v23, 16  ;;  %v883_v41 = vshll.u32 %v1454_v23, 16  ;;  %v1405_v42 = vor.u32 %v1537_v13, %v1404_v12 }
  0x21   : > { %376 = vmatpush.bf16.msra.mxu0 %v1523_v43  ;;  %v989_v34 = vunpack.c.l.b16 %v878_v25  ;;  %v1549_v36 = vld [vmem:[%s1951_s1 + $0xc0] sm:$0xff]  ;;  %v484_v43 = vor.u32 %v483_v28, %v480_v27  ;;  %v487_v44 = vshll.u32 %v423_v26, 16  ;;  %v894_v45 = vshrl.u32 %v1456_v29, 16  ;;  %v1458_v4 = vld [vmem:[%s1741_s28 + $0x28] sm:$0xf] }
  0x22   : > { %641 = vmatpush.bf16.msra.mxu1 %v1531_v48  ;;  %v580_v46 = vpack.c.b16 %v573_v24, %v572_v19  ;;  %v882_v47 = vrot.slane %v880_v40, 4  ;;  %v885_v48 = vrot.slane %v883_v41, 5  ;;  %v897_v53 = vshll.u32 %v1456_v29, 16  ;;  %v424_v61 = vld [vmem:[%s1741_s28 + $0x20] sm:$0xf] }
  0x23   : > { %795 = vmatpush.bf16.msra.mxu2 %v1543_v49  ;;  %v889_v49 = vshll.u32 %v1455_v35, 16  ;;  %v996_v51 = vpack.c.b16 %v989_v34, %v988_v33  ;;  %v896_v52 = vrot.slane %v894_v45, 4  ;;  %v903_v54 = vshll.u32 %v1457_v39, 16  ;;  %v1460_v11 = vld [vmem:[%s1741_s28 + $0x30] sm:$0xf] }
  0x24   : > { %1057 = vmatpush.bf16.msra.mxu3 %v1551_v55  ;;  %v471_v55 = vrot.slane %v470_v37, 4  ;;  %v475_v56 = vrot.slane %v473_v38, 5  ;;  %v886_v57 = vor.u32 %v885_v48, %v882_v47  ;;  %v485_v58 = vrot.slane %v484_v43, 4  ;;  %v1287_v16 = vld [vmem:[%s1741_s28 + $0x10] sm:$0xf] }
  0x25   : > { %377 = vmatpush.bf16.msra.mxu0 %v1522_v60  ;;  %v489_v59 = vrot.slane %v487_v44, 5  ;;  %v899_v60 = vrot.slane %v897_v53, 5  ;;  %v891_v63 = vrot.slane %v889_v49, 5  ;;  %v492_v7 = vshrl.u32 %v424_v61, 16  ;;  %v1518_v17 = vld [vmem:[%s1741_s28 + $0x14] sm:$0xf0] }
  0x26   : > { %642 = vmatpush.bf16.msra.mxu1 %v1530_v0  ;;  %v887_v62 = vrot.slane %v886_v57, 4  ;;  %v476_v3 = vsel %vm1786_vm2, %v471_v55, %v475_v56  ;;  %v495_v8 = vshll.u32 %v424_v61, 16  ;;  %v908_v14 = vshrl.u32 %v1458_v4, 16  ;;  %v1408_v20 = vld [vmem:[%s1741_s28 + $0x18] sm:$0xf] }
  0x27   : > { %796 = vmatpush.bf16.msra.mxu2 %v1542_v1  ;;  %v900_v0 = vor.u32 %v899_v60, %v896_v52  ;;  %v905_v1 = vrot.slane %v903_v54, 5  ;;  %v490_v5 = vsel %vm1786_vm2, %v485_v58, %v489_v59  ;;  %v911_v15 = vshll.u32 %v1458_v4, 16  ;;  %v1538_v21 = vld [vmem:[%s1741_s28 + $0x1c] sm:$0xf0]  ;;  %v425_v28 = vld [vmem:[%s1741_s28 + $0x24] sm:$0x1] }
  0x28   : > { %1058 = vmatpush.bf16.msra.mxu3 %v1550_v2  ;;  %v426_v2 = vld [vmem:[%s1741_s28 + $0x28] sm:$0xf]  ;;  %v892_v12 = vsel %vm1786_vm2, %v887_v62, %v891_v63  ;;  %v575_v19 = vunpack.c.l.b16 %v490_v5  ;;  %v494_v22 = vrot.slane %v492_v7, 4  ;;  %v497_v23 = vrot.slane %v495_v8, 5  ;;  %v427_v29 = vld [vmem:[%s1741_s28 + $0x2c] sm:$0x1] }
  0x29   : > { %378 = vmatpush.bf16.msra.mxu0 %v1521_v18  ;;  %v901_v6 = vrot.slane %v900_v0, 4  ;;  %v506_v9 = vshrl.u32 %v426_v2, 16  ;;  %v509_v10 = vshll.u32 %v426_v2, 16  ;;  %v574_v18 = vunpack.c.l.b16 %v476_v3  ;;  %v1461_v37 = vld [vmem:[%s1741_s28 + $0x34] sm:$0x1] }
  0x2a   : > { %643 = vmatpush.bf16.msra.mxu1 %v1529_v30  ;;  %v922_v24 = vshrl.u32 %v1460_v11, 16  ;;  %v925_v25 = vshll.u32 %v1460_v11, 16  ;;  %v990_v26 = vunpack.c.l.b16 %v892_v12  ;;  %v910_v33 = vrot.slane %v908_v14, 4  ;;  %v428_v59 = vld [vmem:[%s1741_s28 + $0x30] sm:$0xf] }
  0x2b   : > { %797 = vmatpush.bf16.msra.mxu2 %v1541_v31  ;;  %v906_v13 = vsel %vm1786_vm2, %v901_v6, %v905_v1  ;;  %v508_v30 = vrot.slane %v506_v9, 4  ;;  %v511_v31 = vrot.slane %v509_v10, 5  ;;  %v913_v34 = vrot.slane %v911_v15, 5  ;;  %v430_v60 = vld [vmem:[%s1741_s28 + $0x38] sm:$0xf] }
  0x2c   : > { %1059 = vmatpush.bf16.msra.mxu3 %v1549_v36  ;;  %379 = vmatmul.bf16.vlgmr.msra.gmra.mxu0 %v1284_v32  ;;  %v991_v27 = vunpack.c.l.b16 %v906_v13  ;;  %v1459_v32 = vld [vmem:[%s1741_s28 + $0x2c] sm:$0x1]  ;;  %v924_v35 = vrot.slane %v922_v24, 4  ;;  %v927_v36 = vrot.slane %v925_v25, 5  ;;  %v1288_v38 = vor.u32 %v1518_v17, %v1287_v16  ;;  %v1462_v61 = vld [vmem:[%s1741_s28 + $0x38] sm:$0xf] }
  0x2d   : > { %644 = vmatmul.bf16.vlgmr.msra.gmra.mxu1 %v580_v46  ;;  %v581_v39 = vpack.c.b16 %v575_v19, %v574_v18  ;;  %v1409_v40 = vor.u32 %v1538_v21, %v1408_v20  ;;  %v501_v41 = vshll.u32 %v425_v28, 16  ;;  %v512_v43 = vor.u32 %v511_v31, %v508_v30  ;;  %v1464_v62 = vld [vmem:[%s1741_s28 + $0x40] sm:$0xf]  ;;  %v1519_v12 = vld [vmem:[%s1741_s28 + $0x24] sm:$0xf0] }
  0x2e   : > { %798 = vmatmul.bf16.vlgmr.msra.gmra.mxu2 %v1405_v42  ;;  %v498_v42 = vor.u32 %v497_v23, %v494_v22  ;;  %v515_v44 = vshll.u32 %v427_v29, 16  ;;  %v917_v45 = vshll.u32 %v1459_v32, 16  ;;  %v997_v46 = vpack.c.b16 %v991_v27, %v990_v26  ;;  %v1291_v11 = vld [vmem:[%s1741_s28 + $0x20] sm:$0xf]  ;;  %v1412_v15 = vld [vmem:[%s1741_s28 + $0x28] sm:$0xf] }
  0x2f   : > { %1060 = vmatmul.bf16.vlgmr.msra.gmra.mxu3 %v996_v51  ;;  %v914_v47 = vor.u32 %v913_v34, %v910_v33  ;;  %v928_v48 = vor.u32 %v927_v36, %v924_v35  ;;  %v931_v49 = vshll.u32 %v1461_v37, 16  ;;  %v503_v52 = vrot.slane %v501_v41, 5  ;;  %v1539_v16 = vld [vmem:[%s1741_s28 + $0x2c] sm:$0xf0]  ;;  %v429_v20 = vld [vmem:[%s1741_s28 + $0x34] sm:$0x1] }
  0x30   : > { %v499_v51 = vrot.slane %v498_v42, 4  ;;  %v513_v53 = vrot.slane %v512_v43, 4  ;;  %v517_v54 = vrot.slane %v515_v44, 5  ;;  %v919_v56 = vrot.slane %v917_v45, 5  ;;  %v431_v24 = vld [vmem:[%s1741_s28 + $0x3c] sm:$0x1] }
  0x31   : > { %v915_v55 = vrot.slane %v914_v47, 4  ;;  %v929_v57 = vrot.slane %v928_v48, 4  ;;  %v933_v58 = vrot.slane %v931_v49, 5  ;;  %v520_v1 = vshrl.u32 %v428_v59, 16  ;;  %v1463_v29 = vld [vmem:[%s1741_s28 + $0x3c] sm:$0x1] }
  0x32   : > { %v504_v63 = vsel %vm1786_vm2, %v499_v51, %v503_v52  ;;  %v518_v0 = vsel %vm1786_vm2, %v513_v53, %v517_v54  ;;  %v523_v2 = vshll.u32 %v428_v59, 16  ;;  %v534_v5 = vshrl.u32 %v430_v60, 16  ;;  %v1465_v30 = vld [vmem:[%s1741_s28 + $0x44] sm:$0x1]  ;;  %v1520_v59 = vld [vmem:[%s1741_s28 + $0x34] sm:$0xf0] }
  0x33   : > { %v920_v3 = vsel %vm1786_vm2, %v915_v55, %v919_v56  ;;  %v934_v4 = vsel %vm1786_vm2, %v929_v57, %v933_v58  ;;  %v537_v6 = vshll.u32 %v430_v60, 16  ;;  %v936_v7 = vshrl.u32 %v1462_v61, 16  ;;  %v1295_v58 = vld [vmem:[%s1741_s28 + $0x30] sm:$0xf] }
  0x34   : > { %v939_v8 = vshll.u32 %v1462_v61, 16  ;;  %v950_v9 = vshrl.u32 %v1464_v62, 16  ;;  %v953_v10 = vshll.u32 %v1464_v62, 16  ;;  %v576_v13 = vunpack.c.l.b16 %v504_v63  ;;  %v1416_v62 = vld [vmem:[%s1741_s28 + $0x38] sm:$0xf] }
  0x35   : > { %v577_v14 = vunpack.c.l.b16 %v518_v0  ;;  %v992_v17 = vunpack.c.l.b16 %v920_v3  ;;  %v522_v18 = vrot.slane %v520_v1, 4  ;;  %v993_v19 = vunpack.c.l.b16 %v934_v4  ;;  %v1540_v63 = vld [vmem:[%s1741_s28 + $0x3c] sm:$0xf0]  ;;  %s1117_s28 = sld [smem:[#allocation3]] }
  0x36   : > { %v525_v21 = vrot.slane %v523_v2, 5  ;;  %v536_v22 = vrot.slane %v534_v5, 4  ;;  %v539_v23 = vrot.slane %v537_v6, 5  ;;  %v938_v25 = vrot.slane %v936_v7, 4 }
  0x37   : > { %v941_v26 = vrot.slane %v939_v8, 5  ;;  %v952_v27 = vrot.slane %v950_v9, 4  ;;  %v955_v28 = vrot.slane %v953_v10, 5  ;;  %v1292_v31 = vor.u32 %v1519_v12, %v1291_v11  ;;  %v1899_v12 = vld [vmem:[%s1952_s2] ss:$0 sm:$0xff] }
  0x38   : > { %v582_v32 = vpack.c.b16 %v577_v14, %v576_v13  ;;  %v1413_v33 = vor.u32 %v1539_v16, %v1412_v15  ;;  %v529_v34 = vshll.u32 %v429_v20, 16  ;;  %v998_v35 = vpack.c.b16 %v993_v19, %v992_v17  ;;  %v1558_v14 = vld [vmem:[%s1906_s7] sm:$0xff]  }
  0x39   : > { %v526_v36 = vor.u32 %v525_v21, %v522_v18  ;;  %v540_v37 = vor.u32 %v539_v23, %v536_v22  ;;  %v956_v41 = vor.u32 %v955_v28, %v952_v27  ;;  %v959_v42 = vshll.u32 %v1465_v30, 16 }
  0x3a   : > { %v531_v44 = vrot.slane %v529_v34, 5  ;;  %v1296_v0 = vor.u32 %v1520_v59, %v1295_v58  ;;  %v1417_v2 = vor.u32 %v1540_v63, %v1416_v62  ;;  %v1559_v22 = vunpack.c.l.bf16 %v1558_v14 }
  0x3b   : > { %v527_v43 = vrot.slane %v526_v36, 4  ;;  %v541_v45 = vrot.slane %v540_v37, 4  ;;  %v957_v49 = vrot.slane %v956_v41, 4  ;;  %v961_v51 = vrot.slane %v959_v42, 5 }
  0x3c   : > { %384 = vmatmul.bf16.gmra.mxu0 %v1288_v38  ;;  %v543_v38 = vshll.u32 %v431_v24, 16  ;;  %v1910_v16 = vstv %s1117_s28  ;;  %v1560_v23 = vunpack.c.h.bf16 %v1558_v14  ;;  %v1159_v28 = vmul.f32 -1.0, %v1559_v22 }
  0x3d   : > { %649 = vmatmul.bf16.gmra.mxu1 %v581_v39  ;;  %v942_v39 = vor.u32 %v941_v26, %v938_v25  ;;  %v532_v52 = vsel %vm1786_vm2, %v527_v43, %v531_v44  ;;  %v962_v55 = vsel %vm1786_vm2, %v957_v49, %v961_v51  ;;  %v1593_v43 = vld [vmem:[%s1906_s7 + $0x8] sm:$0xff]  }
  0x3e   : > { %803 = vmatmul.bf16.gmra.mxu2 %v1409_v40  ;;  %v945_v40 = vshll.u32 %v1463_v29, 16  ;;  %v578_v56 = vunpack.c.l.b16 %v532_v52  ;;  %v995_v61 = vunpack.c.l.b16 %v962_v55  ;;  %v1160_v29 = vmul.f32 -1.0, %v1560_v23 }
  0x3f   : > { %1065 = vmatmul.bf16.gmra.mxu3 %v997_v46  ;;  %v545_v46 = vrot.slane %v543_v38, 5  ;;  %v943_v47 = vrot.slane %v942_v39, 4  ;;  %v1563_v51 = vunpack.c.l.bf16 %v1593_v43  ;;  %v1564_v52 = vunpack.c.h.bf16 %v1593_v43 }
  0x40   : > { %v947_v48 = vrot.slane %v945_v40, 5 }
  0x41   : > { %v546_v53 = vsel %vm1786_vm2, %v541_v45, %v545_v46  ;;  %v1162_v58 = vmul.f32 -1.0, %v1564_v52 }
  0x42   : > { %v948_v54 = vsel %vm1786_vm2, %v943_v47, %v947_v48  ;;  %v579_v57 = vunpack.c.l.b16 %v546_v53 }
  0x43   : > { %v994_v60 = vunpack.c.l.b16 %v948_v54 }
  0x44   : > { %v583_v1 = vpack.c.b16 %v579_v57, %v578_v56  ;;  %v1161_v57 = vmul.f32 -1.0, %v1563_v51 }
  0x45   : > { %v999_v3 = vpack.c.b16 %v995_v61, %v994_v60 }
  0x4c   : > { %389 = vmatmul.bf16.gmra.mxu0 %v1292_v31 }
  0x4d   : > { %654 = vmatmul.bf16.gmra.mxu1 %v582_v32 }
  0x4e   : > { %808 = vmatmul.bf16.gmra.mxu2 %v1413_v33 }
  0x4f   : > { %1070 = vmatmul.bf16.gmra.mxu3 %v998_v35 }
  0x5c   : > { %394 = vmatmul.bf16.gmra.mxu0 %v1296_v0 }
  0x5d   : > { %659 = vmatmul.bf16.gmra.mxu1 %v583_v1 }
  0x5e   : > { %813 = vmatmul.bf16.gmra.mxu2 %v1417_v2 }
  0x5f   : > { %1075 = vmatmul.bf16.gmra.mxu3 %v999_v3 }
  0xa9   : > { %v380_v50 = vpop.f32.mrf.mxu0 }
  0xaa   : > { %v645_v4 = vpop.f32.mrf.mxu1 }
  0xab   : > { %v665_v5 = vadd.f32 %v645_v4, %v380_v50 }
  0xb1   : > { %v799_v6 = vpop.f32.mrf.mxu2  ;;  %v382_v9 = vpop.f32.mrf.mxu0 }
  0xb2   : > { %v1061_v7 = vpop.f32.mrf.mxu3  ;;  %v819_v8 = vadd.f32 %v799_v6, %v665_v5  ;;  %v647_v10 = vpop.f32.mrf.mxu1 }
  0xb3   : > { %v666_v15 = vadd.f32 %v647_v10, %v382_v9 }
  0xb4   : > { %v1081_v11 = vadd.f32 %v1061_v7, %v819_v8  ;;  %v1594_v7 = vld [vmem:[%s1906_s7 + $0x10] sm:$0xff]  }
  0xb5   : > { %v1568_v14 = vunpack.c.h.bf16 %v1594_v7 }
  0xb6   : > { %v1109_v13 = vadd.f32 %v1899_v12, %v1081_v11 }
  0xb7   : > { %v1164_v23 = vmul.f32 -1.0, %v1568_v14 }
  0xb8   : > { %v1127_v24 = vmul.f32 %v1910_v16, %v1109_v13  ;;  %vm1118_vm3 = vcmp.gt.f32.partialorder %v1109_v13, 0.0 }
  0xb9   : > { %v801_v17 = vpop.f32.mrf.mxu2  ;;  %v385_v20 = vpop.f32.mrf.mxu0 }
  0xba   : > { %v1063_v18 = vpop.f32.mrf.mxu3  ;;  %v820_v19 = vadd.f32 %v801_v17, %v666_v15  ;;  %v650_v21 = vpop.f32.mrf.mxu1  ;;  %v1135_v30 = vsel %vm1118_vm3, %v1109_v13, %v1127_v24  ;;  %v1567_v13 = vunpack.c.l.bf16 %v1594_v7 }
  0xbb   : > { %v667_v27 = vadd.f32 %v650_v21, %v385_v20  ;;  %v1167_v38 = vadd.f32 %v1159_v28, %v1135_v30 }
  0xbc   : > { %v1082_v25 = vadd.f32 %v1063_v18, %v820_v19  ;;  %v1163_v22 = vmul.f32 -1.0, %v1567_v13 }
  0xbe   : > { %v1110_v26 = vadd.f32 %v1899_v12, %v1082_v25 }
  0xc0   : > { %vm1119_vm4 = vcmp.gt.f32.partialorder %v1110_v26, 0.0  ;;  %v1128_v31 = vmul.f32 %v1910_v16, %v1110_v26 }
  0xc1   : > { %v804_v32 = vpop.f32.mrf.mxu2  ;;  %v387_v36 = vpop.f32.mrf.mxu0 }
  0xc2   : > { %v1066_v33 = vpop.f32.mrf.mxu3  ;;  %v1136_v34 = vsel %vm1119_vm4, %v1110_v26, %v1128_v31  ;;  %v821_v35 = vadd.f32 %v804_v32, %v667_v27  ;;  %v652_v37 = vpop.f32.mrf.mxu1 }
  0xc3   : > { %v1168_v39 = vadd.f32 %v1160_v29, %v1136_v34  ;;  %v668_v44 = vadd.f32 %v652_v37, %v387_v36  ;;  %v1595_v37 = vld [vmem:[%s1906_s7 + $0x18] sm:$0xff]  }
  0xc4   : > { %v1083_v40 = vadd.f32 %v1066_v33, %v821_v35  ;;  %v1572_v43 = vunpack.c.h.bf16 %v1595_v37 }
  0xc5   : > { %v1576_v41 = vpack.c.bf16 %v1168_v39, %v1167_v38 }
  0xc6   : > { %v1111_v42 = vadd.f32 %v1899_v12, %v1083_v40 }
  0xc7   : > { %1577 = vst [vmem:[%s1920_s10] sm:$0xff] %v1576_v41   ;;  %v1571_v41 = vunpack.c.l.bf16 %v1595_v37 }
  0xc8   : > { %v1129_v53 = vmul.f32 %v1910_v16, %v1111_v42  ;;  %vm1120_vm5 = vcmp.gt.f32.partialorder %v1111_v42, 0.0 }
  0xc9   : > { %v806_v45 = vpop.f32.mrf.mxu2  ;;  %v390_v48 = vpop.f32.mrf.mxu0 }
  0xca   : > { %v1068_v46 = vpop.f32.mrf.mxu3  ;;  %v822_v47 = vadd.f32 %v806_v45, %v668_v44  ;;  %v655_v49 = vpop.f32.mrf.mxu1  ;;  %v1137_v59 = vsel %vm1120_vm5, %v1111_v42, %v1129_v53 }
  0xcb   : > { %v669_v56 = vadd.f32 %v655_v49, %v390_v48  ;;  %v1169_v3 = vadd.f32 %v1161_v57, %v1137_v59  ;;  %v1166_v48 = vmul.f32 -1.0, %v1572_v43 }
  0xcc   : > { %v1084_v54 = vadd.f32 %v1068_v46, %v822_v47  ;;  %v1165_v47 = vmul.f32 -1.0, %v1571_v41 }
  0xce   : > { %v1112_v55 = vadd.f32 %v1899_v12, %v1084_v54 }
  0xd0   : > { %vm1121_vm6 = vcmp.gt.f32.partialorder %v1112_v55, 0.0  ;;  %v1130_v60 = vmul.f32 %v1910_v16, %v1112_v55 }
  0xd1   : > { %v809_v61 = vpop.f32.mrf.mxu2  ;;  %v392_v1 = vpop.f32.mrf.mxu0 }
  0xd2   : > { %v1071_v62 = vpop.f32.mrf.mxu3  ;;  %v1138_v63 = vsel %vm1121_vm6, %v1112_v55, %v1130_v60  ;;  %v823_v0 = vadd.f32 %v809_v61, %v669_v56  ;;  %v657_v2 = vpop.f32.mrf.mxu1 }
  0xd3   : > { %v1170_v50 = vadd.f32 %v1162_v58, %v1138_v63  ;;  %v670_v8 = vadd.f32 %v657_v2, %v392_v1 }
  0xd4   : > { %v1085_v4 = vadd.f32 %v1071_v62, %v823_v0 }
  0xd5   : > { %v1581_v5 = vpack.c.bf16 %v1170_v50, %v1169_v3 }
  0xd6   : > { %v1113_v6 = vadd.f32 %v1899_v12, %v1085_v4 }
  0xd7   : > { %1596 = vst [vmem:[%s1920_s10 + $0x8] sm:$0xff] %v1581_v5  }
  0xd8   : > { %v1131_v18 = vmul.f32 %v1910_v16, %v1113_v6  ;;  %vm1122_vm7 = vcmp.gt.f32.partialorder %v1113_v6, 0.0 }
  0xd9   : > { %v811_v9 = vpop.f32.mrf.mxu2  ;;  %v395_v15 = vpop.f32.mrf.mxu0 }
  0xda   : > { %v1073_v10 = vpop.f32.mrf.mxu3  ;;  %v824_v11 = vadd.f32 %v811_v9, %v670_v8  ;;  %v660_v17 = vpop.f32.mrf.mxu1  ;;  %v1139_v24 = vsel %vm1122_vm7, %v1113_v6, %v1131_v18 }
  0xdb   : > { %v671_v21 = vadd.f32 %v660_v17, %v395_v15  ;;  %v1171_v30 = vadd.f32 %v1163_v22, %v1139_v24 }
  0xdc   : > { %v1086_v19 = vadd.f32 %v1073_v10, %v824_v11 }
  0xde   : > { %v1114_v20 = vadd.f32 %v1899_v12, %v1086_v19 }
  0xe0   : > { %vm1123_vm8 = vcmp.gt.f32.partialorder %v1114_v20, 0.0  ;;  %v1132_v25 = vmul.f32 %v1910_v16, %v1114_v20 }
  0xe1   : > { %v814_v26 = vpop.f32.mrf.mxu2  ;;  %v397_v34 = vpop.f32.mrf.mxu0 }
  0xe2   : > { %v1076_v27 = vpop.f32.mrf.mxu3  ;;  %v1140_v28 = vsel %vm1123_vm8, %v1114_v20, %v1132_v25  ;;  %v825_v29 = vadd.f32 %v814_v26, %v671_v21  ;;  %v662_v35 = vpop.f32.mrf.mxu1 }
  0xe3   : > { %v1172_v31 = vadd.f32 %v1164_v23, %v1140_v28  ;;  %v672_v38 = vadd.f32 %v662_v35, %v397_v34 }
  0xe4   : > { %v1087_v32 = vadd.f32 %v1076_v27, %v825_v29 }
  0xe5   : > { %v1586_v33 = vpack.c.bf16 %v1172_v31, %v1171_v30 }
  0xe6   : > { %v1115_v36 = vadd.f32 %v1899_v12, %v1087_v32 }
  0xe7   : > { %1597 = vst [vmem:[%s1920_s10 + $0x10] sm:$0xff] %v1586_v33  }
  0xe8   : > { %v1133_v44 = vmul.f32 %v1910_v16, %v1115_v36  ;;  %vm1124_vm9 = vcmp.gt.f32.partialorder %v1115_v36, 0.0 }
  0xe9   : > { %v816_v39 = vpop.f32.mrf.mxu2 }
  0xea   : > { %v826_v40 = vadd.f32 %v816_v39, %v672_v38  ;;  %v1078_v42 = vpop.f32.mrf.mxu3  ;;  %v1141_v49 = vsel %vm1124_vm9, %v1115_v36, %v1133_v44 }
  0xeb   : > { %v1173_v53 = vadd.f32 %v1165_v47, %v1141_v49 }
  0xec   : > { %v1088_v45 = vadd.f32 %v1078_v42, %v826_v40 }
  0xee   : > { %v1116_v46 = vadd.f32 %v1899_v12, %v1088_v45 }
  0xf0   : > { %vm1125_vm10 = vcmp.gt.f32.partialorder %v1116_v46, 0.0  ;;  %v1134_v51 = vmul.f32 %v1910_v16, %v1116_v46 }
  0xf2   : > { %v1142_v52 = vsel %vm1125_vm10, %v1116_v46, %v1134_v51 }
  0xf3   : > { %v1174_v54 = vadd.f32 %v1166_v48, %v1142_v52 }
  0xf5   : > { %v1591_v55 = vpack.c.bf16 %v1174_v54, %v1173_v53 }
  0xf7   : > { %1598 = vst [vmem:[%s1920_s10 + $0x18] sm:$0xff] %v1591_v55  }
  0xf8 PF: > { %s16_s22 = sadd.s32 1, %s1646_s22   ;;  %s1958_s20 = smov %s1642_s21 }
  0xf9   : > { %p13_p5 = scmp.ge.s32.totalorder %s16_s22, 4   ;;  %s1959_s21 = smov %s1961_s3 }
  0xfb   :  { %15 = sbr.rel (!%p13_p5) target bundleno = 2 (0x2), region = 75 }

// kernel: upblockpix_forward.9
= control target key start
LH: loop header
LB: loop body
LE: loop exit
PB: predicated region body
PF: predicated region fallthrough
CT: control target
= control target key end

     0   :  { %s6982_s20 = smov 0   ;;  %s6984_s21 = smov 0   ;;  %s8493_s0 = inlined_call_operand.vmem [shape: bf16[36,18,128], index: 0, kind: input, shape index: {}]   ;;  %s8494_s1 = inlined_call_operand.vmem [shape: bf16[9,128,128], index: 1, kind: input, shape index: {}]   ;;  %s8495_s2 = inlined_call_operand.vmem [shape: f32[1,128], index: 2, kind: input, shape index: {}]   ;;  %s8496_s3 = inlined_call_operand.<no memory space> [shape: f32[1], index: 3, kind: input, shape index: {}]   ;;  %s8497_s4 = inlined_call_operand.vmem [shape: bf16[512,128], index: 4, kind: input, shape index: {}]   ;;  %s8498_s5 = inlined_call_operand.vmem [shape: bf16[512,128], index: 5, kind: output, shape index: {}]  }
   0x1   :  { %10 = sst [smem:[#allocation3]] %s8496_s3  ;;  %s6986_s22 = smov 0  }
   0x2 LB: > { %s28_s3 = sadd.s32 1, %s6943_s21  ;;  %p5657_p0 = scmp.ge.s32.totalorder %s6947_s22, 1  ;;  %s6947_s22 = sphi %s6986_s22, %s16_s22   ;;  %s6943_s21 = sphi %s6984_s21, %s8531_s21   ;;  %s6939_s20 = sphi %s6982_s20, %s8530_s20  }
   0x3   : > { %p30_p1 = scmp.ge.s32.totalorder %s28_s3, 2  ;;  %p207_p2 = scmp.lt.s32.totalorder %s6947_s22, 3 }
   0x5   : > { %s8533_s3 = smov (%p30_p1, %s28_s3), 0  ;;  %p208_p3 = pnand %p5657_p0, %p207_p2 }
   0x7   : > { %211 = sbr.rel (%p208_p3) target bundleno = 760 (0x2f8), region = 40 }
   0xc   : > { %v6604_v0 = vld [vmem:[%s8494_s1 + $0x38] sm:$0xff]  ;;  %v6603_v1 = vld [vmem:[%s8494_s1 + $0x30] sm:$0xff]  ;;  %v6602_v2 = vld [vmem:[%s8494_s1 + $0x28] sm:$0xff]  ;;  %s6580_s12 = smul.u32 216, %s6939_s20  ;;  %vm716_vm0 = vsmask.f32 3328 }
   0xd   : > { %6875 = vmatpush.bf16.msra.mxu1 %v6604_v0  ;;  %6876 = vmatpush.bf16.msra.mxu2 %v6604_v0  ;;  %v6601_v3 = vld [vmem:[%s8494_s1 + $0x20] sm:$0xff]  ;;  %v6600_v4 = vld [vmem:[%s8494_s1 + $0x18] sm:$0xff]  ;;  %v6599_v5 = vld [vmem:[%s8494_s1 + $0x10] sm:$0xff]  ;;  %vm717_vm1 = vsmask.f32 7440  ;;  %vm1513_vm2 = vcmask 1042432  }
   0xe   : > { %6877 = vmatpush.bf16.msra.mxu3 %v6604_v0  ;;  %515 = vmatpush.bf16.msra.mxu0 %v6604_v0  ;;  %v6598_v6 = vld [vmem:[%s8494_s1 + $0x8] sm:$0xff]  ;;  %v6597_v7 = vld [vmem:[%s8494_s1] sm:$0xff]  ;;  %s7030_s17 = scalar_lea.vmem %s8493_s0, %s6580_s12  ;;  %v6620_v8 = vld [vmem:[%s8494_s1 + $0xb8] sm:$0xff]  ;;  %vm1514_vm3 = vcmask 1046532   ;;  %s5658_s23 = sshll.u32 %s6939_s20, 5 }
   0xf   : > { %v6644_v9 = vld [vmem:[%s8494_s1 + $0xf8] sm:$0xff]  ;;  %v6585_v10 = vld [vmem:[%s7030_s17 + $0x30] sm:$0xff]  ;;  %v6589_v11 = vld [vmem:[%s7030_s17 + $0x60] sm:$0xff]  ;;  %p8125_p4 = scmp.lt.s32.totalorder %s5658_s23, 63  ;;  %s8147_s25 = sld [smem:[#allocation3]] }
  0x10   : > { %v6593_v12 = vld [vmem:[%s7030_s17 + $0x90] sm:$0xff]  ;;  %v6581_v13 = vld [vmem:[%s7030_s17] sm:$0xff]  ;;  %v6612_v14 = vld [vmem:[%s8494_s1 + $0x78] sm:$0xff] }
  0x11   : > { %6878 = vmatpush.bf16.msra.mxu1 %v6603_v1  ;;  %6879 = vmatpush.bf16.msra.mxu2 %v6603_v1  ;;  %v6652_v15 = vld [vmem:[%s8494_s1 + $0x138] sm:$0xff]  ;;  %v6619_v16 = vld [vmem:[%s8494_s1 + $0xb0] sm:$0xff]  ;;  %v6618_v20 = vld [vmem:[%s8494_s1 + $0xa8] sm:$0xff]  ;;  %s8535_s23 = smov (!%p8125_p4, %s5658_s23), 63 }
  0x12   : > { %6880 = vmatpush.bf16.msra.mxu3 %v6603_v1  ;;  %516 = vmatpush.bf16.msra.mxu0 %v6603_v1  ;;  %v6643_v17 = vld [vmem:[%s8494_s1 + $0xf0] sm:$0xff]  ;;  %v6642_v21 = vld [vmem:[%s8494_s1 + $0xe8] sm:$0xff]  ;;  %v6617_v24 = vld [vmem:[%s8494_s1 + $0xa0] sm:$0xff]  ;;  %s5659_s20 = sshll.u32 %s8535_s23, 2 }
  0x13   : > { %v6611_v18 = vld [vmem:[%s8494_s1 + $0x70] sm:$0xff]  ;;  %v6610_v22 = vld [vmem:[%s8494_s1 + $0x68] sm:$0xff]  ;;  %v6641_v25 = vld [vmem:[%s8494_s1 + $0xe0] sm:$0xff]  ;;  %s8171_s30 = scalar_lea.vmem %s8497_s4, %s5659_s20  ;;  %s8218_s8 = scalar_lea.vmem %s8498_s5, %s5659_s20 }
  0x14   : > { %v6651_v19 = vld [vmem:[%s8494_s1 + $0x130] sm:$0xff]  ;;  %v6650_v23 = vld [vmem:[%s8494_s1 + $0x128] sm:$0xff]  ;;  %v6609_v26 = vld [vmem:[%s8494_s1 + $0x60] sm:$0xff] }
  0x15   : > { %6881 = vmatpush.bf16.msra.mxu1 %v6602_v2  ;;  %6882 = vmatpush.bf16.msra.mxu2 %v6602_v2  ;;  %v6649_v27 = vld [vmem:[%s8494_s1 + $0x120] sm:$0xff]  ;;  %v6616_v28 = vld [vmem:[%s8494_s1 + $0x98] sm:$0xff]  ;;  %v6590_v31 = vld [vmem:[%s7030_s17 + $0x6c] sm:$0xff] }
  0x16   : > { %6883 = vmatpush.bf16.msra.mxu3 %v6602_v2  ;;  %517 = vmatpush.bf16.msra.mxu0 %v6602_v2  ;;  %v6640_v29 = vld [vmem:[%s8494_s1 + $0xd8] sm:$0xff]  ;;  %v6582_v33 = vld [vmem:[%s7030_s17 + $0xc] sm:$0xff]  ;;  %v6613_v44 = vld [vmem:[%s8494_s1 + $0x80] sm:$0xff] }
  0x17   : > { %v6586_v30 = vld [vmem:[%s7030_s17 + $0x3c] sm:$0xff]  ;;  %v6615_v36 = vld [vmem:[%s8494_s1 + $0x90] sm:$0xff]  ;;  %v6614_v40 = vld [vmem:[%s8494_s1 + $0x88] sm:$0xff] }
  0x18   : > { %v6594_v32 = vld [vmem:[%s7030_s17 + $0x9c] sm:$0xff]  ;;  %v6639_v37 = vld [vmem:[%s8494_s1 + $0xd0] sm:$0xff]  ;;  %v6638_v41 = vld [vmem:[%s8494_s1 + $0xc8] sm:$0xff] }
  0x19   : > { %6884 = vmatpush.bf16.msra.mxu1 %v6601_v3  ;;  %6885 = vmatpush.bf16.msra.mxu2 %v6601_v3  ;;  %v6608_v34 = vld [vmem:[%s8494_s1 + $0x58] sm:$0xff]  ;;  %v6607_v38 = vld [vmem:[%s8494_s1 + $0x50] sm:$0xff]  ;;  %v6606_v42 = vld [vmem:[%s8494_s1 + $0x48] sm:$0xff] }
  0x1a   : > { %6886 = vmatpush.bf16.msra.mxu3 %v6601_v3  ;;  %518 = vmatpush.bf16.msra.mxu0 %v6601_v3  ;;  %v6648_v35 = vld [vmem:[%s8494_s1 + $0x118] sm:$0xff]  ;;  %v6647_v39 = vld [vmem:[%s8494_s1 + $0x110] sm:$0xff]  ;;  %v6646_v43 = vld [vmem:[%s8494_s1 + $0x108] sm:$0xff] }
  0x1b   : > { %v6637_v45 = vld [vmem:[%s8494_s1 + $0xc0] sm:$0xff]  ;;  %v6587_v48 = vld [vmem:[%s7030_s17 + $0x48] sm:$0xff]  ;;  %v6591_v49 = vld [vmem:[%s7030_s17 + $0x78] sm:$0xff] }
  0x1c   : > { %v6605_v46 = vld [vmem:[%s8494_s1 + $0x40] sm:$0xff]  ;;  %v6595_v50 = vld [vmem:[%s7030_s17 + $0xa8] sm:$0xff]  ;;  %v6583_v51 = vld [vmem:[%s7030_s17 + $0x18] sm:$0xff] }
  0x1d   : > { %6887 = vmatpush.bf16.msra.mxu1 %v6600_v4  ;;  %6888 = vmatpush.bf16.msra.mxu2 %v6600_v4  ;;  %v6645_v47 = vld [vmem:[%s8494_s1 + $0x100] sm:$0xff]  ;;  %v6017_v54 = vld [vmem:[%s7030_s17 + $0xc] sm:$0xf]  ;;  %v6018_v55 = vld [vmem:[%s7030_s17 + $0x10] sm:$0xf] }
  0x1e   : > { %6889 = vmatpush.bf16.msra.mxu3 %v6600_v4  ;;  %519 = vmatpush.bf16.msra.mxu0 %v6600_v4  ;;  %v668_v52 = vld [vmem:[%s7030_s17] sm:$0xf]  ;;  %v669_v53 = vld [vmem:[%s7030_s17 + $0x4] sm:$0xf]  ;;  %v6684_v56 = vld [vmem:[%s8494_s1 + $0x1b8] sm:$0xff]  ;;  %v2373_v0 = vshrl.u32 %v6017_v54, 16 }
  0x1f   : > { %v6692_v57 = vld [vmem:[%s8494_s1 + $0x1f8] sm:$0xff]  ;;  %v720_v60 = vshrl.u32 %v668_v52, 16  ;;  %v723_v61 = vshll.u32 %v668_v52, 16  ;;  %v729_v62 = vshll.u32 %v669_v53, 16  ;;  %v733_v63 = vshrl.u32 %v669_v53, 16  ;;  %vm7174_vm4 = vmor %vm716_vm0, %vm717_vm1 }
  0x20   : > { %v6660_v58 = vld [vmem:[%s8494_s1 + $0x178] sm:$0xff]  ;;  %v2376_v1 = vshll.u32 %v6017_v54, 16  ;;  %v2382_v2 = vshll.u32 %v6018_v55, 16  ;;  %v2386_v3 = vshrl.u32 %v6018_v55, 16  ;;  %v670_v4 = vld [vmem:[%s7030_s17 + $0x8] sm:$0x1]  ;;  %vm7178_vm5 = vmor %vm1513_vm2, %vm1514_vm3 }
  0x21   : > { %6890 = vmatpush.bf16.msra.mxu1 %v6599_v5  ;;  %6891 = vmatpush.bf16.msra.mxu2 %v6599_v5  ;;  %v6700_v59 = vld [vmem:[%s8494_s1 + $0x238] sm:$0xff]  ;;  %v673_v53 = vld [vmem:[%s7030_s17 + $0x14] sm:$0x1] }
  0x22   : > { %6892 = vmatpush.bf16.msra.mxu3 %v6599_v5  ;;  %520 = vmatpush.bf16.msra.mxu0 %v6599_v5  ;;  %v722_v5 = vrot.slane %v720_v60, 4 }
  0x25   : > { %6893 = vmatpush.bf16.msra.mxu1 %v6598_v6  ;;  %6894 = vmatpush.bf16.msra.mxu2 %v6598_v6 }
  0x26   : > { %6895 = vmatpush.bf16.msra.mxu3 %v6598_v6  ;;  %521 = vmatpush.bf16.msra.mxu0 %v6598_v6  ;;  %v725_v6 = vrot.slane %v723_v61, 5 }
  0x29   : > { %6896 = vmatpush.bf16.msra.mxu1 %v6597_v7  ;;  %6897 = vmatpush.bf16.msra.mxu2 %v6597_v7 }
  0x2a   : > { %6898 = vmatpush.bf16.msra.mxu3 %v6597_v7  ;;  %522 = vmatpush.bf16.msra.mxu0 %v6597_v7  ;;  %v7157_v7 = vrot.slane %v729_v62, 5 }
  0x2c   : > { %543 = vmatmul.bf16.vlgmr.msra.gmra.mxu1 %v6585_v10  ;;  %563 = vmatmul.bf16.vlgmr.msra.gmra.mxu2 %v6589_v11  ;;  %v2375_v10 = vrot.slane %v2373_v0, 4  ;;  %v2378_v11 = vrot.slane %v2376_v1, 5 }
  0x2d   : > { %1789 = vmatpush.bf16.msrb.mxu2 %v6620_v8  ;;  %583 = vmatmul.bf16.vlgmr.msra.gmra.mxu3 %v6593_v12  ;;  %v735_v8 = vrot.slane %v733_v63, 4  ;;  %v7160_v12 = vrot.slane %v2382_v2, 5 }
  0x2e   : > { %2171 = vmatpush.bf16.msrb.mxu3 %v6644_v9  ;;  %523 = vmatmul.bf16.vlgmr.msra.gmra.mxu0 %v6581_v13  ;;  %v1418_v9 = vld [vmem:[%s7030_s17 + $0x4] sm:$0xf]  ;;  %v2388_v13 = vrot.slane %v2386_v3, 4 }
  0x2f   : > { %1264 = vmatpush.bf16.msrb.mxu1 %v6612_v14  ;;  %2917 = vmatpush.bf16.msrb.mxu0 %v6652_v15  ;;  %v6019_v14 = vld [vmem:[%s7030_s17 + $0x14] sm:$0x1]  ;;  %v739_v15 = vshll.u32 %v670_v4, 16 }
  0x31   : > { %1790 = vmatpush.bf16.msrb.mxu2 %v6619_v16  ;;  %v6588_v16 = vld [vmem:[%s7030_s17 + $0x54] sm:$0xff] }
  0x32   : > { %2172 = vmatpush.bf16.msrb.mxu3 %v6643_v17  ;;  %v726_v17 = vor.u32 %v725_v6, %v722_v5  ;;  %v763_v5 = vshll.u32 %v673_v53, 16 }
  0x33   : > { %1265 = vmatpush.bf16.msrb.mxu1 %v6611_v18  ;;  %2918 = vmatpush.bf16.msrb.mxu0 %v6651_v19  ;;  %v736_v18 = vor.u32 %v735_v8, %v7157_v7  ;;  %v1518_v19 = vrot.slane %v1418_v9, 5  ;;  %v1420_v9 = vld [vmem:[%s7030_s17 + $0xc] sm:$0xe] }
  0x35   : > { %1791 = vmatpush.bf16.msrb.mxu2 %v6618_v20  ;;  %v6592_v20 = vld [vmem:[%s7030_s17 + $0x84] sm:$0xff] }
  0x36   : > { %2173 = vmatpush.bf16.msrb.mxu3 %v6642_v21  ;;  %v1417_v21 = vld [vmem:[%s7030_s17] sm:$0xe] }
  0x37   : > { %1266 = vmatpush.bf16.msrb.mxu1 %v6610_v22  ;;  %2919 = vmatpush.bf16.msrb.mxu0 %v6650_v23  ;;  %v2379_v22 = vor.u32 %v2378_v11, %v2375_v10  ;;  %v2389_v23 = vor.u32 %v2388_v13, %v7160_v12 }
  0x39   : > { %1792 = vmatpush.bf16.msrb.mxu2 %v6617_v24  ;;  %v2392_v24 = vshll.u32 %v6019_v14, 16  ;;  %v1422_v14 = vld [vmem:[%s7030_s17 + $0x14] sm:$0x1] }
  0x3a   : > { %2174 = vmatpush.bf16.msrb.mxu3 %v6641_v25  ;;  %v6596_v25 = vld [vmem:[%s7030_s17 + $0xb4] sm:$0xff] }
  0x3b   : > { %1267 = vmatpush.bf16.msrb.mxu1 %v6609_v26  ;;  %2920 = vmatpush.bf16.msrb.mxu0 %v6649_v27  ;;  %v6584_v26 = vld [vmem:[%s7030_s17 + $0x24] sm:$0xff] }
  0x3c   : > { %548 = vmatmul.bf16.gmra.mxu1 %v6586_v30  ;;  %568 = vmatmul.bf16.gmra.mxu2 %v6590_v31  ;;  %v1419_v27 = vld [vmem:[%s7030_s17 + $0x8] sm:$0x1]  ;;  %v672_v30 = vld [vmem:[%s7030_s17 + $0x10] sm:$0xf] }
  0x3d   : > { %1793 = vmatpush.bf16.msrb.mxu2 %v6616_v28  ;;  %588 = vmatmul.bf16.gmra.mxu3 %v6594_v32  ;;  %v741_v28 = vrot.slane %v739_v15, 5  ;;  %v727_v32 = vrot.slane %v726_v17, 4  ;;  %v6022_v15 = vld [vmem:[%s7030_s17 + $0x20] sm:$0x1] }
  0x3e   : > { %2175 = vmatpush.bf16.msrb.mxu3 %v6640_v29  ;;  %528 = vmatmul.bf16.gmra.mxu0 %v6582_v33  ;;  %v671_v29 = vld [vmem:[%s7030_s17 + $0xc] sm:$0xf]  ;;  %v737_v33 = vrot.slane %v736_v18, 4 }
  0x3f   : > { %1268 = vmatpush.bf16.msrb.mxu1 %v6608_v34  ;;  %2921 = vmatpush.bf16.msrb.mxu0 %v6648_v35  ;;  %v5808_v34 = vrot.slane %v1417_v21, 9  ;;  %v1520_v35 = vrot.slane %v1518_v19, 4 }
  0x41   : > { %1794 = vmatpush.bf16.msrb.mxu2 %v6615_v36 }
  0x42   : > { %2176 = vmatpush.bf16.msrb.mxu3 %v6639_v37  ;;  %v1521_v37 = vrot.slane %v1419_v27, 5 }
  0x43   : > { %1269 = vmatpush.bf16.msrb.mxu1 %v6607_v38  ;;  %2922 = vmatpush.bf16.msrb.mxu0 %v6647_v39  ;;  %v2380_v38 = vrot.slane %v2379_v22, 4  ;;  %v2390_v39 = vrot.slane %v2389_v23, 4  ;;  %v5809_v23 = vrot.slane %v1420_v9, 9 }
  0x45   : > { %1795 = vmatpush.bf16.msrb.mxu2 %v6614_v40  ;;  %v2394_v40 = vrot.slane %v2392_v24, 5 }
  0x46   : > { %2177 = vmatpush.bf16.msrb.mxu3 %v6638_v41  ;;  %v744_v41 = vshrl.u32 %v671_v29, 16 }
  0x47   : > { %1270 = vmatpush.bf16.msrb.mxu1 %v6606_v42  ;;  %2923 = vmatpush.bf16.msrb.mxu0 %v6646_v43  ;;  %v747_v42 = vshll.u32 %v671_v29, 16  ;;  %v753_v43 = vshll.u32 %v672_v30, 16  ;;  %v2395_v52 = vsel %vm7174_vm4, %v2390_v39, %v2394_v40  ;;  %v674_v29 = vld [vmem:[%s7030_s17 + $0x18] sm:$0xf]  ;;  %v6691_v39 = vld [vmem:[%s8494_s1 + $0x1f0] sm:$0xff] }
  0x48   : > { %v746_v54 = vrot.slane %v744_v41, 4  ;;  %v2806_v4 = vunpack.c.l.b16 %v2395_v52  ;;  %v6659_v40 = vld [vmem:[%s8494_s1 + $0x170] sm:$0xff] }
  0x49   : > { %1796 = vmatpush.bf16.msrb.mxu2 %v6613_v44  ;;  %v757_v44 = vshrl.u32 %v672_v30, 16  ;;  %v749_v55 = vrot.slane %v747_v42, 5  ;;  %v675_v30 = vld [vmem:[%s7030_s17 + $0x1c] sm:$0xf] }
  0x4a   : > { %2178 = vmatpush.bf16.msrb.mxu3 %v6637_v45  ;;  %v732_v45 = vsel %vm7174_vm4, %v727_v32, %v7157_v7  ;;  %v6023_v32 = vld [vmem:[%s7030_s17 + $0x24] sm:$0xf] }
  0x4b   : > { %1271 = vmatpush.bf16.msrb.mxu1 %v6605_v46  ;;  %2924 = vmatpush.bf16.msrb.mxu0 %v6645_v47  ;;  %v1519_v46 = vsel %vm7178_vm5, %v5808_v34, %v1518_v19  ;;  %v6020_v47 = vld [vmem:[%s7030_s17 + $0x18] sm:$0xf]  ;;  %v1152_v63 = vunpack.c.l.b16 %v732_v45  ;;  %v750_v6 = vor.u32 %v749_v55, %v746_v54  ;;  %v765_v19 = vrot.slane %v763_v5, 5  ;;  %v6699_v45 = vld [vmem:[%s8494_s1 + $0x230] sm:$0xff] }
  0x4c   : > { %553 = vmatmul.bf16.gmra.mxu1 %v6587_v48  ;;  %573 = vmatmul.bf16.gmra.mxu2 %v6591_v49  ;;  %v6021_v48 = vld [vmem:[%s7030_s17 + $0x1c] sm:$0xf]  ;;  %v742_v49 = vsel %vm7174_vm4, %v737_v33, %v741_v28  ;;  %v2400_v60 = vshll.u32 %v6020_v47, 16  ;;  %v1677_v1 = vunpack.c.l.b16 %v1519_v46  ;;  %v2416_v28 = vshll.u32 %v6022_v15, 16  ;;  %v6024_v33 = vld [vmem:[%s7030_s17 + $0x28] sm:$0xf] }
  0x4d   : > { %593 = vmatmul.bf16.gmra.mxu3 %v6595_v50  ;;  %3821 = vmatpush.bf16.msra.mxu2 %v6684_v56  ;;  %v1522_v50 = vsel %vm7178_vm5, %v1520_v35, %v1521_v37  ;;  %v7199_v56 = vrot.slane %v753_v43, 5  ;;  %v2406_v61 = vshll.u32 %v6021_v48, 16  ;;  %v2410_v62 = vshrl.u32 %v6021_v48, 16  ;;  %v1423_v15 = vld [vmem:[%s7030_s17 + $0x18] sm:$0xe] }
  0x4e   : > { %533 = vmatmul.bf16.gmra.mxu0 %v6583_v51  ;;  %4567 = vmatpush.bf16.msra.mxu3 %v6692_v57  ;;  %v2385_v51 = vsel %vm7174_vm4, %v2380_v38, %v7160_v12  ;;  %v759_v57 = vrot.slane %v757_v44, 4  ;;  %v1153_v0 = vunpack.c.l.b16 %v742_v49  ;;  %v1678_v2 = vunpack.c.l.b16 %v1522_v50  ;;  %v6683_v38 = vld [vmem:[%s8494_s1 + $0x1b0] sm:$0xff] }
  0x4f   : > { %3439 = vmatpush.bf16.msra.mxu1 %v6660_v58  ;;  %5089 = vmatpush.bf16.msra.mxu0 %v6700_v59  ;;  %v1421_v58 = vld [vmem:[%s7030_s17 + $0x10] sm:$0xf]  ;;  %v2397_v59 = vshrl.u32 %v6020_v47, 16  ;;  %v2805_v3 = vunpack.c.l.b16 %v2385_v51  ;;  %v2402_v11 = vrot.slane %v2400_v60, 5  ;;  %v7204_v12 = vrot.slane %v2406_v61, 5 }
  0x50   : > { %v760_v7 = vor.u32 %v759_v57, %v7199_v56  ;;  %v1525_v8 = vrot.slane %v1421_v58, 5  ;;  %v2412_v13 = vrot.slane %v2410_v62, 4  ;;  %v1709_v17 = vpack.c.b16 %v1678_v2, %v1677_v1  ;;  %v676_v60 = vld [vmem:[%s7030_s17 + $0x20] sm:$0x1]  ;;  %v1424_v1 = vld [vmem:[%s7030_s17 + $0x1c] sm:$0xf] }
  0x51   : > { %v2399_v10 = vrot.slane %v2397_v59, 4  ;;  %v2837_v18 = vpack.c.b16 %v2806_v4, %v2805_v3  ;;  %v751_v21 = vrot.slane %v750_v6, 4  ;;  %v2418_v44 = vrot.slane %v2416_v28, 5  ;;  %3822 = vmatpush.bf16.msra.mxu2 %v6683_v38 }
  0x52   : > { %v761_v22 = vrot.slane %v760_v7, 4  ;;  %v1527_v24 = vrot.slane %v1525_v8, 4  ;;  %v2413_v27 = vor.u32 %v2412_v13, %v7204_v12  ;;  %v1526_v37 = vsel %vm7178_vm5, %v5809_v23, %v1525_v8  ;;  %4568 = vmatpush.bf16.msra.mxu3 %v6691_v39  ;;  %v6025_v8 = vld [vmem:[%s7030_s17 + $0x2c] sm:$0x1]  ;;  %v677_v23 = vld [vmem:[%s7030_s17 + $0x24] sm:$0xf] }
  0x53   : > { %v756_v34 = vsel %vm7174_vm4, %v751_v21, %v7199_v56  ;;  %v768_v46 = vshrl.u32 %v674_v29, 16  ;;  %v771_v47 = vshll.u32 %v674_v29, 16  ;;  %v777_v48 = vshll.u32 %v675_v30, 16  ;;  %3440 = vmatpush.bf16.msra.mxu1 %v6659_v40  ;;  %5090 = vmatpush.bf16.msra.mxu0 %v6699_v45  ;;  %v1425_v21 = vld [vmem:[%s7030_s17 + $0x20] sm:$0x1] }
  0x54   : > { %v766_v35 = vsel %vm7174_vm4, %v761_v22, %v765_v19  ;;  %v2414_v43 = vrot.slane %v2413_v27, 4  ;;  %v781_v49 = vshrl.u32 %v675_v30, 16  ;;  %v2421_v50 = vshrl.u32 %v6023_v32, 16  ;;  %v6622_v19 = vld [vmem:[%s7030_s17 + $0x18] sm:$0xff] }
  0x55   : > { %v2424_v51 = vshll.u32 %v6023_v32, 16  ;;  %v2430_v52 = vshll.u32 %v6024_v33, 16  ;;  %v2434_v53 = vshrl.u32 %v6024_v33, 16  ;;  %v1154_v54 = vunpack.c.l.b16 %v756_v34 }
  0x56   : > { %v1155_v55 = vunpack.c.l.b16 %v766_v35  ;;  %v1679_v56 = vunpack.c.l.b16 %v1526_v37  ;;  %v2419_v59 = vsel %vm7174_vm4, %v2414_v43, %v2418_v44  ;;  %v770_v61 = vrot.slane %v768_v46, 4 }
  0x57   : > { %v773_v62 = vrot.slane %v771_v47, 5  ;;  %v2423_v2 = vrot.slane %v2421_v50, 4  ;;  %v2426_v3 = vrot.slane %v2424_v51, 5  ;;  %v2432_v4 = vrot.slane %v2430_v52, 5  ;;  %v679_v51 = vld [vmem:[%s7030_s17 + $0x2c] sm:$0x1] }
  0x58   : > { %v2436_v5 = vrot.slane %v2434_v53, 4  ;;  %v2808_v7 = vunpack.c.l.b16 %v2419_v59  ;;  %v787_v9 = vshll.u32 %v676_v60, 16  ;;  %v1532_v13 = vrot.slane %v1424_v1, 5  ;;  %v1427_v1 = vld [vmem:[%s7030_s17 + $0x28] sm:$0xf] }
  0x59   : > { %v5810_v27 = vrot.slane %v1423_v15, 9  ;;  %v1535_v29 = vrot.slane %v1425_v21, 5  ;;  %v792_v34 = vshrl.u32 %v677_v23, 16  ;;  %v795_v35 = vshll.u32 %v677_v23, 16  ;;  %v680_v21 = vld [vmem:[%s7030_s17 + $0x30] sm:$0xf] }
  0x5a   : > { %v789_v22 = vrot.slane %v787_v9, 5  ;;  %v1534_v28 = vrot.slane %v1532_v13, 4  ;;  %v6623_v9 = vld [vmem:[%s7030_s17 + $0x24] sm:$0xff] }
  0x5b   : > { %v1533_v43 = vsel %vm7178_vm5, %v5810_v27, %v1532_v13  ;;  %v794_v47 = vrot.slane %v792_v34, 4  ;;  %v1426_v13 = vld [vmem:[%s7030_s17 + $0x24] sm:$0xe]  ;;  %v6029_v27 = vld [vmem:[%s7030_s17 + $0x3c] sm:$0xf]  ;;  %v816_v34 = vshrl.u32 %v680_v21, 16 }
  0x5c   : > { %558 = vmatmul.bf16.gmra.mxu1 %v6588_v16  ;;  %578 = vmatmul.bf16.gmra.mxu2 %v6592_v20  ;;  %v1184_v16 = vpack.c.b16 %v1153_v0, %v1152_v63  ;;  %v6621_v20 = vld [vmem:[%s7030_s17 + $0xc] sm:$0xff]  ;;  %v779_v63 = vrot.slane %v777_v48, 5  ;;  %v783_v0 = vrot.slane %v781_v49, 4  ;;  %v1536_v44 = vsel %vm7178_vm5, %v1534_v28, %v1535_v29 }
  0x5d   : > { %598 = vmatmul.bf16.gmra.mxu3 %v6596_v25  ;;  %v1528_v25 = vrot.slane %v1422_v14, 5  ;;  %v797_v48 = vrot.slane %v795_v35, 5  ;;  %v1682_v59 = vunpack.c.l.b16 %v1536_v44  ;;  %v6690_v28 = vld [vmem:[%s8494_s1 + $0x1e8] sm:$0xff]  ;;  %v819_v35 = vshll.u32 %v680_v21, 16 }
  0x5e   : > { %538 = vmatmul.bf16.gmra.mxu0 %v6584_v26  ;;  %v2403_v26 = vor.u32 %v2402_v11, %v2399_v10  ;;  %v1185_v10 = vpack.c.b16 %v1155_v55, %v1154_v54  ;;  %v774_v11 = vor.u32 %v773_v62, %v770_v61  ;;  %4569 = vmatpush.bf16.msra.mxu3 %v6690_v28 }
  0x5f   : > { %v1529_v41 = vsel %vm7178_vm5, %v1527_v24, %v1528_v25  ;;  %v678_v24 = vld [vmem:[%s7030_s17 + $0x28] sm:$0xf]  ;;  %v798_v62 = vor.u32 %v797_v48, %v794_v47 }
  0x60   : > { %v2404_v42 = vrot.slane %v2403_v26, 4  ;;  %v1680_v57 = vunpack.c.l.b16 %v1529_v41  ;;  %v775_v25 = vrot.slane %v774_v11, 4  ;;  %v801_v37 = vshll.u32 %v678_v24, 16  ;;  %v6026_v41 = vld [vmem:[%s7030_s17 + $0x30] sm:$0xf] }
  0x61   : > { %v805_v38 = vshrl.u32 %v678_v24, 16  ;;  %v2445_v52 = vshrl.u32 %v6026_v41, 16  ;;  %v2448_v53 = vshll.u32 %v6026_v41, 16  ;;  %v799_v11 = vrot.slane %v798_v62, 4 }
  0x62   : > { %v2409_v58 = vsel %vm7174_vm4, %v2404_v42, %v7204_v12  ;;  %v784_v12 = vor.u32 %v783_v0, %v779_v63  ;;  %v1710_v14 = vpack.c.b16 %v1680_v57, %v1679_v56  ;;  %v780_v39 = vsel %vm7174_vm4, %v775_v25, %v779_v63  ;;  %v6027_v42 = vld [vmem:[%s7030_s17 + $0x34] sm:$0xf] }
  0x63   : > { %v2807_v6 = vunpack.c.l.b16 %v2409_v58  ;;  %v803_v49 = vrot.slane %v801_v37, 5  ;;  %v807_v50 = vrot.slane %v805_v38, 4  ;;  %v2454_v54 = vshll.u32 %v6027_v42, 16 }
  0x64   : > { %v785_v26 = vrot.slane %v784_v12, 4  ;;  %v2458_v55 = vshrl.u32 %v6027_v42, 16  ;;  %v1156_v56 = vunpack.c.l.b16 %v780_v39  ;;  %v1681_v58 = vunpack.c.l.b16 %v1533_v43  ;;  %v6030_v39 = vld [vmem:[%s7030_s17 + $0x40] sm:$0xf]  ;;  %v6658_v42 = vld [vmem:[%s8494_s1 + $0x168] sm:$0xff] }
  0x65   : > { %v808_v63 = vor.u32 %v807_v50, %v803_v49  ;;  %v811_v0 = vshll.u32 %v679_v51, 16  ;;  %v804_v23 = vsel %vm7174_vm4, %v799_v11, %v803_v49  ;;  %v2472_v41 = vshll.u32 %v6029_v27, 16  ;;  %3441 = vmatpush.bf16.msra.mxu1 %v6658_v42  ;;  %v6698_v51 = vld [vmem:[%s8494_s1 + $0x228] sm:$0xff] }
  0x66   : > { %v790_v40 = vsel %vm7174_vm4, %v785_v26, %v789_v22  ;;  %v681_v22 = vld [vmem:[%s7030_s17 + $0x34] sm:$0xf]  ;;  %v6682_v26 = vld [vmem:[%s8494_s1 + $0x1a8] sm:$0xff]  ;;  %v1158_v43 = vunpack.c.l.b16 %v804_v23  ;;  %v2478_v49 = vshll.u32 %v6030_v39, 16  ;;  %v2482_v50 = vshrl.u32 %v6030_v39, 16  ;;  %5091 = vmatpush.bf16.msra.mxu0 %v6698_v51 }
  0x67   : > { %v1157_v57 = vunpack.c.l.b16 %v790_v40  ;;  %v813_v12 = vrot.slane %v811_v0, 5  ;;  %v809_v15 = vrot.slane %v808_v63, 4  ;;  %v825_v37 = vshll.u32 %v681_v22, 16  ;;  %3823 = vmatpush.bf16.msra.mxu2 %v6682_v26  ;;  %v1430_v63 = vld [vmem:[%s7030_s17 + $0x34] sm:$0xf] }
  0x68   : > { %v829_v38 = vshrl.u32 %v681_v22, 16  ;;  %v2469_v40 = vshrl.u32 %v6029_v27, 16  ;;  %v2480_v0 = vrot.slane %v2478_v49, 5 }
  0x69   : > { %v814_v29 = vsel %vm7174_vm4, %v809_v15, %v813_v12  ;;  %v1429_v12 = vld [vmem:[%s7030_s17 + $0x30] sm:$0xe] }
  0x6a   : > { %v1159_v44 = vunpack.c.l.b16 %v814_v29  ;;  %v6032_v29 = vld [vmem:[%s7030_s17 + $0x48] sm:$0xf] }
  0x6b   : > { %v2493_v42 = vshrl.u32 %v6032_v29, 16 }
  0x6c   : > { %1272 = vmatmul.bf16.vlgmr.msrb.gmra.mxu1 %v1184_v16  ;;  %1797 = vmatmul.bf16.vlgmr.msrb.gmra.mxu2 %v1709_v17  ;;  %v2427_v16 = vor.u32 %v2426_v3, %v2423_v2  ;;  %v2437_v17 = vor.u32 %v2436_v5, %v2432_v4  ;;  %v2447_v2 = vrot.slane %v2445_v52, 4  ;;  %v2450_v3 = vrot.slane %v2448_v53, 5 }
  0x6d   : > { %2179 = vmatmul.bf16.vlgmr.msrb.gmra.mxu3 %v6621_v20  ;;  %v2838_v20 = vpack.c.b16 %v2808_v7, %v2807_v6  ;;  %v2460_v5 = vrot.slane %v2458_v55, 4  ;;  %v6028_v6 = vld [vmem:[%s7030_s17 + $0x38] sm:$0x1]  ;;  %v1186_v7 = vpack.c.b16 %v1157_v57, %v1156_v56  ;;  %v818_v52 = vrot.slane %v816_v34, 4  ;;  %v6033_v34 = vld [vmem:[%s7030_s17 + $0x4c] sm:$0xf] }
  0x6e   : > { %2925 = vmatmul.bf16.vlgmr.msrb.gmra.mxu0 %v2837_v18  ;;  %v2440_v18 = vshll.u32 %v6025_v8, 16  ;;  %v2428_v30 = vrot.slane %v2427_v16, 4  ;;  %v2438_v32 = vrot.slane %v2437_v17, 4  ;;  %v1711_v8 = vpack.c.b16 %v1682_v59, %v1681_v58  ;;  %v1428_v16 = vld [vmem:[%s7030_s17 + $0x2c] sm:$0x1] }
  0x6f   : > { %v2451_v17 = vor.u32 %v2450_v3, %v2447_v2  ;;  %v1542_v25 = vrot.slane %v1428_v16, 5  ;;  %v821_v53 = vrot.slane %v819_v35, 5  ;;  %v831_v55 = vrot.slane %v829_v38, 4  ;;  %v682_v58 = vld [vmem:[%s7030_s17 + $0x38] sm:$0x1] }
  0x70   : > { %v2442_v33 = vrot.slane %v2440_v18, 5  ;;  %v2433_v45 = vsel %vm7174_vm4, %v2428_v30, %v2432_v4  ;;  %v7264_v4 = vrot.slane %v2454_v54, 5  ;;  %v827_v54 = vrot.slane %v825_v37, 5  ;;  %v683_v16 = vld [vmem:[%s7030_s17 + $0x3c] sm:$0xf] }
  0x71   : > { %v2809_v60 = vunpack.c.l.b16 %v2433_v45  ;;  %v2452_v30 = vrot.slane %v2451_v17, 4  ;;  %v2471_v59 = vrot.slane %v2469_v40, 4  ;;  %v822_v2 = vor.u32 %v821_v53, %v818_v52 }
  0x72   : > { %v2443_v46 = vsel %vm7174_vm4, %v2438_v32, %v2442_v33  ;;  %v2461_v18 = vor.u32 %v2460_v5, %v7264_v4  ;;  %v832_v3 = vor.u32 %v831_v55, %v827_v54  ;;  %v6031_v5 = vld [vmem:[%s7030_s17 + $0x44] sm:$0x1]  ;;  %v843_v26 = vshll.u32 %v683_v16, 16  ;;  %v1433_v55 = vld [vmem:[%s7030_s17 + $0x40] sm:$0xf] }
  0x73   : > { %v2810_v61 = vunpack.c.l.b16 %v2443_v46  ;;  %v2457_v47 = vsel %vm7174_vm4, %v2452_v30, %v7264_v4  ;;  %v835_v4 = vshll.u32 %v682_v58, 16  ;;  %v2488_v15 = vshll.u32 %v6031_v5, 16  ;;  %v1434_v5 = vld [vmem:[%s7030_s17 + $0x44] sm:$0x1] }
  0x74   : > { %v2462_v32 = vrot.slane %v2461_v18, 4  ;;  %v823_v17 = vrot.slane %v822_v2, 4  ;;  %v833_v18 = vrot.slane %v832_v3, 4  ;;  %v2495_v58 = vrot.slane %v2493_v42, 4  ;;  %v6034_v2 = vld [vmem:[%s7030_s17 + $0x50] sm:$0x1] }
  0x75   : > { %v2490_v28 = vrot.slane %v2488_v15, 5 }
  0x76   : > { %v828_v30 = vsel %vm7174_vm4, %v823_v17, %v827_v54  ;;  %v685_v54 = vld [vmem:[%s7030_s17 + $0x44] sm:$0x1] }
  0x7c   : > { %1277 = vmatmul.bf16.gmra.mxu1 %v1185_v10  ;;  %1802 = vmatmul.bf16.gmra.mxu2 %v1710_v14  ;;  %v2839_v10 = vpack.c.b16 %v2810_v61, %v2809_v60  ;;  %v1539_v14 = vrot.slane %v1427_v1, 5  ;;  %v2474_v60 = vrot.slane %v2472_v41, 5  ;;  %v2811_v61 = vunpack.c.l.b16 %v2457_v47 }
  0x7d   : > { %2184 = vmatmul.bf16.gmra.mxu3 %v6622_v19  ;;  %v2464_v19 = vshll.u32 %v6028_v6, 16  ;;  %v2484_v1 = vrot.slane %v2482_v50, 4  ;;  %v1187_v6 = vpack.c.b16 %v1159_v44, %v1158_v43  ;;  %v845_v41 = vrot.slane %v843_v26, 5  ;;  %v6036_v26 = vld [vmem:[%s7030_s17 + $0x58] sm:$0xf] }
  0x7e   : > { %2930 = vmatmul.bf16.gmra.mxu0 %v2838_v20  ;;  %v5811_v20 = vrot.slane %v1426_v13, 9  ;;  %v1541_v24 = vrot.slane %v1539_v14, 4  ;;  %v1431_v13 = vld [vmem:[%s7030_s17 + $0x38] sm:$0x1]  ;;  %v2496_v43 = vshll.u32 %v6032_v29, 16  ;;  %v1160_v47 = vunpack.c.l.b16 %v828_v30 }
  0x7f   : > { %v2466_v33 = vrot.slane %v2464_v19, 5  ;;  %v837_v19 = vrot.slane %v835_v4, 5  ;;  %v1549_v22 = vrot.slane %v1431_v13, 5  ;;  %v2526_v42 = vshll.u32 %v6036_v26, 16 }
  0x80   : > { %v1540_v45 = vsel %vm7178_vm5, %v5811_v20, %v1539_v14  ;;  %v1543_v46 = vsel %vm7178_vm5, %v1541_v24, %v1542_v25  ;;  %v2485_v14 = vor.u32 %v2484_v1, %v2480_v0  ;;  %v5812_v20 = vrot.slane %v1429_v12, 9  ;;  %v684_v24 = vld [vmem:[%s7030_s17 + $0x40] sm:$0xf] }
  0x81   : > { %v2467_v48 = vsel %vm7174_vm4, %v2462_v32, %v2466_v33  ;;  %v1683_v56 = vunpack.c.l.b16 %v1540_v45  ;;  %v1684_v57 = vunpack.c.l.b16 %v1543_v46  ;;  %v840_v25 = vshrl.u32 %v683_v16, 16 }
  0x82   : > { %v2812_v62 = vunpack.c.l.b16 %v2467_v48  ;;  %v2486_v27 = vrot.slane %v2485_v14, 4  ;;  %v849_v32 = vshll.u32 %v684_v24, 16  ;;  %v853_v33 = vshrl.u32 %v684_v24, 16 }
  0x83   : > { %v838_v35 = vsel %vm7174_vm4, %v833_v18, %v837_v19  ;;  %v842_v40 = vrot.slane %v840_v25, 4  ;;  %v2502_v45 = vshll.u32 %v6033_v34, 16  ;;  %v2506_v46 = vshrl.u32 %v6033_v34, 16  ;;  %v686_v19 = vld [vmem:[%s7030_s17 + $0x48] sm:$0xf]  ;;  %v6681_v25 = vld [vmem:[%s8494_s1 + $0x1a0] sm:$0xff] }
  0x84   : > { %v2840_v11 = vpack.c.b16 %v2812_v62, %v2811_v61  ;;  %v2491_v44 = vsel %vm7174_vm4, %v2486_v27, %v2490_v28  ;;  %v7322_v48 = vrot.slane %v849_v32, 5  ;;  %v855_v49 = vrot.slane %v853_v33, 4  ;;  %v6689_v27 = vld [vmem:[%s8494_s1 + $0x1e0] sm:$0xff]  ;;  %3824 = vmatpush.bf16.msra.mxu2 %v6681_v25 }
  0x85   : > { %v1161_v50 = vunpack.c.l.b16 %v838_v35  ;;  %v7327_v61 = vrot.slane %v2502_v45, 5  ;;  %v2508_v62 = vrot.slane %v2506_v46, 4  ;;  %v1553_v1 = vrot.slane %v1433_v55, 5  ;;  %4570 = vmatpush.bf16.msra.mxu3 %v6689_v27 }
  0x86   : > { %v2512_v14 = vshll.u32 %v6034_v2, 16  ;;  %v1556_v18 = vrot.slane %v1434_v5, 5  ;;  %v864_v30 = vshrl.u32 %v686_v19, 16  ;;  %v867_v32 = vshll.u32 %v686_v19, 16  ;;  %v6037_v2 = vld [vmem:[%s7030_s17 + $0x5c] sm:$0x1] }
  0x87   : > { %v1188_v3 = vpack.c.b16 %v1161_v50, %v1160_v47  ;;  %v2509_v13 = vor.u32 %v2508_v62, %v7327_v61  ;;  %v1555_v17 = vrot.slane %v1553_v1, 4  ;;  %v7380_v62 = vrot.slane %v2526_v42, 5  ;;  %v6626_v19 = vld [vmem:[%s7030_s17 + $0x48] sm:$0xff] }
  0x88   : > { %v2514_v29 = vrot.slane %v2512_v14, 5  ;;  %v1437_v14 = vld [vmem:[%s7030_s17 + $0x50] sm:$0x1] }
  0x89   : > { %v2510_v28 = vrot.slane %v2509_v13, 4  ;;  %v1557_v35 = vsel %vm7178_vm5, %v1555_v17, %v1556_v18  ;;  %v2536_v17 = vshll.u32 %v6037_v2, 16  ;;  %v1563_v27 = vrot.slane %v1437_v14, 5 }
  0x8a   : > { %v1688_v55 = vunpack.c.l.b16 %v1557_v35 }
  0x8b   : > { %v2515_v50 = vsel %vm7174_vm4, %v2510_v28, %v2514_v29 }
  0x8c   : > { %1282 = vmatmul.bf16.gmra.mxu1 %v1186_v7  ;;  %1807 = vmatmul.bf16.gmra.mxu2 %v1711_v8  ;;  %v1712_v7 = vpack.c.b16 %v1684_v57, %v1683_v56  ;;  %v1546_v8 = vrot.slane %v1430_v63, 5  ;;  %v2814_v56 = vunpack.c.l.b16 %v2491_v44  ;;  %v846_v57 = vor.u32 %v845_v41, %v842_v40  ;;  %v6657_v44 = vld [vmem:[%s8494_s1 + $0x160] sm:$0xff] }
  0x8d   : > { %2189 = vmatmul.bf16.gmra.mxu3 %v6623_v9  ;;  %v2475_v9 = vor.u32 %v2474_v60, %v2471_v59  ;;  %v2498_v59 = vrot.slane %v2496_v43, 5  ;;  %v1432_v60 = vld [vmem:[%s7030_s17 + $0x3c] sm:$0xe]  ;;  %v856_v63 = vor.u32 %v855_v49, %v7322_v48  ;;  %v2530_v43 = vshrl.u32 %v6036_v26, 16  ;;  %3442 = vmatpush.bf16.msra.mxu1 %v6657_v44 }
  0x8e   : > { %2935 = vmatmul.bf16.gmra.mxu0 %v2839_v10  ;;  %v6624_v10 = vld [vmem:[%s7030_s17 + $0x30] sm:$0xff]  ;;  %v1548_v21 = vrot.slane %v1546_v8, 4  ;;  %v1547_v37 = vsel %vm7178_vm5, %v5812_v20, %v1546_v8  ;;  %v687_v20 = vld [vmem:[%s7030_s17 + $0x4c] sm:$0xf] }
  0x8f   : > { %v2476_v23 = vrot.slane %v2475_v9, 4  ;;  %v1685_v51 = vunpack.c.l.b16 %v1547_v37  ;;  %v847_v9 = vrot.slane %v846_v57, 4  ;;  %v857_v15 = vrot.slane %v856_v63, 4 }
  0x90   : > { %v1550_v38 = vsel %vm7178_vm5, %v1548_v21, %v1549_v22  ;;  %v6035_v21 = vld [vmem:[%s7030_s17 + $0x54] sm:$0xf]  ;;  %v873_v37 = vshll.u32 %v687_v20, 16  ;;  %v2532_v63 = vrot.slane %v2530_v43, 4 }
  0x91   : > { %v2481_v39 = vsel %vm7174_vm4, %v2476_v23, %v2480_v0  ;;  %v1686_v52 = vunpack.c.l.b16 %v1550_v38  ;;  %v859_v0 = vshll.u32 %v685_v54, 16  ;;  %v852_v22 = vsel %vm7174_vm4, %v847_v9, %v7322_v48  ;;  %v1435_v9 = vld [vmem:[%s7030_s17 + $0x48] sm:$0xe] }
  0x92   : > { %v2813_v53 = vunpack.c.l.b16 %v2481_v39  ;;  %v877_v38 = vshrl.u32 %v687_v20, 16  ;;  %v2517_v40 = vshrl.u32 %v6035_v21, 16  ;;  %v2520_v41 = vshll.u32 %v6035_v21, 16 }
  0x93   : > { %v1713_v4 = vpack.c.b16 %v1686_v52, %v1685_v51  ;;  %v861_v16 = vrot.slane %v859_v0, 5  ;;  %v1162_v46 = vunpack.c.l.b16 %v852_v22  ;;  %v866_v51 = vrot.slane %v864_v30, 4 }
  0x94   : > { %v2841_v8 = vpack.c.b16 %v2814_v56, %v2813_v53  ;;  %v869_v52 = vrot.slane %v867_v32, 5  ;;  %v6697_v53 = vld [vmem:[%s8494_s1 + $0x220] sm:$0xff]  ;;  %v688_v56 = vld [vmem:[%s7030_s17 + $0x50] sm:$0x1]  ;;  %v7377_v57 = vrot.slane %v873_v37, 5  ;;  %v2538_v30 = vrot.slane %v2536_v17, 5 }
  0x95   : > { %v862_v34 = vsel %vm7174_vm4, %v857_v15, %v861_v16  ;;  %5092 = vmatpush.bf16.msra.mxu0 %v6697_v53  ;;  %v2533_v16 = vor.u32 %v2532_v63, %v7380_v62  ;;  %v689_v32 = vld [vmem:[%s7030_s17 + $0x54] sm:$0xf] }
  0x96   : > { %v1163_v54 = vunpack.c.l.b16 %v862_v34  ;;  %v690_v34 = vld [vmem:[%s7030_s17 + $0x58] sm:$0xf]  ;;  %v888_v44 = vshrl.u32 %v689_v32, 16 }
  0x97   : > { %v2534_v29 = vrot.slane %v2533_v16, 4 }
  0x98   : > { %v1189_v5 = vpack.c.b16 %v1163_v54, %v1162_v46  ;;  %v891_v46 = vshll.u32 %v689_v32, 16  ;;  %v890_v63 = vrot.slane %v888_v44, 4  ;;  %v1440_v32 = vld [vmem:[%s7030_s17 + $0x5c] sm:$0x1] }
  0x9c   : > { %1287 = vmatmul.bf16.gmra.mxu1 %v1187_v6  ;;  %1812 = vmatmul.bf16.gmra.mxu2 %v1712_v7  ;;  %v6625_v7 = vld [vmem:[%s7030_s17 + $0x3c] sm:$0xff] }
  0x9d   : > { %2194 = vmatmul.bf16.gmra.mxu3 %v6624_v10  ;;  %v5813_v10 = vrot.slane %v1432_v60, 9  ;;  %v2519_v60 = vrot.slane %v2517_v40, 4  ;;  %v6039_v40 = vld [vmem:[%s7030_s17 + $0x64] sm:$0xf] }
  0x9e   : > { %2940 = vmatmul.bf16.gmra.mxu0 %v2840_v11  ;;  %v2499_v11 = vor.u32 %v2498_v59, %v2495_v58  ;;  %v879_v58 = vrot.slane %v877_v38, 4  ;;  %v1436_v59 = vld [vmem:[%s7030_s17 + $0x4c] sm:$0xf]  ;;  %v6038_v38 = vld [vmem:[%s7030_s17 + $0x60] sm:$0xf] }
  0x9f   : > { %v1554_v23 = vsel %vm7178_vm5, %v5813_v10, %v1553_v1  ;;  %v2816_v1 = vunpack.c.l.b16 %v2515_v50  ;;  %v1560_v10 = vrot.slane %v1436_v59, 5  ;;  %v2539_v50 = vsel %vm7174_vm4, %v2534_v29, %v2538_v30  ;;  %v6627_v29 = vld [vmem:[%s7030_s17 + $0x54] sm:$0xff] }
  0xa0   : > { %v2500_v24 = vrot.slane %v2499_v11, 4  ;;  %v1687_v47 = vunpack.c.l.b16 %v1554_v23  ;;  %v5814_v23 = vrot.slane %v1435_v9, 9  ;;  %v2541_v54 = vshrl.u32 %v6038_v38, 16  ;;  %v6040_v9 = vld [vmem:[%s7030_s17 + $0x68] sm:$0x1] }
  0xa1   : > { %v1562_v26 = vrot.slane %v1560_v10, 4  ;;  %v2818_v2 = vunpack.c.l.b16 %v2539_v50 }
  0xa2   : > { %v2505_v49 = vsel %vm7174_vm4, %v2500_v24, %v7327_v61  ;;  %v2522_v61 = vrot.slane %v2520_v41, 5  ;;  %v1714_v13 = vpack.c.b16 %v1688_v55, %v1687_v47  ;;  %v1561_v37 = vsel %vm7178_vm5, %v5814_v23, %v1560_v10 }
  0xa3   : > { %v2815_v0 = vunpack.c.l.b16 %v2505_v49  ;;  %v1564_v43 = vsel %vm7178_vm5, %v1562_v26, %v1563_v27  ;;  %v2544_v55 = vshll.u32 %v6038_v38, 16  ;;  %v2543_v10 = vrot.slane %v2541_v54, 4  ;;  %v692_v38 = vld [vmem:[%s7030_s17 + $0x60] sm:$0xf] }
  0xa4   : > { %v2523_v15 = vor.u32 %v2522_v61, %v2519_v60  ;;  %v1689_v60 = vunpack.c.l.b16 %v1561_v37  ;;  %v2560_v27 = vshll.u32 %v6040_v9, 16 }
  0xa5   : > { %v2842_v20 = vpack.c.b16 %v2816_v1, %v2815_v0  ;;  %v893_v0 = vrot.slane %v891_v46, 5 }
  0xa6   : > { %v2524_v28 = vrot.slane %v2523_v15, 4  ;;  %v2562_v50 = vrot.slane %v2560_v27, 5 }
  0xa8   : > { %v2529_v49 = vsel %vm7174_vm4, %v2524_v28, %v7380_v62  ;;  %v1690_v62 = vunpack.c.l.b16 %v1564_v43 }
  0xa9   : > { %v7332_v6 = vpop.f32.mrf.mxu1  ;;  %v2817_v1 = vunpack.c.l.b16 %v2529_v49  ;;  %v1570_v49 = vrot.slane %v1440_v32, 5 }
  0xaa   : > { %v1715_v23 = vpack.c.b16 %v1690_v62, %v1689_v60 }
  0xab   : > { %v7335_v12 = vpop.f32.mrf.mxu0  ;;  %v2843_v30 = vpack.c.b16 %v2818_v2, %v2817_v1 }
  0xac   : > { %1292 = vmatmul.bf16.gmra.mxu1 %v1188_v3  ;;  %1817 = vmatmul.bf16.gmra.mxu2 %v1713_v4  ;;  %v870_v3 = vor.u32 %v869_v52, %v866_v51  ;;  %v897_v51 = vshll.u32 %v690_v34, 16  ;;  %v901_v52 = vshrl.u32 %v690_v34, 16 }
  0xad   : > { %2199 = vmatmul.bf16.gmra.mxu3 %v6625_v7  ;;  %v880_v7 = vor.u32 %v879_v58, %v7377_v57 }
  0xae   : > { %2945 = vmatmul.bf16.gmra.mxu0 %v2841_v8  ;;  %v883_v8 = vshll.u32 %v688_v56, 16  ;;  %v871_v22 = vrot.slane %v870_v3, 4  ;;  %v2550_v56 = vshll.u32 %v6039_v40, 16  ;;  %v691_v3 = vld [vmem:[%s7030_s17 + $0x5c] sm:$0x1] }
  0xaf   : > { %v7353_v33 = vpop.f32.mrf.mxu2  ;;  %v881_v24 = vrot.slane %v880_v7, 4  ;;  %v903_v7 = vrot.slane %v901_v52, 4 }
  0xb0   : > { %v7359_v39 = vpop.f32.mrf.mxu3  ;;  %v885_v25 = vrot.slane %v883_v8, 5  ;;  %v876_v35 = vsel %vm7174_vm4, %v871_v22, %v7377_v57  ;;  %v2554_v57 = vshrl.u32 %v6039_v40, 16  ;;  %v1439_v8 = vld [vmem:[%s7030_s17 + $0x58] sm:$0xf]  ;;  %v7427_v14 = vrot.slane %v2550_v56, 5 }
  0xb1   : > { %v7364_v45 = vpop.f32.mrf.mxu1  ;;  %v1164_v59 = vunpack.c.l.b16 %v876_v35  ;;  %v1567_v26 = vrot.slane %v1439_v8, 5  ;;  %v915_v56 = vshll.u32 %v692_v38, 16 }
  0xb2   : > { %v886_v42 = vsel %vm7174_vm4, %v881_v24, %v885_v25  ;;  %v2556_v15 = vrot.slane %v2554_v57, 4  ;;  %v1438_v25 = vld [vmem:[%s7030_s17 + $0x54] sm:$0xe]  ;;  %v6680_v57 = vld [vmem:[%s8494_s1 + $0x198] sm:$0xff] }
  0xb3   : > { %v7366_v48 = vpop.f32.mrf.mxu0  ;;  %v1165_v61 = vunpack.c.l.b16 %v886_v42  ;;  %v5815_v43 = vrot.slane %v1438_v25, 9  ;;  %v1569_v46 = vrot.slane %v1567_v26, 4  ;;  %3825 = vmatpush.bf16.msra.mxu2 %v6680_v57  ;;  %v6656_v25 = vld [vmem:[%s8494_s1 + $0x158] sm:$0xff] }
  0xb4   : > { %v2557_v35 = vor.u32 %v2556_v15, %v7427_v14  ;;  %v917_v15 = vrot.slane %v915_v56, 5  ;;  %3443 = vmatpush.bf16.msra.mxu1 %v6656_v25  ;;  %v695_v25 = vld [vmem:[%s7030_s17 + $0x6c] sm:$0xf] }
  0xb5   : > { %v1190_v17 = vpack.c.b16 %v1165_v61, %v1164_v59  ;;  %v6688_v59 = vld [vmem:[%s8494_s1 + $0x1d8] sm:$0xff]  ;;  %v1571_v8 = vsel %vm7178_vm5, %v1569_v46, %v1570_v49  ;;  %v6043_v46 = vld [vmem:[%s7030_s17 + $0x74] sm:$0x1] }
  0xb6   : > { %v2558_v54 = vrot.slane %v2557_v35, 4  ;;  %4571 = vmatpush.bf16.msra.mxu3 %v6688_v59  ;;  %v694_v35 = vld [vmem:[%s7030_s17 + $0x68] sm:$0x1] }
  0xb7   : > { %v7383_v4 = vpop.f32.mrf.mxu2  ;;  %v931_v56 = vshll.u32 %v694_v35, 16 }
  0xb8   : > { %v7387_v11 = vpop.f32.mrf.mxu3 }
  0xb9   : > { %v7391_v18 = vpop.f32.mrf.mxu1 }
  0xbb   : > { %v7394_v21 = vpop.f32.mrf.mxu0 }
  0xbc   : > { %1297 = vmatmul.bf16.gmra.mxu1 %v1189_v5  ;;  %1822 = vmatmul.bf16.gmra.mxu2 %v1714_v13  ;;  %v7423_v5 = vrot.slane %v897_v51, 5  ;;  %v2546_v13 = vrot.slane %v2544_v55, 5  ;;  %v693_v51 = vld [vmem:[%s7030_s17 + $0x64] sm:$0xf]  ;;  %v912_v55 = vshrl.u32 %v692_v38, 16 }
  0xbd   : > { %2204 = vmatmul.bf16.gmra.mxu3 %v6626_v19  ;;  %v894_v19 = vor.u32 %v893_v0, %v890_v63  ;;  %v921_v61 = vshll.u32 %v693_v51, 16  ;;  %v925_v62 = vshrl.u32 %v693_v51, 16  ;;  %v6041_v63 = vld [vmem:[%s7030_s17 + $0x6c] sm:$0xf]  ;;  %v6042_v0 = vld [vmem:[%s7030_s17 + $0x70] sm:$0xf] }
  0xbe   : > { %2950 = vmatmul.bf16.gmra.mxu0 %v2842_v20  ;;  %v907_v20 = vshll.u32 %v691_v3, 16  ;;  %v904_v24 = vor.u32 %v903_v7, %v7423_v5  ;;  %v2547_v34 = vor.u32 %v2546_v13, %v2543_v10  ;;  %v1568_v7 = vsel %vm7178_vm5, %v5815_v43, %v1567_v26  ;;  %v1442_v38 = vld [vmem:[%s7030_s17 + $0x64] sm:$0xf] }
  0xbf   : > { %v7405_v41 = vpop.f32.mrf.mxu2  ;;  %v895_v40 = vrot.slane %v894_v19, 4  ;;  %v2563_v13 = vsel %vm7174_vm4, %v2558_v54, %v2562_v50  ;;  %v2565_v19 = vshrl.u32 %v6041_v63, 16  ;;  %v7480_v26 = vrot.slane %v921_v61, 5 }
  0xc0   : > { %v7411_v47 = vpop.f32.mrf.mxu3  ;;  %v909_v42 = vrot.slane %v907_v20, 5  ;;  %v905_v44 = vrot.slane %v904_v24, 4  ;;  %v2548_v52 = vrot.slane %v2547_v34, 4  ;;  %v2568_v20 = vshll.u32 %v6041_v63, 16  ;;  %v1443_v63 = vld [vmem:[%s7030_s17 + $0x68] sm:$0x1] }
  0xc1   : > { %8503 = vst [vmem:[#allocation4_spill] sm:$0xff] %v7411_v47  ;;  %v7418_v53 = vpop.f32.mrf.mxu1  ;;  %v900_v2 = vsel %vm7174_vm4, %v895_v40, %v7423_v5  ;;  %v914_v5 = vrot.slane %v912_v55, 4  ;;  %v2578_v24 = vshrl.u32 %v6042_v0, 16  ;;  %v927_v27 = vrot.slane %v925_v62, 4 }
  0xc2   : > { %v910_v3 = vsel %vm7174_vm4, %v905_v44, %v909_v42  ;;  %v2553_v10 = vsel %vm7174_vm4, %v2548_v52, %v7427_v14  ;;  %v6696_v14 = vld [vmem:[%s8494_s1 + $0x218] sm:$0xff]  ;;  %v1691_v32 = vunpack.c.l.b16 %v1568_v7  ;;  %v1692_v34 = vunpack.c.l.b16 %v1571_v8  ;;  %v1441_v44 = vld [vmem:[%s7030_s17 + $0x60] sm:$0xe] }
  0xc3   : > { %v7420_v58 = vpop.f32.mrf.mxu0  ;;  %5093 = vmatpush.bf16.msra.mxu0 %v6696_v14  ;;  %v2819_v40 = vunpack.c.l.b16 %v2553_v10  ;;  %v2820_v42 = vunpack.c.l.b16 %v2563_v13  ;;  %v918_v43 = vor.u32 %v917_v15, %v914_v5  ;;  %v2567_v49 = vrot.slane %v2565_v19, 4  ;;  %v696_v14 = vld [vmem:[%s7030_s17 + $0x70] sm:$0xf] }
  0xc4   : > { %v2570_v50 = vrot.slane %v2568_v20, 5  ;;  %v2580_v52 = vrot.slane %v2578_v24, 4  ;;  %v928_v55 = vor.u32 %v927_v27, %v7480_v26  ;;  %v1574_v57 = vrot.slane %v1442_v38, 5 }
  0xc5   : > { %v1716_v62 = vpack.c.b16 %v1692_v34, %v1691_v32  ;;  %v919_v7 = vrot.slane %v918_v43, 4  ;;  %v5816_v8 = vrot.slane %v1441_v44, 9  ;;  %v2584_v10 = vshll.u32 %v6043_v46, 16  ;;  %v6044_v32 = vld [vmem:[%s7030_s17 + $0x78] sm:$0xf] }
  0xc6   : > { %v2571_v5 = vor.u32 %v2570_v50, %v2567_v49  ;;  %v929_v19 = vrot.slane %v928_v55, 4  ;;  %v933_v20 = vrot.slane %v931_v56, 5  ;;  %v1577_v24 = vrot.slane %v1443_v63, 5  ;;  %v6045_v34 = vld [vmem:[%s7030_s17 + $0x7c] sm:$0xf] }
  0xc7   : > { %v7429_v16 = vpop.f32.mrf.mxu2  ;;  %v924_v27 = vsel %vm7174_vm4, %v919_v7, %v7480_v26  ;;  %v945_v49 = vshll.u32 %v696_v14, 16  ;;  %v949_v26 = vshrl.u32 %v696_v14, 16  ;;  %v2592_v55 = vshll.u32 %v6044_v32, 16 }
  0xc8   : > { %v7431_v22 = vpop.f32.mrf.mxu3  ;;  %v2572_v35 = vrot.slane %v2571_v5, 4  ;;  %v934_v44 = vsel %vm7174_vm4, %v929_v19, %v933_v20  ;;  %v2598_v56 = vshll.u32 %v6045_v34, 16  ;;  %v697_v19 = vld [vmem:[%s7030_s17 + $0x74] sm:$0x1] }
  0xc9   : > { %8504 = vst [vmem:[#allocation5_spill] sm:$0xff] %v7431_v22  ;;  %v7435_v28 = vpop.f32.mrf.mxu1  ;;  %v1169_v5 = vunpack.c.l.b16 %v934_v44  ;;  %v7527_v20 = vrot.slane %v945_v49, 5  ;;  %v2594_v14 = vrot.slane %v2592_v55, 5  ;;  %v1449_v22 = vld [vmem:[%s7030_s17 + $0x80] sm:$0x1] }
  0xcb   : > { %v7440_v37 = vpop.f32.mrf.mxu0 }
  0xcc   : > { %1302 = vmatmul.bf16.gmra.mxu1 %v1190_v17  ;;  %1827 = vmatmul.bf16.gmra.mxu2 %v1715_v23  ;;  %v2574_v23 = vshll.u32 %v6042_v0, 16 }
  0xcd   : > { %2209 = vmatmul.bf16.gmra.mxu3 %v6627_v29  ;;  %v1166_v29 = vunpack.c.l.b16 %v900_v2  ;;  %v6628_v2 = vld [vmem:[%s7030_s17 + $0x60] sm:$0xff] }
  0xce   : > { %2955 = vmatmul.bf16.gmra.mxu0 %v2843_v30  ;;  %v1167_v30 = vunpack.c.l.b16 %v910_v3  ;;  %v7486_v51 = vrot.slane %v2574_v23, 5  ;;  %v2844_v3 = vpack.c.b16 %v2820_v42, %v2819_v40  ;;  %v1576_v23 = vrot.slane %v1574_v57, 4 }
  0xcf   : > { %v7450_v60 = vpop.f32.mrf.mxu2  ;;  %v936_v40 = vshrl.u32 %v695_v25, 16  ;;  %v939_v42 = vshll.u32 %v695_v25, 16 }
  0xd0   : > { %v7454_v1 = vpop.f32.mrf.mxu3  ;;  %v1191_v61 = vpack.c.b16 %v1167_v30, %v1166_v29  ;;  %v2581_v15 = vor.u32 %v2580_v52, %v7486_v51  ;;  %v1575_v29 = vsel %vm7178_vm5, %v5816_v8, %v1574_v57  ;;  %v2586_v30 = vrot.slane %v2584_v10, 5 }
  0xd1   : > { %8505 = vst [vmem:[#allocation6_spill] sm:$0xff] %v7454_v1  ;;  %v7465_v9 = vpop.f32.mrf.mxu1  ;;  %v1578_v46 = vsel %vm7178_vm5, %v1576_v23, %v1577_v24  ;;  %v2589_v52 = vshrl.u32 %v6044_v32, 16  ;;  %v2602_v57 = vshrl.u32 %v6045_v34, 16  ;;  %v1693_v63 = vunpack.c.l.b16 %v1575_v29  ;;  %v1445_v24 = vld [vmem:[%s7030_s17 + $0x70] sm:$0xf] }
  0xd2   : > { %v2582_v38 = vrot.slane %v2581_v15, 4  ;;  %v938_v8 = vrot.slane %v936_v40, 4  ;;  %v941_v10 = vrot.slane %v939_v42, 5  ;;  %v1694_v15 = vunpack.c.l.b16 %v1578_v46  ;;  %v6046_v34 = vld [vmem:[%s7030_s17 + $0x80] sm:$0x1] }
  0xd3   : > { %v7472_v17 = vpop.f32.mrf.mxu0  ;;  %v951_v23 = vrot.slane %v949_v26, 4  ;;  %v2591_v25 = vrot.slane %v2589_v52, 4  ;;  %v2604_v29 = vrot.slane %v2602_v57, 4  ;;  %v955_v42 = vshll.u32 %v697_v19, 16  ;;  %v1444_v26 = vld [vmem:[%s7030_s17 + $0x6c] sm:$0xe] }
  0xd4   : > { %v2587_v7 = vsel %vm7174_vm4, %v2582_v38, %v2586_v30  ;;  %v942_v30 = vor.u32 %v941_v10, %v938_v8  ;;  %v1581_v44 = vrot.slane %v1445_v24, 5  ;;  %v1717_v49 = vpack.c.b16 %v1694_v15, %v1693_v63  ;;  %v1446_v8 = vld [vmem:[%s7030_s17 + $0x74] sm:$0x1]  ;;  %v698_v15 = vld [vmem:[%s7030_s17 + $0x78] sm:$0xf] }
  0xd5   : > { %v2822_v32 = vunpack.c.l.b16 %v2587_v7  ;;  %v952_v40 = vor.u32 %v951_v23, %v7527_v20  ;;  %v2595_v52 = vor.u32 %v2594_v14, %v2591_v25  ;;  %v957_v23 = vrot.slane %v955_v42, 5  ;;  %v6047_v42 = vld [vmem:[%s7030_s17 + $0x84] sm:$0xf] }
  0xd6   : > { %v5817_v24 = vrot.slane %v1444_v26, 9  ;;  %v1583_v63 = vrot.slane %v1581_v44, 4  ;;  %v1584_v25 = vrot.slane %v1446_v8, 5 }
  0xd7   : > { %v7488_v54 = vpop.f32.mrf.mxu2  ;;  %v953_v19 = vrot.slane %v952_v40, 4  ;;  %v2596_v14 = vrot.slane %v2595_v52, 4  ;;  %v963_v40 = vshll.u32 %v698_v15, 16 }
  0xd8   : > { %v7491_v59 = vpop.f32.mrf.mxu3 }
  0xd9   : > { %8506 = vst [vmem:[#allocation7_spill] sm:$0xff] %v7491_v59  ;;  %v7494_v0 = vpop.f32.mrf.mxu1  ;;  %v958_v52 = vsel %vm7174_vm4, %v953_v19, %v957_v23  ;;  %v2613_v23 = vshrl.u32 %v6047_v42, 16 }
  0xdb   : > { %v7497_v13 = vpop.f32.mrf.mxu0 }
  0xdc   : > { %1307 = vmatmul.bf16.gmra.mxu1 %v1191_v61  ;;  %1832 = vmatmul.bf16.gmra.mxu2 %v1716_v62  ;;  %v1168_v62 = vunpack.c.l.b16 %v924_v27  ;;  %v7530_v27 = vrot.slane %v2598_v56, 5  ;;  %v2608_v56 = vshll.u32 %v6046_v34, 16  ;;  %v6687_v34 = vld [vmem:[%s8494_s1 + $0x1d0] sm:$0xff] }
  0xdd   : > { %2214 = vmatmul.bf16.gmra.mxu3 %v6628_v2 }
  0xde   : > { %2960 = vmatmul.bf16.gmra.mxu0 %v2844_v3  ;;  %v2577_v3 = vsel %vm7174_vm4, %v2572_v35, %v7486_v51  ;;  %v1192_v38 = vpack.c.b16 %v1169_v5, %v1168_v62  ;;  %v2605_v55 = vor.u32 %v2604_v29, %v7530_v27  ;;  %v943_v5 = vrot.slane %v942_v30, 4  ;;  %4572 = vmatpush.bf16.msra.mxu3 %v6687_v34 }
  0xdf   : > { %v7509_v43 = vpop.f32.mrf.mxu2  ;;  %v2821_v51 = vunpack.c.l.b16 %v2577_v3  ;;  %v6629_v3 = vld [vmem:[%s7030_s17 + $0x6c] sm:$0xff]  ;;  %v2601_v8 = vsel %vm7174_vm4, %v2596_v14, %v7530_v27 }
  0xe0   : > { %v7515_v50 = vpop.f32.mrf.mxu3  ;;  %v2606_v29 = vrot.slane %v2605_v55, 4  ;;  %v948_v30 = vsel %vm7174_vm4, %v943_v5, %v7527_v20  ;;  %v1582_v55 = vsel %vm7178_vm5, %v5817_v24, %v1581_v44  ;;  %v1585_v20 = vsel %vm7178_vm5, %v1583_v63, %v1584_v25  ;;  %v6655_v27 = vld [vmem:[%s8494_s1 + $0x150] sm:$0xff] }
  0xe1   : > { %8507 = vst [vmem:[#allocation8_spill] sm:$0xff] %v7515_v50  ;;  %v7517_v61 = vpop.f32.mrf.mxu1  ;;  %v2845_v7 = vpack.c.b16 %v2822_v32, %v2821_v51  ;;  %v2610_v51 = vrot.slane %v2608_v56, 5  ;;  %v699_v32 = vld [vmem:[%s7030_s17 + $0x7c] sm:$0xf]  ;;  %v965_v63 = vrot.slane %v963_v40, 5  ;;  %v6695_v25 = vld [vmem:[%s8494_s1 + $0x210] sm:$0xff]  ;;  %v1170_v14 = vunpack.c.l.b16 %v948_v30  ;;  %3444 = vmatpush.bf16.msra.mxu1 %v6655_v27 }
  0xe2   : > { %v969_v56 = vshll.u32 %v699_v32, 16  ;;  %5094 = vmatpush.bf16.msra.mxu0 %v6695_v25  ;;  %v6049_v40 = vld [vmem:[%s7030_s17 + $0x8c] sm:$0x1]  ;;  %v1447_v25 = vld [vmem:[%s7030_s17 + $0x78] sm:$0xe] }
  0xe3   : > { %v7519_v2 = vpop.f32.mrf.mxu0  ;;  %v2611_v5 = vsel %vm7174_vm4, %v2606_v29, %v2610_v51  ;;  %v1695_v29 = vunpack.c.l.b16 %v1582_v55  ;;  %v2632_v1 = vshll.u32 %v6049_v40, 16  ;;  %v6051_v40 = vld [vmem:[%s7030_s17 + $0x94] sm:$0xf] }
  0xe4   : > { %v7576_v51 = vrot.slane %v969_v56, 5 }
  0xe7   : > { %v7533_v35 = vpop.f32.mrf.mxu2 }
  0xe8   : > { %v7536_v46 = vpop.f32.mrf.mxu3 }
  0xe9   : > { %8508 = vst [vmem:[#allocation9_spill] sm:$0xff] %v7536_v46  ;;  %v1273_v57 = vpop.f32.mrf.mxu1 }
  0xea   : > { %v1353_v62 = vadd.f32 %v1273_v57, %v7335_v12  ;;  %v6679_v12 = vld [vmem:[%s8494_s1 + $0x190] sm:$0xff]  ;;  %v973_v57 = vshrl.u32 %v699_v32, 16 }
  0xeb   : > { %v7543_v10 = vpop.f32.mrf.mxu0  ;;  %3826 = vmatpush.bf16.msra.mxu2 %v6679_v12 }
  0xec   : > { %1312 = vmatmul.bf16.gmra.mxu1 %v1192_v38  ;;  %1837 = vmatmul.bf16.gmra.mxu2 %v1717_v49  ;;  %v960_v38 = vshrl.u32 %v698_v15, 16  ;;  %v6048_v49 = vld [vmem:[%s7030_s17 + $0x88] sm:$0xf]  ;;  %v2616_v15 = vshll.u32 %v6047_v42, 16  ;;  %v975_v42 = vrot.slane %v973_v57, 4 }
  0xed   : > { %2219 = vmatmul.bf16.gmra.mxu3 %v6629_v3  ;;  %v2622_v44 = vshll.u32 %v6048_v49, 16  ;;  %v2626_v24 = vshrl.u32 %v6048_v49, 16  ;;  %v1171_v49 = vunpack.c.l.b16 %v958_v52 }
  0xee   : > { %2965 = vmatmul.bf16.gmra.mxu0 %v2845_v7  ;;  %v962_v34 = vrot.slane %v960_v38, 4  ;;  %v700_v38 = vld [vmem:[%s7030_s17 + $0x80] sm:$0x1]  ;;  %v2618_v46 = vrot.slane %v2616_v15, 5  ;;  %v976_v52 = vor.u32 %v975_v42, %v7576_v51  ;;  %v6630_v15 = vld [vmem:[%s7030_s17 + $0x78] sm:$0xff] }
  0xef   : > { %v1798_v26 = vpop.f32.mrf.mxu2  ;;  %v7581_v50 = vrot.slane %v2622_v44, 5  ;;  %v2628_v30 = vrot.slane %v2626_v24, 4  ;;  %v979_v57 = vshll.u32 %v700_v38, 16  ;;  %v1193_v27 = vpack.c.b16 %v1171_v49, %v1170_v14  ;;  %v701_v14 = vld [vmem:[%s7030_s17 + $0x84] sm:$0xf] }
  0xf0   : > { %v1878_v3 = vadd.f32 %v1798_v26, %v1353_v62  ;;  %v2180_v7 = vpop.f32.mrf.mxu3  ;;  %v1696_v26 = vunpack.c.l.b16 %v1585_v20  ;;  %v966_v55 = vor.u32 %v965_v63, %v962_v34 }
  0xf1   : > { %v1275_v19 = vpop.f32.mrf.mxu1  ;;  %v2629_v24 = vor.u32 %v2628_v30, %v7581_v50  ;;  %v981_v49 = vrot.slane %v979_v57, 5 }
  0xf2   : > { %v2260_v32 = vadd.f32 %v2180_v7, %v1878_v3  ;;  %v1354_v62 = vadd.f32 %v1275_v19, %v7366_v48  ;;  %v2823_v48 = vunpack.c.l.b16 %v2601_v8  ;;  %v2824_v3 = vunpack.c.l.b16 %v2611_v5  ;;  %v1448_v7 = vld [vmem:[%s7030_s17 + $0x7c] sm:$0xf] }
  0xf3   : > { %v2928_v12 = vpop.f32.mrf.mxu0  ;;  %v2615_v19 = vrot.slane %v2613_v23, 4  ;;  %v1588_v20 = vrot.slane %v1448_v7, 5  ;;  %v1718_v59 = vpack.c.b16 %v1696_v26, %v1695_v29  ;;  %v967_v42 = vrot.slane %v966_v55, 4  ;;  %v702_v7 = vld [vmem:[%s7030_s17 + $0x88] sm:$0xf] }
  0xf4   : > { %v2846_v44 = vpack.c.b16 %v2824_v3, %v2823_v48  ;;  %v977_v29 = vrot.slane %v976_v52, 4  ;;  %v5818_v26 = vrot.slane %v1447_v25, 9  ;;  %v1591_v48 = vrot.slane %v1449_v22, 5  ;;  %v6050_v3 = vld [vmem:[%s7030_s17 + $0x90] sm:$0xf] }
  0xf5   : > { %v2619_v47 = vor.u32 %v2618_v46, %v2615_v19  ;;  %v1590_v38 = vrot.slane %v1588_v20, 4  ;;  %v2634_v46 = vrot.slane %v2632_v1, 5  ;;  %v7596_v19 = vadd.f32 %v7543_v10, %v2260_v32 }
  0xf6   : > { %v2630_v55 = vrot.slane %v2629_v24, 4  ;;  %v987_v52 = vshll.u32 %v701_v14, 16  ;;  %v972_v57 = vsel %vm7174_vm4, %v967_v42, %v7576_v51  ;;  %v997_v22 = vshrl.u32 %v702_v7, 16 }
  0xf7   : > { %v1800_v56 = vpop.f32.mrf.mxu2  ;;  %8509 = vst [vmem:[#allocation10_spill] sm:$0xff] %v7596_v19  ;;  %v2646_v10 = vshll.u32 %v6051_v40, 16  ;;  %v2650_v32 = vshrl.u32 %v6051_v40, 16  ;;  %v1589_v25 = vsel %vm7178_vm5, %v5818_v26, %v1588_v20  ;;  %v703_v20 = vld [vmem:[%s7030_s17 + $0x8c] sm:$0x1] }
  0xf8   : > { %v1879_v8 = vadd.f32 %v1800_v56, %v1354_v62  ;;  %v2182_v5 = vpop.f32.mrf.mxu3  ;;  %v984_v56 = vshrl.u32 %v701_v14, 16 }
  0xf9   : > { %v1278_v23 = vpop.f32.mrf.mxu1 }
  0xfa   : > { %v2261_v34 = vadd.f32 %v2182_v5, %v1879_v8  ;;  %v1355_v63 = vadd.f32 %v1278_v23, %v7394_v21  ;;  %v2620_v21 = vrot.slane %v2619_v47, 4  ;;  %v2637_v8 = vshrl.u32 %v6050_v3, 16 }
  0xfb   : > { %v7589_v62 = vpop.f32.mrf.mxu0  ;;  %v2640_v5 = vshll.u32 %v6050_v3, 16  ;;  %v982_v47 = vsel %vm7174_vm4, %v977_v29, %v981_v49  ;;  %v1592_v23 = vsel %vm7178_vm5, %v1590_v38, %v1591_v48  ;;  %v986_v24 = vrot.slane %v984_v56, 4 }
  0xfc   : > { %1317 = vmatmul.bf16.gmra.mxu1 %v1193_v27  ;;  %1842 = vmatmul.bf16.gmra.mxu2 %v1718_v59  ;;  %v7598_v30 = vadd.f32 %v2928_v12, %v2261_v34  ;;  %v993_v59 = vshll.u32 %v702_v7, 16  ;;  %v989_v34 = vrot.slane %v987_v52, 5  ;;  %v999_v49 = vrot.slane %v997_v22, 4 }
  0xfd   : > { %2224 = vmatmul.bf16.gmra.mxu3 %v6630_v15  ;;  %v2625_v15 = vsel %vm7174_vm4, %v2620_v21, %v7581_v50  ;;  %v2639_v26 = vrot.slane %v2637_v8, 4  ;;  %v2642_v38 = vrot.slane %v2640_v5, 5  ;;  %v7618_v50 = vrot.slane %v2646_v10, 5  ;;  %v1451_v21 = vld [vmem:[%s7030_s17 + $0x88] sm:$0xf] }
  0xfe   : > { %8510 = vst [vmem:[#allocation11_spill] sm:$0xff] %v7598_v30  ;;  %2970 = vmatmul.bf16.gmra.mxu0 %v2846_v44  ;;  %v2635_v44 = vsel %vm7174_vm4, %v2630_v55, %v2634_v46  ;;  %v7616_v29 = vrot.slane %v993_v59, 5  ;;  %v2652_v7 = vrot.slane %v2650_v32, 4  ;;  %v1172_v48 = vunpack.c.l.b16 %v972_v57  ;;  %v6052_v55 = vld [vmem:[%s7030_s17 + $0x98] sm:$0x1] }
  0xff   : > { %v1803_v1 = vpop.f32.mrf.mxu2  ;;  %v1173_v46 = vunpack.c.l.b16 %v982_v47  ;;  %v1697_v3 = vunpack.c.l.b16 %v1589_v25  ;;  %v1698_v40 = vunpack.c.l.b16 %v1592_v23  ;;  %v2825_v56 = vunpack.c.l.b16 %v2625_v15  ;;  %v1452_v8 = vld [vmem:[%s7030_s17 + $0x8c] sm:$0x1]  ;;  %v6631_v15 = vld [vmem:[%s7030_s17 + $0x84] sm:$0xff] }
 0x100   : > { %v1880_v12 = vadd.f32 %v1803_v1, %v1355_v63  ;;  %v2185_v27 = vpop.f32.mrf.mxu3  ;;  %v1003_v52 = vshll.u32 %v703_v20, 16  ;;  %v990_v59 = vor.u32 %v989_v34, %v986_v24  ;;  %v1000_v22 = vor.u32 %v999_v49, %v7616_v29  ;;  %v1450_v1 = vld [vmem:[%s7030_s17 + $0x84] sm:$0xe]  ;;  %v704_v49 = vld [vmem:[%s7030_s17 + $0x90] sm:$0xf] }
 0x101   : > { %v1280_v51 = vpop.f32.mrf.mxu1  ;;  %v1595_v10 = vrot.slane %v1451_v21, 5  ;;  %v2653_v57 = vor.u32 %v2652_v7, %v7618_v50  ;;  %v2656_v32 = vshll.u32 %v6052_v55, 16  ;;  %v1194_v25 = vpack.c.b16 %v1173_v46, %v1172_v48  ;;  %v705_v46 = vld [vmem:[%s7030_s17 + $0x94] sm:$0xf] }
 0x102   : > { %v2262_v63 = vadd.f32 %v2185_v27, %v1880_v12  ;;  %v1356_v42 = vadd.f32 %v1280_v51, %v7420_v58  ;;  %v2826_v58 = vunpack.c.l.b16 %v2635_v44  ;;  %v2643_v12 = vor.u32 %v2642_v38, %v2639_v26 }
 0x103   : > { %v2933_v14 = vpop.f32.mrf.mxu0  ;;  %v1719_v23 = vpack.c.b16 %v1698_v40, %v1697_v3  ;;  %v1005_v24 = vrot.slane %v1003_v52, 5  ;;  %v5819_v34 = vrot.slane %v1450_v1, 9  ;;  %v1598_v20 = vrot.slane %v1452_v8, 5  ;;  %v6686_v52 = vld [vmem:[%s8494_s1 + $0x1c8] sm:$0xff] }
 0x104   : > { %v2847_v44 = vpack.c.b16 %v2826_v58, %v2825_v56  ;;  %v991_v26 = vrot.slane %v990_v59, 4  ;;  %v1001_v38 = vrot.slane %v1000_v22, 4  ;;  %v1597_v7 = vrot.slane %v1595_v10, 4  ;;  %v6054_v22 = vld [vmem:[%s7030_s17 + $0xa0] sm:$0xf]  ;;  %4573 = vmatpush.bf16.msra.mxu3 %v6686_v52 }
 0x105   : > { %v2654_v55 = vrot.slane %v2653_v57, 4  ;;  %v2658_v48 = vrot.slane %v2656_v32, 5  ;;  %v1008_v3 = vshrl.u32 %v704_v49, 16  ;;  %v1011_v40 = vshll.u32 %v704_v49, 16  ;;  %v6654_v49 = vld [vmem:[%s8494_s1 + $0x148] sm:$0xff] }
 0x106   : > { %v7633_v56 = vadd.f32 %v7589_v62, %v2262_v63  ;;  %v996_v59 = vsel %vm7174_vm4, %v991_v26, %v7616_v29  ;;  %v1596_v62 = vsel %vm7178_vm5, %v5819_v34, %v1595_v10  ;;  %v1017_v63 = vshll.u32 %v705_v46, 16  ;;  %v6694_v26 = vld [vmem:[%s8494_s1 + $0x208] sm:$0xff]  ;;  %3445 = vmatpush.bf16.msra.mxu1 %v6654_v49 }
 0x107   : > { %v1805_v5 = vpop.f32.mrf.mxu2  ;;  %v1006_v8 = vsel %vm7174_vm4, %v1001_v38, %v1005_v24  ;;  %v2659_v57 = vsel %vm7174_vm4, %v2654_v55, %v2658_v48  ;;  %v1010_v32 = vrot.slane %v1008_v3, 4  ;;  %v1174_v38 = vunpack.c.l.b16 %v996_v59  ;;  %5095 = vmatpush.bf16.msra.mxu0 %v6694_v26  ;;  %v1454_v3 = vld [vmem:[%s7030_s17 + $0x94] sm:$0xf] }
 0x108   : > { %v1881_v27 = vadd.f32 %v1805_v5, %v1356_v42  ;;  %v2187_v47 = vpop.f32.mrf.mxu3  ;;  %v2644_v42 = vrot.slane %v2643_v12, 4  ;;  %v1599_v5 = vsel %vm7178_vm5, %v1597_v7, %v1598_v20  ;;  %v7661_v20 = vrot.slane %v1017_v63, 5 }
 0x109   : > { %v1283_v51 = vpop.f32.mrf.mxu1  ;;  %v1175_v7 = vunpack.c.l.b16 %v1006_v8  ;;  %v1700_v55 = vunpack.c.l.b16 %v1599_v5 }
 0x10a   : > { %v2263_v30 = vadd.f32 %v2187_v47, %v1881_v27  ;;  %v1357_v19 = vadd.f32 %v1283_v51, %v7440_v37  ;;  %v6678_v37 = vld [vmem:[%s8494_s1 + $0x188] sm:$0xff]  ;;  %v2649_v12 = vsel %vm7174_vm4, %v2644_v42, %v7618_v50  ;;  %v1013_v27 = vrot.slane %v1011_v40, 5 }
 0x10b   : > { %v7629_v21 = vpop.f32.mrf.mxu0  ;;  %3827 = vmatpush.bf16.msra.mxu2 %v6678_v37  ;;  %v1699_v42 = vunpack.c.l.b16 %v1596_v62  ;;  %v2827_v48 = vunpack.c.l.b16 %v2649_v12 }
 0x10c   : > { %1322 = vmatmul.bf16.gmra.mxu1 %v1194_v25  ;;  %1847 = vmatmul.bf16.gmra.mxu2 %v1719_v23  ;;  %v7635_v58 = vadd.f32 %v2933_v14, %v2263_v30  ;;  %v1021_v30 = vshrl.u32 %v705_v46, 16  ;;  %v6053_v14 = vld [vmem:[%s7030_s17 + $0x9c] sm:$0xf]  ;;  %v706_v25 = vld [vmem:[%s7030_s17 + $0x98] sm:$0x1] }
 0x10d   : > { %2229 = vmatmul.bf16.gmra.mxu3 %v6631_v15  ;;  %v2661_v23 = vshrl.u32 %v6053_v14, 16  ;;  %v2664_v51 = vshll.u32 %v6053_v14, 16  ;;  %v2670_v15 = vshll.u32 %v6054_v22, 16  ;;  %v1027_v46 = vshll.u32 %v706_v25, 16  ;;  %v1453_v14 = vld [vmem:[%s7030_s17 + $0x90] sm:$0xe] }
 0x10e   : > { %2975 = vmatmul.bf16.gmra.mxu0 %v2847_v44  ;;  %v2674_v44 = vshrl.u32 %v6054_v22, 16  ;;  %v6055_v22 = vld [vmem:[%s7030_s17 + $0xa4] sm:$0x1]  ;;  %v1720_v8 = vpack.c.b16 %v1700_v55, %v1699_v42  ;;  %v6632_v25 = vld [vmem:[%s7030_s17 + $0x90] sm:$0xff]  ;;  %v708_v55 = vld [vmem:[%s7030_s17 + $0xa0] sm:$0xf] }
 0x10f   : > { %v1808_v1 = vpop.f32.mrf.mxu2  ;;  %v2663_v40 = vrot.slane %v2661_v23, 4  ;;  %v2666_v37 = vrot.slane %v2664_v51, 5  ;;  %v7670_v52 = vrot.slane %v2670_v15, 5  ;;  %v1455_v23 = vld [vmem:[%s7030_s17 + $0x98] sm:$0x1]  ;;  %v5820_v51 = vrot.slane %v1453_v14, 9 }
 0x110   : > { %v1882_v29 = vadd.f32 %v1808_v1, %v1357_v19  ;;  %v2190_v10 = vpop.f32.mrf.mxu3  ;;  %v1023_v19 = vrot.slane %v1021_v30, 4  ;;  %v2676_v63 = vrot.slane %v2674_v44, 4  ;;  %v1014_v30 = vor.u32 %v1013_v27, %v1010_v32 }
 0x111   : > { %v1285_v47 = vpop.f32.mrf.mxu1  ;;  %v1195_v1 = vpack.c.b16 %v1175_v7, %v1174_v38  ;;  %v2667_v32 = vor.u32 %v2666_v37, %v2663_v40  ;;  %v2680_v15 = vshll.u32 %v6055_v22, 16  ;;  %v707_v38 = vld [vmem:[%s7030_s17 + $0x9c] sm:$0xf]  ;;  %v1605_v42 = vrot.slane %v1455_v23, 5 }
 0x112   : > { %v2264_v24 = vadd.f32 %v2190_v10, %v1882_v29  ;;  %v1358_v34 = vadd.f32 %v1285_v47, %v7472_v17  ;;  %v2828_v17 = vunpack.c.l.b16 %v2659_v57  ;;  %v1024_v59 = vor.u32 %v1023_v19, %v7661_v20 }
 0x113   : > { %v2938_v50 = vpop.f32.mrf.mxu0  ;;  %v1029_v10 = vrot.slane %v1027_v46, 5  ;;  %v1602_v57 = vrot.slane %v1454_v3, 5  ;;  %v2677_v27 = vor.u32 %v2676_v63, %v7670_v52  ;;  %v2668_v3 = vrot.slane %v2667_v32, 4  ;;  %v6057_v63 = vld [vmem:[%s7030_s17 + $0xac] sm:$0xf] }
 0x114   : > { %v2848_v29 = vpack.c.b16 %v2828_v17, %v2827_v48  ;;  %v1025_v26 = vrot.slane %v1024_v59, 4  ;;  %v6056_v48 = vld [vmem:[%s7030_s17 + $0xa8] sm:$0xf]  ;;  %v7685_v17 = vadd.f32 %v7629_v21, %v2264_v24  ;;  %v2682_v37 = vrot.slane %v2680_v15, 5  ;;  %v709_v15 = vld [vmem:[%s7030_s17 + $0xa4] sm:$0x1] }
 0x115   : > { %v1604_v7 = vrot.slane %v1602_v57, 4  ;;  %v2678_v40 = vrot.slane %v2677_v27, 4  ;;  %v1032_v21 = vshrl.u32 %v707_v38, 16  ;;  %v1035_v24 = vshll.u32 %v707_v38, 16 }
 0x116   : > { %v1030_v59 = vsel %vm7174_vm4, %v1025_v26, %v1029_v10  ;;  %v1041_v14 = vshll.u32 %v708_v55, 16  ;;  %v1045_v22 = vshrl.u32 %v708_v55, 16  ;;  %v2673_v10 = vsel %vm7174_vm4, %v2668_v3, %v7670_v52  ;;  %v1457_v52 = vld [vmem:[%s7030_s17 + $0xa0] sm:$0xf] }
 0x117   : > { %v1810_v62 = vpop.f32.mrf.mxu2  ;;  %v2683_v23 = vsel %vm7174_vm4, %v2678_v40, %v2682_v37  ;;  %v2829_v40 = vunpack.c.l.b16 %v2673_v10  ;;  %v1051_v37 = vshll.u32 %v709_v15, 16 }
 0x118   : > { %v1883_v5 = vadd.f32 %v1810_v62, %v1358_v34  ;;  %v2192_v12 = vpop.f32.mrf.mxu3  ;;  %v1015_v34 = vrot.slane %v1014_v30, 4  ;;  %v2685_v62 = vshrl.u32 %v6056_v48, 16  ;;  %v1047_v26 = vrot.slane %v1045_v22, 4 }
 0x119   : > { %v1288_v47 = vpop.f32.mrf.mxu1  ;;  %v1053_v10 = vrot.slane %v1051_v37, 5  ;;  %v6685_v37 = vld [vmem:[%s8494_s1 + $0x1c0] sm:$0xff] }
 0x11a   : > { %v2265_v44 = vadd.f32 %v2192_v12, %v1883_v5  ;;  %v1359_v19 = vadd.f32 %v1288_v47, %v7497_v13  ;;  %v1603_v13 = vsel %vm7178_vm5, %v5820_v51, %v1602_v57  ;;  %v1020_v30 = vsel %vm7174_vm4, %v1015_v34, %v7661_v20  ;;  %4574 = vmatpush.bf16.msra.mxu3 %v6685_v37 }
 0x11b   : > { %v7679_v49 = vpop.f32.mrf.mxu0  ;;  %v1606_v12 = vsel %vm7178_vm5, %v1604_v7, %v1605_v42  ;;  %v2698_v57 = vshrl.u32 %v6057_v63, 16  ;;  %v1176_v20 = vunpack.c.l.b16 %v1020_v30  ;;  %v7706_v34 = vrot.slane %v1041_v14, 5 }
 0x11c   : > { %1327 = vmatmul.bf16.gmra.mxu1 %v1195_v1  ;;  %1852 = vmatmul.bf16.gmra.mxu2 %v1720_v8  ;;  %v7687_v46 = vadd.f32 %v2938_v50, %v2265_v44  ;;  %v2688_v1 = vshll.u32 %v6056_v48, 16  ;;  %v1034_v44 = vrot.slane %v1032_v21, 4  ;;  %v2687_v38 = vrot.slane %v2685_v62, 4  ;;  %v6058_v48 = vld [vmem:[%s7030_s17 + $0xb0] sm:$0x1] }
 0x11d   : > { %2234 = vmatmul.bf16.gmra.mxu3 %v6632_v25  ;;  %v1701_v25 = vunpack.c.l.b16 %v1603_v13  ;;  %v1177_v42 = vunpack.c.l.b16 %v1030_v59  ;;  %v1702_v55 = vunpack.c.l.b16 %v1606_v12  ;;  %v2700_v3 = vrot.slane %v2698_v57, 4  ;;  %v6633_v57 = vld [vmem:[%s7030_s17 + $0x9c] sm:$0xff] }
 0x11e   : > { %2980 = vmatmul.bf16.gmra.mxu0 %v2848_v29  ;;  %v2694_v29 = vshll.u32 %v6057_v63, 16  ;;  %v2690_v7 = vrot.slane %v2688_v1, 5  ;;  %v1048_v21 = vor.u32 %v1047_v26, %v7706_v34  ;;  %v1609_v14 = vrot.slane %v1457_v52, 5 }
 0x11f   : > { %v1813_v50 = vpop.f32.mrf.mxu2  ;;  %v2704_v59 = vshll.u32 %v6058_v48, 16 }
 0x120   : > { %v1884_v8 = vadd.f32 %v1813_v50, %v1359_v19  ;;  %v2195_v5 = vpop.f32.mrf.mxu3  ;;  %v1037_v19 = vrot.slane %v1035_v24, 5  ;;  %v7710_v13 = vrot.slane %v2694_v29, 5  ;;  %v1456_v24 = vld [vmem:[%s7030_s17 + $0x9c] sm:$0xe]  ;;  %v1458_v50 = vld [vmem:[%s7030_s17 + $0xa4] sm:$0x1]  ;;  %v2691_v22 = vor.u32 %v2690_v7, %v2687_v38 }
 0x121   : > { %v1290_v47 = vpop.f32.mrf.mxu1  ;;  %v5821_v26 = vrot.slane %v1456_v24, 9  ;;  %v1612_v52 = vrot.slane %v1458_v50, 5  ;;  %v711_v38 = vld [vmem:[%s7030_s17 + $0xac] sm:$0xf]  ;;  %v1049_v7 = vrot.slane %v1048_v21, 4  ;;  %v1611_v48 = vrot.slane %v1609_v14, 4 }
 0x122   : > { %v2266_v51 = vadd.f32 %v2195_v5, %v1884_v8  ;;  %v1360_v32 = vadd.f32 %v1290_v47, %v7519_v2  ;;  %v2830_v2 = vunpack.c.l.b16 %v2683_v23  ;;  %v1038_v63 = vor.u32 %v1037_v19, %v1034_v44  ;;  %v710_v23 = vld [vmem:[%s7030_s17 + $0xa8] sm:$0xf] }
 0x123   : > { %v2943_v27 = vpop.f32.mrf.mxu0  ;;  %v1196_v8 = vpack.c.b16 %v1177_v42, %v1176_v20  ;;  %v1721_v5 = vpack.c.b16 %v1702_v55, %v1701_v25  ;;  %v2701_v12 = vor.u32 %v2700_v3, %v7710_v13  ;;  %v1056_v25 = vshrl.u32 %v710_v23, 16 }
 0x124   : > { %v2849_v47 = vpack.c.b16 %v2830_v2, %v2829_v40  ;;  %v1039_v19 = vrot.slane %v1038_v63, 4  ;;  %v7722_v42 = vadd.f32 %v7679_v49, %v2266_v51  ;;  %v1059_v3 = vshll.u32 %v710_v23, 16  ;;  %v6677_v2 = vld [vmem:[%s8494_s1 + $0x180] sm:$0xff] }
 0x125   : > { %v2702_v20 = vrot.slane %v2701_v12, 4  ;;  %v1065_v40 = vshll.u32 %v711_v38, 16  ;;  %v1610_v49 = vsel %vm7178_vm5, %v5821_v26, %v1609_v14  ;;  %v1069_v51 = vshrl.u32 %v711_v38, 16  ;;  %3828 = vmatpush.bf16.msra.mxu2 %v6677_v2 }
 0x126   : > { %v1044_v24 = vsel %vm7174_vm4, %v1039_v19, %v7706_v34  ;;  %v1054_v50 = vsel %vm7174_vm4, %v1049_v7, %v1053_v10  ;;  %v1061_v12 = vrot.slane %v1059_v3, 5 }
 0x127   : > { %v1815_v30 = vpop.f32.mrf.mxu2  ;;  %v1178_v38 = vunpack.c.l.b16 %v1044_v24  ;;  %v1179_v7 = vunpack.c.l.b16 %v1054_v50 }
 0x128   : > { %v1885_v62 = vadd.f32 %v1815_v30, %v1360_v32  ;;  %v2197_v1 = vpop.f32.mrf.mxu3  ;;  %v2692_v32 = vrot.slane %v2691_v22, 4  ;;  %v2706_v30 = vrot.slane %v2704_v59, 5  ;;  %v1613_v22 = vsel %vm7178_vm5, %v1611_v48, %v1612_v52  ;;  %v6060_v59 = vld [vmem:[%s7030_s17 + $0xb8] sm:$0xf]  ;;  %v6693_v52 = vld [vmem:[%s8494_s1 + $0x200] sm:$0xff] }
 0x129   : > { %v1293_v29 = vpop.f32.mrf.mxu1  ;;  %v2718_v19 = vshll.u32 %v6060_v59, 16  ;;  %v2722_v26 = vshrl.u32 %v6060_v59, 16  ;;  %v1703_v48 = vunpack.c.l.b16 %v1610_v49  ;;  %5096 = vmatpush.bf16.msra.mxu0 %v6693_v52  ;;  %v1197_v50 = vpack.c.b16 %v1179_v7, %v1178_v38 }
 0x12a   : > { %v2267_v15 = vadd.f32 %v2197_v1, %v1885_v62  ;;  %v1361_v63 = vadd.f32 %v1293_v29, %v7332_v6  ;;  %v2697_v14 = vsel %vm7174_vm4, %v2692_v32, %v7710_v13  ;;  %v2707_v1 = vsel %vm7174_vm4, %v2702_v20, %v2706_v30  ;;  %v6653_v13 = vld [vmem:[%s8494_s1 + $0x140] sm:$0xff] }
 0x12b   : > { %v7718_v44 = vpop.f32.mrf.mxu0  ;;  %v7750_v29 = vrot.slane %v1065_v40, 5  ;;  %v1704_v32 = vunpack.c.l.b16 %v1613_v22  ;;  %v2831_v30 = vunpack.c.l.b16 %v2697_v14  ;;  %v2832_v20 = vunpack.c.l.b16 %v2707_v1  ;;  %3446 = vmatpush.bf16.msra.mxu1 %v6653_v13  ;;  %v1460_v40 = vld [vmem:[%s7030_s17 + $0xac] sm:$0xf]  ;;  %v6061_v22 = vld [vmem:[%s7030_s17 + $0xbc] sm:$0x1] }
 0x12c   : > { %1332 = vmatmul.bf16.gmra.mxu1 %v1196_v8  ;;  %1857 = vmatmul.bf16.gmra.mxu2 %v1721_v5  ;;  %v7724_v55 = vadd.f32 %v2943_v27, %v2267_v15  ;;  %v6059_v27 = vld [vmem:[%s7030_s17 + $0xb4] sm:$0xf]  ;;  %v1058_v8 = vrot.slane %v1056_v25, 4  ;;  %v712_v5 = vld [vmem:[%s7030_s17 + $0xb0] sm:$0x1]  ;;  %v1071_v15 = vrot.slane %v1069_v51, 4 }
 0x12d   : > { %2239 = vmatmul.bf16.gmra.mxu3 %v6633_v57  ;;  %v2709_v57 = vshrl.u32 %v6059_v27, 16  ;;  %v1075_v3 = vshll.u32 %v712_v5, 16  ;;  %v2724_v49 = vrot.slane %v2722_v26, 4  ;;  %v2850_v14 = vpack.c.b16 %v2832_v20, %v2831_v30  ;;  %v6634_v5 = vld [vmem:[%s7030_s17 + $0xa8] sm:$0xff] }
 0x12e   : > { %2985 = vmatmul.bf16.gmra.mxu0 %v2849_v47  ;;  %v2712_v47 = vshll.u32 %v6059_v27, 16  ;;  %v1062_v25 = vor.u32 %v1061_v12, %v1058_v8  ;;  %v1072_v51 = vor.u32 %v1071_v15, %v7750_v29  ;;  %v1459_v27 = vld [vmem:[%s7030_s17 + $0xa8] sm:$0xe]  ;;  %v1616_v1 = vrot.slane %v1460_v40, 5  ;;  %v1461_v12 = vld [vmem:[%s7030_s17 + $0xb0] sm:$0x1] }
 0x12f   : > { %v1818_v21 = vpop.f32.mrf.mxu2  ;;  %v2711_v2 = vrot.slane %v2709_v57, 4  ;;  %v5822_v57 = vrot.slane %v1459_v27, 9  ;;  %v2728_v52 = vshll.u32 %v6061_v22, 16  ;;  %v1619_v7 = vrot.slane %v1461_v12, 5 }
 0x130   : > { %v1886_v6 = vadd.f32 %v1818_v21, %v1361_v63  ;;  %v2200_v62 = vpop.f32.mrf.mxu3  ;;  %v2714_v37 = vrot.slane %v2712_v47, 5  ;;  %v7762_v21 = vrot.slane %v2718_v19, 5  ;;  %v1073_v26 = vrot.slane %v1072_v51, 4 }
 0x131   : > { %v1295_v34 = vpop.f32.mrf.mxu1  ;;  %v1618_v38 = vrot.slane %v1616_v1, 4 }
 0x132   : > { %v2268_v10 = vadd.f32 %v2200_v62, %v1886_v6  ;;  %v1362_v63 = vadd.f32 %v1295_v34, %v7364_v45  ;;  %v1722_v62 = vpack.c.b16 %v1704_v32, %v1703_v48  ;;  %v1063_v45 = vrot.slane %v1062_v25, 4  ;;  %v713_v48 = vld [vmem:[%s7030_s17 + $0xb4] sm:$0xf]  ;;  %v714_v32 = vld [vmem:[%s7030_s17 + $0xb8] sm:$0xf] }
 0x133   : > { %v2948_v23 = vpop.f32.mrf.mxu0  ;;  %v1077_v34 = vrot.slane %v1075_v3, 5  ;;  %v2715_v47 = vor.u32 %v2714_v37, %v2711_v2  ;;  %v2725_v13 = vor.u32 %v2724_v49, %v7762_v21  ;;  %v1617_v3 = vsel %vm7178_vm5, %v5822_v57, %v1616_v1  ;;  %v6062_v2 = vld [vmem:[%s7030_s17 + $0xc0] sm:$0xf] }
 0x134   : > { %v7771_v30 = vadd.f32 %v7718_v44, %v2268_v10  ;;  %v1068_v25 = vsel %vm7174_vm4, %v1063_v45, %v7750_v29  ;;  %v2730_v10 = vrot.slane %v2728_v52, 5  ;;  %v1080_v27 = vshrl.u32 %v713_v48, 16 }
 0x135   : > { %v2716_v40 = vrot.slane %v2715_v47, 4  ;;  %v2726_v44 = vrot.slane %v2725_v13, 4  ;;  %v1083_v49 = vshll.u32 %v713_v48, 16  ;;  %v1180_v12 = vunpack.c.l.b16 %v1068_v25  ;;  %v715_v48 = vld [vmem:[%s7030_s17 + $0xbc] sm:$0x1] }
 0x137   : > { %v1820_v24 = vpop.f32.mrf.mxu2  ;;  %v2721_v1 = vsel %vm7174_vm4, %v2716_v40, %v7762_v21  ;;  %v2731_v47 = vsel %vm7174_vm4, %v2726_v44, %v2730_v10  ;;  %v1463_v40 = vld [vmem:[%s7030_s17 + $0xb8] sm:$0xf]  ;;  %v6064_v44 = vld [vmem:[%s7030_s17 + $0xc8] sm:$0x1] }
 0x138   : > { %v1887_v59 = vadd.f32 %v1820_v24, %v1362_v63  ;;  %v2202_v6 = vpop.f32.mrf.mxu3  ;;  %v1078_v63 = vsel %vm7174_vm4, %v1073_v26, %v1077_v34  ;;  %v1089_v24 = vshll.u32 %v714_v32, 16  ;;  %v1085_v26 = vrot.slane %v1083_v49, 5 }
 0x139   : > { %v1298_v8 = vpop.f32.mrf.mxu1  ;;  %v1181_v57 = vunpack.c.l.b16 %v1078_v63  ;;  %v1099_v49 = vshll.u32 %v715_v48, 16 }
 0x13a   : > { %v2269_v15 = vadd.f32 %v2202_v6, %v1887_v59  ;;  %v1363_v37 = vadd.f32 %v1298_v8, %v7391_v18  ;;  %v1620_v59 = vsel %vm7178_vm5, %v1618_v38, %v1619_v7  ;;  %v2733_v6 = vshrl.u32 %v6062_v2, 16 }
 0x13b   : > { %v2951_v19 = vpop.f32.mrf.mxu0  ;;  %v1705_v18 = vunpack.c.l.b16 %v1617_v3  ;;  %v7792_v13 = vrot.slane %v1089_v24, 5  ;;  %v1706_v38 = vunpack.c.l.b16 %v1620_v59  ;;  %v2833_v7 = vunpack.c.l.b16 %v2721_v1  ;;  %v6635_v1 = vld [vmem:[%s7030_s17 + $0xb4] sm:$0xff] }
 0x13c   : > { %1337 = vmatmul.bf16.gmra.mxu1 %v1197_v50  ;;  %1862 = vmatmul.bf16.gmra.mxu2 %v1722_v62  ;;  %v7773_v20 = vadd.f32 %v2948_v23, %v2269_v15  ;;  %v6063_v23 = vld [vmem:[%s7030_s17 + $0xc4] sm:$0xf]  ;;  %v1093_v50 = vshrl.u32 %v714_v32, 16  ;;  %v2736_v62 = vshll.u32 %v6062_v2, 16  ;;  %v1082_v15 = vrot.slane %v1080_v27, 4 }
 0x13d   : > { %2244 = vmatmul.bf16.gmra.mxu3 %v6634_v5  ;;  %v2742_v8 = vshll.u32 %v6063_v23, 16  ;;  %v2746_v5 = vshrl.u32 %v6063_v23, 16  ;;  %v2735_v21 = vrot.slane %v2733_v6, 4  ;;  %v2834_v3 = vunpack.c.l.b16 %v2731_v47 }
 0x13e   : > { %2990 = vmatmul.bf16.gmra.mxu0 %v2850_v14  ;;  %v1095_v52 = vrot.slane %v1093_v50, 4  ;;  %v2738_v32 = vrot.slane %v2736_v62, 5  ;;  %v1198_v23 = vpack.c.b16 %v1181_v57, %v1180_v12  ;;  %v1623_v59 = vrot.slane %v1463_v40, 5 }
 0x13f   : > { %v1823_v51 = vpop.f32.mrf.mxu2  ;;  %v2744_v2 = vrot.slane %v2742_v8, 5  ;;  %v2748_v25 = vrot.slane %v2746_v5, 4  ;;  %v1464_v8 = vld [vmem:[%s7030_s17 + $0xbc] sm:$0x1]  ;;  %v1101_v47 = vrot.slane %v1099_v49, 5 }
 0x140   : > { %v1888_v22 = vadd.f32 %v1823_v51, %v1363_v37  ;;  %v2205_v29 = vpop.f32.mrf.mxu3  ;;  %v1086_v51 = vor.u32 %v1085_v26, %v1082_v15  ;;  %v1096_v27 = vor.u32 %v1095_v52, %v7792_v13  ;;  %v2739_v6 = vor.u32 %v2738_v32, %v2735_v21  ;;  %v6370_v21 = vld [vmem:[%s7030_s17 + $0x18] sm:$0xf] }
 0x141   : > { %v1300_v14 = vpop.f32.mrf.mxu1  ;;  %v2749_v5 = vor.u32 %v2748_v25, %v2744_v2  ;;  %v1626_v26 = vrot.slane %v1464_v8, 5  ;;  %v4026_v49 = vshll.u32 %v6370_v21, 16 }
 0x142   : > { %v2270_v45 = vadd.f32 %v2205_v29, %v1888_v22  ;;  %v1364_v63 = vadd.f32 %v1300_v14, %v7418_v53  ;;  %v1723_v22 = vpack.c.b16 %v1706_v38, %v1705_v18  ;;  %v1462_v29 = vld [vmem:[%s7030_s17 + $0xb4] sm:$0xe]  ;;  %v2752_v53 = vshll.u32 %v6064_v44, 16 }
 0x143   : > { %v2953_v34 = vpop.f32.mrf.mxu0  ;;  %v1087_v12 = vrot.slane %v1086_v51, 4  ;;  %v1097_v57 = vrot.slane %v1096_v27, 4  ;;  %v5823_v15 = vrot.slane %v1462_v29, 9  ;;  %v1625_v18 = vrot.slane %v1623_v59, 4 }
 0x144   : > { %v7796_v37 = vadd.f32 %v2951_v19, %v2270_v45  ;;  %v2851_v19 = vpack.c.b16 %v2834_v3, %v2833_v7  ;;  %v2740_v52 = vrot.slane %v2739_v6, 4  ;;  %v2750_v7 = vrot.slane %v2749_v5, 4  ;;  %v6371_v3 = vld [vmem:[%s7030_s17 + $0x1c] sm:$0xf]  ;;  %v6114_v5 = vld [vmem:[%s7030_s17 + $0x10] sm:$0xf] }
 0x145   : > { %v2754_v48 = vrot.slane %v2752_v53, 5  ;;  %v1092_v25 = vsel %vm7174_vm4, %v1087_v12, %v7792_v13  ;;  %v4023_v51 = vshrl.u32 %v6370_v21, 16  ;;  %v3168_v21 = vrot.slane %v6114_v5, 5 }
 0x147   : > { %v1825_v10 = vpop.f32.mrf.mxu2  ;;  %v2755_v13 = vsel %vm7174_vm4, %v2750_v7, %v2754_v48  ;;  %v4025_v53 = vrot.slane %v4023_v51, 4  ;;  %v6466_v51 = vld [vmem:[%s7030_s17 + $0x18] sm:$0xe] }
 0x148   : > { %v1889_v24 = vadd.f32 %v1825_v10, %v1364_v63  ;;  %v2207_v50 = vpop.f32.mrf.mxu3  ;;  %v1102_v63 = vsel %vm7174_vm4, %v1097_v57, %v1101_v47  ;;  %v2836_v8 = vunpack.c.l.b16 %v2755_v13 }
 0x149   : > { %v1303_v62 = vpop.f32.mrf.mxu1  ;;  %v1183_v6 = vunpack.c.l.b16 %v1102_v63 }
 0x14a   : > { %v2271_v14 = vadd.f32 %v2207_v50, %v1889_v24  ;;  %v1365_v32 = vadd.f32 %v1303_v62, %v7435_v28  ;;  %v2745_v28 = vsel %vm7174_vm4, %v2740_v52, %v2744_v2  ;;  %v4032_v24 = vshll.u32 %v6371_v3, 16 }
 0x14b   : > { %v2956_v45 = vpop.f32.mrf.mxu0  ;;  %v4036_v50 = vshrl.u32 %v6371_v3, 16  ;;  %v6636_v3 = vld [vmem:[%s7030_s17 + $0xc0] sm:$0xff] }
 0x14c   : > { %1342 = vmatmul.bf16.gmra.mxu1 %v1198_v23  ;;  %1867 = vmatmul.bf16.gmra.mxu2 %v1723_v22  ;;  %v7804_v38 = vadd.f32 %v2953_v34, %v2271_v14  ;;  %v1624_v34 = vsel %vm7178_vm5, %v5823_v15, %v1623_v59  ;;  %v1627_v23 = vsel %vm7178_vm5, %v1625_v18, %v1626_v26  ;;  %v1182_v59 = vunpack.c.l.b16 %v1092_v25  ;;  %v6372_v15 = vld [vmem:[%s7030_s17 + $0x20] sm:$0x1]  ;;  %v6467_v26 = vld [vmem:[%s7030_s17 + $0x1c] sm:$0xf]  ;;  %v6113_v25 = vld [vmem:[%s7030_s17 + $0xc] sm:$0xe] }
 0x14d   : > { %2249 = vmatmul.bf16.gmra.mxu3 %v6635_v1  ;;  %v1707_v62 = vunpack.c.l.b16 %v1624_v34  ;;  %v1708_v1 = vunpack.c.l.b16 %v1627_v23  ;;  %v4028_v14 = vrot.slane %v4026_v49, 5  ;;  %v7825_v12 = vrot.slane %v4032_v24, 5  ;;  %v6115_v23 = vld [vmem:[%s7030_s17 + $0x14] sm:$0x1]  ;;  %v6373_v24 = vld [vmem:[%s7030_s17 + $0x24] sm:$0xf] }
 0x14e   : > { %2995 = vmatmul.bf16.gmra.mxu0 %v2851_v19  ;;  %v2835_v19 = vunpack.c.l.b16 %v2745_v28  ;;  %v4038_v57 = vrot.slane %v4036_v50, 4  ;;  %v4042_v34 = vshll.u32 %v6372_v15, 16  ;;  %v4818_v28 = vrot.slane %v6467_v26, 5  ;;  %v6374_v50 = vld [vmem:[%s7030_s17 + $0x28] sm:$0xf] }
 0x14f   : > { %v1828_v40 = vpop.f32.mrf.mxu2  ;;  %v1724_v48 = vpack.c.b16 %v1708_v1, %v1707_v62  ;;  %v4029_v63 = vor.u32 %v4028_v14, %v4025_v53  ;;  %v6161_v13 = vrot.slane %v6113_v25, 9  ;;  %v3170_v49 = vrot.slane %v3168_v21, 4 }
 0x150   : > { %v1890_v44 = vadd.f32 %v1828_v40, %v1365_v32  ;;  %v2210_v10 = vpop.f32.mrf.mxu3  ;;  %v2852_v40 = vpack.c.b16 %v2836_v8, %v2835_v19  ;;  %v4044_v1 = vrot.slane %v4042_v34, 5  ;;  %v6514_v8 = vrot.slane %v6466_v51, 9  ;;  %v6375_v51 = vld [vmem:[%s7030_s17 + $0x2c] sm:$0x1] }
 0x151   : > { %v1305_v27 = vpop.f32.mrf.mxu1  ;;  %v4820_v5 = vrot.slane %v4818_v28, 4  ;;  %v4056_v15 = vshll.u32 %v6374_v50, 16 }
 0x152   : > { %v2272_v22 = vadd.f32 %v2210_v10, %v1890_v44  ;;  %v1366_v47 = vadd.f32 %v1305_v27, %v7465_v9  ;;  %v4039_v9 = vor.u32 %v4038_v57, %v7825_v12  ;;  %v6468_v27 = vld [vmem:[%s7030_s17 + $0x20] sm:$0x1]  ;;  %v4047_v57 = vshrl.u32 %v6373_v24, 16 }
 0x153   : > { %v2958_v29 = vpop.f32.mrf.mxu0  ;;  %v4821_v53 = vrot.slane %v6468_v27, 5  ;;  %v7855_v34 = vrot.slane %v4056_v15, 5 }
 0x154   : > { %v7822_v2 = vadd.f32 %v2956_v45, %v2272_v22  ;;  %v1199_v45 = vpack.c.b16 %v1183_v6, %v1182_v59  ;;  %v3171_v59 = vrot.slane %v6115_v23, 5  ;;  %v4030_v6 = vrot.slane %v4029_v63, 4 }
 0x155   : > { %v4040_v62 = vrot.slane %v4039_v9, 4  ;;  %v4822_v25 = vsel %vm7178_vm5, %v4820_v5, %v4821_v53  ;;  %v4049_v63 = vrot.slane %v4047_v57, 4  ;;  %v4066_v5 = vshll.u32 %v6375_v51, 16  ;;  %v6661_v57 = vld [vmem:[%s7030_s17 + $0x18] sm:$0xff]  ;;  %v6376_v51 = vld [vmem:[%s7030_s17 + $0x30] sm:$0xf] }
 0x157   : > { %v1830_v18 = vpop.f32.mrf.mxu2 }
 0x158   : > { %v1891_v52 = vadd.f32 %v1830_v18, %v1366_v47  ;;  %v2212_v7 = vpop.f32.mrf.mxu3  ;;  %v4050_v47 = vshll.u32 %v6373_v24, 16  ;;  %v4060_v18 = vshrl.u32 %v6374_v50, 16  ;;  %v4978_v24 = vunpack.c.l.b16 %v4822_v25  ;;  %v6470_v50 = vld [vmem:[%s7030_s17 + $0x28] sm:$0xf] }
 0x159   : > { %v1308_v32 = vpop.f32.mrf.mxu1  ;;  %v4825_v15 = vrot.slane %v6470_v50, 5 }
 0x15a   : > { %v2273_v44 = vadd.f32 %v2212_v7, %v1891_v52  ;;  %v1367_v19 = vadd.f32 %v1308_v32, %v7494_v0  ;;  %v3169_v7 = vsel %vm7178_vm5, %v6161_v13, %v3168_v21  ;;  %v4035_v0 = vsel %vm7174_vm4, %v4030_v6, %v7825_v12  ;;  %v6117_v21 = vld [vmem:[%s7030_s17 + $0x1c] sm:$0xf] }
 0x15b   : > { %v2961_v10 = vpop.f32.mrf.mxu0  ;;  %v4052_v9 = vrot.slane %v4050_v47, 5  ;;  %v3327_v12 = vunpack.c.l.b16 %v3169_v7  ;;  %v4455_v13 = vunpack.c.l.b16 %v4035_v0  ;;  %v3175_v6 = vrot.slane %v6117_v21, 5  ;;  %v6118_v47 = vld [vmem:[%s7030_s17 + $0x20] sm:$0x1]  ;;  %v6469_v7 = vld [vmem:[%s7030_s17 + $0x24] sm:$0xe] }
 0x15c   : > { %1347 = vmatmul.bf16.gmra.mxu1 %v1199_v45  ;;  %1872 = vmatmul.bf16.gmra.mxu2 %v1724_v48  ;;  %v7838_v22 = vadd.f32 %v2958_v29, %v2273_v44  ;;  %v3172_v45 = vsel %vm7178_vm5, %v3170_v49, %v3171_v59  ;;  %v4062_v44 = vrot.slane %v4060_v18, 4  ;;  %v4068_v21 = vrot.slane %v4066_v5, 5 }
 0x15d   : > { %2254 = vmatmul.bf16.gmra.mxu3 %v6636_v3  ;;  %v4045_v3 = vsel %vm7174_vm4, %v4040_v62, %v4044_v1  ;;  %v3328_v23 = vunpack.c.l.b16 %v3172_v45  ;;  %v6116_v1 = vld [vmem:[%s7030_s17 + $0x18] sm:$0xe] }
 0x15e   : > { %3000 = vmatmul.bf16.gmra.mxu0 %v2852_v40  ;;  %v4819_v40 = vsel %vm7178_vm5, %v6514_v8, %v4818_v28  ;;  %v4456_v49 = vunpack.c.l.b16 %v4045_v3  ;;  %v4063_v8 = vor.u32 %v4062_v44, %v7855_v34  ;;  %v6162_v0 = vrot.slane %v6116_v1, 9 }
 0x15f   : > { %v1833_v14 = vpop.f32.mrf.mxu2  ;;  %v4977_v28 = vunpack.c.l.b16 %v4819_v40  ;;  %v3178_v3 = vrot.slane %v6118_v47, 5 }
 0x160   : > { %v1892_v26 = vadd.f32 %v1833_v14, %v1367_v19  ;;  %v2215_v29 = vpop.f32.mrf.mxu3  ;;  %v4053_v19 = vor.u32 %v4052_v9, %v4049_v63  ;;  %v3359_v14 = vpack.c.b16 %v3328_v23, %v3327_v12  ;;  %v4064_v25 = vrot.slane %v4063_v8, 4 }
 0x161   : > { %v1310_v52 = vpop.f32.mrf.mxu1  ;;  %v6515_v63 = vrot.slane %v6469_v7, 9  ;;  %v4827_v9 = vrot.slane %v4825_v15, 4  ;;  %v4074_v8 = vshll.u32 %v6376_v51, 16  ;;  %v6120_v7 = vld [vmem:[%s7030_s17 + $0x28] sm:$0xf] }
 0x162   : > { %v2274_v48 = vadd.f32 %v2215_v29, %v1892_v26  ;;  %v1368_v59 = vadd.f32 %v1310_v52, %v7517_v61  ;;  %v4487_v26 = vpack.c.b16 %v4456_v49, %v4455_v13  ;;  %v5009_v29 = vpack.c.b16 %v4978_v24, %v4977_v28  ;;  %v6471_v61 = vld [vmem:[%s7030_s17 + $0x2c] sm:$0x1]  ;;  %v6377_v13 = vld [vmem:[%s7030_s17 + $0x34] sm:$0xf] }
 0x163   : > { %v2963_v32 = vpop.f32.mrf.mxu0  ;;  %v4054_v40 = vrot.slane %v4053_v19, 4  ;;  %v4828_v44 = vrot.slane %v6471_v61, 5  ;;  %v3176_v28 = vsel %vm7178_vm5, %v6162_v0, %v3175_v6  ;;  %v4071_v19 = vshrl.u32 %v6376_v51, 16 }
 0x164   : > { %v7858_v27 = vadd.f32 %v2961_v10, %v2274_v48  ;;  %v3177_v48 = vrot.slane %v3175_v6, 4  ;;  %v4080_v5 = vshll.u32 %v6377_v13, 16  ;;  %v3182_v51 = vrot.slane %v6120_v7, 5 }
 0x165   : > { %v4059_v50 = vsel %vm7174_vm4, %v4054_v40, %v7855_v34  ;;  %v4829_v1 = vsel %vm7178_vm5, %v4827_v9, %v4828_v44  ;;  %v4073_v61 = vrot.slane %v4071_v19, 4  ;;  %v6378_v40 = vld [vmem:[%s7030_s17 + $0x38] sm:$0x1] }
 0x166   : > { %v3179_v24 = vsel %vm7178_vm5, %v3177_v48, %v3178_v3  ;;  %v4457_v47 = vunpack.c.l.b16 %v4059_v50  ;;  %v7889_v0 = vrot.slane %v4080_v5, 5  ;;  %v4090_v50 = vshll.u32 %v6378_v40, 16  ;;  %v6379_v5 = vld [vmem:[%s7030_s17 + $0x3c] sm:$0xf] }
 0x167   : > { %v1835_v62 = vpop.f32.mrf.mxu2 }
 0x168   : > { %v1893_v10 = vadd.f32 %v1835_v62, %v1368_v59  ;;  %v2217_v53 = vpop.f32.mrf.mxu3  ;;  %v4069_v62 = vsel %vm7174_vm4, %v4064_v25, %v4068_v21  ;;  %v6473_v21 = vld [vmem:[%s7030_s17 + $0x34] sm:$0xf] }
 0x169   : > { %v1313_v18 = vpop.f32.mrf.mxu1 }
 0x16a   : > { %v2275_v52 = vadd.f32 %v2217_v53, %v1893_v10  ;;  %v1369_v23 = vadd.f32 %v1313_v18, %v7353_v33  ;;  %v4826_v33 = vsel %vm7178_vm5, %v6515_v63, %v4825_v15  ;;  %v4084_v10 = vshrl.u32 %v6377_v13, 16 }
 0x16b   : > { %v2966_v45 = vpop.f32.mrf.mxu0  ;;  %v4458_v18 = vunpack.c.l.b16 %v4069_v62  ;;  %v4980_v15 = vunpack.c.l.b16 %v4829_v1  ;;  %v6121_v62 = vld [vmem:[%s7030_s17 + $0x2c] sm:$0x1]  ;;  %v6472_v1 = vld [vmem:[%s7030_s17 + $0x30] sm:$0xe] }
 0x16c   : > { %3447 = vmatmul.bf16.vlgmr.msra.gmra.mxu1 %v3359_v14  ;;  %3829 = vmatmul.bf16.vlgmr.msra.gmra.mxu2 %v6661_v57  ;;  %v7868_v12 = vadd.f32 %v2963_v32, %v2275_v52  ;;  %v3329_v14 = vunpack.c.l.b16 %v3176_v28  ;;  %v3330_v57 = vunpack.c.l.b16 %v3179_v24  ;;  %v4076_v52 = vrot.slane %v4074_v8, 5  ;;  %v6119_v28 = vld [vmem:[%s7030_s17 + $0x24] sm:$0xe] }
 0x16d   : > { %4575 = vmatmul.bf16.vlgmr.msra.gmra.mxu3 %v4487_v26  ;;  %v4979_v26 = vunpack.c.l.b16 %v4826_v33  ;;  %v4086_v48 = vrot.slane %v4084_v10, 4  ;;  %v4832_v33 = vrot.slane %v6473_v21, 5  ;;  %v6163_v19 = vrot.slane %v6119_v28, 9  ;;  %v6380_v10 = vld [vmem:[%s7030_s17 + $0x40] sm:$0xf] }
 0x16e   : > { %5097 = vmatmul.bf16.vlgmr.msra.gmra.mxu0 %v5009_v29  ;;  %v3360_v44 = vpack.c.b16 %v3330_v57, %v3329_v14  ;;  %v4077_v24 = vor.u32 %v4076_v52, %v4073_v61  ;;  %v3184_v8 = vrot.slane %v3182_v51, 4  ;;  %v3185_v14 = vrot.slane %v6121_v62, 5 }
 0x16f   : > { %v1838_v49 = vpop.f32.mrf.mxu2  ;;  %v4834_v7 = vrot.slane %v4832_v33, 4  ;;  %v4104_v40 = vshll.u32 %v6380_v10, 16 }
 0x170   : > { %v1894_v59 = vadd.f32 %v1838_v49, %v1369_v23  ;;  %v2220_v32 = vpop.f32.mrf.mxu3  ;;  %v4488_v23 = vpack.c.b16 %v4458_v18, %v4457_v47  ;;  %v5010_v49 = vpack.c.b16 %v4980_v15, %v4979_v26  ;;  %v4078_v57 = vrot.slane %v4077_v24, 4 }
 0x171   : > { %v1315_v6 = vpop.f32.mrf.mxu1  ;;  %v4092_v18 = vrot.slane %v4090_v50, 5  ;;  %v6516_v15 = vrot.slane %v6472_v1, 9  ;;  %v7919_v50 = vrot.slane %v4104_v40, 5  ;;  %v6381_v1 = vld [vmem:[%s7030_s17 + $0x44] sm:$0x1] }
 0x172   : > { %v2276_v53 = vadd.f32 %v2220_v32, %v1894_v59  ;;  %v1370_v3 = vadd.f32 %v1315_v6, %v7383_v4  ;;  %v4087_v4 = vor.u32 %v4086_v48, %v7889_v0  ;;  %v6474_v6 = vld [vmem:[%s7030_s17 + $0x38] sm:$0x1]  ;;  %v4095_v48 = vshrl.u32 %v6379_v5, 16 }
 0x173   : > { %v2968_v34 = vpop.f32.mrf.mxu0  ;;  %v4835_v61 = vrot.slane %v6474_v6, 5 }
 0x174   : > { %v7886_v29 = vadd.f32 %v2966_v45, %v2276_v53  ;;  %v6662_v45 = vld [vmem:[%s7030_s17 + $0x24] sm:$0xff]  ;;  %v4088_v47 = vrot.slane %v4087_v4, 4  ;;  %v4097_v24 = vrot.slane %v4095_v48, 4  ;;  %v6663_v48 = vld [vmem:[%s7030_s17 + $0x30] sm:$0xff] }
 0x175   : > { %v4836_v28 = vsel %vm7178_vm5, %v4834_v7, %v4835_v61  ;;  %v4114_v7 = vshll.u32 %v6381_v1, 16  ;;  %v6382_v1 = vld [vmem:[%s7030_s17 + $0x48] sm:$0xf] }
 0x177   : > { %v1840_v25 = vpop.f32.mrf.mxu2 }
 0x178   : > { %v1895_v63 = vadd.f32 %v1840_v25, %v1370_v3  ;;  %v2222_v9 = vpop.f32.mrf.mxu3  ;;  %v4098_v3 = vshll.u32 %v6379_v5, 16  ;;  %v4108_v25 = vshrl.u32 %v6380_v10, 16  ;;  %v4982_v5 = vunpack.c.l.b16 %v4836_v28  ;;  %v6476_v10 = vld [vmem:[%s7030_s17 + $0x40] sm:$0xf] }
 0x179   : > { %v1318_v13 = vpop.f32.mrf.mxu1  ;;  %v4839_v40 = vrot.slane %v6476_v10, 5 }
 0x17a   : > { %v2277_v59 = vadd.f32 %v2222_v9, %v1895_v63  ;;  %v1371_v26 = vadd.f32 %v1318_v13, %v7405_v41  ;;  %v3183_v9 = vsel %vm7178_vm5, %v6163_v19, %v3182_v51  ;;  %v4083_v41 = vsel %vm7174_vm4, %v4078_v57, %v7889_v0  ;;  %v6123_v51 = vld [vmem:[%s7030_s17 + $0x34] sm:$0xf] }
 0x17b   : > { %v2971_v32 = vpop.f32.mrf.mxu0  ;;  %v4093_v13 = vsel %vm7174_vm4, %v4088_v47, %v4092_v18  ;;  %v4100_v4 = vrot.slane %v4098_v3, 5  ;;  %v3331_v0 = vunpack.c.l.b16 %v3183_v9  ;;  %v4459_v19 = vunpack.c.l.b16 %v4083_v41  ;;  %v6122_v18 = vld [vmem:[%s7030_s17 + $0x30] sm:$0xe]  ;;  %v6124_v3 = vld [vmem:[%s7030_s17 + $0x38] sm:$0x1] }
 0x17c   : > { %3452 = vmatmul.bf16.gmra.mxu1 %v3360_v44  ;;  %3834 = vmatmul.bf16.gmra.mxu2 %v6662_v45  ;;  %v7902_v53 = vadd.f32 %v2968_v34, %v2277_v59  ;;  %v3186_v44 = vsel %vm7178_vm5, %v3184_v8, %v3185_v14  ;;  %v4110_v59 = vrot.slane %v4108_v25, 4  ;;  %v4460_v8 = vunpack.c.l.b16 %v4093_v13  ;;  %v6475_v9 = vld [vmem:[%s7030_s17 + $0x3c] sm:$0xe] }
 0x17d   : > { %4580 = vmatmul.bf16.gmra.mxu3 %v4488_v23  ;;  %v3332_v62 = vunpack.c.l.b16 %v3186_v44  ;;  %v3189_v57 = vrot.slane %v6123_v51, 5  ;;  %v6164_v41 = vrot.slane %v6122_v18, 9  ;;  %v3192_v13 = vrot.slane %v6124_v3, 5 }
 0x17e   : > { %5102 = vmatmul.bf16.gmra.mxu0 %v5010_v49  ;;  %v4833_v49 = vsel %vm7178_vm5, %v6516_v15, %v4832_v33  ;;  %v4111_v15 = vor.u32 %v4110_v59, %v7919_v50  ;;  %v4116_v51 = vrot.slane %v4114_v7, 5 }
 0x17f   : > { %v1843_v52 = vpop.f32.mrf.mxu2  ;;  %v4981_v33 = vunpack.c.l.b16 %v4833_v49 }
 0x180   : > { %v1896_v21 = vadd.f32 %v1843_v52, %v1371_v26  ;;  %v2225_v34 = vpop.f32.mrf.mxu3  ;;  %v4101_v26 = vor.u32 %v4100_v4, %v4097_v24  ;;  %v3361_v52 = vpack.c.b16 %v3332_v62, %v3331_v0  ;;  %v4112_v28 = vrot.slane %v4111_v15, 4 }
 0x181   : > { %v1320_v63 = vpop.f32.mrf.mxu1  ;;  %v6517_v24 = vrot.slane %v6475_v9, 9  ;;  %v4841_v4 = vrot.slane %v4839_v40, 4  ;;  %v4122_v15 = vshll.u32 %v6382_v1, 16  ;;  %v6126_v9 = vld [vmem:[%s7030_s17 + $0x40] sm:$0xf] }
 0x182   : > { %v2278_v45 = vadd.f32 %v2225_v34, %v1896_v21  ;;  %v1372_v14 = vadd.f32 %v1320_v63, %v7429_v16  ;;  %v4489_v21 = vpack.c.b16 %v4460_v8, %v4459_v19  ;;  %v5011_v34 = vpack.c.b16 %v4982_v5, %v4981_v33  ;;  %v6477_v16 = vld [vmem:[%s7030_s17 + $0x44] sm:$0x1]  ;;  %v6383_v19 = vld [vmem:[%s7030_s17 + $0x4c] sm:$0xf] }
 0x183   : > { %v2973_v23 = vpop.f32.mrf.mxu0  ;;  %v4102_v49 = vrot.slane %v4101_v26, 4  ;;  %v4842_v59 = vrot.slane %v6477_v16, 5  ;;  %v3190_v33 = vsel %vm7178_vm5, %v6164_v41, %v3189_v57  ;;  %v4119_v26 = vshrl.u32 %v6382_v1, 16 }
 0x184   : > { %v7922_v6 = vadd.f32 %v2971_v32, %v2278_v45  ;;  %v3191_v45 = vrot.slane %v3189_v57, 4  ;;  %v4128_v7 = vshll.u32 %v6383_v19, 16  ;;  %v3196_v1 = vrot.slane %v6126_v9, 5 }
 0x185   : > { %v4107_v10 = vsel %vm7174_vm4, %v4102_v49, %v7919_v50  ;;  %v4843_v18 = vsel %vm7178_vm5, %v4841_v4, %v4842_v59  ;;  %v4121_v16 = vrot.slane %v4119_v26, 4  ;;  %v6384_v49 = vld [vmem:[%s7030_s17 + $0x50] sm:$0x1] }
 0x186   : > { %v3193_v5 = vsel %vm7178_vm5, %v3191_v45, %v3192_v13  ;;  %v4461_v3 = vunpack.c.l.b16 %v4107_v10  ;;  %v7953_v41 = vrot.slane %v4128_v7, 5  ;;  %v4138_v10 = vshll.u32 %v6384_v49, 16  ;;  %v6385_v7 = vld [vmem:[%s7030_s17 + $0x54] sm:$0xf] }
 0x187   : > { %v1845_v47 = vpop.f32.mrf.mxu2 }
 0x188   : > { %v1897_v32 = vadd.f32 %v1845_v47, %v1372_v14  ;;  %v2227_v61 = vpop.f32.mrf.mxu3  ;;  %v4117_v47 = vsel %vm7174_vm4, %v4112_v28, %v4116_v51  ;;  %v6479_v51 = vld [vmem:[%s7030_s17 + $0x4c] sm:$0xf] }
 0x189   : > { %v1323_v25 = vpop.f32.mrf.mxu1 }
 0x18a   : > { %v2279_v63 = vadd.f32 %v2227_v61, %v1897_v32  ;;  %v1373_v62 = vadd.f32 %v1323_v25, %v7450_v60  ;;  %v4840_v60 = vsel %vm7178_vm5, %v6517_v24, %v4839_v40  ;;  %v4132_v32 = vshrl.u32 %v6383_v19, 16 }
 0x18b   : > { %v2976_v44 = vpop.f32.mrf.mxu0  ;;  %v4462_v25 = vunpack.c.l.b16 %v4117_v47  ;;  %v4984_v40 = vunpack.c.l.b16 %v4843_v18  ;;  %v6127_v47 = vld [vmem:[%s7030_s17 + $0x44] sm:$0x1]  ;;  %v6478_v18 = vld [vmem:[%s7030_s17 + $0x48] sm:$0xe] }
 0x18c   : > { %3457 = vmatmul.bf16.gmra.mxu1 %v3361_v52  ;;  %3839 = vmatmul.bf16.gmra.mxu2 %v6663_v48  ;;  %v7932_v0 = vadd.f32 %v2973_v23, %v2279_v63  ;;  %v3333_v52 = vunpack.c.l.b16 %v3190_v33  ;;  %v3334_v48 = vunpack.c.l.b16 %v3193_v5  ;;  %v4124_v63 = vrot.slane %v4122_v15, 5  ;;  %v6125_v33 = vld [vmem:[%s7030_s17 + $0x3c] sm:$0xe] }
 0x18d   : > { %4585 = vmatmul.bf16.gmra.mxu3 %v4489_v21  ;;  %v4983_v21 = vunpack.c.l.b16 %v4840_v60  ;;  %v4134_v45 = vrot.slane %v4132_v32, 4  ;;  %v4846_v60 = vrot.slane %v6479_v51, 5  ;;  %v6165_v26 = vrot.slane %v6125_v33, 9  ;;  %v6386_v32 = vld [vmem:[%s7030_s17 + $0x58] sm:$0xf] }
 0x18e   : > { %5107 = vmatmul.bf16.gmra.mxu0 %v5011_v34  ;;  %v3362_v59 = vpack.c.b16 %v3334_v48, %v3333_v52  ;;  %v4125_v5 = vor.u32 %v4124_v63, %v4121_v16  ;;  %v3198_v15 = vrot.slane %v3196_v1, 4  ;;  %v3199_v52 = vrot.slane %v6127_v47, 5 }
 0x18f   : > { %v1848_v8 = vpop.f32.mrf.mxu2  ;;  %v4848_v9 = vrot.slane %v4846_v60, 4  ;;  %v4152_v49 = vshll.u32 %v6386_v32, 16 }
 0x190   : > { %v1898_v14 = vadd.f32 %v1848_v8, %v1373_v62  ;;  %v2230_v23 = vpop.f32.mrf.mxu3  ;;  %v4490_v62 = vpack.c.b16 %v4462_v25, %v4461_v3  ;;  %v5012_v8 = vpack.c.b16 %v4984_v40, %v4983_v21  ;;  %v4126_v48 = vrot.slane %v4125_v5, 4 }
 0x191   : > { %v1325_v57 = vpop.f32.mrf.mxu1  ;;  %v4140_v25 = vrot.slane %v4138_v10, 5  ;;  %v6518_v40 = vrot.slane %v6478_v18, 9  ;;  %v7983_v10 = vrot.slane %v4152_v49, 5  ;;  %v6387_v18 = vld [vmem:[%s7030_s17 + $0x5c] sm:$0x1] }
 0x192   : > { %v2280_v61 = vadd.f32 %v2230_v23, %v1898_v14  ;;  %v1374_v13 = vadd.f32 %v1325_v57, %v7488_v54  ;;  %v4135_v54 = vor.u32 %v4134_v45, %v7953_v41  ;;  %v6480_v57 = vld [vmem:[%s7030_s17 + $0x50] sm:$0x1]  ;;  %v4143_v45 = vshrl.u32 %v6385_v7, 16 }
 0x193   : > { %v2978_v50 = vpop.f32.mrf.mxu0  ;;  %v4849_v16 = vrot.slane %v6480_v57, 5 }
 0x194   : > { %v7950_v34 = vadd.f32 %v2976_v44, %v2280_v61  ;;  %v6664_v44 = vld [vmem:[%s7030_s17 + $0x3c] sm:$0xff]  ;;  %v4136_v3 = vrot.slane %v4135_v54, 4  ;;  %v4145_v5 = vrot.slane %v4143_v45, 4  ;;  %v6665_v45 = vld [vmem:[%s7030_s17 + $0x48] sm:$0xff] }
 0x195   : > { %v4850_v33 = vsel %vm7178_vm5, %v4848_v9, %v4849_v16  ;;  %v4162_v9 = vshll.u32 %v6387_v18, 16  ;;  %v6388_v18 = vld [vmem:[%s7030_s17 + $0x60] sm:$0xf] }
 0x197   : > { %v1850_v28 = vpop.f32.mrf.mxu2 }
 0x198   : > { %v1899_v24 = vadd.f32 %v1850_v28, %v1374_v13  ;;  %v2232_v4 = vpop.f32.mrf.mxu3  ;;  %v4146_v13 = vshll.u32 %v6385_v7, 16  ;;  %v4156_v28 = vshrl.u32 %v6386_v32, 16  ;;  %v4986_v7 = vunpack.c.l.b16 %v4850_v33  ;;  %v6482_v32 = vld [vmem:[%s7030_s17 + $0x58] sm:$0xf] }
 0x199   : > { %v1328_v19 = vpop.f32.mrf.mxu1  ;;  %v4853_v49 = vrot.slane %v6482_v32, 5 }
 0x19a   : > { %v2281_v14 = vadd.f32 %v2232_v4, %v1899_v24  ;;  %v1375_v21 = vadd.f32 %v1328_v19, %v7509_v43  ;;  %v3197_v4 = vsel %vm7178_vm5, %v6165_v26, %v3196_v1  ;;  %v4131_v43 = vsel %vm7174_vm4, %v4126_v48, %v7953_v41  ;;  %v6129_v1 = vld [vmem:[%s7030_s17 + $0x4c] sm:$0xf] }
 0x19b   : > { %v2981_v23 = vpop.f32.mrf.mxu0  ;;  %v4141_v19 = vsel %vm7174_vm4, %v4136_v3, %v4140_v25  ;;  %v4148_v54 = vrot.slane %v4146_v13, 5  ;;  %v3335_v41 = vunpack.c.l.b16 %v3197_v4  ;;  %v4463_v26 = vunpack.c.l.b16 %v4131_v43  ;;  %v6128_v25 = vld [vmem:[%s7030_s17 + $0x48] sm:$0xe]  ;;  %v6130_v13 = vld [vmem:[%s7030_s17 + $0x50] sm:$0x1] }
 0x19c   : > { %3462 = vmatmul.bf16.gmra.mxu1 %v3362_v59  ;;  %3844 = vmatmul.bf16.gmra.mxu2 %v6664_v44  ;;  %v7966_v61 = vadd.f32 %v2978_v50, %v2281_v14  ;;  %v3200_v59 = vsel %vm7178_vm5, %v3198_v15, %v3199_v52  ;;  %v4158_v14 = vrot.slane %v4156_v28, 4  ;;  %v4464_v15 = vunpack.c.l.b16 %v4141_v19  ;;  %v6481_v4 = vld [vmem:[%s7030_s17 + $0x54] sm:$0xe] }
 0x19d   : > { %4590 = vmatmul.bf16.gmra.mxu3 %v4490_v62  ;;  %v3336_v47 = vunpack.c.l.b16 %v3200_v59  ;;  %v3203_v48 = vrot.slane %v6129_v1, 5  ;;  %v6166_v43 = vrot.slane %v6128_v25, 9  ;;  %v3206_v19 = vrot.slane %v6130_v13, 5 }
 0x19e   : > { %5112 = vmatmul.bf16.gmra.mxu0 %v5012_v8  ;;  %v4847_v8 = vsel %vm7178_vm5, %v6518_v40, %v4846_v60  ;;  %v4159_v40 = vor.u32 %v4158_v14, %v7983_v10  ;;  %v4164_v1 = vrot.slane %v4162_v9, 5 }
 0x19f   : > { %v1853_v63 = vpop.f32.mrf.mxu2  ;;  %v4985_v60 = vunpack.c.l.b16 %v4847_v8 }
 0x1a0   : > { %v1900_v51 = vadd.f32 %v1853_v63, %v1375_v21  ;;  %v2235_v50 = vpop.f32.mrf.mxu3  ;;  %v4149_v21 = vor.u32 %v4148_v54, %v4145_v5  ;;  %v3363_v63 = vpack.c.b16 %v3336_v47, %v3335_v41  ;;  %v4160_v33 = vrot.slane %v4159_v40, 4 }
 0x1a1   : > { %v1330_v24 = vpop.f32.mrf.mxu1  ;;  %v6519_v5 = vrot.slane %v6481_v4, 9  ;;  %v4855_v54 = vrot.slane %v4853_v49, 4  ;;  %v4170_v40 = vshll.u32 %v6388_v18, 16 }
 0x1a2   : > { %v2282_v44 = vadd.f32 %v2235_v50, %v1900_v51  ;;  %v1376_v52 = vadd.f32 %v1330_v24, %v7533_v35  ;;  %v4491_v51 = vpack.c.b16 %v4464_v15, %v4463_v26  ;;  %v5013_v50 = vpack.c.b16 %v4986_v7, %v4985_v60  ;;  %v6483_v35 = vld [vmem:[%s7030_s17 + $0x5c] sm:$0x1]  ;;  %v6389_v26 = vld [vmem:[%s7030_s17 + $0x64] sm:$0xf] }
 0x1a3   : > { %v2983_v62 = vpop.f32.mrf.mxu0  ;;  %v4150_v8 = vrot.slane %v4149_v21, 4  ;;  %v4856_v14 = vrot.slane %v6483_v35, 5  ;;  %v3204_v60 = vsel %vm7178_vm5, %v6166_v43, %v3203_v48  ;;  %v4167_v21 = vshrl.u32 %v6388_v18, 16 }
 0x1a4   : > { %v7986_v57 = vadd.f32 %v2981_v23, %v2282_v44  ;;  %v3205_v44 = vrot.slane %v3203_v48, 4  ;;  %v4176_v9 = vshll.u32 %v6389_v26, 16 }
 0x1a5   : > { %v4155_v32 = vsel %vm7174_vm4, %v4150_v8, %v7983_v10  ;;  %v4857_v25 = vsel %vm7178_vm5, %v4855_v54, %v4856_v14  ;;  %v4169_v35 = vrot.slane %v4167_v21, 4  ;;  %v6390_v8 = vld [vmem:[%s7030_s17 + $0x68] sm:$0x1]  ;;  %v6485_v54 = vld [vmem:[%s7030_s17 + $0x64] sm:$0xf] }
 0x1a6   : > { %v3207_v7 = vsel %vm7178_vm5, %v3205_v44, %v3206_v19  ;;  %v4465_v13 = vunpack.c.l.b16 %v4155_v32  ;;  %v8017_v43 = vrot.slane %v4176_v9, 5  ;;  %v6486_v9 = vld [vmem:[%s7030_s17 + $0x68] sm:$0x1] }
 0x1a7   : > { %v1855_v3 = vpop.f32.mrf.mxu2 }
 0x1a8   : > { %v1901_v23 = vadd.f32 %v1855_v3, %v1376_v52  ;;  %v2237_v16 = vpop.f32.mrf.mxu3  ;;  %v4165_v3 = vsel %vm7174_vm4, %v4160_v33, %v4164_v1  ;;  %v6131_v1 = vld [vmem:[%s7030_s17 + $0x54] sm:$0xe] }
 0x1a9   : > { %v1333_v28 = vpop.f32.mrf.mxu1 }
 0x1aa   : > { %v2283_v24 = vadd.f32 %v2237_v16, %v1901_v23  ;;  %v1377_v47 = vadd.f32 %v1333_v28, %v7359_v39  ;;  %v4854_v39 = vsel %vm7178_vm5, %v6519_v5, %v4853_v49  ;;  %v4180_v23 = vshrl.u32 %v6389_v26, 16  ;;  %v6132_v49 = vld [vmem:[%s7030_s17 + $0x58] sm:$0xf] }
 0x1ab   : > { %v2986_v59 = vpop.f32.mrf.mxu0  ;;  %v4466_v28 = vunpack.c.l.b16 %v4165_v3  ;;  %v3210_v5 = vrot.slane %v6132_v49, 5 }
 0x1ac   : > { %3467 = vmatmul.bf16.gmra.mxu1 %v3363_v63  ;;  %3849 = vmatmul.bf16.gmra.mxu2 %v6665_v45  ;;  %v7996_v41 = vadd.f32 %v2983_v62, %v2283_v24  ;;  %v3337_v63 = vunpack.c.l.b16 %v3204_v60  ;;  %v3338_v45 = vunpack.c.l.b16 %v3207_v7  ;;  %v4172_v24 = vrot.slane %v4170_v40, 5  ;;  %v6484_v40 = vld [vmem:[%s7030_s17 + $0x60] sm:$0xe] }
 0x1ad   : > { %4595 = vmatmul.bf16.gmra.mxu3 %v4491_v51  ;;  %v4987_v51 = vunpack.c.l.b16 %v4854_v39  ;;  %v4182_v44 = vrot.slane %v4180_v23, 4  ;;  %v4492_v26 = vpack.c.b16 %v4466_v28, %v4465_v13  ;;  %v6167_v39 = vrot.slane %v6131_v1, 9  ;;  %v6391_v23 = vld [vmem:[%s7030_s17 + $0x6c] sm:$0xf]  ;;  %v6392_v28 = vld [vmem:[%s7030_s17 + $0x70] sm:$0xf] }
 0x1ae   : > { %5117 = vmatmul.bf16.gmra.mxu0 %v5013_v50  ;;  %v4988_v50 = vunpack.c.l.b16 %v4857_v25  ;;  %v3364_v18 = vpack.c.b16 %v3338_v45, %v3337_v63  ;;  %v4173_v32 = vor.u32 %v4172_v24, %v4169_v35  ;;  %v4860_v25 = vrot.slane %v6485_v54, 5 }
 0x1af   : > { %v1858_v15 = vpop.f32.mrf.mxu2  ;;  %v6520_v49 = vrot.slane %v6484_v40, 9  ;;  %v4863_v24 = vrot.slane %v6486_v9, 5  ;;  %v4194_v54 = vshll.u32 %v6391_v23, 16 }
 0x1b0   : > { %v1902_v52 = vadd.f32 %v1858_v15, %v1377_v47  ;;  %v2240_v62 = vpop.f32.mrf.mxu3  ;;  %v6133_v15 = vld [vmem:[%s7030_s17 + $0x5c] sm:$0x1]  ;;  %v5014_v7 = vpack.c.b16 %v4988_v50, %v4987_v51  ;;  %v4174_v63 = vrot.slane %v4173_v32, 4  ;;  %v8511_v51 = vld [vmem:[#allocation4_spill] sm:$0xff]  ;;  %v4862_v35 = vrot.slane %v4860_v25, 4 }
 0x1b1   : > { %v1335_v48 = vpop.f32.mrf.mxu1  ;;  %v3213_v21 = vrot.slane %v6133_v15, 5 }
 0x1b2   : > { %v2284_v16 = vadd.f32 %v2240_v62, %v1902_v52  ;;  %v1378_v19 = vadd.f32 %v1335_v48, %v7387_v11  ;;  %v4183_v52 = vor.u32 %v4182_v44, %v8017_v43  ;;  %v4186_v11 = vshll.u32 %v6390_v8, 16 }
 0x1b3   : > { %v2988_v10 = vpop.f32.mrf.mxu0  ;;  %v3212_v48 = vrot.slane %v3210_v5, 4 }
 0x1b4   : > { %v8015_v4 = vadd.f32 %v2986_v59, %v2284_v16  ;;  %v6666_v59 = vld [vmem:[%s7030_s17 + $0x54] sm:$0xff]  ;;  %v4184_v45 = vrot.slane %v4183_v52, 4  ;;  %v4188_v13 = vrot.slane %v4186_v11, 5 }
 0x1b5   : > { %v3214_v8 = vsel %vm7178_vm5, %v3212_v48, %v3213_v21 }
 0x1b6   : > { %v3340_v52 = vunpack.c.l.b16 %v3214_v8 }
 0x1b7   : > { %v1860_v33 = vpop.f32.mrf.mxu2 }
 0x1b8   : > { %v1903_v14 = vadd.f32 %v1860_v33, %v1378_v19  ;;  %v2242_v47 = vpop.f32.mrf.mxu3  ;;  %v3211_v19 = vsel %vm7178_vm5, %v6167_v39, %v3210_v5  ;;  %v4189_v5 = vsel %vm7174_vm4, %v4184_v45, %v4188_v13  ;;  %v4196_v39 = vrot.slane %v4194_v54, 5  ;;  %v8512_v45 = vld [vmem:[#allocation5_spill] sm:$0xff] }
 0x1b9   : > { %v1338_v60 = vpop.f32.mrf.mxu1  ;;  %v3339_v32 = vunpack.c.l.b16 %v3211_v19  ;;  %v4468_v9 = vunpack.c.l.b16 %v4189_v5  ;;  %v6134_v19 = vld [vmem:[%s7030_s17 + $0x60] sm:$0xe]  ;;  %v6489_v5 = vld [vmem:[%s7030_s17 + $0x74] sm:$0x1] }
 0x1ba   : > { %v2285_v62 = vadd.f32 %v2242_v47, %v1903_v14  ;;  %v1379_v50 = vadd.f32 %v1338_v60, %v8511_v51  ;;  %v4200_v14 = vshll.u32 %v6392_v28, 16  ;;  %v4204_v47 = vshrl.u32 %v6392_v28, 16  ;;  %v6488_v28 = vld [vmem:[%s7030_s17 + $0x70] sm:$0xf] }
 0x1bb   : > { %v2991_v3 = vpop.f32.mrf.mxu0  ;;  %v4861_v60 = vsel %vm7178_vm5, %v6520_v49, %v4860_v25 }
 0x1bc   : > { %3472 = vmatmul.bf16.gmra.mxu1 %v3364_v18  ;;  %3854 = vmatmul.bf16.gmra.mxu2 %v6666_v59  ;;  %v8029_v16 = vadd.f32 %v2988_v10, %v2285_v62  ;;  %v4191_v10 = vshrl.u32 %v6391_v23, 16  ;;  %v4179_v59 = vsel %vm7174_vm4, %v4174_v63, %v8017_v43  ;;  %v6135_v62 = vld [vmem:[%s7030_s17 + $0x64] sm:$0xf]  ;;  %v8047_v43 = vrot.slane %v4200_v14, 5  ;;  %v6393_v63 = vld [vmem:[%s7030_s17 + $0x74] sm:$0x1] }
 0x1bd   : > { %4600 = vmatmul.bf16.gmra.mxu3 %v4492_v26  ;;  %v4206_v48 = vrot.slane %v4204_v47, 4  ;;  %v4467_v40 = vunpack.c.l.b16 %v4179_v59  ;;  %v4989_v25 = vunpack.c.l.b16 %v4861_v60  ;;  %v3217_v49 = vrot.slane %v6135_v62, 5  ;;  %v6394_v60 = vld [vmem:[%s7030_s17 + $0x78] sm:$0xf]  ;;  %v6395_v62 = vld [vmem:[%s7030_s17 + $0x7c] sm:$0xf] }
 0x1be   : > { %5122 = vmatmul.bf16.gmra.mxu0 %v5014_v7  ;;  %v4864_v7 = vsel %vm7178_vm5, %v4862_v35, %v4863_v24  ;;  %v4193_v11 = vrot.slane %v4191_v10, 4  ;;  %v4867_v47 = vrot.slane %v6488_v28, 5  ;;  %v4218_v28 = vshll.u32 %v6394_v60, 16 }
 0x1bf   : > { %v1863_v44 = vpop.f32.mrf.mxu2  ;;  %v4990_v23 = vunpack.c.l.b16 %v4864_v7  ;;  %v4207_v10 = vor.u32 %v4206_v48, %v8047_v43  ;;  %v4493_v54 = vpack.c.b16 %v4468_v9, %v4467_v40  ;;  %v6168_v7 = vrot.slane %v6134_v19, 9 }
 0x1c0   : > { %v1904_v33 = vadd.f32 %v1863_v44, %v1379_v50  ;;  %v2245_v1 = vpop.f32.mrf.mxu3  ;;  %v3365_v50 = vpack.c.b16 %v3340_v52, %v3339_v32  ;;  %v6667_v44 = vld [vmem:[%s7030_s17 + $0x60] sm:$0xff]  ;;  %v4197_v8 = vor.u32 %v4196_v39, %v4193_v11  ;;  %v3219_v32 = vrot.slane %v3217_v49, 4 }
 0x1c1   : > { %v1340_v18 = vpop.f32.mrf.mxu1  ;;  %v5015_v14 = vpack.c.b16 %v4990_v23, %v4989_v25  ;;  %v4208_v11 = vrot.slane %v4207_v10, 4  ;;  %v4869_v9 = vrot.slane %v4867_v47, 4  ;;  %v4870_v25 = vrot.slane %v6489_v5, 5 }
 0x1c2   : > { %v2286_v26 = vadd.f32 %v2245_v1, %v1904_v33  ;;  %v1380_v13 = vadd.f32 %v1340_v18, %v8512_v45  ;;  %v4210_v33 = vshll.u32 %v6393_v63, 16  ;;  %v4198_v45 = vrot.slane %v4197_v8, 4  ;;  %v8514_v63 = vld [vmem:[#allocation6_spill] sm:$0xff] }
 0x1c3   : > { %v2993_v15 = vpop.f32.mrf.mxu0  ;;  %v4215_v23 = vshrl.u32 %v6394_v60, 16  ;;  %v3218_v19 = vsel %vm7178_vm5, %v6168_v7, %v3217_v49 }
 0x1c4   : > { %v8049_v21 = vadd.f32 %v2991_v3, %v2286_v26  ;;  %v6136_v3 = vld [vmem:[%s7030_s17 + $0x68] sm:$0x1]  ;;  %v6487_v26 = vld [vmem:[%s7030_s17 + $0x6c] sm:$0xe]  ;;  %v4212_v39 = vrot.slane %v4210_v33, 5  ;;  %v3341_v60 = vunpack.c.l.b16 %v3218_v19 }
 0x1c5   : > { %v3220_v52 = vrot.slane %v6136_v3, 5  ;;  %v6521_v40 = vrot.slane %v6487_v26, 9  ;;  %v4203_v3 = vsel %vm7174_vm4, %v4198_v45, %v8047_v43  ;;  %v4217_v49 = vrot.slane %v4215_v23, 4  ;;  %v6138_v43 = vld [vmem:[%s7030_s17 + $0x70] sm:$0xf] }
 0x1c6   : > { %v4213_v10 = vsel %vm7174_vm4, %v4208_v11, %v4212_v39  ;;  %v6139_v23 = vld [vmem:[%s7030_s17 + $0x74] sm:$0x1]  ;;  %v6668_v19 = vld [vmem:[%s7030_s17 + $0x6c] sm:$0xff] }
 0x1c7   : > { %v1865_v51 = vpop.f32.mrf.mxu2  ;;  %v4868_v33 = vsel %vm7178_vm5, %v6521_v40, %v4867_v47  ;;  %v4469_v47 = vunpack.c.l.b16 %v4203_v3  ;;  %v4470_v45 = vunpack.c.l.b16 %v4213_v10  ;;  %v8516_v40 = vld [vmem:[#allocation7_spill] sm:$0xff]  ;;  %v6492_v3 = vld [vmem:[%s7030_s17 + $0x80] sm:$0x1] }
 0x1c8   : > { %v1905_v35 = vadd.f32 %v1865_v51, %v1380_v13  ;;  %v2247_v24 = vpop.f32.mrf.mxu3  ;;  %v4224_v51 = vshll.u32 %v6395_v62, 16  ;;  %v4991_v11 = vunpack.c.l.b16 %v4868_v33 }
 0x1c9   : > { %v1343_v1 = vpop.f32.mrf.mxu1  ;;  %v4494_v33 = vpack.c.b16 %v4470_v45, %v4469_v47  ;;  %v6398_v47 = vld [vmem:[%s7030_s17 + $0x88] sm:$0xf]  ;;  %v8518_v45 = vld [vmem:[#allocation8_spill] sm:$0xff] }
 0x1ca   : > { %v2287_v18 = vadd.f32 %v2247_v24, %v1905_v35  ;;  %v1381_v13 = vadd.f32 %v1343_v1, %v8514_v63  ;;  %v4228_v35 = vshrl.u32 %v6395_v62, 16  ;;  %v4871_v1 = vsel %vm7178_vm5, %v4869_v9, %v4870_v25  ;;  %v6137_v25 = vld [vmem:[%s7030_s17 + $0x6c] sm:$0xe] }
 0x1cb   : > { %v2996_v59 = vpop.f32.mrf.mxu0  ;;  %v8078_v26 = vrot.slane %v4224_v51, 5  ;;  %v4992_v39 = vunpack.c.l.b16 %v4871_v1  ;;  %v3224_v63 = vrot.slane %v6138_v43, 5 }
 0x1cc   : > { %3477 = vmatmul.bf16.gmra.mxu1 %v3365_v50  ;;  %3859 = vmatmul.bf16.gmra.mxu2 %v6667_v44  ;;  %v8062_v48 = vadd.f32 %v2993_v15, %v2287_v18  ;;  %v3221_v15 = vsel %vm7178_vm5, %v3219_v32, %v3220_v52  ;;  %v4220_v18 = vrot.slane %v4218_v28, 5  ;;  %v4230_v5 = vrot.slane %v4228_v35, 4  ;;  %v6396_v32 = vld [vmem:[%s7030_s17 + $0x80] sm:$0x1]  ;;  %v6491_v52 = vld [vmem:[%s7030_s17 + $0x7c] sm:$0xf] }
 0x1cd   : > { %4605 = vmatmul.bf16.gmra.mxu3 %v4493_v54  ;;  %v3342_v7 = vunpack.c.l.b16 %v3221_v15  ;;  %v4234_v35 = vshll.u32 %v6396_v32, 16  ;;  %v6490_v15 = vld [vmem:[%s7030_s17 + $0x78] sm:$0xe]  ;;  %v5016_v1 = vpack.c.b16 %v4992_v39, %v4991_v11 }
 0x1ce   : > { %8513 = vst [vmem:[#allocation4_spill] sm:$0xff] %v8062_v48  ;;  %5127 = vmatmul.bf16.gmra.mxu0 %v5015_v14  ;;  %v4231_v28 = vor.u32 %v4230_v5, %v8078_v26 }
 0x1cf   : > { %v1868_v24 = vpop.f32.mrf.mxu2  ;;  %v4236_v32 = vrot.slane %v4234_v35, 5 }
 0x1d0   : > { %v1906_v50 = vadd.f32 %v1868_v24, %v1381_v13  ;;  %v2250_v44 = vpop.f32.mrf.mxu3  ;;  %v4221_v13 = vor.u32 %v4220_v18, %v4217_v49  ;;  %v4874_v24 = vrot.slane %v6491_v52, 5  ;;  %v3226_v18 = vrot.slane %v3224_v63, 4 }
 0x1d1   : > { %v1345_v8 = vpop.f32.mrf.mxu1  ;;  %v6522_v52 = vrot.slane %v6490_v15, 9  ;;  %v4252_v15 = vshrl.u32 %v6398_v47, 16 }
 0x1d2   : > { %v2288_v54 = vadd.f32 %v2250_v44, %v1906_v50  ;;  %v1382_v9 = vadd.f32 %v1345_v8, %v8516_v40  ;;  %v3366_v44 = vpack.c.b16 %v3342_v7, %v3341_v60  ;;  %v6169_v8 = vrot.slane %v6137_v25, 9  ;;  %v6397_v60 = vld [vmem:[%s7030_s17 + $0x84] sm:$0xf] }
 0x1d3   : > { %v2998_v14 = vpop.f32.mrf.mxu0  ;;  %v4222_v5 = vrot.slane %v4221_v13, 4  ;;  %v4232_v40 = vrot.slane %v4231_v28, 4  ;;  %v4875_v28 = vsel %vm7178_vm5, %v6522_v52, %v4874_v24  ;;  %v4254_v52 = vrot.slane %v4252_v15, 4 }
 0x1d4   : > { %v8083_v62 = vadd.f32 %v2996_v59, %v2288_v54  ;;  %v3227_v54 = vrot.slane %v6139_v23, 5  ;;  %v3225_v39 = vsel %vm7178_vm5, %v6169_v8, %v3224_v63 }
 0x1d5   : > { %v4227_v23 = vsel %vm7174_vm4, %v4222_v5, %v8078_v26 }
 0x1d6   : > { %8515 = vst [vmem:[#allocation5_spill] sm:$0xff] %v8083_v62  ;;  %v3228_v25 = vsel %vm7178_vm5, %v3226_v18, %v3227_v54  ;;  %v4471_v8 = vunpack.c.l.b16 %v4227_v23  ;;  %v6403_v62 = vld [vmem:[%s7030_s17 + $0x9c] sm:$0xf] }
 0x1d7   : > { %v1870_v51 = vpop.f32.mrf.mxu2 }
 0x1d8   : > { %v1907_v59 = vadd.f32 %v1870_v51, %v1382_v9  ;;  %v2252_v50 = vpop.f32.mrf.mxu3  ;;  %v4876_v9 = vrot.slane %v4874_v24, 4  ;;  %v4877_v51 = vrot.slane %v6492_v3, 5  ;;  %v6141_v24 = vld [vmem:[%s7030_s17 + $0x7c] sm:$0xf] }
 0x1d9   : > { %v1348_v10 = vpop.f32.mrf.mxu1 }
 0x1da   : > { %v2289_v43 = vadd.f32 %v2252_v50, %v1907_v59  ;;  %v1383_v11 = vadd.f32 %v1348_v10, %v8518_v45  ;;  %v4878_v35 = vsel %vm7178_vm5, %v4876_v9, %v4877_v51  ;;  %v4239_v59 = vshrl.u32 %v6397_v60, 16  ;;  %v6140_v45 = vld [vmem:[%s7030_s17 + $0x78] sm:$0xe] }
 0x1db   : > { %v3001_v49 = vpop.f32.mrf.mxu0  ;;  %v4994_v18 = vunpack.c.l.b16 %v4878_v35  ;;  %v3231_v51 = vrot.slane %v6141_v24, 5  ;;  %v6493_v24 = vld [vmem:[%s7030_s17 + $0x84] sm:$0xe] }
 0x1dc   : > { %3482 = vmatmul.bf16.gmra.mxu1 %v3366_v44  ;;  %3864 = vmatmul.bf16.gmra.mxu2 %v6668_v19  ;;  %v8093_v7 = vadd.f32 %v2998_v14, %v2289_v43  ;;  %v4237_v14 = vsel %vm7174_vm4, %v4232_v40, %v4236_v32  ;;  %v4242_v44 = vshll.u32 %v6397_v60, 16  ;;  %v4248_v19 = vshll.u32 %v6398_v47, 16  ;;  %v8520_v60 = vld [vmem:[#allocation9_spill] sm:$0xff] }
 0x1dd   : > { %4610 = vmatmul.bf16.gmra.mxu3 %v4494_v33  ;;  %v3343_v33 = vunpack.c.l.b16 %v3225_v39  ;;  %v4472_v54 = vunpack.c.l.b16 %v4237_v14  ;;  %v4993_v43 = vunpack.c.l.b16 %v4875_v28  ;;  %v4241_v5 = vrot.slane %v4239_v59, 4  ;;  %v6399_v39 = vld [vmem:[%s7030_s17 + $0x8c] sm:$0x1]  ;;  %v6494_v14 = vld [vmem:[%s7030_s17 + $0x88] sm:$0xf]  ;;  %v6669_v59 = vld [vmem:[%s7030_s17 + $0x78] sm:$0xff] }
 0x1de   : > { %8517 = vst [vmem:[#allocation6_spill] sm:$0xff] %v8093_v7  ;;  %5132 = vmatmul.bf16.gmra.mxu0 %v5016_v1  ;;  %v3344_v1 = vunpack.c.l.b16 %v3228_v25  ;;  %v4244_v40 = vrot.slane %v4242_v44, 5  ;;  %v8111_v32 = vrot.slane %v4248_v19, 5  ;;  %v6170_v19 = vrot.slane %v6140_v45, 9  ;;  %v6498_v7 = vld [vmem:[%s7030_s17 + $0x98] sm:$0x1] }
 0x1df   : > { %v1873_v13 = vpop.f32.mrf.mxu2  ;;  %v3233_v15 = vrot.slane %v3231_v51, 4 }
 0x1e0   : > { %v1908_v63 = vadd.f32 %v1873_v13, %v1383_v11  ;;  %v2255_v50 = vpop.f32.mrf.mxu3  ;;  %v6142_v11 = vld [vmem:[%s7030_s17 + $0x80] sm:$0x1]  ;;  %v3367_v23 = vpack.c.b16 %v3344_v1, %v3343_v33  ;;  %v4495_v13 = vpack.c.b16 %v4472_v54, %v4471_v8  ;;  %v4881_v8 = vrot.slane %v6494_v14, 5  ;;  %v6495_v54 = vld [vmem:[%s7030_s17 + $0x8c] sm:$0x1] }
 0x1e1   : > { %v1350_v3 = vpop.f32.mrf.mxu1 }
 0x1e2   : > { %v2290_v26 = vadd.f32 %v2255_v50, %v1908_v63  ;;  %v1384_v47 = vadd.f32 %v1350_v3, %v8520_v60  ;;  %v5017_v63 = vpack.c.b16 %v4994_v18, %v4993_v43  ;;  %v4255_v50 = vor.u32 %v4254_v52, %v8111_v32  ;;  %v6400_v18 = vld [vmem:[%s7030_s17 + $0x90] sm:$0xf] }
 0x1e3   : > { %v3003_v10 = vpop.f32.mrf.mxu0  ;;  %v3234_v3 = vrot.slane %v6142_v11, 5  ;;  %v3232_v52 = vsel %vm7178_vm5, %v6170_v19, %v3231_v51  ;;  %v8523_v11 = vld [vmem:[#allocation10_spill] sm:$0xff]  ;;  %v4263_v14 = vshrl.u32 %v6400_v18, 16 }
 0x1e4   : > { %v8113_v9 = vadd.f32 %v3001_v49, %v2290_v26  ;;  %v4245_v49 = vor.u32 %v4244_v40, %v4241_v5  ;;  %v4258_v26 = vshll.u32 %v6399_v39, 16  ;;  %v6401_v5 = vld [vmem:[%s7030_s17 + $0x94] sm:$0xf] }
 0x1e5   : > { %v3235_v60 = vsel %vm7178_vm5, %v3233_v15, %v3234_v3  ;;  %v6144_v15 = vld [vmem:[%s7030_s17 + $0x88] sm:$0xf] }
 0x1e6   : > { %8519 = vst [vmem:[#allocation7_spill] sm:$0xff] %v8113_v9  ;;  %v4246_v43 = vrot.slane %v4245_v49, 4  ;;  %v4260_v45 = vrot.slane %v4258_v26, 5  ;;  %v3346_v19 = vunpack.c.l.b16 %v3235_v60  ;;  %v6143_v60 = vld [vmem:[%s7030_s17 + $0x84] sm:$0xe] }
 0x1e7   : > { %v1875_v25 = vpop.f32.mrf.mxu2 }
 0x1e8   : > { %v1909_v28 = vadd.f32 %v1875_v25, %v1384_v47  ;;  %v2257_v35 = vpop.f32.mrf.mxu3  ;;  %v4256_v47 = vrot.slane %v4255_v50, 4  ;;  %v6523_v25 = vrot.slane %v6493_v24, 9  ;;  %v3345_v50 = vunpack.c.l.b16 %v3232_v52 }
 0x1e9   : > { %v3448_v44 = vpop.f32.mrf.mxu1 }
 0x1ea   : > { %v2291_v33 = vadd.f32 %v2257_v35, %v1909_v28  ;;  %v3528_v39 = vadd.f32 %v3448_v44, %v8523_v11  ;;  %v4266_v28 = vshll.u32 %v6400_v18, 16  ;;  %v4272_v35 = vshll.u32 %v6401_v5, 16  ;;  %v8162_v18 = vld [vmem:[%s8495_s2] ss:$0 sm:$0xff] }
 0x1eb   : > { %v5098_v1 = vpop.f32.mrf.mxu0  ;;  %v4251_v44 = vsel %vm7174_vm4, %v4246_v43, %v8111_v32  ;;  %v4882_v24 = vsel %vm7178_vm5, %v6523_v25, %v4881_v8  ;;  %v4265_v32 = vrot.slane %v4263_v14, 4 }
 0x1ec   : > { %3487 = vmatmul.bf16.gmra.mxu1 %v3367_v23  ;;  %3869 = vmatmul.bf16.gmra.mxu2 %v6669_v59  ;;  %v8133_v40 = vadd.f32 %v3003_v10, %v2291_v33  ;;  %v4883_v10 = vrot.slane %v4881_v8, 4  ;;  %v4884_v23 = vrot.slane %v6495_v54, 5  ;;  %v4276_v59 = vshrl.u32 %v6401_v5, 16 }
 0x1ed   : > { %4615 = vmatmul.bf16.gmra.mxu3 %v4495_v13  ;;  %v4261_v33 = vsel %vm7174_vm4, %v4256_v47, %v4260_v45  ;;  %v4268_v43 = vrot.slane %v4266_v28, 5  ;;  %v8164_v5 = vrot.slane %v4272_v35, 5  ;;  %v3238_v47 = vrot.slane %v6144_v15, 5  ;;  %v6402_v45 = vld [vmem:[%s7030_s17 + $0x98] sm:$0x1] }
 0x1ee   : > { %8522 = vst [vmem:[#allocation8_spill] sm:$0xff] %v8133_v40  ;;  %5137 = vmatmul.bf16.gmra.mxu0 %v5017_v63  ;;  %v4885_v54 = vsel %vm7178_vm5, %v4883_v10, %v4884_v23  ;;  %v4278_v52 = vrot.slane %v4276_v59, 4  ;;  %v4473_v11 = vunpack.c.l.b16 %v4251_v44  ;;  %v4995_v25 = vunpack.c.l.b16 %v4882_v24  ;;  %v6145_v23 = vld [vmem:[%s7030_s17 + $0x8c] sm:$0x1]  ;;  %v6497_v35 = vld [vmem:[%s7030_s17 + $0x94] sm:$0xf] }
 0x1ef   : > { %v3830_v13 = vpop.f32.mrf.mxu2  ;;  %v4996_v10 = vunpack.c.l.b16 %v4885_v54  ;;  %v3368_v28 = vpack.c.b16 %v3346_v19, %v3345_v50  ;;  %v8179_v59 = vld [vmem:[%s8171_s30] sm:$0xff]   ;;  %v4269_v40 = vor.u32 %v4268_v43, %v4265_v32  ;;  %v4282_v15 = vshll.u32 %v6402_v45, 16  ;;  %v6496_v45 = vld [vmem:[%s7030_s17 + $0x90] sm:$0xe] }
 0x1f0   : > { %v3910_v63 = vadd.f32 %v3830_v13, %v3528_v39  ;;  %v4576_v49 = vpop.f32.mrf.mxu3  ;;  %v4474_v39 = vunpack.c.l.b16 %v4261_v33  ;;  %v8524_v13 = vld [vmem:[#allocation11_spill] sm:$0xff]  ;;  %v6670_v24 = vld [vmem:[%s7030_s17 + $0x84] sm:$0xff]  ;;  %v3240_v54 = vrot.slane %v3238_v47, 4  ;;  %v8185_v50 = vstv %s8147_s25 }
 0x1f1   : > { %v3450_v51 = vpop.f32.mrf.mxu1  ;;  %v5018_v9 = vpack.c.b16 %v4996_v10, %v4995_v25  ;;  %v6703_v32 = vunpack.c.l.bf16 %v8179_v59  ;;  %v4284_v25 = vrot.slane %v4282_v15, 5  ;;  %v6404_v10 = vld [vmem:[%s7030_s17 + $0xa0] sm:$0xf] }
 0x1f2   : > { %v4656_v3 = vadd.f32 %v4576_v49, %v3910_v63  ;;  %v3529_v14 = vadd.f32 %v3450_v51, %v8524_v13  ;;  %v6171_v49 = vrot.slane %v6143_v60, 9  ;;  %v3241_v51 = vrot.slane %v6145_v23, 5 }
 0x1f3   : > { %v5100_v26 = vpop.f32.mrf.mxu0  ;;  %v4496_v13 = vpack.c.b16 %v4474_v39, %v4473_v11  ;;  %v4888_v60 = vrot.slane %v6497_v35, 5  ;;  %v6524_v35 = vrot.slane %v6496_v45, 9 }
 0x1f4   : > { %v5178_v8 = vadd.f32 %v5098_v1, %v4656_v3  ;;  %v4279_v1 = vor.u32 %v4278_v52, %v8164_v5  ;;  %v3242_v39 = vsel %vm7178_vm5, %v3240_v54, %v3241_v51 }
 0x1f6   : > { %v5278_v44 = vadd.f32 %v8162_v18, %v5178_v8  ;;  %v6704_v8 = vunpack.c.h.bf16 %v8179_v59  ;;  %v4280_v23 = vrot.slane %v4279_v1, 4  ;;  %v4890_v59 = vrot.slane %v4888_v60, 4 }
 0x1f7   : > { %v3832_v63 = vpop.f32.mrf.mxu2  ;;  %v4290_v1 = vshll.u32 %v6403_v62, 16 }
 0x1f8   : > { %v3911_v3 = vadd.f32 %v3832_v63, %v3529_v14  ;;  %v4578_v33 = vpop.f32.mrf.mxu3  ;;  %v3239_v14 = vsel %vm7178_vm5, %v6171_v49, %v3238_v47  ;;  %v4270_v63 = vrot.slane %v4269_v40, 4  ;;  %v5344_v48 = vmul.f32 %v8185_v50, %v5278_v44 }
 0x1f9   : > { %v3453_v19 = vpop.f32.mrf.mxu1  ;;  %vm5311_vm6 = vcmp.gt.f32.partialorder %v5278_v44, 0.0  ;;  %v4287_v49 = vshrl.u32 %v6403_v62, 16  ;;  %v4285_v62 = vsel %vm7174_vm4, %v4280_v23, %v4284_v25 }
 0x1fa   : > { %v4657_v43 = vadd.f32 %v4578_v33, %v3911_v3  ;;  %v4891_v3 = vrot.slane %v6498_v7, 5  ;;  %v3530_v47 = vadd.f32 %v3453_v19, %v7633_v56  ;;  %v4275_v15 = vsel %vm7174_vm4, %v4270_v63, %v8164_v5 }
 0x1fb   : > { %v5103_v52 = vpop.f32.mrf.mxu0  ;;  %v4296_v33 = vshll.u32 %v6404_v10, 16  ;;  %v5376_v54 = vsel %vm5311_vm6, %v5278_v44, %v5344_v48  ;;  %v3348_v56 = vunpack.c.l.b16 %v3242_v39  ;;  %v4889_v19 = vsel %vm7178_vm5, %v6524_v35, %v4888_v60  ;;  %v6147_v48 = vld [vmem:[%s7030_s17 + $0x94] sm:$0xf]  ;;  %v6146_v35 = vld [vmem:[%s7030_s17 + $0x90] sm:$0xe] }
 0x1fc   : > { %v5179_v11 = vadd.f32 %v5100_v26, %v4657_v43  ;;  %3492 = vmatmul.bf16.gmra.mxu1 %v3368_v28  ;;  %3874 = vmatmul.bf16.gmra.mxu2 %v6670_v24  ;;  %v3347_v28 = vunpack.c.l.b16 %v3239_v14  ;;  %v4300_v24 = vshrl.u32 %v6404_v10, 16  ;;  %v4892_v5 = vsel %vm7178_vm5, %v4890_v59, %v4891_v3  ;;  %v6405_v3 = vld [vmem:[%s7030_s17 + $0xa4] sm:$0x1] }
 0x1fd   : > { %4620 = vmatmul.bf16.gmra.mxu3 %v4496_v13  ;;  %v4289_v14 = vrot.slane %v4287_v49, 4  ;;  %v4292_v63 = vrot.slane %v4290_v1, 5  ;;  %v8211_v10 = vrot.slane %v4296_v33, 5  ;;  %v4475_v25 = vunpack.c.l.b16 %v4275_v15  ;;  %v6148_v49 = vld [vmem:[%s7030_s17 + $0x98] sm:$0x1] }
 0x1fe   : > { %5142 = vmatmul.bf16.gmra.mxu0 %v5018_v9  ;;  %v5279_v40 = vadd.f32 %v8162_v18, %v5179_v11  ;;  %v5472_v11 = vadd.f32 %v6703_v32, %v5376_v54  ;;  %v4302_v23 = vrot.slane %v4300_v24, 4  ;;  %v3245_v59 = vrot.slane %v6147_v48, 5  ;;  %v6500_v33 = vld [vmem:[%s7030_s17 + $0xa0] sm:$0xf]  ;;  %v8227_v24 = vld [vmem:[%s8171_s30 + $0x8] sm:$0xff]  }
 0x1ff   : > { %v3835_v26 = vpop.f32.mrf.mxu2  ;;  %v4476_v32 = vunpack.c.l.b16 %v4285_v62 }
 0x200   : > { %vm5312_vm7 = vcmp.gt.f32.partialorder %v5279_v40, 0.0  ;;  %v5345_v9 = vmul.f32 %v8185_v50, %v5279_v40  ;;  %v3912_v7 = vadd.f32 %v3835_v26, %v3530_v47  ;;  %v4581_v51 = vpop.f32.mrf.mxu3  ;;  %v4998_v47 = vunpack.c.l.b16 %v4892_v5  ;;  %v6671_v5 = vld [vmem:[%s7030_s17 + $0x90] sm:$0xff] }
 0x201   : > { %v3455_v13 = vpop.f32.mrf.mxu1  ;;  %v3369_v26 = vpack.c.b16 %v3348_v56, %v3347_v28  ;;  %v4303_v15 = vor.u32 %v4302_v23, %v8211_v10  ;;  %v3248_v28 = vrot.slane %v6148_v49, 5  ;;  %v4497_v56 = vpack.c.b16 %v4476_v32, %v4475_v25 }
 0x202   : > { %v5377_v44 = vsel %vm5312_vm7, %v5279_v40, %v5345_v9  ;;  %v4658_v43 = vadd.f32 %v4581_v51, %v3912_v7  ;;  %v3531_v1 = vadd.f32 %v3455_v13, %v7635_v58  ;;  %v6172_v9 = vrot.slane %v6146_v35, 9 }
 0x203   : > { %v5105_v45 = vpop.f32.mrf.mxu0  ;;  %v5473_v39 = vadd.f32 %v6704_v8, %v5377_v44  ;;  %v4997_v8 = vunpack.c.l.b16 %v4889_v19  ;;  %v4306_v7 = vshll.u32 %v6405_v3, 16  ;;  %v3247_v58 = vrot.slane %v3245_v59, 4 }
 0x204   : > { %v5180_v60 = vadd.f32 %v5103_v52, %v4658_v43  ;;  %v4293_v52 = vor.u32 %v4292_v63, %v4289_v14  ;;  %v4895_v44 = vrot.slane %v6500_v33, 5  ;;  %v6707_v43 = vunpack.c.l.bf16 %v8227_v24 }
 0x205   : > { %v6768_v40 = vpack.c.bf16 %v5473_v39, %v5472_v11  ;;  %v5019_v48 = vpack.c.b16 %v4998_v47, %v4997_v8  ;;  %v6499_v11 = vld [vmem:[%s7030_s17 + $0x9c] sm:$0xe]  ;;  %v6501_v39 = vld [vmem:[%s7030_s17 + $0xa4] sm:$0x1]  ;;  %v6708_v23 = vunpack.c.h.bf16 %v8227_v24  ;;  %v4304_v3 = vrot.slane %v4303_v15, 4 }
 0x206   : > { %v5280_v51 = vadd.f32 %v8162_v18, %v5180_v60  ;;  %v3246_v60 = vsel %vm7178_vm5, %v6172_v9, %v3245_v59  ;;  %v4294_v35 = vrot.slane %v4293_v52, 4  ;;  %v3249_v32 = vsel %vm7178_vm5, %v3247_v58, %v3248_v28  ;;  %v6407_v47 = vld [vmem:[%s7030_s17 + $0xac] sm:$0xf] }
 0x207   : > { %6769 = vst [vmem:[%s8218_s8] sm:$0xff] %v6768_v40   ;;  %v3837_v54 = vpop.f32.mrf.mxu2  ;;  %v6406_v40 = vld [vmem:[%s7030_s17 + $0xa8] sm:$0xf]  ;;  %v4308_v8 = vrot.slane %v4306_v7, 5  ;;  %v4897_v33 = vrot.slane %v4895_v44, 4  ;;  %v4898_v24 = vrot.slane %v6501_v39, 5  ;;  %v4320_v7 = vshll.u32 %v6407_v47, 16 }
 0x208   : > { %v3913_v62 = vadd.f32 %v3837_v54, %v3531_v1  ;;  %v4583_v19 = vpop.f32.mrf.mxu3  ;;  %v5346_v49 = vmul.f32 %v8185_v50, %v5280_v51  ;;  %vm5313_vm8 = vcmp.gt.f32.partialorder %v5280_v51, 0.0  ;;  %v6525_v1 = vrot.slane %v6499_v11, 9 }
 0x209   : > { %v3458_v13 = vpop.f32.mrf.mxu1  ;;  %v4311_v9 = vshrl.u32 %v6406_v40, 16  ;;  %v4314_v52 = vshll.u32 %v6406_v40, 16  ;;  %v4299_v15 = vsel %vm7174_vm4, %v4294_v35, %v8211_v10  ;;  %v4899_v10 = vsel %vm7178_vm5, %v4897_v33, %v4898_v24 }
 0x20a   : > { %v4659_v14 = vadd.f32 %v4583_v19, %v3913_v62  ;;  %v3532_v54 = vadd.f32 %v3458_v13, %v7685_v17  ;;  %v4324_v62 = vshrl.u32 %v6407_v47, 16  ;;  %v5378_v19 = vsel %vm5313_vm8, %v5280_v51, %v5346_v49 }
 0x20b   : > { %v5108_v63 = vpop.f32.mrf.mxu0  ;;  %v4309_v17 = vsel %vm7174_vm4, %v4304_v3, %v4308_v8  ;;  %v4896_v13 = vsel %vm7178_vm5, %v6525_v1, %v4895_v44  ;;  %v4316_v35 = vrot.slane %v4314_v52, 5  ;;  %v5474_v40 = vadd.f32 %v6707_v43, %v5378_v19  ;;  %v6149_v8 = vld [vmem:[%s7030_s17 + $0x9c] sm:$0xe]  ;;  %v6408_v1 = vld [vmem:[%s7030_s17 + $0xb0] sm:$0x1] }
 0x20c   : > { %v5181_v25 = vadd.f32 %v5105_v45, %v4659_v14  ;;  %3497 = vmatmul.bf16.gmra.mxu1 %v3369_v26  ;;  %3879 = vmatmul.bf16.gmra.mxu2 %v6671_v5  ;;  %v3349_v26 = vunpack.c.l.b16 %v3246_v60  ;;  %v6150_v14 = vld [vmem:[%s7030_s17 + $0xa0] sm:$0xf]  ;;  %v4313_v60 = vrot.slane %v4311_v9, 4  ;;  %v4326_v3 = vrot.slane %v4324_v62, 4  ;;  %v6151_v9 = vld [vmem:[%s7030_s17 + $0xa4] sm:$0x1] }
 0x20d   : > { %4625 = vmatmul.bf16.gmra.mxu3 %v4497_v56  ;;  %v3252_v47 = vrot.slane %v6150_v14, 5  ;;  %v4478_v24 = vunpack.c.l.b16 %v4309_v17  ;;  %v6173_v62 = vrot.slane %v6149_v8, 9  ;;  %v4330_v19 = vshll.u32 %v6408_v1, 16  ;;  %v6672_v17 = vld [vmem:[%s7030_s17 + $0x9c] sm:$0xff]  ;;  %v6409_v8 = vld [vmem:[%s7030_s17 + $0xb4] sm:$0xf] }
 0x20e   : > { %5147 = vmatmul.bf16.gmra.mxu0 %v5019_v48  ;;  %v5281_v59 = vadd.f32 %v8162_v18, %v5181_v25  ;;  %v3350_v48 = vunpack.c.l.b16 %v3249_v32  ;;  %v8256_v25 = vrot.slane %v4320_v7, 5  ;;  %v4477_v32 = vunpack.c.l.b16 %v4299_v15 }
 0x20f   : > { %v3840_v45 = vpop.f32.mrf.mxu2 }
 0x210   : > { %vm5314_vm9 = vcmp.gt.f32.partialorder %v5281_v59, 0.0  ;;  %v5347_v5 = vmul.f32 %v8185_v50, %v5281_v59  ;;  %v3914_v58 = vadd.f32 %v3840_v45, %v3532_v54  ;;  %v4586_v28 = vpop.f32.mrf.mxu3  ;;  %v5000_v54 = vunpack.c.l.b16 %v4899_v10  ;;  %v8265_v45 = vld [vmem:[%s8171_s30 + $0x10] sm:$0xff]  }
 0x211   : > { %v3460_v56 = vpop.f32.mrf.mxu1  ;;  %v3370_v52 = vpack.c.b16 %v3350_v48, %v3349_v26  ;;  %v4327_v15 = vor.u32 %v4326_v3, %v8256_v25  ;;  %v3255_v26 = vrot.slane %v6151_v9, 5  ;;  %v4498_v48 = vpack.c.b16 %v4478_v24, %v4477_v32 }
 0x212   : > { %v5379_v51 = vsel %vm5314_vm9, %v5281_v59, %v5347_v5  ;;  %v4660_v11 = vadd.f32 %v4586_v28, %v3914_v58  ;;  %v4999_v59 = vunpack.c.l.b16 %v4896_v13  ;;  %v3533_v43 = vadd.f32 %v3460_v56, %v7687_v46 }
 0x213   : > { %v5110_v39 = vpop.f32.mrf.mxu0  ;;  %v5475_v49 = vadd.f32 %v6708_v23, %v5379_v51  ;;  %v6503_v23 = vld [vmem:[%s7030_s17 + $0xac] sm:$0xf]  ;;  %v3254_v46 = vrot.slane %v3252_v47, 4  ;;  %v6711_v14 = vunpack.c.l.bf16 %v8265_v45  ;;  %v4332_v24 = vrot.slane %v4330_v19, 5 }
 0x214   : > { %v5182_v44 = vadd.f32 %v5108_v63, %v4660_v11  ;;  %v4317_v63 = vor.u32 %v4316_v35, %v4313_v60  ;;  %v5020_v13 = vpack.c.b16 %v5000_v54, %v4999_v59  ;;  %v4902_v10 = vrot.slane %v6503_v23, 5  ;;  %v6502_v60 = vld [vmem:[%s7030_s17 + $0xa8] sm:$0xe]  ;;  %v6504_v35 = vld [vmem:[%s7030_s17 + $0xb0] sm:$0x1] }
 0x215   : > { %v6773_v33 = vpack.c.bf16 %v5475_v49, %v5474_v40  ;;  %v6712_v40 = vunpack.c.h.bf16 %v8265_v45  ;;  %v3253_v49 = vsel %vm7178_vm5, %v6173_v62, %v3252_v47  ;;  %v6410_v59 = vld [vmem:[%s7030_s17 + $0xb8] sm:$0xf]  ;;  %v6526_v54 = vrot.slane %v6502_v60, 9 }
 0x216   : > { %v5282_v5 = vadd.f32 %v8162_v18, %v5182_v44  ;;  %v4318_v3 = vrot.slane %v4317_v63, 4  ;;  %v4328_v44 = vrot.slane %v4327_v15, 4  ;;  %v4904_v9 = vrot.slane %v4902_v10, 4 }
 0x217   : > { %6860 = vst [vmem:[%s8218_s8 + $0x8] sm:$0xff] %v6773_v33   ;;  %v3842_v7 = vpop.f32.mrf.mxu2  ;;  %v3256_v33 = vsel %vm7178_vm5, %v3254_v46, %v3255_v26  ;;  %v4335_v45 = vshrl.u32 %v6409_v8, 16  ;;  %v4344_v63 = vshll.u32 %v6410_v59, 16  ;;  %v4348_v15 = vshrl.u32 %v6410_v59, 16 }
 0x218   : > { %v3915_v58 = vadd.f32 %v3842_v7, %v3533_v43  ;;  %v4588_v28 = vpop.f32.mrf.mxu3  ;;  %v5348_v1 = vmul.f32 %v8185_v50, %v5282_v5  ;;  %vm5315_vm10 = vcmp.gt.f32.partialorder %v5282_v5, 0.0  ;;  %v4905_v43 = vrot.slane %v6504_v35, 5 }
 0x219   : > { %v3463_v56 = vpop.f32.mrf.mxu1  ;;  %v4338_v7 = vshll.u32 %v6409_v8, 16  ;;  %v4323_v62 = vsel %vm7174_vm4, %v4318_v3, %v8256_v25  ;;  %v3352_v26 = vunpack.c.l.b16 %v3256_v33  ;;  %v8293_v3 = vrot.slane %v4344_v63, 5 }
 0x21a   : > { %v4661_v51 = vadd.f32 %v4588_v28, %v3915_v58  ;;  %v3534_v23 = vadd.f32 %v3463_v56, %v7722_v42  ;;  %v5380_v19 = vsel %vm5315_vm10, %v5282_v5, %v5348_v1  ;;  %v4333_v42 = vsel %vm7174_vm4, %v4328_v44, %v4332_v24  ;;  %v6153_v1 = vld [vmem:[%s7030_s17 + $0xac] sm:$0xf] }
 0x21b   : > { %v5113_v11 = vpop.f32.mrf.mxu0  ;;  %v4903_v56 = vsel %vm7178_vm5, %v6526_v54, %v4902_v10  ;;  %v4906_v25 = vsel %vm7178_vm5, %v4904_v9, %v4905_v43  ;;  %v4340_v60 = vrot.slane %v4338_v7, 5  ;;  %v5476_v35 = vadd.f32 %v6711_v14, %v5380_v19  ;;  %v6152_v54 = vld [vmem:[%s7030_s17 + $0xa8] sm:$0xe]  ;;  %v6411_v9 = vld [vmem:[%s7030_s17 + $0xbc] sm:$0x1] }
 0x21c   : > { %v5183_v32 = vadd.f32 %v5110_v39, %v4661_v51  ;;  %3502 = vmatmul.bf16.gmra.mxu1 %v3370_v52  ;;  %3884 = vmatmul.bf16.gmra.mxu2 %v6672_v17  ;;  %v3351_v52 = vunpack.c.l.b16 %v3253_v49  ;;  %v4337_v51 = vrot.slane %v4335_v45, 4  ;;  %v4350_v44 = vrot.slane %v4348_v15, 4  ;;  %v8302_v14 = vld [vmem:[%s8171_s30 + $0x18] sm:$0xff]   ;;  %v6673_v15 = vld [vmem:[%s7030_s17 + $0xa8] sm:$0xff]  ;;  %v6154_v19 = vld [vmem:[%s7030_s17 + $0xb0] sm:$0x1] }
 0x21d   : > { %4630 = vmatmul.bf16.gmra.mxu3 %v4498_v48  ;;  %v4479_v10 = vunpack.c.l.b16 %v4323_v62  ;;  %v4480_v33 = vunpack.c.l.b16 %v4333_v42  ;;  %v5001_v24 = vunpack.c.l.b16 %v4903_v56  ;;  %v5002_v59 = vunpack.c.l.b16 %v4906_v25 }
 0x21e   : > { %5152 = vmatmul.bf16.gmra.mxu0 %v5020_v13  ;;  %v5283_v47 = vadd.f32 %v8162_v18, %v5183_v32  ;;  %v3259_v45 = vrot.slane %v6153_v1, 5  ;;  %v4351_v7 = vor.u32 %v4350_v44, %v8293_v3  ;;  %v6716_v56 = vunpack.c.h.bf16 %v8302_v14  ;;  %v6412_v44 = vld [vmem:[%s7030_s17 + $0xc0] sm:$0xf] }
 0x21f   : > { %v3845_v39 = vpop.f32.mrf.mxu2 }
 0x220   : > { %vm5316_vm11 = vcmp.gt.f32.partialorder %v5283_v47, 0.0  ;;  %v5349_v58 = vmul.f32 %v8185_v50, %v5283_v47  ;;  %v3916_v28 = vadd.f32 %v3845_v39, %v3534_v23  ;;  %v4591_v17 = vpop.f32.mrf.mxu3  ;;  %v3371_v23 = vpack.c.b16 %v3352_v26, %v3351_v52 }
 0x221   : > { %v3465_v46 = vpop.f32.mrf.mxu1  ;;  %v6715_v52 = vunpack.c.l.bf16 %v8302_v14  ;;  %v4362_v14 = vshll.u32 %v6412_v44, 16 }
 0x222   : > { %v5381_v48 = vsel %vm5316_vm11, %v5283_v47, %v5349_v58  ;;  %v4662_v5 = vadd.f32 %v4591_v17, %v3916_v28  ;;  %v3535_v43 = vadd.f32 %v3465_v46, %v7724_v55  ;;  %v6506_v47 = vld [vmem:[%s7030_s17 + $0xb8] sm:$0xf]  ;;  %v6174_v58 = vrot.slane %v6152_v54, 9 }
 0x223   : > { %v5115_v13 = vpop.f32.mrf.mxu0  ;;  %v5477_v49 = vadd.f32 %v6712_v40, %v5381_v48  ;;  %v4354_v55 = vshll.u32 %v6411_v9, 16  ;;  %v4499_v17 = vpack.c.b16 %v4480_v33, %v4479_v10  ;;  %v5021_v46 = vpack.c.b16 %v5002_v59, %v5001_v24  ;;  %v6505_v48 = vld [vmem:[%s7030_s17 + $0xb4] sm:$0xe]  ;;  %v6413_v33 = vld [vmem:[%s7030_s17 + $0xc4] sm:$0xf] }
 0x224   : > { %v5184_v8 = vadd.f32 %v5113_v11, %v4662_v5  ;;  %v4341_v11 = vor.u32 %v4340_v60, %v4337_v51  ;;  %v4909_v42 = vrot.slane %v6506_v47, 5  ;;  %v6507_v5 = vld [vmem:[%s7030_s17 + $0xbc] sm:$0x1]  ;;  %v3261_v51 = vrot.slane %v3259_v45, 4 }
 0x225   : > { %v6778_v32 = vpack.c.bf16 %v5477_v49, %v5476_v35  ;;  %v3262_v60 = vrot.slane %v6154_v19, 5  ;;  %v4352_v49 = vrot.slane %v4351_v7, 4  ;;  %v3260_v10 = vsel %vm7178_vm5, %v6174_v58, %v3259_v45 }
 0x226   : > { %v5284_v39 = vadd.f32 %v8162_v18, %v5184_v8  ;;  %v4342_v35 = vrot.slane %v4341_v11, 4  ;;  %v6527_v24 = vrot.slane %v6505_v48, 9  ;;  %v4911_v59 = vrot.slane %v4909_v42, 4 }
 0x227   : > { %6861 = vst [vmem:[%s8218_s8 + $0x10] sm:$0xff] %v6778_v32   ;;  %v3847_v40 = vpop.f32.mrf.mxu2  ;;  %v4356_v32 = vrot.slane %v4354_v55, 5  ;;  %v4912_v54 = vrot.slane %v6507_v5, 5  ;;  %v4359_v47 = vshrl.u32 %v6412_v44, 16  ;;  %v4368_v45 = vshll.u32 %v6413_v33, 16 }
 0x228   : > { %v3917_v62 = vadd.f32 %v3847_v40, %v3535_v43  ;;  %v4593_v63 = vpop.f32.mrf.mxu3  ;;  %v5350_v8 = vmul.f32 %v8185_v50, %v5284_v39  ;;  %vm5317_vm12 = vcmp.gt.f32.partialorder %v5284_v39, 0.0  ;;  %v3263_v40 = vsel %vm7178_vm5, %v3261_v51, %v3262_v60 }
 0x229   : > { %v3468_v28 = vpop.f32.mrf.mxu1  ;;  %v4372_v11 = vshrl.u32 %v6413_v33, 16  ;;  %v3353_v19 = vunpack.c.l.b16 %v3260_v10  ;;  %v4357_v58 = vsel %vm7174_vm4, %v4352_v49, %v4356_v32  ;;  %v4910_v55 = vsel %vm7178_vm5, %v6527_v24, %v4909_v42 }
 0x22a   : > { %v4663_v26 = vadd.f32 %v4593_v63, %v3917_v62  ;;  %v3536_v43 = vadd.f32 %v3468_v28, %v7771_v30  ;;  %v5382_v7 = vsel %vm5317_vm12, %v5284_v39, %v5350_v8  ;;  %v4364_v48 = vrot.slane %v4362_v14, 5 }
 0x22b   : > { %v5118_v25 = vpop.f32.mrf.mxu0  ;;  %v5478_v5 = vadd.f32 %v6715_v52, %v5382_v7  ;;  %v8332_v60 = vrot.slane %v4368_v45, 5  ;;  %v3354_v42 = vunpack.c.l.b16 %v3263_v40  ;;  %v4482_v8 = vunpack.c.l.b16 %v4357_v58  ;;  %v6155_v52 = vld [vmem:[%s7030_s17 + $0xb4] sm:$0xe]  ;;  %v6848_v7 = vld [vmem:[%s8171_s30 + $0x20] sm:$0xff]  }
 0x22c   : > { %v5185_v1 = vadd.f32 %v5115_v13, %v4663_v26  ;;  %3507 = vmatmul.bf16.gmra.mxu1 %v3371_v23  ;;  %3889 = vmatmul.bf16.gmra.mxu2 %v6673_v15  ;;  %v4347_v23 = vsel %vm7174_vm4, %v4342_v35, %v8293_v3  ;;  %v4913_v3 = vsel %vm7178_vm5, %v4911_v59, %v4912_v54  ;;  %v4361_v26 = vrot.slane %v4359_v47, 4  ;;  %v6157_v54 = vld [vmem:[%s7030_s17 + $0xbc] sm:$0x1]  ;;  %v6509_v47 = vld [vmem:[%s7030_s17 + $0xc4] sm:$0xf]  ;;  %v6674_v45 = vld [vmem:[%s7030_s17 + $0xb4] sm:$0xff] }
 0x22d   : > { %4635 = vmatmul.bf16.gmra.mxu3 %v4499_v17  ;;  %v4374_v35 = vrot.slane %v4372_v11, 4  ;;  %v4481_v44 = vunpack.c.l.b16 %v4347_v23  ;;  %v5003_v32 = vunpack.c.l.b16 %v4910_v55  ;;  %v5004_v33 = vunpack.c.l.b16 %v4913_v3  ;;  %v6508_v3 = vld [vmem:[%s7030_s17 + $0xc0] sm:$0xe] }
 0x22e   : > { %5157 = vmatmul.bf16.gmra.mxu0 %v5021_v46  ;;  %v5285_v9 = vadd.f32 %v8162_v18, %v5185_v1  ;;  %v6156_v46 = vld [vmem:[%s7030_s17 + $0xb8] sm:$0xf]  ;;  %v6414_v1 = vld [vmem:[%s7030_s17 + $0xc8] sm:$0x1]  ;;  %v3372_v23 = vpack.c.b16 %v3354_v42, %v3353_v19 }
 0x22f   : > { %v3850_v13 = vpop.f32.mrf.mxu2  ;;  %v3266_v24 = vrot.slane %v6156_v46, 5  ;;  %v4500_v11 = vpack.c.b16 %v4482_v8, %v4481_v44  ;;  %v6528_v8 = vrot.slane %v6508_v3, 9 }
 0x230   : > { %vm5318_vm13 = vcmp.gt.f32.partialorder %v5285_v9, 0.0  ;;  %v5351_v62 = vmul.f32 %v8185_v50, %v5285_v9  ;;  %v3918_v63 = vadd.f32 %v3850_v13, %v3536_v43  ;;  %v4596_v15 = vpop.f32.mrf.mxu3  ;;  %v4378_v43 = vshll.u32 %v6414_v1, 16 }
 0x231   : > { %v3470_v30 = vpop.f32.mrf.mxu1 }
 0x232   : > { %v5383_v28 = vsel %vm5318_vm13, %v5285_v9, %v5351_v62  ;;  %v4664_v17 = vadd.f32 %v4596_v15, %v3918_v63  ;;  %v3537_v59 = vadd.f32 %v3470_v30, %v7773_v20  ;;  %v4365_v9 = vor.u32 %v4364_v48, %v4361_v26  ;;  %v6510_v48 = vld [vmem:[%s7030_s17 + $0xc8] sm:$0x1] }
 0x233   : > { %v5120_v39 = vpop.f32.mrf.mxu0  ;;  %v5479_v51 = vadd.f32 %v6716_v56, %v5383_v28  ;;  %v5022_v62 = vpack.c.b16 %v5004_v33, %v5003_v32  ;;  %v6175_v63 = vrot.slane %v6155_v52, 9  ;;  %v3268_v15 = vrot.slane %v3266_v24, 4  ;;  %v6416_v33 = vld [vmem:[%s7030_s17 + $0xd0] sm:$0xf] }
 0x234   : > { %v5186_v49 = vadd.f32 %v5118_v25, %v4664_v17  ;;  %v4375_v25 = vor.u32 %v4374_v35, %v8332_v60  ;;  %v3269_v30 = vrot.slane %v6157_v54, 5  ;;  %v4916_v28 = vrot.slane %v6509_v47, 5 }
 0x235   : > { %v6783_v10 = vpack.c.bf16 %v5479_v51, %v5478_v5  ;;  %v4366_v17 = vrot.slane %v4365_v9, 4  ;;  %v4380_v26 = vrot.slane %v4378_v43, 5  ;;  %v6719_v5 = vunpack.c.l.bf16 %v6848_v7 }
 0x236   : > { %v5286_v14 = vadd.f32 %v8162_v18, %v5186_v49  ;;  %v4376_v46 = vrot.slane %v4375_v25, 4  ;;  %v6720_v35 = vunpack.c.h.bf16 %v6848_v7  ;;  %v6415_v49 = vld [vmem:[%s7030_s17 + $0xcc] sm:$0xf]  ;;  %v3267_v42 = vsel %vm7178_vm5, %v6175_v63, %v3266_v24 }
 0x237   : > { %6862 = vst [vmem:[%s8218_s8 + $0x18] sm:$0xff] %v6783_v10   ;;  %v3852_v56 = vpop.f32.mrf.mxu2  ;;  %v3270_v44 = vsel %vm7178_vm5, %v3268_v15, %v3269_v30  ;;  %v4918_v32 = vrot.slane %v4916_v28, 4  ;;  %v4371_v52 = vsel %vm7174_vm4, %v4366_v17, %v8332_v60  ;;  %v4383_v24 = vshrl.u32 %v6415_v49, 16  ;;  %v6159_v17 = vld [vmem:[%s7030_s17 + $0xc4] sm:$0xf] }
 0x238   : > { %v3919_v13 = vadd.f32 %v3852_v56, %v3537_v59  ;;  %v4598_v40 = vpop.f32.mrf.mxu3  ;;  %v5352_v19 = vmul.f32 %v8185_v50, %v5286_v14  ;;  %vm5319_vm14 = vcmp.gt.f32.partialorder %v5286_v14, 0.0  ;;  %v4381_v54 = vsel %vm7174_vm4, %v4376_v46, %v4380_v26 }
 0x239   : > { %v3473_v20 = vpop.f32.mrf.mxu1  ;;  %v4386_v56 = vshll.u32 %v6415_v49, 16  ;;  %v4396_v60 = vshrl.u32 %v6416_v33, 16  ;;  %v4483_v15 = vunpack.c.l.b16 %v4371_v52  ;;  %v4484_v30 = vunpack.c.l.b16 %v4381_v54  ;;  %v6160_v54 = vld [vmem:[%s7030_s17 + $0xc8] sm:$0x1] }
 0x23a   : > { %v4665_v58 = vadd.f32 %v4598_v40, %v3919_v13  ;;  %v3538_v10 = vadd.f32 %v3473_v20, %v7796_v37  ;;  %v5384_v9 = vsel %vm5319_vm14, %v5286_v14, %v5352_v19  ;;  %v3355_v13 = vunpack.c.l.b16 %v3267_v42 }
 0x23b   : > { %v5123_v55 = vpop.f32.mrf.mxu0  ;;  %v4917_v40 = vsel %vm7178_vm5, %v6528_v8, %v4916_v28  ;;  %v3356_v20 = vunpack.c.l.b16 %v3270_v44  ;;  %v4385_v28 = vrot.slane %v4383_v24, 4  ;;  %v4388_v46 = vrot.slane %v4386_v56, 5  ;;  %v6512_v44 = vld [vmem:[%s7030_s17 + $0xd0] sm:$0xf] }
 0x23c   : > { %v5187_v51 = vadd.f32 %v5120_v39, %v4665_v58  ;;  %3512 = vmatmul.bf16.gmra.mxu1 %v3372_v23  ;;  %3894 = vmatmul.bf16.gmra.mxu2 %v6674_v45  ;;  %v4919_v39 = vrot.slane %v6510_v48, 5  ;;  %v4392_v23 = vshll.u32 %v6416_v33, 16  ;;  %v5005_v3 = vunpack.c.l.b16 %v4917_v40 }
 0x23d   : > { %4640 = vmatmul.bf16.gmra.mxu3 %v4500_v11  ;;  %v3273_v42 = vrot.slane %v6159_v17, 5  ;;  %v4389_v33 = vor.u32 %v4388_v46, %v4385_v28  ;;  %v4501_v52 = vpack.c.b16 %v4484_v30, %v4483_v15 }
 0x23e   : > { %5162 = vmatmul.bf16.gmra.mxu0 %v5022_v62  ;;  %v5287_v1 = vadd.f32 %v8162_v18, %v5187_v51  ;;  %v4920_v14 = vsel %vm7178_vm5, %v4918_v32, %v4919_v39  ;;  %v5480_v62 = vadd.f32 %v6719_v5, %v5384_v9  ;;  %v8367_v19 = vrot.slane %v4392_v23, 5  ;;  %v6417_v5 = vld [vmem:[%s7030_s17 + $0xd4] sm:$0x1]  ;;  %v6675_v32 = vld [vmem:[%s7030_s17 + $0xc0] sm:$0xff] }
 0x23f   : > { %v3855_v59 = vpop.f32.mrf.mxu2  ;;  %v5006_v48 = vunpack.c.l.b16 %v4920_v14  ;;  %v4398_v51 = vrot.slane %v4396_v60, 4  ;;  %v6158_v39 = vld [vmem:[%s7030_s17 + $0xc0] sm:$0xe]  ;;  %v4402_v56 = vshll.u32 %v6417_v5, 16  ;;  %v3275_v40 = vrot.slane %v3273_v42, 4  ;;  %v6849_v60 = vld [vmem:[%s8171_s30 + $0x28] sm:$0xff]  }
 0x240   : > { %vm5320_vm15 = vcmp.gt.f32.partialorder %v5287_v1, 0.0  ;;  %v5353_v25 = vmul.f32 %v8185_v50, %v5287_v1  ;;  %v3920_v43 = vadd.f32 %v3855_v59, %v3538_v10  ;;  %v4601_v37 = vpop.f32.mrf.mxu3  ;;  %v3373_v10 = vpack.c.b16 %v3356_v20, %v3355_v13  ;;  %v6513_v23 = vld [vmem:[%s7030_s17 + $0xd4] sm:$0x1] }
 0x241   : > { %v3475_v47 = vpop.f32.mrf.mxu1  ;;  %v4399_v24 = vor.u32 %v4398_v51, %v8367_v19  ;;  %v4390_v20 = vrot.slane %v4389_v33, 4  ;;  %v6723_v17 = vunpack.c.l.bf16 %v6849_v60  ;;  %v6724_v28 = vunpack.c.h.bf16 %v6849_v60 }
 0x242   : > { %v5385_v45 = vsel %vm5320_vm15, %v5287_v1, %v5353_v25  ;;  %v4666_v11 = vadd.f32 %v4601_v37, %v3920_v43  ;;  %v3539_v49 = vadd.f32 %v3475_v47, %v7804_v38  ;;  %v5023_v38 = vpack.c.b16 %v5006_v48, %v5005_v3  ;;  %v6511_v43 = vld [vmem:[%s7030_s17 + $0xcc] sm:$0xe] }
 0x243   : > { %v5125_v7 = vpop.f32.mrf.mxu0  ;;  %v5481_v63 = vadd.f32 %v6720_v35, %v5385_v45  ;;  %v4923_v37 = vrot.slane %v6512_v44, 5  ;;  %v6176_v47 = vrot.slane %v6158_v39, 9  ;;  %v4400_v14 = vrot.slane %v4399_v24, 4 }
 0x244   : > { %v5188_v58 = vadd.f32 %v5123_v55, %v4666_v11  ;;  %v3276_v11 = vrot.slane %v6160_v54, 5  ;;  %v4926_v3 = vrot.slane %v6513_v23, 5 }
 0x245   : > { %v6788_v26 = vpack.c.bf16 %v5481_v63, %v5480_v62  ;;  %v4404_v62 = vrot.slane %v4402_v56, 5  ;;  %v6529_v63 = vrot.slane %v6511_v43, 9  ;;  %v3274_v5 = vsel %vm7178_vm5, %v6176_v47, %v3273_v42 }
 0x246   : > { %v5288_v55 = vadd.f32 %v8162_v18, %v5188_v58  ;;  %v4925_v58 = vrot.slane %v4923_v37, 4 }
 0x247   : > { %6863 = vst [vmem:[%s8218_s8 + $0x20] sm:$0xff] %v6788_v26   ;;  %v3857_v35 = vpop.f32.mrf.mxu2  ;;  %v4405_v44 = vsel %vm7174_vm4, %v4400_v14, %v4404_v62 }
 0x248   : > { %v3921_v8 = vadd.f32 %v3857_v35, %v3539_v49  ;;  %v4603_v1 = vpop.f32.mrf.mxu3  ;;  %v5354_v13 = vmul.f32 %v8185_v50, %v5288_v55  ;;  %vm5321_vm0 = vcmp.gt.f32.partialorder %v5288_v55, 0.0  ;;  %v3277_v35 = vsel %vm7178_vm5, %v3275_v40, %v3276_v11  ;;  %v6676_v40 = vld [vmem:[%s7030_s17 + $0xcc] sm:$0xff] }
 0x249   : > { %v3478_v59 = vpop.f32.mrf.mxu1  ;;  %v4927_v42 = vsel %vm7178_vm5, %v4925_v58, %v4926_v3  ;;  %v4486_v31 = vunpack.c.l.b16 %v4405_v44 }
 0x24a   : > { %v4667_v9 = vadd.f32 %v4603_v1, %v3921_v8  ;;  %v3540_v30 = vadd.f32 %v3478_v59, %v7822_v2  ;;  %v4395_v2 = vsel %vm7174_vm4, %v4390_v20, %v8367_v19  ;;  %v3357_v59 = vunpack.c.l.b16 %v3274_v5  ;;  %v6850_v20 = vld [vmem:[%s8171_s30 + $0x30] sm:$0xff]  }
 0x24b   : > { %v5128_v25 = vpop.f32.mrf.mxu0  ;;  %v4485_v19 = vunpack.c.l.b16 %v4395_v2  ;;  %v5008_v24 = vunpack.c.l.b16 %v4927_v42 }
 0x24c   : > { %v5189_v45 = vadd.f32 %v5125_v7, %v4667_v9  ;;  %3517 = vmatmul.bf16.gmra.mxu1 %v3373_v10  ;;  %3899 = vmatmul.bf16.gmra.mxu2 %v6675_v32  ;;  %v5386_v7 = vsel %vm5321_vm0, %v5288_v55, %v5354_v13  ;;  %v4924_v10 = vsel %vm7178_vm5, %v6529_v63, %v4923_v37  ;;  %v6727_v63 = vunpack.c.l.bf16 %v6850_v20 }
 0x24d   : > { %4645 = vmatmul.bf16.gmra.mxu3 %v4501_v52  ;;  %v5482_v32 = vadd.f32 %v6723_v17, %v5386_v7  ;;  %v3358_v52 = vunpack.c.l.b16 %v3277_v35  ;;  %v5007_v54 = vunpack.c.l.b16 %v4924_v10 }
 0x24e   : > { %5167 = vmatmul.bf16.gmra.mxu0 %v5023_v38  ;;  %v5289_v15 = vadd.f32 %v8162_v18, %v5189_v45 }
 0x24f   : > { %v3860_v46 = vpop.f32.mrf.mxu2  ;;  %v3374_v47 = vpack.c.b16 %v3358_v52, %v3357_v59  ;;  %v5024_v13 = vpack.c.b16 %v5008_v24, %v5007_v54 }
 0x250   : > { %vm5322_vm1 = vcmp.gt.f32.partialorder %v5289_v15, 0.0  ;;  %v5355_v26 = vmul.f32 %v8185_v50, %v5289_v15  ;;  %v3922_v48 = vadd.f32 %v3860_v46, %v3540_v30  ;;  %v4606_v51 = vpop.f32.mrf.mxu3 }
 0x251   : > { %v3480_v49 = vpop.f32.mrf.mxu1 }
 0x252   : > { %v5387_v55 = vsel %vm5322_vm1, %v5289_v15, %v5355_v26  ;;  %v4668_v8 = vadd.f32 %v4606_v51, %v3922_v48  ;;  %v3541_v56 = vadd.f32 %v3480_v49, %v7838_v22  ;;  %v8407_v22 = vld [vmem:[%s8495_s2] ss:$0 sm:$0xff]  ;;  %v6728_v15 = vunpack.c.h.bf16 %v6850_v20 }
 0x253   : > { %v5130_v1 = vpop.f32.mrf.mxu0  ;;  %v5483_v39 = vadd.f32 %v6724_v28, %v5387_v55 }
 0x254   : > { %v5190_v33 = vadd.f32 %v5128_v25, %v4668_v8  ;;  %v4502_v25 = vpack.c.b16 %v4486_v31, %v4485_v19 }
 0x255   : > { %v6793_v38 = vpack.c.bf16 %v5483_v39, %v5482_v32  ;;  %v6851_v39 = vld [vmem:[%s8171_s30 + $0x38] sm:$0xff]  }
 0x256   : > { %v5290_v43 = vadd.f32 %v8162_v18, %v5190_v33  ;;  %v6731_v19 = vunpack.c.l.bf16 %v6851_v39 }
 0x257   : > { %6864 = vst [vmem:[%s8218_s8 + $0x28] sm:$0xff] %v6793_v38   ;;  %v3862_v9 = vpop.f32.mrf.mxu2 }
 0x258   : > { %v3923_v36 = vadd.f32 %v3862_v9, %v3541_v56  ;;  %v4608_v37 = vpop.f32.mrf.mxu3  ;;  %v5356_v11 = vmul.f32 %v8185_v50, %v5290_v43  ;;  %vm5323_vm2 = vcmp.gt.f32.partialorder %v5290_v43, 0.0 }
 0x259   : > { %v3483_v23 = vpop.f32.mrf.mxu1 }
 0x25a   : > { %v4669_v60 = vadd.f32 %v4608_v37, %v3923_v36  ;;  %v3542_v62 = vadd.f32 %v3483_v23, %v7858_v27  ;;  %v5388_v58 = vsel %vm5323_vm2, %v5290_v43, %v5356_v11 }
 0x25b   : > { %v5133_v45 = vpop.f32.mrf.mxu0  ;;  %v5484_v51 = vadd.f32 %v6727_v63, %v5388_v58  ;;  %v6852_v63 = vld [vmem:[%s8171_s30 + $0x40] sm:$0xff]  }
 0x25c   : > { %v5191_v14 = vadd.f32 %v5130_v1, %v4669_v60  ;;  %3522 = vmatmul.bf16.gmra.mxu1 %v3374_v47  ;;  %3904 = vmatmul.bf16.gmra.mxu2 %v6676_v40 }
 0x25d   : > { %4650 = vmatmul.bf16.gmra.mxu3 %v4502_v25 }
 0x25e   : > { %5172 = vmatmul.bf16.gmra.mxu0 %v5024_v13  ;;  %v5291_v18 = vadd.f32 %v8407_v22, %v5191_v14 }
 0x25f   : > { %v3865_v30 = vpop.f32.mrf.mxu2 }
 0x260   : > { %vm5324_vm3 = vcmp.gt.f32.partialorder %v5291_v18, 0.0  ;;  %v5357_v3 = vmul.f32 %v8185_v50, %v5291_v18  ;;  %v3924_v17 = vadd.f32 %v3865_v30, %v3542_v62  ;;  %v4611_v28 = vpop.f32.mrf.mxu3 }
 0x261   : > { %v3485_v46 = vpop.f32.mrf.mxu1 }
 0x262   : > { %v5389_v7 = vsel %vm5324_vm3, %v5291_v18, %v5357_v3  ;;  %v4670_v26 = vadd.f32 %v4611_v28, %v3924_v17  ;;  %v3543_v27 = vadd.f32 %v3485_v46, %v7868_v12  ;;  %v6732_v12 = vunpack.c.h.bf16 %v6851_v39 }
 0x263   : > { %v5135_v48 = vpop.f32.mrf.mxu0  ;;  %v5485_v49 = vadd.f32 %v6728_v15, %v5389_v7  ;;  %v6735_v3 = vunpack.c.l.bf16 %v6852_v63 }
 0x264   : > { %v5192_v5 = vadd.f32 %v5133_v45, %v4670_v26 }
 0x265   : > { %v6798_v35 = vpack.c.bf16 %v5485_v49, %v5484_v51 }
 0x266   : > { %v5292_v44 = vadd.f32 %v8407_v22, %v5192_v5 }
 0x267   : > { %6865 = vst [vmem:[%s8218_s8 + $0x30] sm:$0xff] %v6798_v35   ;;  %v3867_v2 = vpop.f32.mrf.mxu2 }
 0x268   : > { %v3925_v55 = vadd.f32 %v3867_v2, %v3543_v27  ;;  %v4613_v8 = vpop.f32.mrf.mxu3  ;;  %v5358_v32 = vmul.f32 %v8185_v50, %v5292_v44  ;;  %vm5325_vm4 = vcmp.gt.f32.partialorder %v5292_v44, 0.0 }
 0x269   : > { %v3488_v1 = vpop.f32.mrf.mxu1 }
 0x26a   : > { %v4671_v10 = vadd.f32 %v4613_v8, %v3925_v55  ;;  %v3544_v52 = vadd.f32 %v3488_v1, %v7886_v29  ;;  %v5390_v31 = vsel %vm5325_vm4, %v5292_v44, %v5358_v32 }
 0x26b   : > { %v5138_v42 = vpop.f32.mrf.mxu0  ;;  %v5486_v47 = vadd.f32 %v6731_v19, %v5390_v31 }
 0x26c   : > { %v5193_v33 = vadd.f32 %v5135_v48, %v4671_v10 }
 0x26e   : > { %v5293_v59 = vadd.f32 %v8407_v22, %v5193_v33 }
 0x26f   : > { %v3870_v38 = vpop.f32.mrf.mxu2 }
 0x270   : > { %vm5326_vm5 = vcmp.gt.f32.partialorder %v5293_v59, 0.0  ;;  %v5359_v54 = vmul.f32 %v8185_v50, %v5293_v59  ;;  %v3926_v24 = vadd.f32 %v3870_v38, %v3544_v52  ;;  %v4616_v56 = vpop.f32.mrf.mxu3 }
 0x271   : > { %v3490_v9 = vpop.f32.mrf.mxu1 }
 0x272   : > { %v5391_v43 = vsel %vm5326_vm5, %v5293_v59, %v5359_v54  ;;  %v4672_v36 = vadd.f32 %v4616_v56, %v3926_v24  ;;  %v3545_v29 = vadd.f32 %v3490_v9, %v7902_v53  ;;  %v6736_v53 = vunpack.c.h.bf16 %v6852_v63  ;;  %v6853_v59 = vld [vmem:[%s8171_s30 + $0x48] sm:$0xff]   ;;  %v6854_v63 = vld [vmem:[%s8171_s30 + $0x50] sm:$0xff]  }
 0x273   : > { %v5140_v37 = vpop.f32.mrf.mxu0  ;;  %v5487_v40 = vadd.f32 %v6732_v12, %v5391_v43  ;;  %v6739_v38 = vunpack.c.l.bf16 %v6853_v59 }
 0x274   : > { %v5194_v23 = vadd.f32 %v5138_v42, %v4672_v36 }
 0x275   : > { %v6803_v25 = vpack.c.bf16 %v5487_v40, %v5486_v47 }
 0x276   : > { %v5294_v60 = vadd.f32 %v8407_v22, %v5194_v23 }
 0x277   : > { %6866 = vst [vmem:[%s8218_s8 + $0x38] sm:$0xff] %v6803_v25   ;;  %v3872_v13 = vpop.f32.mrf.mxu2 }
 0x278   : > { %v3927_v45 = vadd.f32 %v3872_v13, %v3545_v29  ;;  %v4618_v11 = vpop.f32.mrf.mxu3  ;;  %v5360_v62 = vmul.f32 %v8185_v50, %v5294_v60  ;;  %vm5327_vm6 = vcmp.gt.f32.partialorder %v5294_v60, 0.0 }
 0x279   : > { %v3493_v20 = vpop.f32.mrf.mxu1 }
 0x27a   : > { %v4673_v14 = vadd.f32 %v4618_v11, %v3927_v45  ;;  %v3546_v58 = vadd.f32 %v3493_v20, %v7922_v6  ;;  %v5392_v28 = vsel %vm5327_vm6, %v5294_v60, %v5360_v62 }
 0x27b   : > { %v5143_v18 = vpop.f32.mrf.mxu0  ;;  %v5488_v35 = vadd.f32 %v6735_v3, %v5392_v28  ;;  %v6743_v3 = vunpack.c.l.bf16 %v6854_v63 }
 0x27c   : > { %v5195_v15 = vadd.f32 %v5140_v37, %v4673_v14 }
 0x27e   : > { %v5295_v30 = vadd.f32 %v8407_v22, %v5195_v15 }
 0x27f   : > { %v3875_v17 = vpop.f32.mrf.mxu2 }
 0x280   : > { %vm5328_vm7 = vcmp.gt.f32.partialorder %v5295_v30, 0.0  ;;  %v5361_v46 = vmul.f32 %v8185_v50, %v5295_v30  ;;  %v3928_v7 = vadd.f32 %v3875_v17, %v3546_v58  ;;  %v4621_v26 = vpop.f32.mrf.mxu3 }
 0x281   : > { %v3495_v48 = vpop.f32.mrf.mxu1 }
 0x282   : > { %v5393_v51 = vsel %vm5328_vm7, %v5295_v30, %v5361_v46  ;;  %v4674_v49 = vadd.f32 %v4621_v26, %v3928_v7  ;;  %v3547_v6 = vadd.f32 %v3495_v48, %v7932_v0  ;;  %v6740_v0 = vunpack.c.h.bf16 %v6853_v59 }
 0x283   : > { %v5145_v5 = vpop.f32.mrf.mxu0  ;;  %v5489_v27 = vadd.f32 %v6736_v53, %v5393_v51 }
 0x284   : > { %v5196_v2 = vadd.f32 %v5143_v18, %v4674_v49 }
 0x285   : > { %v6808_v44 = vpack.c.bf16 %v5489_v27, %v5488_v35 }
 0x286   : > { %v5296_v8 = vadd.f32 %v8407_v22, %v5196_v2 }
 0x287   : > { %6867 = vst [vmem:[%s8218_s8 + $0x40] sm:$0xff] %v6808_v44   ;;  %v3877_v55 = vpop.f32.mrf.mxu2 }
 0x288   : > { %v3929_v1 = vadd.f32 %v3877_v55, %v3547_v6  ;;  %v4623_v10 = vpop.f32.mrf.mxu3  ;;  %v5362_v33 = vmul.f32 %v8185_v50, %v5296_v8  ;;  %vm5329_vm8 = vcmp.gt.f32.partialorder %v5296_v8, 0.0 }
 0x289   : > { %v3498_v42 = vpop.f32.mrf.mxu1 }
 0x28a   : > { %v4675_v32 = vadd.f32 %v4623_v10, %v3929_v1  ;;  %v3548_v12 = vadd.f32 %v3498_v42, %v7950_v34  ;;  %v5394_v54 = vsel %vm5329_vm8, %v5296_v8, %v5362_v33 }
 0x28b   : > { %v5148_v39 = vpop.f32.mrf.mxu0  ;;  %v5490_v40 = vadd.f32 %v6739_v38, %v5394_v54 }
 0x28c   : > { %v5197_v52 = vadd.f32 %v5145_v5, %v4675_v32 }
 0x28e   : > { %v5297_v19 = vadd.f32 %v8407_v22, %v5197_v52 }
 0x28f   : > { %v3880_v31 = vpop.f32.mrf.mxu2 }
 0x290   : > { %vm5330_vm9 = vcmp.gt.f32.partialorder %v5297_v19, 0.0  ;;  %v5363_v24 = vmul.f32 %v8185_v50, %v5297_v19  ;;  %v3930_v56 = vadd.f32 %v3880_v31, %v3548_v12  ;;  %v4626_v9 = vpop.f32.mrf.mxu3 }
 0x291   : > { %v3500_v43 = vpop.f32.mrf.mxu1 }
 0x292   : > { %v5395_v36 = vsel %vm5330_vm9, %v5297_v19, %v5363_v24  ;;  %v4676_v37 = vadd.f32 %v4626_v9, %v3930_v56  ;;  %v3549_v34 = vadd.f32 %v3500_v43, %v7966_v61  ;;  %v6744_v61 = vunpack.c.h.bf16 %v6854_v63 }
 0x293   : > { %v5150_v47 = vpop.f32.mrf.mxu0  ;;  %v5491_v23 = vadd.f32 %v6740_v0, %v5395_v36 }
 0x294   : > { %v5198_v25 = vadd.f32 %v5148_v39, %v4676_v37  ;;  %v6855_v39 = vld [vmem:[%s8171_s30 + $0x58] sm:$0xff]  }
 0x295   : > { %v6813_v29 = vpack.c.bf16 %v5491_v23, %v5490_v40  ;;  %v6747_v19 = vunpack.c.l.bf16 %v6855_v39 }
 0x296   : > { %v5298_v60 = vadd.f32 %v8407_v22, %v5198_v25 }
 0x297   : > { %6868 = vst [vmem:[%s8218_s8 + $0x48] sm:$0xff] %v6813_v29   ;;  %v3882_v13 = vpop.f32.mrf.mxu2 }
 0x298   : > { %v3931_v45 = vadd.f32 %v3882_v13, %v3549_v34  ;;  %v4628_v11 = vpop.f32.mrf.mxu3  ;;  %v5364_v62 = vmul.f32 %v8185_v50, %v5298_v60  ;;  %vm5331_vm10 = vcmp.gt.f32.partialorder %v5298_v60, 0.0 }
 0x299   : > { %v3503_v20 = vpop.f32.mrf.mxu1 }
 0x29a   : > { %v4677_v14 = vadd.f32 %v4628_v11, %v3931_v45  ;;  %v3550_v58 = vadd.f32 %v3503_v20, %v7986_v57  ;;  %v5396_v17 = vsel %vm5331_vm10, %v5298_v60, %v5364_v62  ;;  %v6856_v20 = vld [vmem:[%s8171_s30 + $0x60] sm:$0xff]  }
 0x29b   : > { %v5153_v18 = vpop.f32.mrf.mxu0  ;;  %v5492_v5 = vadd.f32 %v6743_v3, %v5396_v17  ;;  %v6751_v63 = vunpack.c.l.bf16 %v6856_v20 }
 0x29c   : > { %v5199_v15 = vadd.f32 %v5150_v47, %v4677_v14 }
 0x29e   : > { %v5299_v30 = vadd.f32 %v8407_v22, %v5199_v15 }
 0x29f   : > { %v3885_v53 = vpop.f32.mrf.mxu2 }
 0x2a0   : > { %vm5332_vm11 = vcmp.gt.f32.partialorder %v5299_v30, 0.0  ;;  %v5365_v28 = vmul.f32 %v8185_v50, %v5299_v30  ;;  %v3932_v46 = vadd.f32 %v3885_v53, %v3550_v58  ;;  %v4631_v7 = vpop.f32.mrf.mxu3 }
 0x2a1   : > { %v3505_v26 = vpop.f32.mrf.mxu1 }
 0x2a2   : > { %v5397_v48 = vsel %vm5332_vm11, %v5299_v30, %v5365_v28  ;;  %v4678_v51 = vadd.f32 %v4631_v7, %v3932_v46  ;;  %v3551_v57 = vadd.f32 %v3505_v26, %v7996_v41  ;;  %v6748_v41 = vunpack.c.h.bf16 %v6855_v39 }
 0x2a3   : > { %v5155_v49 = vpop.f32.mrf.mxu0  ;;  %v5493_v35 = vadd.f32 %v6744_v61, %v5397_v48 }
 0x2a4   : > { %v5200_v27 = vadd.f32 %v5153_v18, %v4678_v51 }
 0x2a5   : > { %v6818_v2 = vpack.c.bf16 %v5493_v35, %v5492_v5 }
 0x2a6   : > { %v5300_v6 = vadd.f32 %v8407_v22, %v5200_v27 }
 0x2a7   : > { %6869 = vst [vmem:[%s8218_s8 + $0x50] sm:$0xff] %v6818_v2   ;;  %v3887_v44 = vpop.f32.mrf.mxu2 }
 0x2a8   : > { %v3933_v55 = vadd.f32 %v3887_v44, %v3551_v57  ;;  %v4633_v8 = vpop.f32.mrf.mxu3  ;;  %v5366_v32 = vmul.f32 %v8185_v50, %v5300_v6  ;;  %vm5333_vm12 = vcmp.gt.f32.partialorder %v5300_v6, 0.0 }
 0x2a9   : > { %v3508_v1 = vpop.f32.mrf.mxu1 }
 0x2aa   : > { %v4679_v10 = vadd.f32 %v4633_v8, %v3933_v55  ;;  %v3552_v52 = vadd.f32 %v3508_v1, %v8015_v4  ;;  %v5398_v38 = vsel %vm5333_vm12, %v5300_v6, %v5366_v32  ;;  %v6857_v55 = vld [vmem:[%s8171_s30 + $0x68] sm:$0xff]  }
 0x2ab   : > { %v5158_v42 = vpop.f32.mrf.mxu0  ;;  %v5494_v36 = vadd.f32 %v6747_v19, %v5398_v38  ;;  %v6755_v39 = vunpack.c.l.bf16 %v6857_v55 }
 0x2ac   : > { %v5201_v33 = vadd.f32 %v5155_v49, %v4679_v10 }
 0x2ae   : > { %v5301_v59 = vadd.f32 %v8407_v22, %v5201_v33  ;;  %v6756_v33 = vunpack.c.h.bf16 %v6857_v55 }
 0x2af   : > { %v3890_v12 = vpop.f32.mrf.mxu2 }
 0x2b0   : > { %vm5334_vm13 = vcmp.gt.f32.partialorder %v5301_v59, 0.0  ;;  %v5367_v0 = vmul.f32 %v8185_v50, %v5301_v59  ;;  %v3934_v31 = vadd.f32 %v3890_v12, %v3552_v52  ;;  %v4636_v54 = vpop.f32.mrf.mxu3 }
 0x2b1   : > { %v3510_v24 = vpop.f32.mrf.mxu1 }
 0x2b2   : > { %v5399_v56 = vsel %vm5334_vm13, %v5301_v59, %v5367_v0  ;;  %v4680_v9 = vadd.f32 %v4636_v54, %v3934_v31  ;;  %v3553_v4 = vadd.f32 %v3510_v24, %v8029_v16  ;;  %v6752_v16 = vunpack.c.h.bf16 %v6856_v20 }
 0x2b3   : > { %v5160_v43 = vpop.f32.mrf.mxu0  ;;  %v5495_v37 = vadd.f32 %v6748_v41, %v5399_v56 }
 0x2b4   : > { %v5202_v47 = vadd.f32 %v5158_v42, %v4680_v9  ;;  %v8526_v42 = vld [vmem:[#allocation5_spill] sm:$0xff] }
 0x2b5   : > { %v6823_v40 = vpack.c.bf16 %v5495_v37, %v5494_v36 }
 0x2b6   : > { %v5302_v25 = vadd.f32 %v8407_v22, %v5202_v47 }
 0x2b7   : > { %6870 = vst [vmem:[%s8218_s8 + $0x58] sm:$0xff] %v6823_v40   ;;  %v3892_v23 = vpop.f32.mrf.mxu2 }
 0x2b8   : > { %v3935_v29 = vadd.f32 %v3892_v23, %v3553_v4  ;;  %v4638_v34 = vpop.f32.mrf.mxu3  ;;  %v5368_v11 = vmul.f32 %v8185_v50, %v5302_v25  ;;  %vm5335_vm14 = vcmp.gt.f32.partialorder %v5302_v25, 0.0 }
 0x2b9   : > { %v3513_v13 = vpop.f32.mrf.mxu1 }
 0x2ba   : > { %v4681_v60 = vadd.f32 %v4638_v34, %v3935_v29  ;;  %v3554_v62 = vadd.f32 %v3513_v13, %v8049_v21  ;;  %v5400_v30 = vsel %vm5335_vm14, %v5302_v25, %v5368_v11  ;;  %v8525_v21 = vld [vmem:[#allocation4_spill] sm:$0xff]  ;;  %v6858_v13 = vld [vmem:[%s8171_s30 + $0x70] sm:$0xff]   ;;  %v8528_v11 = vld [vmem:[#allocation7_spill] sm:$0xff] }
 0x2bb   : > { %v5163_v45 = vpop.f32.mrf.mxu0  ;;  %v5496_v46 = vadd.f32 %v6751_v63, %v5400_v30 }
 0x2bc   : > { %v5203_v14 = vadd.f32 %v5160_v43, %v4681_v60  ;;  %v8527_v43 = vld [vmem:[#allocation6_spill] sm:$0xff] }
 0x2be   : > { %v5303_v18 = vadd.f32 %v8407_v22, %v5203_v14  ;;  %v6759_v14 = vunpack.c.l.bf16 %v6858_v13 }
 0x2bf   : > { %v3895_v15 = vpop.f32.mrf.mxu2 }
 0x2c0   : > { %vm5336_vm15 = vcmp.gt.f32.partialorder %v5303_v18, 0.0  ;;  %v5369_v58 = vmul.f32 %v8185_v50, %v5303_v18  ;;  %v3936_v3 = vadd.f32 %v3895_v15, %v3554_v62  ;;  %v4641_v61 = vpop.f32.mrf.mxu3 }
 0x2c1   : > { %v3515_v53 = vpop.f32.mrf.mxu1 }
 0x2c2   : > { %v5401_v17 = vsel %vm5336_vm15, %v5303_v18, %v5369_v58  ;;  %v4682_v28 = vadd.f32 %v4641_v61, %v3936_v3  ;;  %v3555_v49 = vadd.f32 %v3515_v53, %v8525_v21  ;;  %v6760_v18 = vunpack.c.h.bf16 %v6858_v13 }
 0x2c3   : > { %v5497_v7 = vadd.f32 %v6752_v16, %v5401_v17  ;;  %v5165_v26 = vpop.f32.mrf.mxu0 }
 0x2c4   : > { %v5204_v48 = vadd.f32 %v5163_v45, %v4682_v28 }
 0x2c5   : > { %v6828_v51 = vpack.c.bf16 %v5497_v7, %v5496_v46 }
 0x2c6   : > { %v5304_v35 = vadd.f32 %v8407_v22, %v5204_v48 }
 0x2c7   : > { %6871 = vst [vmem:[%s8218_s8 + $0x60] sm:$0xff] %v6828_v51   ;;  %v3897_v5 = vpop.f32.mrf.mxu2 }
 0x2c8   : > { %v3937_v27 = vadd.f32 %v3897_v5, %v3555_v49  ;;  %v4643_v2 = vpop.f32.mrf.mxu3  ;;  %v5370_v6 = vmul.f32 %v8185_v50, %v5304_v35  ;;  %vm5337_vm0 = vcmp.gt.f32.partialorder %v5304_v35, 0.0 }
 0x2c9   : > { %v3518_v57 = vpop.f32.mrf.mxu1 }
 0x2ca   : > { %v4683_v44 = vadd.f32 %v4643_v2, %v3937_v27  ;;  %v3556_v32 = vadd.f32 %v3518_v57, %v8526_v42  ;;  %v5402_v52 = vsel %vm5337_vm0, %v5304_v35, %v5370_v6  ;;  %v6859_v57 = vld [vmem:[%s8171_s30 + $0x78] sm:$0xff]  }
 0x2cb   : > { %v5168_v1 = vpop.f32.mrf.mxu0  ;;  %v5498_v54 = vadd.f32 %v6755_v39, %v5402_v52  ;;  %v6763_v55 = vunpack.c.l.bf16 %v6859_v57 }
 0x2cc   : > { %v5205_v8 = vadd.f32 %v5165_v26, %v4683_v44  ;;  %v8529_v26 = vld [vmem:[#allocation8_spill] sm:$0xff] }
 0x2ce   : > { %v5305_v10 = vadd.f32 %v8407_v22, %v5205_v8  ;;  %v6764_v8 = vunpack.c.h.bf16 %v6859_v57 }
 0x2cf   : > { %v3900_v59 = vpop.f32.mrf.mxu2 }
 0x2d0   : > { %vm5338_vm1 = vcmp.gt.f32.partialorder %v5305_v10, 0.0  ;;  %v5371_v19 = vmul.f32 %v8185_v50, %v5305_v10  ;;  %v3938_v41 = vadd.f32 %v3900_v59, %v3556_v32  ;;  %v4646_v12 = vpop.f32.mrf.mxu3 }
 0x2d1   : > { %v3520_v38 = vpop.f32.mrf.mxu1 }
 0x2d2   : > { %v5403_v0 = vsel %vm5338_vm1, %v5305_v10, %v5371_v19  ;;  %v4684_v31 = vadd.f32 %v4646_v12, %v3938_v41  ;;  %v3557_v36 = vadd.f32 %v3520_v38, %v8527_v43 }
 0x2d3   : > { %v5499_v24 = vadd.f32 %v6756_v33, %v5403_v0  ;;  %v5170_v37 = vpop.f32.mrf.mxu0 }
 0x2d4   : > { %v5206_v56 = vadd.f32 %v5168_v1, %v4684_v31 }
 0x2d5   : > { %v6833_v9 = vpack.c.bf16 %v5499_v24, %v5498_v54 }
 0x2d6   : > { %v5306_v40 = vadd.f32 %v8407_v22, %v5206_v56 }
 0x2d7   : > { %6872 = vst [vmem:[%s8218_s8 + $0x68] sm:$0xff] %v6833_v9   ;;  %v3902_v47 = vpop.f32.mrf.mxu2 }
 0x2d8   : > { %v3939_v4 = vadd.f32 %v3902_v47, %v3557_v36  ;;  %v4648_v23 = vpop.f32.mrf.mxu3  ;;  %v5372_v34 = vmul.f32 %v8185_v50, %v5306_v40  ;;  %vm5339_vm2 = vcmp.gt.f32.partialorder %v5306_v40, 0.0 }
 0x2d9   : > { %v3523_v25 = vpop.f32.mrf.mxu1 }
 0x2da   : > { %v4685_v29 = vadd.f32 %v4648_v23, %v3939_v4  ;;  %v3558_v20 = vadd.f32 %v3523_v25, %v8528_v11  ;;  %v5404_v63 = vsel %vm5339_vm2, %v5306_v40, %v5372_v34 }
 0x2db   : > { %v5173_v58 = vpop.f32.mrf.mxu0  ;;  %v5500_v53 = vadd.f32 %v6759_v14, %v5404_v63 }
 0x2dc   : > { %v5207_v60 = vadd.f32 %v5170_v37, %v4685_v29 }
 0x2de   : > { %v5307_v45 = vadd.f32 %v8407_v22, %v5207_v60 }
 0x2df   : > { %v3905_v62 = vpop.f32.mrf.mxu2 }
 0x2e0   : > { %vm5340_vm3 = vcmp.gt.f32.partialorder %v5307_v45, 0.0  ;;  %v5373_v16 = vmul.f32 %v8185_v50, %v5307_v45  ;;  %v3940_v15 = vadd.f32 %v3905_v62, %v3558_v20  ;;  %v4651_v30 = vpop.f32.mrf.mxu3 }
 0x2e1   : > { %v3525_v28 = vpop.f32.mrf.mxu1 }
 0x2e2   : > { %v5405_v3 = vsel %vm5340_vm3, %v5307_v45, %v5373_v16  ;;  %v4686_v61 = vadd.f32 %v4651_v30, %v3940_v15  ;;  %v3559_v48 = vadd.f32 %v3525_v28, %v8529_v26 }
 0x2e3   : > { %v5501_v17 = vadd.f32 %v6760_v18, %v5405_v3  ;;  %v5175_v27 = vpop.f32.mrf.mxu0 }
 0x2e4   : > { %v5208_v46 = vadd.f32 %v5173_v58, %v4686_v61 }
 0x2e5   : > { %v6838_v7 = vpack.c.bf16 %v5501_v17, %v5500_v53 }
 0x2e6   : > { %v5308_v21 = vadd.f32 %v8407_v22, %v5208_v46 }
 0x2e7   : > { %6873 = vst [vmem:[%s8218_s8 + $0x70] sm:$0xff] %v6838_v7   ;;  %v3907_v51 = vpop.f32.mrf.mxu2 }
 0x2e8   : > { %v3941_v49 = vadd.f32 %v3907_v51, %v3559_v48  ;;  %v4653_v5 = vpop.f32.mrf.mxu3  ;;  %v5374_v2 = vmul.f32 %v8185_v50, %v5308_v21  ;;  %vm5341_vm4 = vcmp.gt.f32.partialorder %v5308_v21, 0.0 }
 0x2ea   : > { %v4687_v35 = vadd.f32 %v4653_v5, %v3941_v49  ;;  %v5406_v1 = vsel %vm5341_vm4, %v5308_v21, %v5374_v2 }
 0x2eb   : > { %v5502_v32 = vadd.f32 %v6763_v55, %v5406_v1 }
 0x2ec   : > { %v5209_v44 = vadd.f32 %v5175_v27, %v4687_v35 }
 0x2ee   : > { %v5309_v6 = vadd.f32 %v8407_v22, %v5209_v44 }
 0x2f0   : > { %vm5342_vm5 = vcmp.gt.f32.partialorder %v5309_v6, 0.0  ;;  %v5375_v10 = vmul.f32 %v8185_v50, %v5309_v6 }
 0x2f2   : > { %v5407_v42 = vsel %vm5342_vm5, %v5309_v6, %v5375_v10 }
 0x2f3   : > { %v5503_v39 = vadd.f32 %v6764_v8, %v5407_v42 }
 0x2f5   : > { %v6843_v33 = vpack.c.bf16 %v5503_v39, %v5502_v32 }
 0x2f7   : > { %6874 = vst [vmem:[%s8218_s8 + $0x78] sm:$0xff] %v6843_v33  }
 0x2f8 PF: > { %s16_s22 = sadd.s32 1, %s6947_s22   ;;  %s8530_s20 = smov %s6943_s21 }
 0x2f9   : > { %p13_p5 = scmp.ge.s32.totalorder %s16_s22, 4   ;;  %s8531_s21 = smov %s8533_s3 }
 0x2fb   :  { %15 = sbr.rel (!%p13_p5) target bundleno = 2 (0x2), region = 81 }

</bundles_post_ra>
